<compile_context>
chip_gen: v5e
topology: v5e:2x2
jax: 0.10.0
libtpu: 0.0.40
codegen_flags: <defaults>
</compile_context>

<pallas_src>
import math

import jax
import jax.numpy as jnp
from jax.experimental import pallas as pl
from jax.experimental.pallas import tpu as pltpu


PATCH = 8                   # every branch satisfies fe_stride * down_ks == 8
FE_STRIDES = (1, 2, 4, 8)   # synthetic feature_extractor strides (kernel == stride)
DOWN_KS = (8, 4, 2, 1)      # nn.Conv2d(128, 8, kernel_size=ks, stride=ks)
LN_DIM = 512
LN_EPS = 1e-5               # PyTorch LayerNorm default


def _round_up(x, m):
    return (x + m - 1) // m * m


# ------------------------------ Pallas kernel ------------------------------ #

def _fused_encoder_kernel(x_ref, w_ref, b_ref, g_ref, bt_ref, o_ref):
    # x_ref : (S, K)   bf16   activations (one row per (n, t) sample, raw NCHW-flat)
    # w_ref : (K, 512) bf16   fused conv weights (resident across grid steps)
    # b_ref / g_ref / bt_ref : (1, 512) f32   bias / LN gamma / LN beta
    # o_ref : (S, 512) f32
    y = jnp.dot(x_ref[...], w_ref[...], preferred_element_type=jnp.float32)
    y = y + b_ref[...]
    # Fused LayerNorm(512) epilogue in f32 (XLU/EUP work, hides under the MXU).
    mean = jnp.mean(y, axis=-1, keepdims=True)
    yc = y - mean
    var = jnp.mean(yc * yc, axis=-1, keepdims=True)
    inv = jax.lax.rsqrt(var + LN_EPS)
    o_ref[...] = yc * inv * g_ref[...] + bt_ref[...]


# ----------------------------- weight fusion -------------------------------- #

def fuse_params(params, d, h, w):
    """Fold FE convs + downscale convs + concat-order + LN params into one matmul."""
    Ho, Wo = h // PATCH, w // PATCH
    P = Ho * Wo
    n_branch = len(DOWN_KS)
    assert 8 * n_branch * P == LN_DIM, "LayerNorm(512) requires (h/8)*(w/8) == 16"

    wf_cols, b_cols = [], []
    for (wfe, bfe), (wd, bd), s, ks in zip(params["fe"], params["down"],
                                           FE_STRIDES, DOWN_KS):
        assert s * ks == PATCH
        # Compose the two non-overlapping patch convs into one 8x8-patch conv:
        # w_eff[o, cin, kh*s+ph, kw*s+pw] = sum_c wd[o, c, kh, kw] * wfe[c, cin, ph, pw]
        w_eff = jnp.einsum("ocab,cief->oiaebf", wd, wfe).reshape(8, d, PATCH, PATCH)
        b_eff = jnp.einsum("ocab,c->o", wd, bfe) + bd
        # rows k = cin*64 + r*8 + q  (PyTorch (C, kh, kw) im2col order)
        wf_cols.append(w_eff.reshape(8, d * PATCH * PATCH).T)        # (256, 8)
        b_cols.append(b_eff)

    wf = jnp.stack(wf_cols, axis=1)          # (256, n_branch, 8)  [k, branch, c]
    b32 = jnp.concatenate(b_cols)            # (32,) ordered (branch, c)

    # Expand over the P patches (block diagonal: patch p only feeds its own outputs),
    # then permute once:
    #   input rows  (ho, wo, cin, r, q) -> raw flat NCHW order (cin, ho, r, wo, q)
    #   output cols (p, branch, c)      -> torch concat order  (branch, c, p)
    w_big = jnp.einsum("pq,kbc->pkqbc", jnp.eye(P, dtype=jnp.float32), wf)
    w_big = w_big.reshape(Ho, Wo, d, PATCH, PATCH, P, n_branch, 8)
    w_big = w_big.transpose(2, 0, 3, 1, 4, 6, 7, 5)
    w_big = w_big.reshape(d * h * w, LN_DIM)

    b512 = jnp.repeat(b32, P)                # torch order (branch, c, p)

    return {
        "w": w_big.astype(jnp.bfloat16),     # bf16 MXU operand
        "b": b512.reshape(1, LN_DIM).astype(jnp.float32),
        "gamma": params["ln_gamma"].reshape(1, LN_DIM).astype(jnp.float32),
        "beta": params["ln_beta"].reshape(1, LN_DIM).astype(jnp.float32),
    }


# ------------------------------ forward pass -------------------------------- #

def image_encoder_forward(X, fused):
    n, t, d, h, w = X.shape
    M = n * t
    K = d * h * w

    # No im2col / transposes: weights were permuted at init to match flat NCHW rows.
    x2 = X.reshape(M, K).astype(jnp.bfloat16)

    # Tile the sample axis; pad so the grid divides evenly.
    s_tile = min(256, _round_up(M, 8))
    Mp = _round_up(M, s_tile)
    if Mp != M:
        x2 = jnp.pad(x2, ((0, Mp - M), (0, 0)))

    out = pl.pallas_call(
        _fused_encoder_kernel,
        out_shape=jax.ShapeDtypeStruct((Mp, LN_DIM), jnp.float32),
        grid=(Mp // s_tile,),
        in_specs=[
            pl.BlockSpec((s_tile, K), lambda i: (i, 0)),      # activations (pipelined)
            pl.BlockSpec((K, LN_DIM), lambda i: (0, 0)),      # fused weight (resident)
            pl.BlockSpec((1, LN_DIM), lambda i: (0, 0)),      # bias
            pl.BlockSpec((1, LN_DIM), lambda i: (0, 0)),      # LN gamma
            pl.BlockSpec((1, LN_DIM), lambda i: (0, 0)),      # LN beta
        ],
        out_specs=pl.BlockSpec((s_tile, LN_DIM), lambda i: (i, 0)),
        compiler_params=pltpu.CompilerParams(
            dimension_semantics=("parallel",),                # 2 TCs on v7x
            vmem_limit_bytes=32 * 1024 * 1024,                # fits v5e/v6e/v7x
        ),
    )(x2, fused["w"], fused["b"], fused["gamma"], fused["beta"])

    return out[:M].reshape(n, t, LN_DIM)


# ------------------------------- parameters --------------------------------- #

def init_params(key, d):
    keys = jax.random.split(key, 2 * (len(FE_STRIDES) + len(DOWN_KS)) + 2)
    params = {"fe": [], "down": []}
    ki = 0
    for s in FE_STRIDES:
        fan_in = d * s * s
        w = jax.random.normal(keys[ki], (128, d, s, s), jnp.float32) / math.sqrt(fan_in)
        b = 0.01 * jax.random.normal(keys[ki + 1], (128,), jnp.float32)
        params["fe"].append((w, b))
        ki += 2
    for ksz in DOWN_KS:
        fan_in = 128 * ksz * ksz
        w = jax.random.normal(keys[ki], (8, 128, ksz, ksz), jnp.float32) / math.sqrt(fan_in)
        b = 0.01 * jax.random.normal(keys[ki + 1], (8,), jnp.float32)
        params["down"].append((w, b))
        ki += 2
    # nn.LayerNorm(512) (perturbed from the ones/zeros default so the concat-order
    # folding of gamma/beta is actually exercised by the correctness check)
    params["ln_gamma"] = 1.0 + 0.1 * jax.random.normal(keys[ki], (LN_DIM,), jnp.float32)
    params["ln_beta"] = 0.1 * jax.random.normal(keys[ki + 1], (LN_DIM,), jnp.float32)
    return params


# ------------------------------- reference ---------------------------------- #

def _conv_ref(x, w, b, stride):
    y = jax.lax.conv_general_dilated(
        x, w, (stride, stride), "VALID",
        dimension_numbers=("NCHW", "OIHW", "NCHW"),
        precision=jax.lax.Precision.HIGHEST)
    return y + b.reshape(1, -1, 1, 1)


def reference_forward(X, params):
    n, t, d, h, w = X.shape
    Hf = X.reshape(n * t, d, h, w)
    feats = [_conv_ref(Hf, w_, b_, w_.shape[-1]) for (w_, b_) in params["fe"]]
    pieces = []
    for (w_, b_), f in zip(params["down"], feats):
        y = _conv_ref(f, w_, b_, w_.shape[-1])
        pieces.append(y.reshape(n, t, -1))
    Hcat = jnp.concatenate(pieces, axis=-1)
    mean = jnp.mean(Hcat, axis=-1, keepdims=True)
    var = jnp.mean((Hcat - mean) ** 2, axis=-1, keepdims=True)
    return ((Hcat - mean) * jax.lax.rsqrt(var + LN_EPS)
            * params["ln_gamma"] + params["ln_beta"])


# ----------------------------------- main ------------------------------------ #

if __name__ == "__main__":
    key = jax.random.PRNGKey(0)
    k_x, k_p = jax.random.split(key)

    # h = w = 32 is required by the module itself: LayerNorm(512) = 4 branches * 8 ch
    # * (h/8)*(w/8) spatial positions.
    n, t, d, h, w = 2, 3, 4, 32, 32
    X = jax.random.normal(k_x, (n, t, d, h, w), jnp.float32)
    params = init_params(k_p, d)
    fused = fuse_params(params, d, h, w)       # one-time weight folding / permutation

    fwd = jax.jit(image_encoder_forward)
    out = jax.block_until_ready(fwd(X, fused))
    assert out.shape == (n, t, LN_DIM), out.shape

    ref = jax.block_until_ready(reference_forward(X, params))
    err = float(jnp.max(jnp.abs(out - ref)))
    assert err < 5e-2, f"max abs err {err}"

    print("KERNEL_OK")
</pallas_src>

<mosaic_0001>
module attributes {stable_mosaic.version = 11 : i64} {
  func.func @_fused_encoder_kernel(%arg0: i32, %arg1: memref<8x4096xbf16, #tpu.memory_space<vmem>>, %arg2: memref<4096x512xbf16, #tpu.memory_space<vmem>>, %arg3: memref<1x512xf32, #tpu.memory_space<vmem>>, %arg4: memref<1x512xf32, #tpu.memory_space<vmem>>, %arg5: memref<1x512xf32, #tpu.memory_space<vmem>>, %arg6: memref<8x512xf32, #tpu.memory_space<vmem>>) attributes {dimension_semantics = [#tpu.dimension_semantics<parallel>], iteration_bounds = array<i64: 1>, scalar_prefetch = 0 : i64, scratch_operands = 0 : i64, tpu.core_type = #tpu.core_type<tc>, window_params = [{transform_indices = @transform_0, window_bounds = array<i64: 8, 4096>}, {pipeline_mode = #tpu.pipeline_mode<synchronous>, transform_indices = @transform_1, window_bounds = array<i64: 4096, 512>}, {pipeline_mode = #tpu.pipeline_mode<synchronous>, transform_indices = @transform_2, window_bounds = array<i64: 1, 512>}, {pipeline_mode = #tpu.pipeline_mode<synchronous>, transform_indices = @transform_3, window_bounds = array<i64: 1, 512>}, {pipeline_mode = #tpu.pipeline_mode<synchronous>, transform_indices = @transform_4, window_bounds = array<i64: 1, 512>}, {transform_indices = @transform_5, window_bounds = array<i64: 8, 512>}]} {
    %c0 = arith.constant 0 : index
    %c0_0 = arith.constant 0 : index
    %0 = vector.load %arg1[%c0, %c0_0] : memref<8x4096xbf16, #tpu.memory_space<vmem>>, vector<8x4096xbf16>
    %c0_1 = arith.constant 0 : index
    %c0_2 = arith.constant 0 : index
    %1 = vector.load %arg2[%c0_1, %c0_2] : memref<4096x512xbf16, #tpu.memory_space<vmem>>, vector<4096x512xbf16>
    %cst = arith.constant dense<0.000000e+00> : vector<8x512xf32>
    %2 = tpu.matmul %0, %1, %cst {dimension_numbers = #tpu.dot_dimension_numbers<[1], [0], [0], [1], [0, 0, 1, 1], [], []>} : vector<8x4096xbf16>, vector<4096x512xbf16>, vector<8x512xf32> -> vector<8x512xf32>
    %c0_3 = arith.constant 0 : index
    %c0_4 = arith.constant 0 : index
    %3 = vector.load %arg3[%c0_3, %c0_4] : memref<1x512xf32, #tpu.memory_space<vmem>>, vector<1x512xf32>
    %4 = vector.broadcast %3 : vector<1x512xf32> to vector<8x512xf32>
    %5 = arith.addf %2, %4 : vector<8x512xf32>
    %cst_5 = arith.constant dense<0.000000e+00> : vector<8xf32>
    %6 = vector.multi_reduction <add>, %5, %cst_5 [1] : vector<8x512xf32> to vector<8xf32>
    %7 = vector.shape_cast %6 : vector<8xf32> to vector<8x1xf32>
    %cst_6 = arith.constant 5.120000e+02 : f32
    %8 = vector.broadcast %cst_6 : f32 to vector<8x1xf32>
    %9 = arith.divf %7, %8 : vector<8x1xf32>
    %10 = vector.broadcast %9 : vector<8x1xf32> to vector<8x512xf32>
    %11 = arith.subf %5, %10 : vector<8x512xf32>
    %12 = arith.mulf %11, %11 : vector<8x512xf32>
    %cst_7 = arith.constant dense<0.000000e+00> : vector<8xf32>
    %13 = vector.multi_reduction <add>, %12, %cst_7 [1] : vector<8x512xf32> to vector<8xf32>
    %14 = vector.shape_cast %13 : vector<8xf32> to vector<8x1xf32>
    %cst_8 = arith.constant 5.120000e+02 : f32
    %15 = vector.broadcast %cst_8 : f32 to vector<8x1xf32>
    %16 = arith.divf %14, %15 : vector<8x1xf32>
    %cst_9 = arith.constant 9.99999974E-6 : f32
    %17 = vector.broadcast %cst_9 : f32 to vector<8x1xf32>
    %18 = arith.addf %16, %17 : vector<8x1xf32>
    %19 = math.rsqrt %18 : vector<8x1xf32>
    %20 = vector.broadcast %19 : vector<8x1xf32> to vector<8x512xf32>
    %21 = arith.mulf %11, %20 : vector<8x512xf32>
    %c0_10 = arith.constant 0 : index
    %c0_11 = arith.constant 0 : index
    %22 = vector.load %arg4[%c0_10, %c0_11] : memref<1x512xf32, #tpu.memory_space<vmem>>, vector<1x512xf32>
    %23 = vector.broadcast %22 : vector<1x512xf32> to vector<8x512xf32>
    %24 = arith.mulf %21, %23 : vector<8x512xf32>
    %c0_12 = arith.constant 0 : index
    %c0_13 = arith.constant 0 : index
    %25 = vector.load %arg5[%c0_12, %c0_13] : memref<1x512xf32, #tpu.memory_space<vmem>>, vector<1x512xf32>
    %26 = vector.broadcast %25 : vector<1x512xf32> to vector<8x512xf32>
    %27 = arith.addf %24, %26 : vector<8x512xf32>
    %c0_14 = arith.constant 0 : index
    %c0_15 = arith.constant 0 : index
    %28 = vector.load %arg6[%c0_14, %c0_15] : memref<8x512xf32, #tpu.memory_space<vmem>>, vector<8x512xf32>
    tpu.vector_store %arg6[%c0_14, %c0_15], %27 {strides = array<i32>} : memref<8x512xf32, #tpu.memory_space<vmem>>, vector<8x512xf32>,
    return
  }
  func.func @transform_0(%arg0: i32) -> (i32, i32) {
    %c0_i32 = arith.constant 0 : i32
    %c0_i32_0 = arith.constant 0 : i32
    return %arg0, %c0_i32 : i32, i32
  }
  func.func @transform_1(%arg0: i32) -> (i32, i32) {
    %c0_i32 = arith.constant 0 : i32
    %c0_i32_0 = arith.constant 0 : i32
    %c0_i32_1 = arith.constant 0 : i32
    return %c0_i32, %c0_i32_0 : i32, i32
  }
  func.func @transform_2(%arg0: i32) -> (i32, i32) {
    %c0_i32 = arith.constant 0 : i32
    %c0_i32_0 = arith.constant 0 : i32
    %c0_i32_1 = arith.constant 0 : i32
    return %c0_i32, %c0_i32_0 : i32, i32
  }
  func.func @transform_3(%arg0: i32) -> (i32, i32) {
    %c0_i32 = arith.constant 0 : i32
    %c0_i32_0 = arith.constant 0 : i32
    %c0_i32_1 = arith.constant 0 : i32
    return %c0_i32, %c0_i32_0 : i32, i32
  }
  func.func @transform_4(%arg0: i32) -> (i32, i32) {
    %c0_i32 = arith.constant 0 : i32
    %c0_i32_0 = arith.constant 0 : i32
    %c0_i32_1 = arith.constant 0 : i32
    return %c0_i32, %c0_i32_0 : i32, i32
  }
  func.func @transform_5(%arg0: i32) -> (i32, i32) {
    %c0_i32 = arith.constant 0 : i32
    %c0_i32_0 = arith.constant 0 : i32
    return %arg0, %c0_i32 : i32, i32
  }
}

</mosaic_0001>

<bundles_post_ra>
// kernel: image_encoder_forward.1
= control target key start
LH: loop header
LB: loop body
LE: loop exit
PB: predicated region body
PF: predicated region fallthrough
CT: control target
= control target key end

     0   :  { %10 = vsyncpa [#allocation3], 0  ;;  %s13722_s0 = inlined_call_operand.vmem [shape: bf16[8,4096], index: 0, kind: input, shape index: {}]   ;;  %s13723_s1 = inlined_call_operand.hbm [shape: bf16[4096,512], index: 1, kind: input, shape index: {}]   ;;  %s13724_s2 = inlined_call_operand.hbm [shape: f32[1,512], index: 2, kind: input, shape index: {}]   ;;  %s13725_s3 = inlined_call_operand.hbm [shape: f32[1,512], index: 3, kind: input, shape index: {}]   ;;  %s13726_s4 = inlined_call_operand.hbm [shape: f32[1,512], index: 4, kind: input, shape index: {}]   ;;  %s13727_s5 = inlined_call_operand.vmem [shape: f32[8,512], index: 5, kind: output, shape index: {}]  }
   0x1   :  { %11 = vsyncpa [#allocation5], 0  ;;  %s33_s20 = sshll.u32 %s13724_s2, 4  ;;  %s34_s20 = int_to_ptr.hbm [resolvable:$true] %s33_s20 }
   0x2   :  { %12 = vsyncpa [#allocation8], 0  ;;  %s13340_s21 = smov [#allocation4]   ;;  %s19_s25 = sshll.u32 %s13723_s1, 4  ;;  %s20_s25 = int_to_ptr.hbm [resolvable:$true] %s19_s25 }
   0x3   :  { %s35_s22 = sshll.u32 %s13340_s21, 4  ;;  %s13341_s26 = smov [#allocation2]   ;;  %s36_s22 = int_to_ptr.vmem [resolvable:$true] %s35_s22 }
   0x4   :  { %38 = dma.hbm_to_vmem [thread:$0]  %s34_s20, 64, %s36_s22, [#allocation5]  }
   0x5   :  { %s21_s27 = sshll.u32 %s13341_s26, 4  ;;  %s13342_s28 = smov 256   ;;  %s22_s27 = int_to_ptr.vmem [resolvable:$true] %s21_s27 }
   0x6   :  { %s13343_s29 = smov 16   ;;  %s44_s2 = sshll.u32 %s13725_s3, 4  ;;  %s45_s2 = int_to_ptr.hbm [resolvable:$true] %s44_s2 }
   0x7   :  { %27 = dma.hbm_to_vmem [thread:$0]  %s20_s25, 131072, %s22_s27, [#allocation3], %s13342_s28, %s13342_s28, %s13343_s29  }
   0x8   :  { %s13344_s7 = smov [#allocation6]   ;;  %s55_s1 = sshll.u32 %s13726_s4, 4  ;;  %s56_s1 = int_to_ptr.hbm [resolvable:$true] %s55_s1 }
   0x9   :  { %s46_s8 = sshll.u32 %s13344_s7, 4  ;;  %s13345_s11 = smov [#allocation7]   ;;  %s47_s8 = int_to_ptr.vmem [resolvable:$true] %s46_s8 }
   0xa   :  { %49 = dma.hbm_to_vmem [thread:$0]  %s45_s2, 64, %s47_s8, [#allocation5]  }
   0xb   :  { %s57_s12 = sshll.u32 %s13345_s11, 4  ;;  %s58_s12 = int_to_ptr.vmem [resolvable:$true] %s57_s12 }
   0xc   :  { %60 = dma.hbm_to_vmem [thread:$0]  %s56_s1, 64, %s58_s12, [#allocation8]  }
   0xd   :  { %13334 = dma.done.wait [#allocation3], 131072  }
   0xe   :  { %13335 = vsyncadd [#allocation3], 4294836224 }
   0xf   :  { %13336 = dma.done.wait [#allocation5], 128  }
  0x10   :  { %13337 = vsyncadd [#allocation5], 4294967168 }
  0x11   :  { %13338 = dma.done.wait [#allocation8], 64  }
  0x12   :  { %13339 = vsyncadd [#allocation8], 4294967232  ;;  %v8218_v0 = vld [vmem:[#allocation2 + $0xe0] sm:$0xf]  ;;  %v12230_v1 = vld [vmem:[#allocation2 + $0xec] sm:$0xf0] }
  0x13   :  { %v8346_v2 = vld [vmem:[#allocation2 + $0x1e0] sm:$0xf]  ;;  %v8219_v3 = vor.u32 %v12230_v1, %v8218_v0  ;;  %v12262_v4 = vld [vmem:[#allocation2 + $0x1ec] sm:$0xf0] }
  0x14   :  { %v8474_v5 = vld [vmem:[#allocation2 + $0x2e0] sm:$0xf]  ;;  %v12294_v6 = vld [vmem:[#allocation2 + $0x2ec] sm:$0xf0]  ;;  %v8347_v7 = vor.u32 %v12262_v4, %v8346_v2 }
  0x15   :  { %v8475_v8 = vor.u32 %v12294_v6, %v8474_v5  ;;  %v8602_v9 = vld [vmem:[#allocation2 + $0x3e0] sm:$0xf]  ;;  %v12326_v10 = vld [vmem:[#allocation2 + $0x3ec] sm:$0xf0]  ;;  %6359 = vmatpush.bf16.msra.mxu0 %v8219_v3 }
  0x16   :  { %v8202_v11 = vld [vmem:[#allocation2 + $0xc0] sm:$0xf]  ;;  %v8603_v12 = vor.u32 %v12326_v10, %v8602_v9  ;;  %v12226_v13 = vld [vmem:[#allocation2 + $0xcc] sm:$0xf0]  ;;  %6372 = vmatpush.bf16.msra.mxu1 %v8347_v7 }
  0x17   :  { %v8330_v14 = vld [vmem:[#allocation2 + $0x1c0] sm:$0xf]  ;;  %v12258_v15 = vld [vmem:[#allocation2 + $0x1cc] sm:$0xf0]  ;;  %6385 = vmatpush.bf16.msra.mxu2 %v8475_v8  ;;  %v8203_v16 = vor.u32 %v12226_v13, %v8202_v11 }
  0x18   :  { %v8331_v17 = vor.u32 %v12258_v15, %v8330_v14  ;;  %v8458_v18 = vld [vmem:[#allocation2 + $0x2c0] sm:$0xf]  ;;  %v12290_v19 = vld [vmem:[#allocation2 + $0x2cc] sm:$0xf0]  ;;  %6398 = vmatpush.bf16.msra.mxu3 %v8603_v12 }
  0x19   :  { %v8586_v20 = vld [vmem:[#allocation2 + $0x3c0] sm:$0xf]  ;;  %v8459_v21 = vor.u32 %v12290_v19, %v8458_v18  ;;  %v12322_v22 = vld [vmem:[#allocation2 + $0x3cc] sm:$0xf0]  ;;  %6360 = vmatpush.bf16.msra.mxu0 %v8203_v16 }
  0x1a   :  { %v8186_v23 = vld [vmem:[#allocation2 + $0xa0] sm:$0xf]  ;;  %v12222_v24 = vld [vmem:[#allocation2 + $0xac] sm:$0xf0]  ;;  %v8587_v25 = vor.u32 %v12322_v22, %v8586_v20  ;;  %6373 = vmatpush.bf16.msra.mxu1 %v8331_v17 }
  0x1b   :  { %v8314_v26 = vld [vmem:[#allocation2 + $0x1a0] sm:$0xf]  ;;  %v12254_v27 = vld [vmem:[#allocation2 + $0x1ac] sm:$0xf0]  ;;  %v8187_v29 = vor.u32 %v12222_v24, %v8186_v23  ;;  %6386 = vmatpush.bf16.msra.mxu2 %v8459_v21 }
  0x1c   :  { %v8442_v28 = vld [vmem:[#allocation2 + $0x2a0] sm:$0xf]  ;;  %v12286_v30 = vld [vmem:[#allocation2 + $0x2ac] sm:$0xf0]  ;;  %v8315_v33 = vor.u32 %v12254_v27, %v8314_v26  ;;  %6399 = vmatpush.bf16.msra.mxu3 %v8587_v25 }
  0x1d   :  { %v8570_v31 = vld [vmem:[#allocation2 + $0x3a0] sm:$0xf]  ;;  %v12318_v32 = vld [vmem:[#allocation2 + $0x3ac] sm:$0xf0]  ;;  %v8443_v34 = vor.u32 %v12286_v30, %v8442_v28  ;;  %6361 = vmatpush.bf16.msra.mxu0 %v8187_v29 }
  0x1e   :  { %v8170_v35 = vld [vmem:[#allocation2 + $0x80] sm:$0xf]  ;;  %v12218_v36 = vld [vmem:[#allocation2 + $0x8c] sm:$0xf0]  ;;  %v8571_v38 = vor.u32 %v12318_v32, %v8570_v31  ;;  %6374 = vmatpush.bf16.msra.mxu1 %v8315_v33 }
  0x1f   :  { %v8298_v37 = vld [vmem:[#allocation2 + $0x180] sm:$0xf]  ;;  %v12250_v39 = vld [vmem:[#allocation2 + $0x18c] sm:$0xf0]  ;;  %v8171_v44 = vor.u32 %v12218_v36, %v8170_v35  ;;  %6387 = vmatpush.bf16.msra.mxu2 %v8443_v34 }
  0x20   :  { %v8426_v40 = vld [vmem:[#allocation2 + $0x280] sm:$0xf]  ;;  %v12282_v41 = vld [vmem:[#allocation2 + $0x28c] sm:$0xf0]  ;;  %v8299_v45 = vor.u32 %v12250_v39, %v8298_v37  ;;  %6400 = vmatpush.bf16.msra.mxu3 %v8571_v38 }
  0x21   :  { %v8554_v42 = vld [vmem:[#allocation2 + $0x380] sm:$0xf]  ;;  %v12314_v43 = vld [vmem:[#allocation2 + $0x38c] sm:$0xf0]  ;;  %v8427_v46 = vor.u32 %v12282_v41, %v8426_v40  ;;  %6362 = vmatpush.bf16.msra.mxu0 %v8171_v44 }
  0x22   :  { %v8154_v47 = vld [vmem:[#allocation2 + $0x60] sm:$0xf]  ;;  %v12214_v48 = vld [vmem:[#allocation2 + $0x6c] sm:$0xf0]  ;;  %v8555_v50 = vor.u32 %v12314_v43, %v8554_v42  ;;  %6375 = vmatpush.bf16.msra.mxu1 %v8299_v45 }
  0x23   :  { %v8282_v49 = vld [vmem:[#allocation2 + $0x160] sm:$0xf]  ;;  %v12246_v51 = vld [vmem:[#allocation2 + $0x16c] sm:$0xf0]  ;;  %v8155_v56 = vor.u32 %v12214_v48, %v8154_v47  ;;  %6388 = vmatpush.bf16.msra.mxu2 %v8427_v46 }
  0x24   :  { %v8410_v52 = vld [vmem:[#allocation2 + $0x260] sm:$0xf]  ;;  %v12278_v53 = vld [vmem:[#allocation2 + $0x26c] sm:$0xf0]  ;;  %v8283_v57 = vor.u32 %v12246_v51, %v8282_v49  ;;  %6401 = vmatpush.bf16.msra.mxu3 %v8555_v50 }
  0x25   :  { %v8538_v54 = vld [vmem:[#allocation2 + $0x360] sm:$0xf]  ;;  %v12310_v55 = vld [vmem:[#allocation2 + $0x36c] sm:$0xf0]  ;;  %v8411_v58 = vor.u32 %v12278_v53, %v8410_v52  ;;  %6363 = vmatpush.bf16.msra.mxu0 %v8155_v56 }
  0x26   :  { %v8138_v59 = vld [vmem:[#allocation2 + $0x40] sm:$0xf]  ;;  %v12210_v60 = vld [vmem:[#allocation2 + $0x4c] sm:$0xf0]  ;;  %v8539_v62 = vor.u32 %v12310_v55, %v8538_v54  ;;  %6376 = vmatpush.bf16.msra.mxu1 %v8283_v57 }
  0x27   :  { %v8266_v61 = vld [vmem:[#allocation2 + $0x140] sm:$0xf]  ;;  %v12242_v63 = vld [vmem:[#allocation2 + $0x14c] sm:$0xf0]  ;;  %v8139_v4 = vor.u32 %v12210_v60, %v8138_v59  ;;  %6389 = vmatpush.bf16.msra.mxu2 %v8411_v58 }
  0x28   :  { %v8394_v0 = vld [vmem:[#allocation2 + $0x240] sm:$0xf]  ;;  %v12274_v1 = vld [vmem:[#allocation2 + $0x24c] sm:$0xf0]  ;;  %v8267_v5 = vor.u32 %v12242_v63, %v8266_v61  ;;  %6402 = vmatpush.bf16.msra.mxu3 %v8539_v62 }
  0x29   :  { %v8522_v2 = vld [vmem:[#allocation2 + $0x340] sm:$0xf]  ;;  %v12306_v3 = vld [vmem:[#allocation2 + $0x34c] sm:$0xf0]  ;;  %v8395_v6 = vor.u32 %v12274_v1, %v8394_v0  ;;  %6364 = vmatpush.bf16.msra.mxu0 %v8139_v4 }
  0x2a   :  { %v8122_v7 = vld [vmem:[#allocation2 + $0x20] sm:$0xf]  ;;  %v12206_v8 = vld [vmem:[#allocation2 + $0x2c] sm:$0xf0]  ;;  %v8523_v10 = vor.u32 %v12306_v3, %v8522_v2  ;;  %6377 = vmatpush.bf16.msra.mxu1 %v8267_v5  ;;  %v78_v2 = vld [vmem:[%s13722_s0 + $0x8] sm:$0xff] }
  0x2b   :  { %v8250_v9 = vld [vmem:[#allocation2 + $0x120] sm:$0xf]  ;;  %v12238_v11 = vld [vmem:[#allocation2 + $0x12c] sm:$0xf0]  ;;  %v8123_v16 = vor.u32 %v12206_v8, %v8122_v7  ;;  %6390 = vmatpush.bf16.msra.mxu2 %v8395_v6  ;;  %v1145_v8 = vunpack.c.l.b16 %v78_v2 }
  0x2c   :  { %v8378_v12 = vld [vmem:[#allocation2 + $0x220] sm:$0xf]  ;;  %v12270_v13 = vld [vmem:[#allocation2 + $0x22c] sm:$0xf0]  ;;  %v8251_v19 = vor.u32 %v12238_v11, %v8250_v9  ;;  %6403 = vmatpush.bf16.msra.mxu3 %v8523_v10  ;;  %v1146_v10 = vunpack.c.h.b16 %v78_v2 }
  0x2d   :  { %v8506_v14 = vld [vmem:[#allocation2 + $0x320] sm:$0xf]  ;;  %v12302_v15 = vld [vmem:[#allocation2 + $0x32c] sm:$0xf0]  ;;  %v8379_v20 = vor.u32 %v12270_v13, %v8378_v12  ;;  %6365 = vmatpush.bf16.msra.mxu0 %v8123_v16 }
  0x2e   :  { %v8106_v17 = vld [vmem:[#allocation2] sm:$0xf]  ;;  %v12202_v18 = vld [vmem:[#allocation2 + $0xc] sm:$0xf0]  ;;  %v8507_v24 = vor.u32 %v12302_v15, %v8506_v14  ;;  %6378 = vmatpush.bf16.msra.mxu1 %v8251_v19 }
  0x2f   :  { %v8234_v21 = vld [vmem:[#allocation2 + $0x100] sm:$0xf]  ;;  %v12234_v22 = vld [vmem:[#allocation2 + $0x10c] sm:$0xf0]  ;;  %v8107_v31 = vor.u32 %v12202_v18, %v8106_v17  ;;  %6391 = vmatpush.bf16.msra.mxu2 %v8379_v20  ;;  %v13395_v18 = vpack.c.b16 %v1145_v8, %v1145_v8  ;;  %v13399_v20 = vpack.c.b16 %v1146_v10, %v1146_v10 }
  0x30   :  { %v8362_v23 = vld [vmem:[#allocation2 + $0x200] sm:$0xf]  ;;  %v12266_v25 = vld [vmem:[#allocation2 + $0x20c] sm:$0xf0]  ;;  %v8235_v35 = vor.u32 %v12234_v22, %v8234_v21  ;;  %6404 = vmatpush.bf16.msra.mxu3 %v8507_v24 }
  0x31   :  { %v8490_v26 = vld [vmem:[#allocation2 + $0x300] sm:$0xf]  ;;  %v12298_v27 = vld [vmem:[#allocation2 + $0x30c] sm:$0xf0]  ;;  %v8363_v36 = vor.u32 %v12266_v25, %v8362_v23  ;;  %6366 = vmatpush.bf16.msra.mxu0 %v8107_v31 }
  0x32   :  { %v8730_v28 = vld [vmem:[#allocation2 + $0x4e0] sm:$0xf]  ;;  %v12358_v29 = vld [vmem:[#allocation2 + $0x4ec] sm:$0xf0]  ;;  %v8491_v39 = vor.u32 %v12298_v27, %v8490_v26  ;;  %6379 = vmatpush.bf16.msra.mxu1 %v8235_v35 }
  0x33   :  { %v8858_v30 = vld [vmem:[#allocation2 + $0x5e0] sm:$0xf]  ;;  %v12390_v32 = vld [vmem:[#allocation2 + $0x5ec] sm:$0xf0]  ;;  %v8731_v40 = vor.u32 %v12358_v29, %v8730_v28  ;;  %6392 = vmatpush.bf16.msra.mxu2 %v8363_v36 }
  0x34   :  { %v8986_v33 = vld [vmem:[#allocation2 + $0x6e0] sm:$0xf]  ;;  %v12422_v34 = vld [vmem:[#allocation2 + $0x6ec] sm:$0xf0]  ;;  %v8859_v41 = vor.u32 %v12390_v32, %v8858_v30  ;;  %6405 = vmatpush.bf16.msra.mxu3 %v8491_v39 }
  0x35   :  { %v9114_v37 = vld [vmem:[#allocation2 + $0x7e0] sm:$0xf]  ;;  %v12454_v38 = vld [vmem:[#allocation2 + $0x7ec] sm:$0xf0]  ;;  %v8987_v42 = vor.u32 %v12422_v34, %v8986_v33  ;;  %6411 = vmatpush.bf16.msrb.mxu0 %v8731_v40 }
  0x36   :  { %v8714_v43 = vld [vmem:[#allocation2 + $0x4c0] sm:$0xf]  ;;  %v12354_v44 = vld [vmem:[#allocation2 + $0x4cc] sm:$0xf0]  ;;  %v9115_v46 = vor.u32 %v12454_v38, %v9114_v37  ;;  %6424 = vmatpush.bf16.msrb.mxu1 %v8859_v41  ;;  %6393 = vmatmul.bf16.vlgmr.msra.gmra.mxu2 %v13395_v18 }
  0x37   :  { %v8842_v45 = vld [vmem:[#allocation2 + $0x5c0] sm:$0xf]  ;;  %v12386_v47 = vld [vmem:[#allocation2 + $0x5cc] sm:$0xf0]  ;;  %v8715_v52 = vor.u32 %v12354_v44, %v8714_v43  ;;  %6437 = vmatpush.bf16.msrb.mxu2 %v8987_v42  ;;  %6406 = vmatmul.bf16.vlgmr.msra.gmra.mxu3 %v13399_v20 }
  0x38   :  { %v8970_v48 = vld [vmem:[#allocation2 + $0x6c0] sm:$0xf]  ;;  %v12418_v49 = vld [vmem:[#allocation2 + $0x6cc] sm:$0xf0]  ;;  %v8843_v54 = vor.u32 %v12386_v47, %v8842_v45  ;;  %6450 = vmatpush.bf16.msrb.mxu3 %v9115_v46 }
  0x39   :  { %v9098_v50 = vld [vmem:[#allocation2 + $0x7c0] sm:$0xf]  ;;  %v12450_v51 = vld [vmem:[#allocation2 + $0x7cc] sm:$0xf0]  ;;  %v8971_v55 = vor.u32 %v12418_v49, %v8970_v48  ;;  %6412 = vmatpush.bf16.msrb.mxu0 %v8715_v52 }
  0x3a   :  { %v8698_v53 = vld [vmem:[#allocation2 + $0x4a0] sm:$0xf]  ;;  %v12350_v56 = vld [vmem:[#allocation2 + $0x4ac] sm:$0xf0]  ;;  %v9099_v59 = vor.u32 %v12450_v51, %v9098_v50  ;;  %6425 = vmatpush.bf16.msrb.mxu1 %v8843_v54 }
  0x3b   :  { %v8826_v57 = vld [vmem:[#allocation2 + $0x5a0] sm:$0xf]  ;;  %v12382_v58 = vld [vmem:[#allocation2 + $0x5ac] sm:$0xf0]  ;;  %v8699_v0 = vor.u32 %v12350_v56, %v8698_v53  ;;  %6438 = vmatpush.bf16.msrb.mxu2 %v8971_v55 }
  0x3c   :  { %v8954_v60 = vld [vmem:[#allocation2 + $0x6a0] sm:$0xf]  ;;  %v12414_v61 = vld [vmem:[#allocation2 + $0x6ac] sm:$0xf0]  ;;  %v8827_v1 = vor.u32 %v12382_v58, %v8826_v57  ;;  %6451 = vmatpush.bf16.msrb.mxu3 %v9099_v59 }
  0x3d   :  { %v9082_v62 = vld [vmem:[#allocation2 + $0x7a0] sm:$0xf]  ;;  %v12446_v63 = vld [vmem:[#allocation2 + $0x7ac] sm:$0xf0]  ;;  %v8955_v4 = vor.u32 %v12414_v61, %v8954_v60  ;;  %6413 = vmatpush.bf16.msrb.mxu0 %v8699_v0 }
  0x3e   :  { %v77_v3 = vld [vmem:[%s13722_s0] sm:$0xff]  ;;  %v12346_v6 = vld [vmem:[#allocation2 + $0x48c] sm:$0xf0]  ;;  %v9083_v11 = vor.u32 %v12446_v63, %v9082_v62  ;;  %6426 = vmatpush.bf16.msrb.mxu1 %v8827_v1 }
  0x3f   :  { %v8682_v5 = vld [vmem:[#allocation2 + $0x480] sm:$0xf]  ;;  %v1143_v9 = vunpack.c.l.b16 %v77_v3  ;;  %v12378_v12 = vld [vmem:[#allocation2 + $0x58c] sm:$0xf0]  ;;  %v1144_v15 = vunpack.c.h.b16 %v77_v3  ;;  %6439 = vmatpush.bf16.msrb.mxu2 %v8955_v4  ;;  %v80_v3 = vld [vmem:[%s13722_s0 + $0x18] sm:$0xff] }
  0x40   :  { %v8810_v7 = vld [vmem:[#allocation2 + $0x580] sm:$0xf]  ;;  %v12410_v14 = vld [vmem:[#allocation2 + $0x68c] sm:$0xf0]  ;;  %v8683_v21 = vor.u32 %v12346_v6, %v8682_v5  ;;  %6452 = vmatpush.bf16.msrb.mxu3 %v9083_v11 }
  0x41   :  { %v8938_v13 = vld [vmem:[#allocation2 + $0x680] sm:$0xf]  ;;  %v12442_v17 = vld [vmem:[#allocation2 + $0x78c] sm:$0xf0]  ;;  %v13397_v19 = vpack.c.b16 %v1143_v9, %v1143_v9  ;;  %v13401_v22 = vpack.c.b16 %v1144_v15, %v1144_v15  ;;  %v8811_v23 = vor.u32 %v12378_v12, %v8810_v7  ;;  %v1149_v15 = vunpack.c.l.b16 %v80_v3 }
  0x42   :  { %v9066_v16 = vld [vmem:[#allocation2 + $0x780] sm:$0xf]  ;;  %v8939_v24 = vor.u32 %v12410_v14, %v8938_v13  ;;  %v12342_v26 = vld [vmem:[#allocation2 + $0x46c] sm:$0xf0]  ;;  %6414 = vmatpush.bf16.msrb.mxu0 %v8683_v21 }
  0x43   :  { %v8666_v25 = vld [vmem:[#allocation2 + $0x460] sm:$0xf]  ;;  %v9067_v28 = vor.u32 %v12442_v17, %v9066_v16  ;;  %v12374_v29 = vld [vmem:[#allocation2 + $0x56c] sm:$0xf0]  ;;  %6367 = vmatmul.bf16.vlgmr.msra.gmra.mxu0 %v13397_v19  ;;  %6380 = vmatmul.bf16.vlgmr.msra.gmra.mxu1 %v13401_v22 }
  0x44   :  { %v8794_v27 = vld [vmem:[#allocation2 + $0x560] sm:$0xf]  ;;  %v12406_v31 = vld [vmem:[#allocation2 + $0x66c] sm:$0xf0]  ;;  %v8667_v34 = vor.u32 %v12342_v26, %v8666_v25  ;;  %6427 = vmatpush.bf16.msrb.mxu1 %v8811_v23  ;;  %6440 = vmatpush.bf16.msrb.mxu2 %v8939_v24  ;;  %v1150_v25 = vunpack.c.h.b16 %v80_v3 }
  0x45   :  { %v8922_v30 = vld [vmem:[#allocation2 + $0x660] sm:$0xf]  ;;  %v12438_v33 = vld [vmem:[#allocation2 + $0x76c] sm:$0xf0]  ;;  %v8795_v35 = vor.u32 %v12374_v29, %v8794_v27  ;;  %6453 = vmatpush.bf16.msrb.mxu3 %v9067_v28 }
  0x46   :  { %v9050_v32 = vld [vmem:[#allocation2 + $0x760] sm:$0xf]  ;;  %v8923_v36 = vor.u32 %v12406_v31, %v8922_v30  ;;  %v12338_v38 = vld [vmem:[#allocation2 + $0x44c] sm:$0xf0]  ;;  %6415 = vmatpush.bf16.msrb.mxu0 %v8667_v34 }
  0x47   :  { %v8650_v37 = vld [vmem:[#allocation2 + $0x440] sm:$0xf]  ;;  %v9051_v40 = vor.u32 %v12438_v33, %v9050_v32  ;;  %v12370_v41 = vld [vmem:[#allocation2 + $0x54c] sm:$0xf0] }
  0x48   :  { %v8778_v39 = vld [vmem:[#allocation2 + $0x540] sm:$0xf]  ;;  %v12402_v43 = vld [vmem:[#allocation2 + $0x64c] sm:$0xf0]  ;;  %v8651_v46 = vor.u32 %v12338_v38, %v8650_v37  ;;  %6428 = vmatpush.bf16.msrb.mxu1 %v8795_v35  ;;  %6441 = vmatpush.bf16.msrb.mxu2 %v8923_v36  ;;  %v13413_v38 = vpack.c.b16 %v1149_v15, %v1149_v15 }
  0x49   :  { %v8906_v42 = vld [vmem:[#allocation2 + $0x640] sm:$0xf]  ;;  %v12434_v45 = vld [vmem:[#allocation2 + $0x74c] sm:$0xf0]  ;;  %v8779_v47 = vor.u32 %v12370_v41, %v8778_v39  ;;  %6454 = vmatpush.bf16.msrb.mxu3 %v9051_v40 }
  0x4a   :  { %v9034_v44 = vld [vmem:[#allocation2 + $0x740] sm:$0xf]  ;;  %v8907_v48 = vor.u32 %v12402_v43, %v8906_v42  ;;  %v12334_v50 = vld [vmem:[#allocation2 + $0x42c] sm:$0xf0]  ;;  %6416 = vmatpush.bf16.msrb.mxu0 %v8651_v46  ;;  %v13417_v42 = vpack.c.b16 %v1150_v25, %v1150_v25 }
  0x4b   :  { %v8634_v49 = vld [vmem:[#allocation2 + $0x420] sm:$0xf]  ;;  %v9035_v52 = vor.u32 %v12434_v45, %v9034_v44  ;;  %v12366_v53 = vld [vmem:[#allocation2 + $0x52c] sm:$0xf0] }
  0x4c   :  { %v8762_v51 = vld [vmem:[#allocation2 + $0x520] sm:$0xf]  ;;  %v12398_v55 = vld [vmem:[#allocation2 + $0x62c] sm:$0xf0]  ;;  %v8635_v59 = vor.u32 %v12334_v50, %v8634_v49  ;;  %6429 = vmatpush.bf16.msrb.mxu1 %v8779_v47  ;;  %6442 = vmatpush.bf16.msrb.mxu2 %v8907_v48 }
  0x4d   :  { %v8890_v54 = vld [vmem:[#allocation2 + $0x620] sm:$0xf]  ;;  %v12430_v57 = vld [vmem:[#allocation2 + $0x72c] sm:$0xf0]  ;;  %v8763_v63 = vor.u32 %v12366_v53, %v8762_v51  ;;  %6455 = vmatpush.bf16.msrb.mxu3 %v9035_v52 }
  0x4e   :  { %v9018_v56 = vld [vmem:[#allocation2 + $0x720] sm:$0xf]  ;;  %v12330_v60 = vld [vmem:[#allocation2 + $0x40c] sm:$0xf0]  ;;  %v8891_v0 = vor.u32 %v12398_v55, %v8890_v54  ;;  %6417 = vmatpush.bf16.msrb.mxu0 %v8635_v59 }
  0x4f   :  { %v8618_v58 = vld [vmem:[#allocation2 + $0x400] sm:$0xf]  ;;  %v12362_v62 = vld [vmem:[#allocation2 + $0x50c] sm:$0xf0]  ;;  %v9019_v4 = vor.u32 %v12430_v57, %v9018_v56 }
  0x50   :  { %v8746_v61 = vld [vmem:[#allocation2 + $0x500] sm:$0xf]  ;;  %v12394_v2 = vld [vmem:[#allocation2 + $0x60c] sm:$0xf0]  ;;  %v8619_v11 = vor.u32 %v12330_v60, %v8618_v58  ;;  %6430 = vmatpush.bf16.msrb.mxu1 %v8763_v63  ;;  %6443 = vmatpush.bf16.msrb.mxu2 %v8891_v0 }
  0x51   :  { %v8874_v1 = vld [vmem:[#allocation2 + $0x600] sm:$0xf]  ;;  %v12426_v6 = vld [vmem:[#allocation2 + $0x70c] sm:$0xf0]  ;;  %v8747_v16 = vor.u32 %v12362_v62, %v8746_v61  ;;  %6456 = vmatpush.bf16.msrb.mxu3 %v9019_v4 }
  0x52   :  { %v9002_v5 = vld [vmem:[#allocation2 + $0x700] sm:$0xf]  ;;  %v79_v7 = vld [vmem:[%s13722_s0 + $0x10] sm:$0xff]  ;;  %v8875_v17 = vor.u32 %v12394_v2, %v8874_v1  ;;  %6418 = vmatpush.bf16.msrb.mxu0 %v8619_v11 }
  0x53   :  { %v9242_v8 = vld [vmem:[#allocation2 + $0x8e0] sm:$0xf]  ;;  %v12486_v9 = vld [vmem:[#allocation2 + $0x8ec] sm:$0xf0]  ;;  %v1147_v24 = vunpack.c.l.b16 %v79_v7  ;;  %v9003_v26 = vor.u32 %v12426_v6, %v9002_v5  ;;  %v1148_v28 = vunpack.c.h.b16 %v79_v7 }
  0x54   :  { %v9370_v10 = vld [vmem:[#allocation2 + $0x9e0] sm:$0xf]  ;;  %v12518_v12 = vld [vmem:[#allocation2 + $0x9ec] sm:$0xf0]  ;;  %v9243_v27 = vor.u32 %v12486_v9, %v9242_v8  ;;  %6431 = vmatpush.bf16.msrb.mxu1 %v8747_v16  ;;  %6444 = vmatpush.bf16.msrb.mxu2 %v8875_v17 }
  0x55   :  { %v9498_v13 = vld [vmem:[#allocation2 + $0xae0] sm:$0xf]  ;;  %v12550_v14 = vld [vmem:[#allocation2 + $0xaec] sm:$0xf0]  ;;  %v9371_v29 = vor.u32 %v12518_v12, %v9370_v10  ;;  %v13415_v41 = vpack.c.b16 %v1147_v24, %v1147_v24  ;;  %6457 = vmatpush.bf16.msrb.mxu3 %v9003_v26  ;;  %v13419_v44 = vpack.c.b16 %v1148_v28, %v1148_v28 }
  0x56   :  { %v9626_v21 = vld [vmem:[#allocation2 + $0xbe0] sm:$0xf]  ;;  %v12582_v23 = vld [vmem:[#allocation2 + $0xbec] sm:$0xf0]  ;;  %v9499_v30 = vor.u32 %v12550_v14, %v9498_v13  ;;  %6463 = vmatpush.bf16.msra.mxu0 %v9243_v27 }
  0x57   :  { %v9226_v31 = vld [vmem:[#allocation2 + $0x8c0] sm:$0xf]  ;;  %v12482_v32 = vld [vmem:[#allocation2 + $0x8cc] sm:$0xf0]  ;;  %v9627_v34 = vor.u32 %v12582_v23, %v9626_v21  ;;  %6445 = vmatmul.bf16.vlgmr.msrb.gmra.mxu2 %v13413_v38  ;;  %6419 = vmatmul.bf16.vlgmr.msrb.gmra.mxu0 %v13415_v41 }
  0x58   :  { %v9354_v33 = vld [vmem:[#allocation2 + $0x9c0] sm:$0xf]  ;;  %v12514_v35 = vld [vmem:[#allocation2 + $0x9cc] sm:$0xf0]  ;;  %v9227_v43 = vor.u32 %v12482_v32, %v9226_v31  ;;  %6476 = vmatpush.bf16.msra.mxu1 %v9371_v29  ;;  %6489 = vmatpush.bf16.msra.mxu2 %v9499_v30 }
  0x59   :  { %v9482_v36 = vld [vmem:[#allocation2 + $0xac0] sm:$0xf]  ;;  %v12546_v37 = vld [vmem:[#allocation2 + $0xacc] sm:$0xf0]  ;;  %v9355_v45 = vor.u32 %v12514_v35, %v9354_v33  ;;  %6502 = vmatpush.bf16.msra.mxu3 %v9627_v34  ;;  %6432 = vmatmul.bf16.vlgmr.msrb.gmra.mxu1 %v13419_v44 }
  0x5a   :  { %v9610_v39 = vld [vmem:[#allocation2 + $0xbc0] sm:$0xf]  ;;  %v12578_v40 = vld [vmem:[#allocation2 + $0xbcc] sm:$0xf0]  ;;  %v9483_v46 = vor.u32 %v12546_v37, %v9482_v36  ;;  %6458 = vmatmul.bf16.vlgmr.msrb.gmra.mxu3 %v13417_v42  ;;  %6464 = vmatpush.bf16.msra.mxu0 %v9227_v43 }
  0x5b   :  { %v9210_v47 = vld [vmem:[#allocation2 + $0x8a0] sm:$0xf]  ;;  %v12478_v48 = vld [vmem:[#allocation2 + $0x8ac] sm:$0xf0]  ;;  %v9611_v50 = vor.u32 %v12578_v40, %v9610_v39 }
  0x5c   :  { %v9338_v49 = vld [vmem:[#allocation2 + $0x9a0] sm:$0xf]  ;;  %v12510_v51 = vld [vmem:[#allocation2 + $0x9ac] sm:$0xf0]  ;;  %v9211_v56 = vor.u32 %v12478_v48, %v9210_v47  ;;  %6477 = vmatpush.bf16.msra.mxu1 %v9355_v45  ;;  %6490 = vmatpush.bf16.msra.mxu2 %v9483_v46 }
  0x5d   :  { %v9466_v52 = vld [vmem:[#allocation2 + $0xaa0] sm:$0xf]  ;;  %v12542_v53 = vld [vmem:[#allocation2 + $0xaac] sm:$0xf0]  ;;  %v9339_v57 = vor.u32 %v12510_v51, %v9338_v49  ;;  %6503 = vmatpush.bf16.msra.mxu3 %v9611_v50 }
  0x5e   :  { %v9594_v54 = vld [vmem:[#allocation2 + $0xba0] sm:$0xf]  ;;  %v12574_v55 = vld [vmem:[#allocation2 + $0xbac] sm:$0xf0]  ;;  %v9467_v58 = vor.u32 %v12542_v53, %v9466_v52  ;;  %6465 = vmatpush.bf16.msra.mxu0 %v9211_v56 }
  0x5f   :  { %v9194_v59 = vld [vmem:[#allocation2 + $0x880] sm:$0xf]  ;;  %v12474_v60 = vld [vmem:[#allocation2 + $0x88c] sm:$0xf0]  ;;  %v9595_v62 = vor.u32 %v12574_v55, %v9594_v54 }
  0x60   :  { %v9322_v61 = vld [vmem:[#allocation2 + $0x980] sm:$0xf]  ;;  %v12506_v63 = vld [vmem:[#allocation2 + $0x98c] sm:$0xf0]  ;;  %v9195_v4 = vor.u32 %v12474_v60, %v9194_v59  ;;  %6478 = vmatpush.bf16.msra.mxu1 %v9339_v57  ;;  %6491 = vmatpush.bf16.msra.mxu2 %v9467_v58 }
  0x61   :  { %v9450_v0 = vld [vmem:[#allocation2 + $0xa80] sm:$0xf]  ;;  %v12538_v1 = vld [vmem:[#allocation2 + $0xa8c] sm:$0xf0]  ;;  %v9323_v5 = vor.u32 %v12506_v63, %v9322_v61  ;;  %6504 = vmatpush.bf16.msra.mxu3 %v9595_v62  ;;  %v82_v61 = vld [vmem:[%s13722_s0 + $0x28] sm:$0xff] }
  0x62   :  { %v9578_v2 = vld [vmem:[#allocation2 + $0xb80] sm:$0xf]  ;;  %v12570_v3 = vld [vmem:[#allocation2 + $0xb8c] sm:$0xf0]  ;;  %v9451_v6 = vor.u32 %v12538_v1, %v9450_v0  ;;  %6466 = vmatpush.bf16.msra.mxu0 %v9195_v4 }
  0x63   :  { %v9178_v7 = vld [vmem:[#allocation2 + $0x860] sm:$0xf]  ;;  %v12470_v8 = vld [vmem:[#allocation2 + $0x86c] sm:$0xf0]  ;;  %v9579_v10 = vor.u32 %v12570_v3, %v9578_v2 }
  0x64   :  { %v9306_v9 = vld [vmem:[#allocation2 + $0x960] sm:$0xf]  ;;  %v12502_v11 = vld [vmem:[#allocation2 + $0x96c] sm:$0xf0]  ;;  %v9179_v16 = vor.u32 %v12470_v8, %v9178_v7  ;;  %6479 = vmatpush.bf16.msra.mxu1 %v9323_v5  ;;  %6492 = vmatpush.bf16.msra.mxu2 %v9451_v6 }
  0x65   :  { %v9434_v12 = vld [vmem:[#allocation2 + $0xa60] sm:$0xf]  ;;  %v12534_v13 = vld [vmem:[#allocation2 + $0xa6c] sm:$0xf0]  ;;  %v9307_v17 = vor.u32 %v12502_v11, %v9306_v9  ;;  %6505 = vmatpush.bf16.msra.mxu3 %v9579_v10  ;;  %v1153_v10 = vunpack.c.l.b16 %v82_v61 }
  0x66   :  { %v9562_v14 = vld [vmem:[#allocation2 + $0xb60] sm:$0xf]  ;;  %v12566_v15 = vld [vmem:[#allocation2 + $0xb6c] sm:$0xf0]  ;;  %v9435_v21 = vor.u32 %v12534_v13, %v9434_v12  ;;  %6467 = vmatpush.bf16.msra.mxu0 %v9179_v16 }
  0x67   :  { %v9162_v23 = vld [vmem:[#allocation2 + $0x840] sm:$0xf]  ;;  %v12466_v24 = vld [vmem:[#allocation2 + $0x84c] sm:$0xf0]  ;;  %v9563_v26 = vor.u32 %v12566_v15, %v9562_v14  ;;  %v1154_v14 = vunpack.c.h.b16 %v82_v61 }
  0x68   :  { %v9290_v25 = vld [vmem:[#allocation2 + $0x940] sm:$0xf]  ;;  %v12498_v27 = vld [vmem:[#allocation2 + $0x94c] sm:$0xf0]  ;;  %v9163_v32 = vor.u32 %v12466_v24, %v9162_v23  ;;  %6480 = vmatpush.bf16.msra.mxu1 %v9307_v17  ;;  %6493 = vmatpush.bf16.msra.mxu2 %v9435_v21 }
  0x69   :  { %v9418_v28 = vld [vmem:[#allocation2 + $0xa40] sm:$0xf]  ;;  %v12530_v29 = vld [vmem:[#allocation2 + $0xa4c] sm:$0xf0]  ;;  %v9291_v33 = vor.u32 %v12498_v27, %v9290_v25  ;;  %6506 = vmatpush.bf16.msra.mxu3 %v9563_v26 }
  0x6a   :  { %v9546_v30 = vld [vmem:[#allocation2 + $0xb40] sm:$0xf]  ;;  %v12562_v31 = vld [vmem:[#allocation2 + $0xb4c] sm:$0xf0]  ;;  %v9419_v34 = vor.u32 %v12530_v29, %v9418_v28  ;;  %6468 = vmatpush.bf16.msra.mxu0 %v9163_v32  ;;  %v13433_v29 = vpack.c.b16 %v1153_v10, %v1153_v10 }
  0x6b   :  { %v9146_v35 = vld [vmem:[#allocation2 + $0x820] sm:$0xf]  ;;  %v12462_v36 = vld [vmem:[#allocation2 + $0x82c] sm:$0xf0]  ;;  %v9547_v39 = vor.u32 %v12562_v31, %v9546_v30 }
  0x6c   :  { %v9274_v37 = vld [vmem:[#allocation2 + $0x920] sm:$0xf]  ;;  %v12494_v40 = vld [vmem:[#allocation2 + $0x92c] sm:$0xf0]  ;;  %v9147_v49 = vor.u32 %v12462_v36, %v9146_v35  ;;  %6481 = vmatpush.bf16.msra.mxu1 %v9291_v33  ;;  %6494 = vmatpush.bf16.msra.mxu2 %v9419_v34  ;;  %v13437_v33 = vpack.c.b16 %v1154_v14, %v1154_v14 }
  0x6d   :  { %v9402_v43 = vld [vmem:[#allocation2 + $0xa20] sm:$0xf]  ;;  %v12526_v45 = vld [vmem:[#allocation2 + $0xa2c] sm:$0xf0]  ;;  %v9275_v53 = vor.u32 %v12494_v40, %v9274_v37  ;;  %6507 = vmatpush.bf16.msra.mxu3 %v9547_v39 }
  0x6e   :  { %v9530_v46 = vld [vmem:[#allocation2 + $0xb20] sm:$0xf]  ;;  %v12558_v47 = vld [vmem:[#allocation2 + $0xb2c] sm:$0xf0]  ;;  %v9403_v54 = vor.u32 %v12526_v45, %v9402_v43  ;;  %6469 = vmatpush.bf16.msra.mxu0 %v9147_v49 }
  0x6f   :  { %v9130_v48 = vld [vmem:[#allocation2 + $0x800] sm:$0xf]  ;;  %v12458_v50 = vld [vmem:[#allocation2 + $0x80c] sm:$0xf0]  ;;  %v9531_v58 = vor.u32 %v12558_v47, %v9530_v46 }
  0x70   :  { %v9258_v51 = vld [vmem:[#allocation2 + $0x900] sm:$0xf]  ;;  %v12490_v52 = vld [vmem:[#allocation2 + $0x90c] sm:$0xf0]  ;;  %v9131_v1 = vor.u32 %v12458_v50, %v9130_v48  ;;  %6482 = vmatpush.bf16.msra.mxu1 %v9275_v53  ;;  %6495 = vmatpush.bf16.msra.mxu2 %v9403_v54 }
  0x71   :  { %v9386_v55 = vld [vmem:[#allocation2 + $0xa00] sm:$0xf]  ;;  %v12522_v56 = vld [vmem:[#allocation2 + $0xa0c] sm:$0xf0]  ;;  %v9259_v6 = vor.u32 %v12490_v52, %v9258_v51  ;;  %6508 = vmatpush.bf16.msra.mxu3 %v9531_v58 }
  0x72   :  { %v81_v57 = vld [vmem:[%s13722_s0 + $0x20] sm:$0xff]  ;;  %v12554_v60 = vld [vmem:[#allocation2 + $0xb0c] sm:$0xf0]  ;;  %v9387_v7 = vor.u32 %v12522_v56, %v9386_v55  ;;  %6470 = vmatpush.bf16.msra.mxu0 %v9131_v1 }
  0x73   :  { %v9514_v59 = vld [vmem:[#allocation2 + $0xb00] sm:$0xf]  ;;  %v12614_v63 = vld [vmem:[#allocation2 + $0xcec] sm:$0xf0]  ;;  %v1151_v5 = vunpack.c.l.b16 %v81_v57  ;;  %v1152_v11 = vunpack.c.h.b16 %v81_v57 }
  0x74   :  { %v9754_v62 = vld [vmem:[#allocation2 + $0xce0] sm:$0xf]  ;;  %v12646_v2 = vld [vmem:[#allocation2 + $0xdec] sm:$0xf0]  ;;  %v9515_v12 = vor.u32 %v12554_v60, %v9514_v59  ;;  %6483 = vmatpush.bf16.msra.mxu1 %v9259_v6  ;;  %6496 = vmatpush.bf16.msra.mxu2 %v9387_v7 }
  0x75   :  { %v9882_v0 = vld [vmem:[#allocation2 + $0xde0] sm:$0xf]  ;;  %v12678_v4 = vld [vmem:[#allocation2 + $0xeec] sm:$0xf0]  ;;  %v9755_v13 = vor.u32 %v12614_v63, %v9754_v62  ;;  %v13431_v25 = vpack.c.b16 %v1151_v5, %v1151_v5  ;;  %v13435_v30 = vpack.c.b16 %v1152_v11, %v1152_v11 }
  0x76   :  { %v10010_v3 = vld [vmem:[#allocation2 + $0xee0] sm:$0xf]  ;;  %v12710_v9 = vld [vmem:[#allocation2 + $0xfec] sm:$0xf0]  ;;  %v9883_v15 = vor.u32 %v12646_v2, %v9882_v0  ;;  %6509 = vmatpush.bf16.msra.mxu3 %v9515_v12 }
  0x77   :  { %v10138_v8 = vld [vmem:[#allocation2 + $0xfe0] sm:$0xf]  ;;  %v10011_v16 = vor.u32 %v12678_v4, %v10010_v3  ;;  %v12610_v21 = vld [vmem:[#allocation2 + $0xccc] sm:$0xf0]  ;;  %6515 = vmatpush.bf16.msrb.mxu0 %v9755_v13  ;;  %6497 = vmatmul.bf16.vlgmr.msra.gmra.mxu2 %v13433_v29 }
  0x78   :  { %v9738_v17 = vld [vmem:[#allocation2 + $0xcc0] sm:$0xf]  ;;  %v10139_v24 = vor.u32 %v12710_v9, %v10138_v8  ;;  %v12642_v26 = vld [vmem:[#allocation2 + $0xdcc] sm:$0xf0]  ;;  %6528 = vmatpush.bf16.msrb.mxu1 %v9883_v15  ;;  %6471 = vmatmul.bf16.vlgmr.msra.gmra.mxu0 %v13431_v25 }
  0x79   :  { %v9866_v23 = vld [vmem:[#allocation2 + $0xdc0] sm:$0xf]  ;;  %v12674_v28 = vld [vmem:[#allocation2 + $0xecc] sm:$0xf0]  ;;  %v9739_v34 = vor.u32 %v12610_v21, %v9738_v17  ;;  %6541 = vmatpush.bf16.msrb.mxu2 %v10011_v16  ;;  %6484 = vmatmul.bf16.vlgmr.msra.gmra.mxu1 %v13435_v30 }
  0x7a   :  { %v9994_v27 = vld [vmem:[#allocation2 + $0xec0] sm:$0xf]  ;;  %v12706_v32 = vld [vmem:[#allocation2 + $0xfcc] sm:$0xf0]  ;;  %v9867_v35 = vor.u32 %v12642_v26, %v9866_v23  ;;  %6554 = vmatpush.bf16.msrb.mxu3 %v10139_v24 }
  0x7b   :  { %v10122_v31 = vld [vmem:[#allocation2 + $0xfc0] sm:$0xf]  ;;  %v9995_v36 = vor.u32 %v12674_v28, %v9994_v27  ;;  %v12606_v39 = vld [vmem:[#allocation2 + $0xcac] sm:$0xf0]  ;;  %6510 = vmatmul.bf16.vlgmr.msra.gmra.mxu3 %v13437_v33  ;;  %6516 = vmatpush.bf16.msrb.mxu0 %v9739_v34 }
  0x7c   :  { %v9722_v37 = vld [vmem:[#allocation2 + $0xca0] sm:$0xf]  ;;  %v10123_v43 = vor.u32 %v12706_v32, %v10122_v31  ;;  %v12638_v45 = vld [vmem:[#allocation2 + $0xdac] sm:$0xf0]  ;;  %6529 = vmatpush.bf16.msrb.mxu1 %v9867_v35 }
  0x7d   :  { %v9850_v40 = vld [vmem:[#allocation2 + $0xda0] sm:$0xf]  ;;  %v12670_v47 = vld [vmem:[#allocation2 + $0xeac] sm:$0xf0]  ;;  %v9723_v50 = vor.u32 %v12606_v39, %v9722_v37  ;;  %6542 = vmatpush.bf16.msrb.mxu2 %v9995_v36 }
  0x7e   :  { %v9978_v46 = vld [vmem:[#allocation2 + $0xea0] sm:$0xf]  ;;  %v12702_v49 = vld [vmem:[#allocation2 + $0xfac] sm:$0xf0]  ;;  %v9851_v51 = vor.u32 %v12638_v45, %v9850_v40  ;;  %6555 = vmatpush.bf16.msrb.mxu3 %v10123_v43 }
  0x7f   :  { %v10106_v48 = vld [vmem:[#allocation2 + $0xfa0] sm:$0xf]  ;;  %v9979_v52 = vor.u32 %v12670_v47, %v9978_v46  ;;  %v12602_v54 = vld [vmem:[#allocation2 + $0xc8c] sm:$0xf0]  ;;  %6517 = vmatpush.bf16.msrb.mxu0 %v9723_v50 }
  0x80   :  { %v9706_v53 = vld [vmem:[#allocation2 + $0xc80] sm:$0xf]  ;;  %v10107_v56 = vor.u32 %v12702_v49, %v10106_v48  ;;  %v12634_v57 = vld [vmem:[#allocation2 + $0xd8c] sm:$0xf0]  ;;  %6530 = vmatpush.bf16.msrb.mxu1 %v9851_v51 }
  0x81   :  { %v9834_v55 = vld [vmem:[#allocation2 + $0xd80] sm:$0xf]  ;;  %v12666_v59 = vld [vmem:[#allocation2 + $0xe8c] sm:$0xf0]  ;;  %v9707_v62 = vor.u32 %v12602_v54, %v9706_v53  ;;  %6543 = vmatpush.bf16.msrb.mxu2 %v9979_v52 }
  0x82   :  { %v9962_v58 = vld [vmem:[#allocation2 + $0xe80] sm:$0xf]  ;;  %v12698_v61 = vld [vmem:[#allocation2 + $0xf8c] sm:$0xf0]  ;;  %v9835_v63 = vor.u32 %v12634_v57, %v9834_v55  ;;  %6556 = vmatpush.bf16.msrb.mxu3 %v10107_v56 }
  0x83   :  { %v10090_v60 = vld [vmem:[#allocation2 + $0xf80] sm:$0xf]  ;;  %v9963_v0 = vor.u32 %v12666_v59, %v9962_v58  ;;  %v12598_v2 = vld [vmem:[#allocation2 + $0xc6c] sm:$0xf0]  ;;  %6518 = vmatpush.bf16.msrb.mxu0 %v9707_v62  ;;  %v84_v59 = vld [vmem:[%s13722_s0 + $0x38] sm:$0xff] }
  0x84   :  { %v9690_v1 = vld [vmem:[#allocation2 + $0xc60] sm:$0xf]  ;;  %v10091_v4 = vor.u32 %v12698_v61, %v10090_v60  ;;  %v12630_v5 = vld [vmem:[#allocation2 + $0xd6c] sm:$0xf0]  ;;  %6531 = vmatpush.bf16.msrb.mxu1 %v9835_v63 }
  0x85   :  { %v9818_v3 = vld [vmem:[#allocation2 + $0xd60] sm:$0xf]  ;;  %v12662_v7 = vld [vmem:[#allocation2 + $0xe6c] sm:$0xf0]  ;;  %v9691_v10 = vor.u32 %v12598_v2, %v9690_v1  ;;  %6544 = vmatpush.bf16.msrb.mxu2 %v9963_v0 }
  0x86   :  { %v9946_v6 = vld [vmem:[#allocation2 + $0xe60] sm:$0xf]  ;;  %v12694_v9 = vld [vmem:[#allocation2 + $0xf6c] sm:$0xf0]  ;;  %v9819_v11 = vor.u32 %v12630_v5, %v9818_v3  ;;  %6557 = vmatpush.bf16.msrb.mxu3 %v10091_v4 }
  0x87   :  { %v10074_v8 = vld [vmem:[#allocation2 + $0xf60] sm:$0xf]  ;;  %v9947_v12 = vor.u32 %v12662_v7, %v9946_v6  ;;  %v12594_v14 = vld [vmem:[#allocation2 + $0xc4c] sm:$0xf0]  ;;  %6519 = vmatpush.bf16.msrb.mxu0 %v9691_v10 }
  0x88   :  { %v9674_v13 = vld [vmem:[#allocation2 + $0xc40] sm:$0xf]  ;;  %v10075_v16 = vor.u32 %v12694_v9, %v10074_v8  ;;  %v12626_v17 = vld [vmem:[#allocation2 + $0xd4c] sm:$0xf0]  ;;  %6532 = vmatpush.bf16.msrb.mxu1 %v9819_v11  ;;  %v1157_v8 = vunpack.c.l.b16 %v84_v59 }
  0x89   :  { %v9802_v15 = vld [vmem:[#allocation2 + $0xd40] sm:$0xf]  ;;  %v12658_v23 = vld [vmem:[#allocation2 + $0xe4c] sm:$0xf0]  ;;  %v9675_v27 = vor.u32 %v12594_v14, %v9674_v13  ;;  %6545 = vmatpush.bf16.msrb.mxu2 %v9947_v12  ;;  %v1158_v12 = vunpack.c.h.b16 %v84_v59 }
  0x8a   :  { %v9930_v21 = vld [vmem:[#allocation2 + $0xe40] sm:$0xf]  ;;  %v12690_v26 = vld [vmem:[#allocation2 + $0xf4c] sm:$0xf0]  ;;  %v9803_v28 = vor.u32 %v12626_v17, %v9802_v15  ;;  %6558 = vmatpush.bf16.msrb.mxu3 %v10075_v16 }
  0x8b   :  { %v10058_v24 = vld [vmem:[#allocation2 + $0xf40] sm:$0xf]  ;;  %v9931_v31 = vor.u32 %v12658_v23, %v9930_v21  ;;  %v12590_v34 = vld [vmem:[#allocation2 + $0xc2c] sm:$0xf0]  ;;  %6520 = vmatpush.bf16.msrb.mxu0 %v9675_v27 }
  0x8c   :  { %v9658_v32 = vld [vmem:[#allocation2 + $0xc20] sm:$0xf]  ;;  %v10059_v36 = vor.u32 %v12690_v26, %v10058_v24  ;;  %v12622_v37 = vld [vmem:[#allocation2 + $0xd2c] sm:$0xf0]  ;;  %6533 = vmatpush.bf16.msrb.mxu1 %v9803_v28  ;;  %v13451_v28 = vpack.c.b16 %v1157_v8, %v1157_v8 }
  0x8d   :  { %v9786_v35 = vld [vmem:[#allocation2 + $0xd20] sm:$0xf]  ;;  %v12654_v40 = vld [vmem:[#allocation2 + $0xe2c] sm:$0xf0]  ;;  %v9659_v47 = vor.u32 %v12590_v34, %v9658_v32  ;;  %6546 = vmatpush.bf16.msrb.mxu2 %v9931_v31 }
  0x8e   :  { %v9914_v39 = vld [vmem:[#allocation2 + $0xe20] sm:$0xf]  ;;  %v12686_v45 = vld [vmem:[#allocation2 + $0xf2c] sm:$0xf0]  ;;  %v9787_v51 = vor.u32 %v12622_v37, %v9786_v35  ;;  %6559 = vmatpush.bf16.msrb.mxu3 %v10059_v36  ;;  %v13455_v35 = vpack.c.b16 %v1158_v12, %v1158_v12 }
  0x8f   :  { %v10042_v43 = vld [vmem:[#allocation2 + $0xf20] sm:$0xf]  ;;  %v12586_v48 = vld [vmem:[#allocation2 + $0xc0c] sm:$0xf0]  ;;  %v9915_v52 = vor.u32 %v12654_v40, %v9914_v39  ;;  %6521 = vmatpush.bf16.msrb.mxu0 %v9659_v47 }
  0x90   :  { %v9642_v46 = vld [vmem:[#allocation2 + $0xc00] sm:$0xf]  ;;  %v12618_v50 = vld [vmem:[#allocation2 + $0xd0c] sm:$0xf0]  ;;  %v10043_v56 = vor.u32 %v12686_v45, %v10042_v43  ;;  %6534 = vmatpush.bf16.msrb.mxu1 %v9787_v51 }
  0x91   :  { %v9770_v49 = vld [vmem:[#allocation2 + $0xd00] sm:$0xf]  ;;  %v12650_v54 = vld [vmem:[#allocation2 + $0xe0c] sm:$0xf0]  ;;  %v9643_v63 = vor.u32 %v12586_v48, %v9642_v46  ;;  %6547 = vmatpush.bf16.msrb.mxu2 %v9915_v52 }
  0x92   :  { %v9898_v53 = vld [vmem:[#allocation2 + $0xe00] sm:$0xf]  ;;  %v83_v55 = vld [vmem:[%s13722_s0 + $0x30] sm:$0xff]  ;;  %v9771_v4 = vor.u32 %v12618_v50, %v9770_v49  ;;  %6560 = vmatpush.bf16.msrb.mxu3 %v10043_v56 }
  0x93   :  { %v10026_v57 = vld [vmem:[#allocation2 + $0xf00] sm:$0xf]  ;;  %v12682_v58 = vld [vmem:[#allocation2 + $0xf0c] sm:$0xf0]  ;;  %v1155_v3 = vunpack.c.l.b16 %v83_v55  ;;  %v9899_v5 = vor.u32 %v12650_v54, %v9898_v53  ;;  %v1156_v9 = vunpack.c.h.b16 %v83_v55  ;;  %6522 = vmatpush.bf16.msrb.mxu0 %v9643_v63 }
  0x94   :  { %v10266_v60 = vld [vmem:[#allocation2 + $0x10e0] sm:$0xf]  ;;  %v12742_v61 = vld [vmem:[#allocation2 + $0x10ec] sm:$0xf0]  ;;  %v10027_v10 = vor.u32 %v12682_v58, %v10026_v57  ;;  %6535 = vmatpush.bf16.msrb.mxu1 %v9771_v4 }
  0x95   :  { %v10394_v62 = vld [vmem:[#allocation2 + $0x11e0] sm:$0xf]  ;;  %v12774_v0 = vld [vmem:[#allocation2 + $0x11ec] sm:$0xf0]  ;;  %v10267_v11 = vor.u32 %v12742_v61, %v10266_v60  ;;  %v13449_v23 = vpack.c.b16 %v1155_v3, %v1155_v3  ;;  %6548 = vmatpush.bf16.msrb.mxu2 %v9899_v5  ;;  %v13453_v31 = vpack.c.b16 %v1156_v9, %v1156_v9 }
  0x96   :  { %v10522_v1 = vld [vmem:[#allocation2 + $0x12e0] sm:$0xf]  ;;  %v12806_v2 = vld [vmem:[#allocation2 + $0x12ec] sm:$0xf0]  ;;  %v10395_v13 = vor.u32 %v12774_v0, %v10394_v62  ;;  %6561 = vmatpush.bf16.msrb.mxu3 %v10027_v10 }
  0x97   :  { %v10650_v6 = vld [vmem:[#allocation2 + $0x13e0] sm:$0xf]  ;;  %v12838_v7 = vld [vmem:[#allocation2 + $0x13ec] sm:$0xf0]  ;;  %v10523_v14 = vor.u32 %v12806_v2, %v10522_v1  ;;  %6567 = vmatpush.bf16.msra.mxu0 %v10267_v11  ;;  %6536 = vmatmul.bf16.vlgmr.msrb.gmra.mxu1 %v13453_v31 }
  0x98   :  { %v10250_v15 = vld [vmem:[#allocation2 + $0x10c0] sm:$0xf]  ;;  %v12738_v16 = vld [vmem:[#allocation2 + $0x10cc] sm:$0xf0]  ;;  %v10651_v21 = vor.u32 %v12838_v7, %v10650_v6  ;;  %6580 = vmatpush.bf16.msra.mxu1 %v10395_v13  ;;  %6523 = vmatmul.bf16.vlgmr.msrb.gmra.mxu0 %v13449_v23 }
  0x99   :  { %v10378_v17 = vld [vmem:[#allocation2 + $0x11c0] sm:$0xf]  ;;  %v12770_v24 = vld [vmem:[#allocation2 + $0x11cc] sm:$0xf0]  ;;  %v10251_v36 = vor.u32 %v12738_v16, %v10250_v15  ;;  %6593 = vmatpush.bf16.msra.mxu2 %v10523_v14  ;;  %6562 = vmatmul.bf16.vlgmr.msrb.gmra.mxu3 %v13455_v35 }
  0x9a   :  { %v10506_v26 = vld [vmem:[#allocation2 + $0x12c0] sm:$0xf]  ;;  %v12802_v27 = vld [vmem:[#allocation2 + $0x12cc] sm:$0xf0]  ;;  %v10379_v37 = vor.u32 %v12770_v24, %v10378_v17  ;;  %6606 = vmatpush.bf16.msra.mxu3 %v10651_v21  ;;  %6549 = vmatmul.bf16.vlgmr.msrb.gmra.mxu2 %v13451_v28 }
  0x9b   :  { %v10634_v32 = vld [vmem:[#allocation2 + $0x13c0] sm:$0xf]  ;;  %v12834_v34 = vld [vmem:[#allocation2 + $0x13cc] sm:$0xf0]  ;;  %v10507_v39 = vor.u32 %v12802_v27, %v10506_v26  ;;  %6568 = vmatpush.bf16.msra.mxu0 %v10251_v36 }
  0x9c   :  { %v10234_v40 = vld [vmem:[#allocation2 + $0x10a0] sm:$0xf]  ;;  %v12734_v43 = vld [vmem:[#allocation2 + $0x10ac] sm:$0xf0]  ;;  %v10635_v46 = vor.u32 %v12834_v34, %v10634_v32  ;;  %6581 = vmatpush.bf16.msra.mxu1 %v10379_v37 }
  0x9d   :  { %v10362_v45 = vld [vmem:[#allocation2 + $0x11a0] sm:$0xf]  ;;  %v12766_v47 = vld [vmem:[#allocation2 + $0x11ac] sm:$0xf0]  ;;  %v10235_v52 = vor.u32 %v12734_v43, %v10234_v40  ;;  %6594 = vmatpush.bf16.msra.mxu2 %v10507_v39 }
  0x9e   :  { %v10490_v48 = vld [vmem:[#allocation2 + $0x12a0] sm:$0xf]  ;;  %v12798_v49 = vld [vmem:[#allocation2 + $0x12ac] sm:$0xf0]  ;;  %v10363_v53 = vor.u32 %v12766_v47, %v10362_v45  ;;  %6607 = vmatpush.bf16.msra.mxu3 %v10635_v46 }
  0x9f   :  { %v10618_v50 = vld [vmem:[#allocation2 + $0x13a0] sm:$0xf]  ;;  %v12830_v51 = vld [vmem:[#allocation2 + $0x13ac] sm:$0xf0]  ;;  %v10491_v54 = vor.u32 %v12798_v49, %v10490_v48  ;;  %6569 = vmatpush.bf16.msra.mxu0 %v10235_v52 }
  0xa0   :  { %v10218_v55 = vld [vmem:[#allocation2 + $0x1080] sm:$0xf]  ;;  %v12730_v56 = vld [vmem:[#allocation2 + $0x108c] sm:$0xf0]  ;;  %v10619_v58 = vor.u32 %v12830_v51, %v10618_v50  ;;  %6582 = vmatpush.bf16.msra.mxu1 %v10363_v53 }
  0xa1   :  { %v10346_v57 = vld [vmem:[#allocation2 + $0x1180] sm:$0xf]  ;;  %v12762_v59 = vld [vmem:[#allocation2 + $0x118c] sm:$0xf0]  ;;  %v10219_v0 = vor.u32 %v12730_v56, %v10218_v55  ;;  %6595 = vmatpush.bf16.msra.mxu2 %v10491_v54 }
  0xa2   :  { %v10474_v60 = vld [vmem:[#allocation2 + $0x1280] sm:$0xf]  ;;  %v12794_v61 = vld [vmem:[#allocation2 + $0x128c] sm:$0xf0]  ;;  %v10347_v1 = vor.u32 %v12762_v59, %v10346_v57  ;;  %6608 = vmatpush.bf16.msra.mxu3 %v10619_v58 }
  0xa3   :  { %v10602_v62 = vld [vmem:[#allocation2 + $0x1380] sm:$0xf]  ;;  %v12826_v63 = vld [vmem:[#allocation2 + $0x138c] sm:$0xf0]  ;;  %v10475_v2 = vor.u32 %v12794_v61, %v10474_v60  ;;  %6570 = vmatpush.bf16.msra.mxu0 %v10219_v0 }
  0xa4   :  { %v10202_v3 = vld [vmem:[#allocation2 + $0x1060] sm:$0xf]  ;;  %v12726_v4 = vld [vmem:[#allocation2 + $0x106c] sm:$0xf0]  ;;  %v10603_v6 = vor.u32 %v12826_v63, %v10602_v62  ;;  %6583 = vmatpush.bf16.msra.mxu1 %v10347_v1  ;;  %v86_v1 = vld [vmem:[%s13722_s0 + $0x48] sm:$0xff] }
  0xa5   :  { %v10330_v5 = vld [vmem:[#allocation2 + $0x1160] sm:$0xf]  ;;  %v12758_v7 = vld [vmem:[#allocation2 + $0x116c] sm:$0xf0]  ;;  %v10203_v12 = vor.u32 %v12726_v4, %v10202_v3  ;;  %6596 = vmatpush.bf16.msra.mxu2 %v10475_v2 }
  0xa6   :  { %v10458_v8 = vld [vmem:[#allocation2 + $0x1260] sm:$0xf]  ;;  %v12790_v9 = vld [vmem:[#allocation2 + $0x126c] sm:$0xf0]  ;;  %v10331_v13 = vor.u32 %v12758_v7, %v10330_v5  ;;  %6609 = vmatpush.bf16.msra.mxu3 %v10603_v6 }
  0xa7   :  { %v10586_v10 = vld [vmem:[#allocation2 + $0x1360] sm:$0xf]  ;;  %v12822_v11 = vld [vmem:[#allocation2 + $0x136c] sm:$0xf0]  ;;  %v10459_v14 = vor.u32 %v12790_v9, %v10458_v8  ;;  %6571 = vmatpush.bf16.msra.mxu0 %v10203_v12 }
  0xa8   :  { %v10186_v15 = vld [vmem:[#allocation2 + $0x1040] sm:$0xf]  ;;  %v12722_v16 = vld [vmem:[#allocation2 + $0x104c] sm:$0xf0]  ;;  %v10587_v21 = vor.u32 %v12822_v11, %v10586_v10  ;;  %6584 = vmatpush.bf16.msra.mxu1 %v10331_v13 }
  0xa9   :  { %v10314_v17 = vld [vmem:[#allocation2 + $0x1140] sm:$0xf]  ;;  %v12754_v24 = vld [vmem:[#allocation2 + $0x114c] sm:$0xf0]  ;;  %v10187_v36 = vor.u32 %v12722_v16, %v10186_v15  ;;  %6597 = vmatpush.bf16.msra.mxu2 %v10459_v14  ;;  %v1161_v14 = vunpack.c.l.b16 %v86_v1 }
  0xaa   :  { %v10442_v26 = vld [vmem:[#allocation2 + $0x1240] sm:$0xf]  ;;  %v12786_v27 = vld [vmem:[#allocation2 + $0x124c] sm:$0xf0]  ;;  %v10315_v37 = vor.u32 %v12754_v24, %v10314_v17  ;;  %6610 = vmatpush.bf16.msra.mxu3 %v10587_v21  ;;  %v1162_v21 = vunpack.c.h.b16 %v86_v1 }
  0xab   :  { %v10570_v32 = vld [vmem:[#allocation2 + $0x1340] sm:$0xf]  ;;  %v12818_v34 = vld [vmem:[#allocation2 + $0x134c] sm:$0xf0]  ;;  %v10443_v39 = vor.u32 %v12786_v27, %v10442_v26  ;;  %6572 = vmatpush.bf16.msra.mxu0 %v10187_v36 }
  0xac   :  { %v10170_v40 = vld [vmem:[#allocation2 + $0x1020] sm:$0xf]  ;;  %v12718_v43 = vld [vmem:[#allocation2 + $0x102c] sm:$0xf0]  ;;  %v10571_v46 = vor.u32 %v12818_v34, %v10570_v32  ;;  %6585 = vmatpush.bf16.msra.mxu1 %v10315_v37 }
  0xad   :  { %v10298_v45 = vld [vmem:[#allocation2 + $0x1120] sm:$0xf]  ;;  %v12750_v47 = vld [vmem:[#allocation2 + $0x112c] sm:$0xf0]  ;;  %v10171_v53 = vor.u32 %v12718_v43, %v10170_v40  ;;  %6598 = vmatpush.bf16.msra.mxu2 %v10443_v39 }
  0xae   :  { %v10426_v48 = vld [vmem:[#allocation2 + $0x1220] sm:$0xf]  ;;  %v12782_v49 = vld [vmem:[#allocation2 + $0x122c] sm:$0xf0]  ;;  %v10299_v57 = vor.u32 %v12750_v47, %v10298_v45  ;;  %6611 = vmatpush.bf16.msra.mxu3 %v10571_v46  ;;  %v13469_v45 = vpack.c.b16 %v1161_v14, %v1161_v14 }
  0xaf   :  { %v10554_v50 = vld [vmem:[#allocation2 + $0x1320] sm:$0xf]  ;;  %v12814_v51 = vld [vmem:[#allocation2 + $0x132c] sm:$0xf0]  ;;  %v10427_v58 = vor.u32 %v12782_v49, %v10426_v48  ;;  %6573 = vmatpush.bf16.msra.mxu0 %v10171_v53  ;;  %v13473_v49 = vpack.c.b16 %v1162_v21, %v1162_v21 }
  0xb0   :  { %v10154_v52 = vld [vmem:[#allocation2 + $0x1000] sm:$0xf]  ;;  %v12714_v54 = vld [vmem:[#allocation2 + $0x100c] sm:$0xf0]  ;;  %v10555_v62 = vor.u32 %v12814_v51, %v10554_v50  ;;  %6586 = vmatpush.bf16.msra.mxu1 %v10299_v57 }
  0xb1   :  { %v10282_v55 = vld [vmem:[#allocation2 + $0x1100] sm:$0xf]  ;;  %v12746_v56 = vld [vmem:[#allocation2 + $0x110c] sm:$0xf0]  ;;  %v10155_v5 = vor.u32 %v12714_v54, %v10154_v52  ;;  %6599 = vmatpush.bf16.msra.mxu2 %v10427_v58 }
  0xb2   :  { %v10410_v59 = vld [vmem:[#allocation2 + $0x1200] sm:$0xf]  ;;  %v12778_v60 = vld [vmem:[#allocation2 + $0x120c] sm:$0xf0]  ;;  %v10283_v10 = vor.u32 %v12746_v56, %v10282_v55  ;;  %6612 = vmatpush.bf16.msra.mxu3 %v10555_v62 }
  0xb3   :  { %v85_v61 = vld [vmem:[%s13722_s0 + $0x40] sm:$0xff]  ;;  %v12810_v0 = vld [vmem:[#allocation2 + $0x130c] sm:$0xf0]  ;;  %v10411_v11 = vor.u32 %v12778_v60, %v10410_v59  ;;  %6574 = vmatpush.bf16.msra.mxu0 %v10155_v5 }
  0xb4   :  { %v10538_v63 = vld [vmem:[#allocation2 + $0x1300] sm:$0xf]  ;;  %v12870_v3 = vld [vmem:[#allocation2 + $0x14ec] sm:$0xf0]  ;;  %v1159_v9 = vunpack.c.l.b16 %v85_v61  ;;  %v1160_v15 = vunpack.c.h.b16 %v85_v61  ;;  %6587 = vmatpush.bf16.msra.mxu1 %v10283_v10 }
  0xb5   :  { %v10778_v2 = vld [vmem:[#allocation2 + $0x14e0] sm:$0xf]  ;;  %v12902_v6 = vld [vmem:[#allocation2 + $0x15ec] sm:$0xf0]  ;;  %v10539_v16 = vor.u32 %v12810_v0, %v10538_v63  ;;  %6600 = vmatpush.bf16.msra.mxu2 %v10411_v11 }
  0xb6   :  { %v10906_v4 = vld [vmem:[#allocation2 + $0x15e0] sm:$0xf]  ;;  %v12934_v8 = vld [vmem:[#allocation2 + $0x16ec] sm:$0xf0]  ;;  %v10779_v17 = vor.u32 %v12870_v3, %v10778_v2  ;;  %v13467_v37 = vpack.c.b16 %v1159_v9, %v1159_v9  ;;  %v13471_v46 = vpack.c.b16 %v1160_v15, %v1160_v15 }
  0xb7   :  { %v11034_v7 = vld [vmem:[#allocation2 + $0x16e0] sm:$0xf]  ;;  %v12966_v13 = vld [vmem:[#allocation2 + $0x17ec] sm:$0xf0]  ;;  %v10907_v24 = vor.u32 %v12902_v6, %v10906_v4  ;;  %6613 = vmatpush.bf16.msra.mxu3 %v10539_v16 }
  0xb8   :  { %v11162_v12 = vld [vmem:[#allocation2 + $0x17e0] sm:$0xf]  ;;  %v11035_v26 = vor.u32 %v12934_v8, %v11034_v7  ;;  %v12866_v32 = vld [vmem:[#allocation2 + $0x14cc] sm:$0xf0]  ;;  %6619 = vmatpush.bf16.msrb.mxu0 %v10779_v17  ;;  %6601 = vmatmul.bf16.vlgmr.msra.gmra.mxu2 %v13469_v45 }
  0xb9   :  { %v10762_v27 = vld [vmem:[#allocation2 + $0x14c0] sm:$0xf]  ;;  %v11163_v36 = vor.u32 %v12966_v13, %v11162_v12  ;;  %v12898_v39 = vld [vmem:[#allocation2 + $0x15cc] sm:$0xf0]  ;;  %6632 = vmatpush.bf16.msrb.mxu1 %v10907_v24  ;;  %6575 = vmatmul.bf16.vlgmr.msra.gmra.mxu0 %v13467_v37 }
  0xba   :  { %v10890_v34 = vld [vmem:[#allocation2 + $0x15c0] sm:$0xf]  ;;  %v12930_v43 = vld [vmem:[#allocation2 + $0x16cc] sm:$0xf0]  ;;  %v10763_v50 = vor.u32 %v12866_v32, %v10762_v27  ;;  %6645 = vmatpush.bf16.msrb.mxu2 %v11035_v26  ;;  %6588 = vmatmul.bf16.vlgmr.msra.gmra.mxu1 %v13471_v46 }
  0xbb   :  { %v11018_v40 = vld [vmem:[#allocation2 + $0x16c0] sm:$0xf]  ;;  %v12962_v48 = vld [vmem:[#allocation2 + $0x17cc] sm:$0xf0]  ;;  %v10891_v51 = vor.u32 %v12898_v39, %v10890_v34  ;;  %6658 = vmatpush.bf16.msrb.mxu3 %v11163_v36 }
  0xbc   :  { %v11146_v47 = vld [vmem:[#allocation2 + $0x17c0] sm:$0xf]  ;;  %v11019_v52 = vor.u32 %v12930_v43, %v11018_v40  ;;  %v12862_v54 = vld [vmem:[#allocation2 + $0x14ac] sm:$0xf0]  ;;  %6614 = vmatmul.bf16.vlgmr.msra.gmra.mxu3 %v13473_v49  ;;  %6620 = vmatpush.bf16.msrb.mxu0 %v10763_v50 }
  0xbd   :  { %v10746_v53 = vld [vmem:[#allocation2 + $0x14a0] sm:$0xf]  ;;  %v11147_v56 = vor.u32 %v12962_v48, %v11146_v47  ;;  %v12894_v57 = vld [vmem:[#allocation2 + $0x15ac] sm:$0xf0]  ;;  %6633 = vmatpush.bf16.msrb.mxu1 %v10891_v51 }
  0xbe   :  { %v10874_v55 = vld [vmem:[#allocation2 + $0x15a0] sm:$0xf]  ;;  %v12926_v59 = vld [vmem:[#allocation2 + $0x16ac] sm:$0xf0]  ;;  %v10747_v62 = vor.u32 %v12862_v54, %v10746_v53  ;;  %6646 = vmatpush.bf16.msrb.mxu2 %v11019_v52 }
  0xbf   :  { %v11002_v58 = vld [vmem:[#allocation2 + $0x16a0] sm:$0xf]  ;;  %v12958_v61 = vld [vmem:[#allocation2 + $0x17ac] sm:$0xf0]  ;;  %v10875_v63 = vor.u32 %v12894_v57, %v10874_v55  ;;  %6659 = vmatpush.bf16.msrb.mxu3 %v11147_v56 }
  0xc0   :  { %v11130_v60 = vld [vmem:[#allocation2 + $0x17a0] sm:$0xf]  ;;  %v11003_v0 = vor.u32 %v12926_v59, %v11002_v58  ;;  %v12858_v2 = vld [vmem:[#allocation2 + $0x148c] sm:$0xf0]  ;;  %6621 = vmatpush.bf16.msrb.mxu0 %v10747_v62  ;;  %v6368_v57 = vpop.f32.mrf.mxu0 }
  0xc1   :  { %v10730_v1 = vld [vmem:[#allocation2 + $0x1480] sm:$0xf]  ;;  %v11131_v4 = vor.u32 %v12958_v61, %v11130_v60  ;;  %v12890_v5 = vld [vmem:[#allocation2 + $0x158c] sm:$0xf0]  ;;  %6634 = vmatpush.bf16.msrb.mxu1 %v10875_v63 }
  0xc2   :  { %v10858_v3 = vld [vmem:[#allocation2 + $0x1580] sm:$0xf]  ;;  %v12922_v7 = vld [vmem:[#allocation2 + $0x168c] sm:$0xf0]  ;;  %v10731_v10 = vor.u32 %v12858_v2, %v10730_v1  ;;  %6647 = vmatpush.bf16.msrb.mxu2 %v11003_v0  ;;  %v6381_v0 = vpop.f32.mrf.mxu1 }
  0xc3   :  { %v10986_v6 = vld [vmem:[#allocation2 + $0x1680] sm:$0xf]  ;;  %v12954_v9 = vld [vmem:[#allocation2 + $0x178c] sm:$0xf0]  ;;  %v10859_v12 = vor.u32 %v12890_v5, %v10858_v3  ;;  %6660 = vmatpush.bf16.msrb.mxu3 %v11131_v4 }
  0xc4   :  { %v11114_v8 = vld [vmem:[#allocation2 + $0x1780] sm:$0xf]  ;;  %v10987_v13 = vor.u32 %v12922_v7, %v10986_v6  ;;  %v12854_v14 = vld [vmem:[#allocation2 + $0x146c] sm:$0xf0]  ;;  %6622 = vmatpush.bf16.msrb.mxu0 %v10731_v10 }
  0xc5   :  { %v10714_v11 = vld [vmem:[#allocation2 + $0x1460] sm:$0xf]  ;;  %v12886_v16 = vld [vmem:[#allocation2 + $0x156c] sm:$0xf0]  ;;  %v11115_v17 = vor.u32 %v12954_v9, %v11114_v8  ;;  %6635 = vmatpush.bf16.msrb.mxu1 %v10859_v12 }
  0xc6   :  { %v10842_v15 = vld [vmem:[#allocation2 + $0x1560] sm:$0xf]  ;;  %v12918_v24 = vld [vmem:[#allocation2 + $0x166c] sm:$0xf0]  ;;  %v10715_v34 = vor.u32 %v12854_v14, %v10714_v11  ;;  %6648 = vmatpush.bf16.msrb.mxu2 %v10987_v13 }
  0xc7   :  { %v10970_v21 = vld [vmem:[#allocation2 + $0x1660] sm:$0xf]  ;;  %v12950_v32 = vld [vmem:[#allocation2 + $0x176c] sm:$0xf0]  ;;  %v10843_v39 = vor.u32 %v12886_v16, %v10842_v15  ;;  %6661 = vmatpush.bf16.msrb.mxu3 %v11115_v17 }
  0xc8   :  { %v1117_v26 = vld [vmem:[#allocation4] sm:$0xf]  ;;  %v10971_v40 = vor.u32 %v12918_v24, %v10970_v21  ;;  %v12850_v43 = vld [vmem:[#allocation2 + $0x144c] sm:$0xf0]  ;;  %6623 = vmatpush.bf16.msrb.mxu0 %v10715_v34  ;;  %v6394_v21 = vpop.f32.mrf.mxu2 }
  0xc9   :  { %v11098_v27 = vld [vmem:[#allocation2 + $0x1760] sm:$0xf]  ;;  %v1119_v48 = vperm.slane %v1117_v26, 0  ;;  %v12882_v51 = vld [vmem:[#allocation2 + $0x154c] sm:$0xf0]  ;;  %6636 = vmatpush.bf16.msrb.mxu1 %v10843_v39 }
  0xca   :  { %v10698_v36 = vld [vmem:[#allocation2 + $0x1440] sm:$0xf]  ;;  %v11099_v50 = vor.u32 %v12950_v32, %v11098_v27  ;;  %v12914_v53 = vld [vmem:[#allocation2 + $0x164c] sm:$0xf0]  ;;  %6649 = vmatpush.bf16.msrb.mxu2 %v10971_v40  ;;  %v88_v32 = vld [vmem:[%s13722_s0 + $0x58] sm:$0xff] }
  0xcb   :  { %v10826_v47 = vld [vmem:[#allocation2 + $0x1540] sm:$0xf]  ;;  %v12946_v55 = vld [vmem:[#allocation2 + $0x174c] sm:$0xf0]  ;;  %v10699_v56 = vor.u32 %v12850_v43, %v10698_v36  ;;  %v6369_v63 = vadd.f32 %v6368_v57, %v1119_v48  ;;  %v6407_v36 = vpop.f32.mrf.mxu3 }
  0xcc   :  { %v10954_v52 = vld [vmem:[#allocation2 + $0x1640] sm:$0xf]  ;;  %v10827_v58 = vor.u32 %v12882_v51, %v10826_v47  ;;  %v12846_v61 = vld [vmem:[#allocation2 + $0x142c] sm:$0xf0]  ;;  %6662 = vmatpush.bf16.msrb.mxu3 %v11099_v50 }
  0xcd   :  { %v11082_v54 = vld [vmem:[#allocation2 + $0x1740] sm:$0xf]  ;;  %v10955_v59 = vor.u32 %v12914_v53, %v10954_v52  ;;  %v12878_v2 = vld [vmem:[#allocation2 + $0x152c] sm:$0xf0]  ;;  %v6382_v8 = vadd.f32 %v6381_v0, %v6369_v63  ;;  %6624 = vmatpush.bf16.msrb.mxu0 %v10699_v56  ;;  %v1166_v0 = vunpack.c.h.b16 %v88_v32 }
  0xce   :  { %v10682_v60 = vld [vmem:[#allocation2 + $0x1420] sm:$0xf]  ;;  %v11083_v1 = vor.u32 %v12946_v55, %v11082_v54  ;;  %v12910_v4 = vld [vmem:[#allocation2 + $0x162c] sm:$0xf0]  ;;  %6637 = vmatpush.bf16.msrb.mxu1 %v10827_v58  ;;  %v6370_v54 = vpop.f32.mrf.mxu0 }
  0xcf   :  { %v10810_v62 = vld [vmem:[#allocation2 + $0x1520] sm:$0xf]  ;;  %v12942_v6 = vld [vmem:[#allocation2 + $0x172c] sm:$0xf0]  ;;  %v10683_v9 = vor.u32 %v12846_v61, %v10682_v60  ;;  %6650 = vmatpush.bf16.msrb.mxu2 %v10955_v59  ;;  %v6395_v34 = vadd.f32 %v6394_v21, %v6382_v8  ;;  %v1165_v59 = vunpack.c.l.b16 %v88_v32  ;;  %v6383_v61 = vpop.f32.mrf.mxu1 }
  0xd0   :  { %v10938_v3 = vld [vmem:[#allocation2 + $0x1620] sm:$0xf]  ;;  %v12842_v10 = vld [vmem:[#allocation2 + $0x140c] sm:$0xf0]  ;;  %v10811_v13 = vor.u32 %v12878_v2, %v10810_v62  ;;  %6663 = vmatpush.bf16.msrb.mxu3 %v11083_v1 }
  0xd1   :  { %v11066_v5 = vld [vmem:[#allocation2 + $0x1720] sm:$0xf]  ;;  %v12874_v12 = vld [vmem:[#allocation2 + $0x150c] sm:$0xf0]  ;;  %v10939_v14 = vor.u32 %v12910_v4, %v10938_v3  ;;  %6625 = vmatpush.bf16.msrb.mxu0 %v10683_v9  ;;  %v13485_v53 = vadd.f32 %v6407_v36, %v6395_v34 }
  0xd2   :  { %v10666_v7 = vld [vmem:[#allocation2 + $0x1400] sm:$0xf]  ;;  %v12906_v16 = vld [vmem:[#allocation2 + $0x160c] sm:$0xf0]  ;;  %v11067_v24 = vor.u32 %v12942_v6, %v11066_v5  ;;  %6638 = vmatpush.bf16.msrb.mxu1 %v10811_v13 }
  0xd3   :  { %v10794_v11 = vld [vmem:[#allocation2 + $0x1500] sm:$0xf]  ;;  %v87_v17 = vld [vmem:[%s13722_s0 + $0x50] sm:$0xff]  ;;  %v10667_v47 = vor.u32 %v12842_v10, %v10666_v7  ;;  %6651 = vmatpush.bf16.msrb.mxu2 %v10939_v14  ;;  %v6409_v21 = vpop.f32.mrf.mxu3 }
  0xd4   :  { %v10922_v15 = vld [vmem:[#allocation2 + $0x1600] sm:$0xf]  ;;  %v12938_v27 = vld [vmem:[#allocation2 + $0x170c] sm:$0xf0]  ;;  %v1163_v52 = vunpack.c.l.b16 %v87_v17  ;;  %v10795_v55 = vor.u32 %v12874_v12, %v10794_v11  ;;  %v1164_v60 = vunpack.c.h.b16 %v87_v17  ;;  %6664 = vmatpush.bf16.msrb.mxu3 %v11067_v24  ;;  %v13489_v11 = vpack.c.b16 %v1165_v59, %v1165_v59 }
  0xd5   :  { %v11050_v26 = vld [vmem:[#allocation2 + $0x1700] sm:$0xf]  ;;  %v12998_v40 = vld [vmem:[#allocation2 + $0x18ec] sm:$0xf0]  ;;  %v10923_v56 = vor.u32 %v12906_v16, %v10922_v15  ;;  %6626 = vmatpush.bf16.msrb.mxu0 %v10667_v47  ;;  %v6396_v15 = vpop.f32.mrf.mxu2  ;;  %v13493_v16 = vpack.c.b16 %v1166_v0, %v1166_v0 }
  0xd6   :  { %v11290_v39 = vld [vmem:[#allocation2 + $0x18e0] sm:$0xf]  ;;  %v13030_v48 = vld [vmem:[#allocation2 + $0x19ec] sm:$0xf0]  ;;  %v11051_v62 = vor.u32 %v12938_v27, %v11050_v26  ;;  %v13487_v7 = vpack.c.b16 %v1163_v52, %v1163_v52  ;;  %6639 = vmatpush.bf16.msrb.mxu1 %v10795_v55  ;;  %v13491_v12 = vpack.c.b16 %v1164_v60, %v1164_v60  ;;  %v6420_v0 = vpop.f32.mrf.mxu0 }
  0xd7   :  { %v11418_v43 = vld [vmem:[#allocation2 + $0x19e0] sm:$0xf]  ;;  %v13062_v51 = vld [vmem:[#allocation2 + $0x1aec] sm:$0xf0]  ;;  %v11291_v63 = vor.u32 %v12998_v40, %v11290_v39  ;;  %6652 = vmatpush.bf16.msrb.mxu2 %v10923_v56 }
  0xd8   :  { %v11546_v50 = vld [vmem:[#allocation2 + $0x1ae0] sm:$0xf]  ;;  %v13094_v58 = vld [vmem:[#allocation2 + $0x1bec] sm:$0xf0]  ;;  %v11419_v1 = vor.u32 %v13030_v48, %v11418_v43  ;;  %6665 = vmatpush.bf16.msrb.mxu3 %v11051_v62  ;;  %6627 = vmatmul.bf16.vlgmr.msrb.gmra.mxu0 %v13487_v7 }
  0xd9   :  { %v11674_v57 = vld [vmem:[#allocation2 + $0x1be0] sm:$0xf]  ;;  %v11547_v2 = vor.u32 %v13062_v51, %v11546_v50  ;;  %v12994_v4 = vld [vmem:[#allocation2 + $0x18cc] sm:$0xf0]  ;;  %6671 = vmatpush.bf16.msra.mxu0 %v11291_v63  ;;  %6640 = vmatmul.bf16.vlgmr.msrb.gmra.mxu1 %v13491_v12 }
  0xda   :  { %v11274_v3 = vld [vmem:[#allocation2 + $0x18c0] sm:$0xf]  ;;  %v11675_v6 = vor.u32 %v13094_v58, %v11674_v57  ;;  %v13026_v8 = vld [vmem:[#allocation2 + $0x19cc] sm:$0xf0]  ;;  %6684 = vmatpush.bf16.msra.mxu1 %v11419_v1  ;;  %6653 = vmatmul.bf16.vlgmr.msrb.gmra.mxu2 %v13489_v11 }
  0xdb   :  { %v11402_v5 = vld [vmem:[#allocation2 + $0x19c0] sm:$0xf]  ;;  %v13058_v10 = vld [vmem:[#allocation2 + $0x1acc] sm:$0xf0]  ;;  %v11275_v17 = vor.u32 %v12994_v4, %v11274_v3  ;;  %6697 = vmatpush.bf16.msra.mxu2 %v11547_v2  ;;  %6666 = vmatmul.bf16.vlgmr.msrb.gmra.mxu3 %v13493_v16 }
  0xdc   :  { %v11530_v9 = vld [vmem:[#allocation2 + $0x1ac0] sm:$0xf]  ;;  %v13090_v14 = vld [vmem:[#allocation2 + $0x1bcc] sm:$0xf0]  ;;  %v11403_v24 = vor.u32 %v13026_v8, %v11402_v5  ;;  %6710 = vmatpush.bf16.msra.mxu3 %v11675_v6  ;;  %v6421_v6 = vadd.f32 %v6420_v0, %v13485_v53  ;;  %v6433_v8 = vpop.f32.mrf.mxu1 }
  0xdd   :  { %v11658_v13 = vld [vmem:[#allocation2 + $0x1bc0] sm:$0xf]  ;;  %v11531_v26 = vor.u32 %v13058_v10, %v11530_v9  ;;  %v12990_v32 = vld [vmem:[#allocation2 + $0x18ac] sm:$0xf0]  ;;  %6672 = vmatpush.bf16.msra.mxu0 %v11275_v17 }
  0xde   :  { %v11258_v27 = vld [vmem:[#allocation2 + $0x18a0] sm:$0xf]  ;;  %v11659_v36 = vor.u32 %v13090_v14, %v11658_v13  ;;  %v13022_v39 = vld [vmem:[#allocation2 + $0x19ac] sm:$0xf0]  ;;  %6685 = vmatpush.bf16.msra.mxu1 %v11403_v24  ;;  %v6434_v21 = vadd.f32 %v6433_v8, %v6421_v6 }
  0xdf   :  { %v11386_v34 = vld [vmem:[#allocation2 + $0x19a0] sm:$0xf]  ;;  %v13054_v43 = vld [vmem:[#allocation2 + $0x1aac] sm:$0xf0]  ;;  %v11259_v50 = vor.u32 %v12990_v32, %v11258_v27  ;;  %6698 = vmatpush.bf16.msra.mxu2 %v11531_v26 }
  0xe0   :  { %v11514_v40 = vld [vmem:[#allocation2 + $0x1aa0] sm:$0xf]  ;;  %v13086_v48 = vld [vmem:[#allocation2 + $0x1bac] sm:$0xf0]  ;;  %v11387_v51 = vor.u32 %v13022_v39, %v11386_v34  ;;  %6711 = vmatpush.bf16.msra.mxu3 %v11659_v36  ;;  %v6446_v39 = vpop.f32.mrf.mxu2 }
  0xe1   :  { %v11642_v47 = vld [vmem:[#allocation2 + $0x1ba0] sm:$0xf]  ;;  %v11515_v52 = vor.u32 %v13054_v43, %v11514_v40  ;;  %v12986_v55 = vld [vmem:[#allocation2 + $0x188c] sm:$0xf0]  ;;  %6673 = vmatpush.bf16.msra.mxu0 %v11259_v50  ;;  %v6459_v50 = vpop.f32.mrf.mxu3 }
  0xe2   :  { %v11242_v54 = vld [vmem:[#allocation2 + $0x1880] sm:$0xf]  ;;  %v11643_v57 = vor.u32 %v13086_v48, %v11642_v47  ;;  %v13018_v58 = vld [vmem:[#allocation2 + $0x198c] sm:$0xf0]  ;;  %6686 = vmatpush.bf16.msra.mxu1 %v11387_v51  ;;  %v6447_v48 = vadd.f32 %v6446_v39, %v6434_v21 }
  0xe3   :  { %v11370_v56 = vld [vmem:[#allocation2 + $0x1980] sm:$0xf]  ;;  %v13050_v60 = vld [vmem:[#allocation2 + $0x1a8c] sm:$0xf0]  ;;  %v11243_v63 = vor.u32 %v12986_v55, %v11242_v54  ;;  %6699 = vmatpush.bf16.msra.mxu2 %v11515_v52 }
  0xe4   :  { %v11498_v59 = vld [vmem:[#allocation2 + $0x1a80] sm:$0xf]  ;;  %v13082_v62 = vld [vmem:[#allocation2 + $0x1b8c] sm:$0xf0]  ;;  %v11371_v1 = vor.u32 %v13018_v58, %v11370_v56  ;;  %6712 = vmatpush.bf16.msra.mxu3 %v11643_v57  ;;  %v13500_v55 = vadd.f32 %v6459_v50, %v6447_v48  ;;  %v6422_v56 = vpop.f32.mrf.mxu0 }
  0xe5   :  { %v11626_v61 = vld [vmem:[#allocation2 + $0x1b80] sm:$0xf]  ;;  %v11499_v2 = vor.u32 %v13050_v60, %v11498_v59  ;;  %v12982_v4 = vld [vmem:[#allocation2 + $0x186c] sm:$0xf0]  ;;  %6674 = vmatpush.bf16.msra.mxu0 %v11243_v63 }
  0xe6   :  { %v11226_v3 = vld [vmem:[#allocation2 + $0x1860] sm:$0xf]  ;;  %v11627_v9 = vor.u32 %v13082_v62, %v11626_v61  ;;  %v13014_v10 = vld [vmem:[#allocation2 + $0x196c] sm:$0xf0]  ;;  %6687 = vmatpush.bf16.msra.mxu1 %v11371_v1  ;;  %v6435_v62 = vpop.f32.mrf.mxu1 }
  0xe7   :  { %v11354_v5 = vld [vmem:[#allocation2 + $0x1960] sm:$0xf]  ;;  %v13046_v14 = vld [vmem:[#allocation2 + $0x1a6c] sm:$0xf0]  ;;  %v11227_v24 = vor.u32 %v12982_v4, %v11226_v3  ;;  %6700 = vmatpush.bf16.msra.mxu2 %v11499_v2 }
  0xe8   :  { %v11482_v13 = vld [vmem:[#allocation2 + $0x1a60] sm:$0xf]  ;;  %v13078_v17 = vld [vmem:[#allocation2 + $0x1b6c] sm:$0xf0]  ;;  %v11355_v26 = vor.u32 %v13014_v10, %v11354_v5  ;;  %6713 = vmatpush.bf16.msra.mxu3 %v11627_v9 }
  0xe9   :  { %v11610_v15 = vld [vmem:[#allocation2 + $0x1b60] sm:$0xf]  ;;  %v11483_v27 = vor.u32 %v13046_v14, %v11482_v13  ;;  %v12978_v34 = vld [vmem:[#allocation2 + $0x184c] sm:$0xf0]  ;;  %6675 = vmatpush.bf16.msra.mxu0 %v11227_v24  ;;  %v6448_v24 = vpop.f32.mrf.mxu2 }
  0xea   :  { %v11210_v32 = vld [vmem:[#allocation2 + $0x1840] sm:$0xf]  ;;  %v11611_v53 = vor.u32 %v13078_v17, %v11610_v15  ;;  %v13010_v40 = vld [vmem:[#allocation2 + $0x194c] sm:$0xf0]  ;;  %6688 = vmatpush.bf16.msra.mxu1 %v11355_v26 }
  0xeb   :  { %v11338_v36 = vld [vmem:[#allocation2 + $0x1940] sm:$0xf]  ;;  %v13042_v47 = vld [vmem:[#allocation2 + $0x1a4c] sm:$0xf0]  ;;  %v11211_v54 = vor.u32 %v12978_v34, %v11210_v32  ;;  %6701 = vmatpush.bf16.msra.mxu2 %v11483_v27  ;;  %v90_v34 = vld [vmem:[%s13722_s0 + $0x68] sm:$0xff] }
  0xec   :  { %v11466_v43 = vld [vmem:[#allocation2 + $0x1a40] sm:$0xf]  ;;  %v13074_v52 = vld [vmem:[#allocation2 + $0x1b4c] sm:$0xf0]  ;;  %v11339_v57 = vor.u32 %v13010_v40, %v11338_v36  ;;  %6714 = vmatpush.bf16.msra.mxu3 %v11611_v53  ;;  %v6461_v36 = vpop.f32.mrf.mxu3  ;;  %v1170_v62 = vunpack.c.h.b16 %v90_v34 }
  0xed   :  { %v11594_v51 = vld [vmem:[#allocation2 + $0x1b40] sm:$0xf]  ;;  %v11467_v58 = vor.u32 %v13042_v47, %v11466_v43  ;;  %v12974_v60 = vld [vmem:[#allocation2 + $0x182c] sm:$0xf0]  ;;  %6676 = vmatpush.bf16.msra.mxu0 %v11211_v54 }
  0xee   :  { %v11194_v59 = vld [vmem:[#allocation2 + $0x1820] sm:$0xf]  ;;  %v11595_v63 = vor.u32 %v13074_v52, %v11594_v51  ;;  %v13006_v0 = vld [vmem:[#allocation2 + $0x192c] sm:$0xf0]  ;;  %6689 = vmatpush.bf16.msra.mxu1 %v11339_v57 }
  0xef   :  { %v11322_v61 = vld [vmem:[#allocation2 + $0x1920] sm:$0xf]  ;;  %v13038_v2 = vld [vmem:[#allocation2 + $0x1a2c] sm:$0xf0]  ;;  %v11195_v6 = vor.u32 %v12974_v60, %v11194_v59  ;;  %6702 = vmatpush.bf16.msra.mxu2 %v11467_v58  ;;  %v1169_v58 = vunpack.c.l.b16 %v90_v34 }
  0xf0   :  { %v11450_v1 = vld [vmem:[#allocation2 + $0x1a20] sm:$0xf]  ;;  %v13070_v4 = vld [vmem:[#allocation2 + $0x1b2c] sm:$0xf0]  ;;  %v11323_v13 = vor.u32 %v13006_v0, %v11322_v61  ;;  %6715 = vmatpush.bf16.msra.mxu3 %v11595_v63 }
  0xf1   :  { %v11578_v3 = vld [vmem:[#allocation2 + $0x1b20] sm:$0xf]  ;;  %v12970_v8 = vld [vmem:[#allocation2 + $0x180c] sm:$0xf0]  ;;  %v11451_v14 = vor.u32 %v13038_v2, %v11450_v1  ;;  %6677 = vmatpush.bf16.msra.mxu0 %v11195_v6 }
  0xf2   :  { %v11178_v5 = vld [vmem:[#allocation2 + $0x1800] sm:$0xf]  ;;  %v13002_v10 = vld [vmem:[#allocation2 + $0x190c] sm:$0xf0]  ;;  %v11579_v26 = vor.u32 %v13070_v4, %v11578_v3  ;;  %6690 = vmatpush.bf16.msra.mxu1 %v11323_v13 }
  0xf3   :  { %v11306_v9 = vld [vmem:[#allocation2 + $0x1900] sm:$0xf]  ;;  %v13034_v17 = vld [vmem:[#allocation2 + $0x1a0c] sm:$0xf0]  ;;  %v11179_v43 = vor.u32 %v12970_v8, %v11178_v5  ;;  %6703 = vmatpush.bf16.msra.mxu2 %v11451_v14 }
  0xf4   :  { %v11434_v15 = vld [vmem:[#allocation2 + $0x1a00] sm:$0xf]  ;;  %v13066_v32 = vld [vmem:[#allocation2 + $0x1b0c] sm:$0xf0]  ;;  %v11307_v52 = vor.u32 %v13002_v10, %v11306_v9  ;;  %6716 = vmatpush.bf16.msra.mxu3 %v11579_v26  ;;  %v13510_v10 = vpack.c.b16 %v1169_v58, %v1169_v58 }
  0xf5   :  { %v89_v21 = vld [vmem:[%s13722_s0 + $0x60] sm:$0xff]  ;;  %v13126_v53 = vld [vmem:[#allocation2 + $0x1cec] sm:$0xf0]  ;;  %v11435_v54 = vor.u32 %v13034_v17, %v11434_v15  ;;  %6678 = vmatpush.bf16.msra.mxu0 %v11179_v43  ;;  %v13514_v17 = vpack.c.b16 %v1170_v62, %v1170_v62 }
  0xf6   :  { %v11562_v27 = vld [vmem:[#allocation2 + $0x1b00] sm:$0xf]  ;;  %v13158_v47 = vld [vmem:[#allocation2 + $0x1dec] sm:$0xf0]  ;;  %v1167_v51 = vunpack.c.l.b16 %v89_v21  ;;  %v1168_v59 = vunpack.c.h.b16 %v89_v21  ;;  %6691 = vmatpush.bf16.msra.mxu1 %v11307_v52 }
  0xf7   :  { %v11802_v39 = vld [vmem:[#allocation2 + $0x1ce0] sm:$0xf]  ;;  %v13190_v50 = vld [vmem:[#allocation2 + $0x1eec] sm:$0xf0]  ;;  %v11563_v60 = vor.u32 %v13066_v32, %v11562_v27  ;;  %6704 = vmatpush.bf16.msra.mxu2 %v11435_v54 }
  0xf8   :  { %v11930_v40 = vld [vmem:[#allocation2 + $0x1de0] sm:$0xf]  ;;  %v13222_v57 = vld [vmem:[#allocation2 + $0x1fec] sm:$0xf0]  ;;  %v11803_v61 = vor.u32 %v13126_v53, %v11802_v39  ;;  %v13508_v5 = vpack.c.b16 %v1167_v51, %v1167_v51  ;;  %v13512_v13 = vpack.c.b16 %v1168_v59, %v1168_v59 }
  0xf9   :  { %v12058_v48 = vld [vmem:[#allocation2 + $0x1ee0] sm:$0xf]  ;;  %v11931_v63 = vor.u32 %v13158_v47, %v11930_v40  ;;  %v13122_v2 = vld [vmem:[#allocation2 + $0x1ccc] sm:$0xf0]  ;;  %6717 = vmatpush.bf16.msra.mxu3 %v11563_v60 }
  0xfa   :  { %v12186_v56 = vld [vmem:[#allocation2 + $0x1fe0] sm:$0xf]  ;;  %v12059_v0 = vor.u32 %v13190_v50, %v12058_v48  ;;  %v13154_v6 = vld [vmem:[#allocation2 + $0x1dcc] sm:$0xf0]  ;;  %6723 = vmatpush.bf16.msrb.mxu0 %v11803_v61  ;;  %6705 = vmatmul.bf16.vlgmr.msra.gmra.mxu2 %v13510_v10  ;;  %v6472_v61 = vpop.f32.mrf.mxu0 }
  0xfb   :  { %v11786_v1 = vld [vmem:[#allocation2 + $0x1cc0] sm:$0xf]  ;;  %v12187_v4 = vor.u32 %v13222_v57, %v12186_v56  ;;  %v13186_v9 = vld [vmem:[#allocation2 + $0x1ecc] sm:$0xf0]  ;;  %6736 = vmatpush.bf16.msrb.mxu1 %v11931_v63  ;;  %6679 = vmatmul.bf16.vlgmr.msra.gmra.mxu0 %v13508_v5 }
  0xfc   :  { %v11914_v3 = vld [vmem:[#allocation2 + $0x1dc0] sm:$0xf]  ;;  %v13218_v15 = vld [vmem:[#allocation2 + $0x1fcc] sm:$0xf0]  ;;  %v11787_v21 = vor.u32 %v13122_v2, %v11786_v1  ;;  %6749 = vmatpush.bf16.msrb.mxu2 %v12059_v0  ;;  %6692 = vmatmul.bf16.vlgmr.msra.gmra.mxu1 %v13512_v13  ;;  %v6473_v0 = vadd.f32 %v6472_v61, %v13500_v55  ;;  %v6485_v2 = vpop.f32.mrf.mxu1 }
  0xfd   :  { %v12042_v8 = vld [vmem:[#allocation2 + $0x1ec0] sm:$0xf]  ;;  %v11915_v24 = vor.u32 %v13154_v6, %v11914_v3  ;;  %v13118_v32 = vld [vmem:[#allocation2 + $0x1cac] sm:$0xf0]  ;;  %6762 = vmatpush.bf16.msrb.mxu3 %v12187_v4 }
  0xfe   :  { %v12170_v14 = vld [vmem:[#allocation2 + $0x1fc0] sm:$0xf]  ;;  %v12043_v26 = vor.u32 %v13186_v9, %v12042_v8  ;;  %v13150_v39 = vld [vmem:[#allocation2 + $0x1dac] sm:$0xf0]  ;;  %6718 = vmatmul.bf16.vlgmr.msra.gmra.mxu3 %v13514_v17  ;;  %6724 = vmatpush.bf16.msrb.mxu0 %v11787_v21 }
  0xff   :  { %v11770_v27 = vld [vmem:[#allocation2 + $0x1ca0] sm:$0xf]  ;;  %v12171_v36 = vor.u32 %v13218_v15, %v12170_v14  ;;  %v13182_v40 = vld [vmem:[#allocation2 + $0x1eac] sm:$0xf0]  ;;  %6737 = vmatpush.bf16.msrb.mxu1 %v11915_v24  ;;  %v6486_v15 = vadd.f32 %v6485_v2, %v6473_v0 }
 0x100   :  { %v11898_v34 = vld [vmem:[#allocation2 + $0x1da0] sm:$0xf]  ;;  %v13214_v47 = vld [vmem:[#allocation2 + $0x1fac] sm:$0xf0]  ;;  %v11771_v48 = vor.u32 %v13118_v32, %v11770_v27  ;;  %6750 = vmatpush.bf16.msrb.mxu2 %v12043_v26 }
 0x101   :  { %v12026_v53 = vld [vmem:[#allocation2 + $0x1ea0] sm:$0xf]  ;;  %v11899_v50 = vor.u32 %v13150_v39, %v11898_v34  ;;  %v13114_v54 = vld [vmem:[#allocation2 + $0x1c8c] sm:$0xf0]  ;;  %6763 = vmatpush.bf16.msrb.mxu3 %v12171_v36 }
 0x102   :  { %v12154_v43 = vld [vmem:[#allocation2 + $0x1fa0] sm:$0xf]  ;;  %v12027_v51 = vor.u32 %v13182_v40, %v12026_v53  ;;  %v13146_v58 = vld [vmem:[#allocation2 + $0x1d8c] sm:$0xf0]  ;;  %6725 = vmatpush.bf16.msrb.mxu0 %v11771_v48 }
 0x103   :  { %v11754_v52 = vld [vmem:[#allocation2 + $0x1c80] sm:$0xf]  ;;  %v12155_v57 = vor.u32 %v13214_v47, %v12154_v43  ;;  %v13178_v60 = vld [vmem:[#allocation2 + $0x1e8c] sm:$0xf0]  ;;  %6738 = vmatpush.bf16.msrb.mxu1 %v11899_v50  ;;  %v6498_v47 = vpop.f32.mrf.mxu2 }
 0x104   :  { %v11882_v56 = vld [vmem:[#allocation2 + $0x1d80] sm:$0xf]  ;;  %v13210_v63 = vld [vmem:[#allocation2 + $0x1f8c] sm:$0xf0]  ;;  %v11755_v1 = vor.u32 %v13114_v54, %v11754_v52  ;;  %6751 = vmatpush.bf16.msrb.mxu2 %v12027_v51  ;;  %v6499_v52 = vadd.f32 %v6498_v47, %v6486_v15  ;;  %v6511_v54 = vpop.f32.mrf.mxu3  ;;  %v92_v47 = vld [vmem:[%s13722_s0 + $0x78] sm:$0xff] }
 0x105   :  { %v12010_v59 = vld [vmem:[#allocation2 + $0x1e80] sm:$0xf]  ;;  %v11883_v3 = vor.u32 %v13146_v58, %v11882_v56  ;;  %v13110_v8 = vld [vmem:[#allocation2 + $0x1c6c] sm:$0xf0]  ;;  %6764 = vmatpush.bf16.msrb.mxu3 %v12155_v57  ;;  %v6474_v58 = vpop.f32.mrf.mxu0 }
 0x106   :  { %v12138_v62 = vld [vmem:[#allocation2 + $0x1f80] sm:$0xf]  ;;  %v12011_v4 = vor.u32 %v13178_v60, %v12010_v59  ;;  %v13142_v21 = vld [vmem:[#allocation2 + $0x1d6c] sm:$0xf0]  ;;  %6726 = vmatpush.bf16.msrb.mxu0 %v11755_v1  ;;  %v6487_v60 = vpop.f32.mrf.mxu1  ;;  %v13521_v61 = vadd.f32 %v6511_v54, %v6499_v52  ;;  %v12260_v52 = vld [vmem:[#allocation2 + $0x1e4] sm:$0xf] }
 0x107   :  { %v11738_v6 = vld [vmem:[#allocation2 + $0x1c60] sm:$0xf]  ;;  %v12139_v14 = vor.u32 %v13210_v63, %v12138_v62  ;;  %v13174_v26 = vld [vmem:[#allocation2 + $0x1e6c] sm:$0xf0]  ;;  %6739 = vmatpush.bf16.msrb.mxu1 %v11883_v3  ;;  %v12292_v58 = vld [vmem:[#allocation2 + $0x2e4] sm:$0xf] }
 0x108   :  { %v11866_v9 = vld [vmem:[#allocation2 + $0x1d60] sm:$0xf]  ;;  %v13206_v32 = vld [vmem:[#allocation2 + $0x1f6c] sm:$0xf0]  ;;  %v11739_v34 = vor.u32 %v13110_v8, %v11738_v6  ;;  %6752 = vmatpush.bf16.msrb.mxu2 %v12011_v4 }
 0x109   :  { %v11994_v24 = vld [vmem:[#allocation2 + $0x1e60] sm:$0xf]  ;;  %v11867_v55 = vor.u32 %v13142_v21, %v11866_v9  ;;  %v13106_v53 = vld [vmem:[#allocation2 + $0x1c4c] sm:$0xf0]  ;;  %6765 = vmatpush.bf16.msrb.mxu3 %v12139_v14 }
 0x10a   :  { %v12122_v27 = vld [vmem:[#allocation2 + $0x1f60] sm:$0xf]  ;;  %v11995_v36 = vor.u32 %v13174_v26, %v11994_v24  ;;  %v13138_v48 = vld [vmem:[#allocation2 + $0x1d4c] sm:$0xf0]  ;;  %6727 = vmatpush.bf16.msrb.mxu0 %v11739_v34 }
 0x10b   :  { %v11722_v39 = vld [vmem:[#allocation2 + $0x1c40] sm:$0xf]  ;;  %v12123_v43 = vor.u32 %v13206_v32, %v12122_v27  ;;  %v13170_v51 = vld [vmem:[#allocation2 + $0x1e4c] sm:$0xf0]  ;;  %6740 = vmatpush.bf16.msrb.mxu1 %v11867_v55 }
 0x10c   :  { %v11850_v40 = vld [vmem:[#allocation2 + $0x1d40] sm:$0xf]  ;;  %v13202_v57 = vld [vmem:[#allocation2 + $0x1f4c] sm:$0xf0]  ;;  %v11723_v59 = vor.u32 %v13106_v53, %v11722_v39  ;;  %6753 = vmatpush.bf16.msrb.mxu2 %v11995_v36  ;;  %v6513_v54 = vpop.f32.mrf.mxu3 }
 0x10d   :  { %v11978_v50 = vld [vmem:[#allocation2 + $0x1e40] sm:$0xf]  ;;  %v11851_v62 = vor.u32 %v13138_v48, %v11850_v40  ;;  %v13102_v1 = vld [vmem:[#allocation2 + $0x1c2c] sm:$0xf0]  ;;  %6766 = vmatpush.bf16.msrb.mxu3 %v12123_v43  ;;  %v6500_v48 = vpop.f32.mrf.mxu2 }
 0x10e   :  { %v12106_v56 = vld [vmem:[#allocation2 + $0x1f40] sm:$0xf]  ;;  %v11979_v63 = vor.u32 %v13170_v51, %v11978_v50  ;;  %v13134_v4 = vld [vmem:[#allocation2 + $0x1d2c] sm:$0xf0]  ;;  %6728 = vmatpush.bf16.msrb.mxu0 %v11723_v59  ;;  %v12228_v50 = vld [vmem:[#allocation2 + $0xe4] sm:$0xf] }
 0x10f   :  { %v11706_v0 = vld [vmem:[#allocation2 + $0x1c20] sm:$0xf]  ;;  %v12107_v3 = vor.u32 %v13202_v57, %v12106_v56  ;;  %v13166_v8 = vld [vmem:[#allocation2 + $0x1e2c] sm:$0xf0]  ;;  %6741 = vmatpush.bf16.msrb.mxu1 %v11851_v62  ;;  %v8220_v51 = vld [vmem:[#allocation2 + $0xf0] sm:$0xf0] }
 0x110   :  { %v11834_v2 = vld [vmem:[#allocation2 + $0x1d20] sm:$0xf]  ;;  %v13198_v14 = vld [vmem:[#allocation2 + $0x1f2c] sm:$0xf0]  ;;  %v11707_v21 = vor.u32 %v13102_v1, %v11706_v0  ;;  %6754 = vmatpush.bf16.msrb.mxu2 %v11979_v63  ;;  %v8348_v57 = vld [vmem:[#allocation2 + $0x1f0] sm:$0xf0] }
 0x111   :  { %v11962_v6 = vld [vmem:[#allocation2 + $0x1e20] sm:$0xf]  ;;  %v13098_v24 = vld [vmem:[#allocation2 + $0x1c0c] sm:$0xf0]  ;;  %v11835_v32 = vor.u32 %v13134_v4, %v11834_v2  ;;  %6767 = vmatpush.bf16.msrb.mxu3 %v12107_v3  ;;  %v8476_v59 = vld [vmem:[#allocation2 + $0x2f0] sm:$0xf0]  ;;  %v1173_v2 = vunpack.c.l.b16 %v92_v47 }
 0x112   :  { %v12090_v9 = vld [vmem:[#allocation2 + $0x1f20] sm:$0xf]  ;;  %v13130_v27 = vld [vmem:[#allocation2 + $0x1d0c] sm:$0xf0]  ;;  %v11963_v34 = vor.u32 %v13166_v8, %v11962_v6  ;;  %6729 = vmatpush.bf16.msrb.mxu0 %v11707_v21  ;;  %v12324_v0 = vld [vmem:[#allocation2 + $0x3e4] sm:$0xf]  ;;  %v8223_v6 = vor.u32 %v12228_v50, %v8220_v51  ;;  %v1174_v8 = vunpack.c.h.b16 %v92_v47 }
 0x113   :  { %v11690_v15 = vld [vmem:[#allocation2 + $0x1c00] sm:$0xf]  ;;  %v13162_v36 = vld [vmem:[#allocation2 + $0x1e0c] sm:$0xf0]  ;;  %v12091_v53 = vor.u32 %v13198_v14, %v12090_v9  ;;  %6742 = vmatpush.bf16.msrb.mxu1 %v11835_v32  ;;  %v8604_v1 = vld [vmem:[#allocation2 + $0x3f0] sm:$0xf0]  ;;  %v8351_v9 = vor.u32 %v12260_v52, %v8348_v57  ;;  %v8479_v14 = vor.u32 %v12292_v58, %v8476_v59 }
 0x114   :  { %v11818_v26 = vld [vmem:[#allocation2 + $0x1d00] sm:$0xf]  ;;  %v91_v39 = vld [vmem:[%s13722_s0 + $0x70] sm:$0xff]  ;;  %v11691_v56 = vor.u32 %v13098_v24, %v11690_v15  ;;  %6755 = vmatpush.bf16.msrb.mxu2 %v11963_v34  ;;  %v12224_v21 = vld [vmem:[#allocation2 + $0xc4] sm:$0xf]  ;;  %v8607_v48 = vor.u32 %v12324_v0, %v8604_v1  ;;  %v13531_v34 = vpack.c.b16 %v1173_v2, %v1173_v2 }
 0x115   :  { %v11946_v55 = vld [vmem:[#allocation2 + $0x1e00] sm:$0xf]  ;;  %v13194_v43 = vld [vmem:[#allocation2 + $0x1f0c] sm:$0xf0]  ;;  %v1171_v60 = vunpack.c.l.b16 %v91_v39  ;;  %v11819_v62 = vor.u32 %v13130_v27, %v11818_v26  ;;  %v1172_v3 = vunpack.c.h.b16 %v91_v39  ;;  %6768 = vmatpush.bf16.msrb.mxu3 %v12091_v53  ;;  %v8204_v15 = vld [vmem:[#allocation2 + $0xd0] sm:$0xf0]  ;;  %v13535_v53 = vpack.c.b16 %v1174_v8, %v1174_v8 }
 0x116   :  { %v12074_v40 = vld [vmem:[#allocation2 + $0x1f00] sm:$0xf]  ;;  %v11947_v63 = vor.u32 %v13162_v36, %v11946_v55  ;;  %v12256_v24 = vld [vmem:[#allocation2 + $0x1c4] sm:$0xf]  ;;  %6730 = vmatpush.bf16.msrb.mxu0 %v11691_v56  ;;  %v8332_v32 = vld [vmem:[#allocation2 + $0x1d0] sm:$0xf0] }
 0x117   :  { %v12075_v4 = vor.u32 %v13194_v43, %v12074_v40  ;;  %v13529_v54 = vpack.c.b16 %v1171_v60, %v1171_v60  ;;  %v12288_v26 = vld [vmem:[#allocation2 + $0x2c4] sm:$0xf]  ;;  %v8460_v27 = vld [vmem:[#allocation2 + $0x2d0] sm:$0xf0]  ;;  %6743 = vmatpush.bf16.msrb.mxu1 %v11819_v62  ;;  %v13533_v55 = vpack.c.b16 %v1172_v3, %v1172_v3  ;;  %v8207_v40 = vor.u32 %v12224_v21, %v8204_v15  ;;  %v6524_v21 = vpop.f32.mrf.mxu0 }
 0x118   :  { %6756 = vmatpush.bf16.msrb.mxu2 %v11947_v63  ;;  %v12320_v36 = vld [vmem:[#allocation2 + $0x3c4] sm:$0xf]  ;;  %v8588_v39 = vld [vmem:[#allocation2 + $0x3d0] sm:$0xf0]  ;;  %v8335_v43 = vor.u32 %v12256_v24, %v8332_v32  ;;  %v8463_v47 = vor.u32 %v12288_v26, %v8460_v27  ;;  %v6537_v26 = vpop.f32.mrf.mxu1 }
 0x119   :  { %6769 = vmatpush.bf16.msrb.mxu3 %v12075_v4  ;;  %v12220_v50 = vld [vmem:[#allocation2 + $0xa4] sm:$0xf]  ;;  %v8188_v51 = vld [vmem:[#allocation2 + $0xb0] sm:$0xf0]  ;;  %6731 = vmatmul.bf16.vlgmr.msrb.gmra.mxu0 %v13529_v54  ;;  %v8591_v56 = vor.u32 %v12320_v36, %v8588_v39 }
 0x11a   :  { %6775 = vmatpush.bf16.msra.mxu0 %v8223_v6  ;;  %v12252_v52 = vld [vmem:[#allocation2 + $0x1a4] sm:$0xf]  ;;  %v8316_v57 = vld [vmem:[#allocation2 + $0x1b0] sm:$0xf0]  ;;  %6744 = vmatmul.bf16.vlgmr.msrb.gmra.mxu1 %v13533_v55  ;;  %v8191_v63 = vor.u32 %v12220_v50, %v8188_v51 }
 0x11b   :  { %6788 = vmatpush.bf16.msra.mxu1 %v8351_v9  ;;  %v12284_v58 = vld [vmem:[#allocation2 + $0x2a4] sm:$0xf]  ;;  %v8444_v59 = vld [vmem:[#allocation2 + $0x2b0] sm:$0xf0]  ;;  %6757 = vmatmul.bf16.vlgmr.msrb.gmra.mxu2 %v13531_v34  ;;  %v8319_v0 = vor.u32 %v12252_v52, %v8316_v57 }
 0x11c   :  { %6801 = vmatpush.bf16.msra.mxu2 %v8479_v14  ;;  %v12316_v60 = vld [vmem:[#allocation2 + $0x3a4] sm:$0xf]  ;;  %v8572_v62 = vld [vmem:[#allocation2 + $0x3b0] sm:$0xf0]  ;;  %6770 = vmatmul.bf16.vlgmr.msrb.gmra.mxu3 %v13535_v53  ;;  %v8447_v1 = vor.u32 %v12284_v58, %v8444_v59 }
 0x11d   :  { %6814 = vmatpush.bf16.msra.mxu3 %v8607_v48  ;;  %v12216_v2 = vld [vmem:[#allocation2 + $0x84] sm:$0xf]  ;;  %v8172_v3 = vld [vmem:[#allocation2 + $0x90] sm:$0xf0]  ;;  %v8575_v6 = vor.u32 %v12316_v60, %v8572_v62  ;;  %v6525_v48 = vadd.f32 %v6524_v21, %v13521_v61 }
 0x11e   :  { %6776 = vmatpush.bf16.msra.mxu0 %v8207_v40  ;;  %v12248_v4 = vld [vmem:[#allocation2 + $0x184] sm:$0xf]  ;;  %v8300_v8 = vld [vmem:[#allocation2 + $0x190] sm:$0xf0]  ;;  %v8175_v32 = vor.u32 %v12216_v2, %v8172_v3  ;;  %v6550_v2 = vpop.f32.mrf.mxu2 }
 0x11f   :  { %6789 = vmatpush.bf16.msra.mxu1 %v8335_v43  ;;  %v12280_v9 = vld [vmem:[#allocation2 + $0x284] sm:$0xf]  ;;  %v8428_v14 = vld [vmem:[#allocation2 + $0x290] sm:$0xf0]  ;;  %v8303_v27 = vor.u32 %v12248_v4, %v8300_v8  ;;  %v6538_v50 = vadd.f32 %v6537_v26, %v6525_v48 }
 0x120   :  { %6802 = vmatpush.bf16.msra.mxu2 %v8463_v47  ;;  %v12312_v15 = vld [vmem:[#allocation2 + $0x384] sm:$0xf]  ;;  %v8556_v24 = vld [vmem:[#allocation2 + $0x390] sm:$0xf0]  ;;  %v8431_v36 = vor.u32 %v12280_v9, %v8428_v14  ;;  %v6563_v9 = vpop.f32.mrf.mxu3  ;;  %v6539_v48 = vpop.f32.mrf.mxu1 }
 0x121   :  { %6815 = vmatpush.bf16.msra.mxu3 %v8591_v56  ;;  %v12212_v39 = vld [vmem:[#allocation2 + $0x64] sm:$0xf]  ;;  %v8156_v40 = vld [vmem:[#allocation2 + $0x70] sm:$0xf0]  ;;  %v8559_v47 = vor.u32 %v12312_v15, %v8556_v24  ;;  %v6551_v8 = vadd.f32 %v6550_v2, %v6538_v50  ;;  %v6526_v15 = vpop.f32.mrf.mxu0 }
 0x122   :  { %6777 = vmatpush.bf16.msra.mxu0 %v8191_v63  ;;  %v12244_v43 = vld [vmem:[#allocation2 + $0x164] sm:$0xf]  ;;  %v8284_v51 = vld [vmem:[#allocation2 + $0x170] sm:$0xf0]  ;;  %v8159_v59 = vor.u32 %v12212_v39, %v8156_v40 }
 0x123   :  { %6790 = vmatpush.bf16.msra.mxu1 %v8319_v0  ;;  %v12276_v52 = vld [vmem:[#allocation2 + $0x264] sm:$0xf]  ;;  %v8412_v56 = vld [vmem:[#allocation2 + $0x270] sm:$0xf0]  ;;  %v8287_v61 = vor.u32 %v12244_v43, %v8284_v51 }
 0x124   :  { %6803 = vmatpush.bf16.msra.mxu2 %v8447_v1  ;;  %v12308_v57 = vld [vmem:[#allocation2 + $0x364] sm:$0xf]  ;;  %v8540_v58 = vld [vmem:[#allocation2 + $0x370] sm:$0xf0]  ;;  %v8415_v60 = vor.u32 %v12276_v52, %v8412_v56 }
 0x125   :  { %6816 = vmatpush.bf16.msra.mxu3 %v8575_v6  ;;  %v12208_v62 = vld [vmem:[#allocation2 + $0x44] sm:$0xf]  ;;  %v8140_v63 = vld [vmem:[#allocation2 + $0x50] sm:$0xf0]  ;;  %v8543_v1 = vor.u32 %v12308_v57, %v8540_v58 }
 0x126   :  { %6778 = vmatpush.bf16.msra.mxu0 %v8175_v32  ;;  %v12240_v0 = vld [vmem:[#allocation2 + $0x144] sm:$0xf]  ;;  %v8268_v3 = vld [vmem:[#allocation2 + $0x150] sm:$0xf0]  ;;  %v8143_v24 = vor.u32 %v12208_v62, %v8140_v63  ;;  %v13542_v32 = vadd.f32 %v6563_v9, %v6551_v8 }
 0x127   :  { %6791 = vmatpush.bf16.msra.mxu1 %v8303_v27  ;;  %v12272_v4 = vld [vmem:[#allocation2 + $0x244] sm:$0xf]  ;;  %v8396_v6 = vld [vmem:[#allocation2 + $0x250] sm:$0xf0]  ;;  %v8271_v26 = vor.u32 %v12240_v0, %v8268_v3 }
 0x128   :  { %6804 = vmatpush.bf16.msra.mxu2 %v8431_v36  ;;  %v12304_v14 = vld [vmem:[#allocation2 + $0x344] sm:$0xf]  ;;  %v8524_v21 = vld [vmem:[#allocation2 + $0x350] sm:$0xf0]  ;;  %v8399_v27 = vor.u32 %v12272_v4, %v8396_v6  ;;  %v6552_v6 = vpop.f32.mrf.mxu2 }
 0x129   :  { %6817 = vmatpush.bf16.msra.mxu3 %v8559_v47  ;;  %v12204_v36 = vld [vmem:[#allocation2 + $0x24] sm:$0xf]  ;;  %v8124_v39 = vld [vmem:[#allocation2 + $0x30] sm:$0xf0]  ;;  %v8527_v43 = vor.u32 %v12304_v14, %v8524_v21  ;;  %v6565_v21 = vpop.f32.mrf.mxu3 }
 0x12a   :  { %6779 = vmatpush.bf16.msra.mxu0 %v8159_v59  ;;  %v12236_v40 = vld [vmem:[#allocation2 + $0x124] sm:$0xf]  ;;  %v8252_v47 = vld [vmem:[#allocation2 + $0x130] sm:$0xf0]  ;;  %v8127_v57 = vor.u32 %v12204_v36, %v8124_v39 }
 0x12b   :  { %6792 = vmatpush.bf16.msra.mxu1 %v8287_v61  ;;  %v12268_v50 = vld [vmem:[#allocation2 + $0x224] sm:$0xf]  ;;  %v8380_v51 = vld [vmem:[#allocation2 + $0x230] sm:$0xf0]  ;;  %v8255_v61 = vor.u32 %v12236_v40, %v8252_v47 }
 0x12c   :  { %6805 = vmatpush.bf16.msra.mxu2 %v8415_v60  ;;  %v12300_v52 = vld [vmem:[#allocation2 + $0x324] sm:$0xf]  ;;  %v8508_v56 = vld [vmem:[#allocation2 + $0x330] sm:$0xf0]  ;;  %v8383_v60 = vor.u32 %v12268_v50, %v8380_v51 }
 0x12d   :  { %6818 = vmatpush.bf16.msra.mxu3 %v8543_v1  ;;  %v12200_v58 = vld [vmem:[#allocation2 + $0x4] sm:$0xf]  ;;  %v8108_v59 = vld [vmem:[#allocation2 + $0x10] sm:$0xf0]  ;;  %v8511_v2 = vor.u32 %v12300_v52, %v8508_v56 }
 0x12e   :  { %6780 = vmatpush.bf16.msra.mxu0 %v8143_v24  ;;  %v12232_v62 = vld [vmem:[#allocation2 + $0x104] sm:$0xf]  ;;  %v8236_v63 = vld [vmem:[#allocation2 + $0x110] sm:$0xf0]  ;;  %v8111_v15 = vor.u32 %v12200_v58, %v8108_v59 }
 0x12f   :  { %6793 = vmatpush.bf16.msra.mxu1 %v8271_v26  ;;  %v12264_v0 = vld [vmem:[#allocation2 + $0x204] sm:$0xf]  ;;  %v8364_v1 = vld [vmem:[#allocation2 + $0x210] sm:$0xf0] }
 0x130   :  { %6806 = vmatpush.bf16.msra.mxu2 %v8399_v27  ;;  %v12296_v3 = vld [vmem:[#allocation2 + $0x304] sm:$0xf]  ;;  %v8492_v4 = vld [vmem:[#allocation2 + $0x310] sm:$0xf0]  ;;  %v8239_v27 = vor.u32 %v12232_v62, %v8236_v63  ;;  %v8367_v36 = vor.u32 %v12264_v0, %v8364_v1 }
 0x131   :  { %6819 = vmatpush.bf16.msra.mxu3 %v8527_v43  ;;  %v12356_v8 = vld [vmem:[#allocation2 + $0x4e4] sm:$0xf]  ;;  %v8732_v9 = vld [vmem:[#allocation2 + $0x4f0] sm:$0xf0]  ;;  %v8495_v43 = vor.u32 %v12296_v3, %v8492_v4 }
 0x132   :  { %v12388_v14 = vld [vmem:[#allocation2 + $0x5e4] sm:$0xf]  ;;  %6781 = vmatpush.bf16.msra.mxu0 %v8127_v57  ;;  %v8860_v24 = vld [vmem:[#allocation2 + $0x5f0] sm:$0xf0]  ;;  %v8735_v47 = vor.u32 %v12356_v8, %v8732_v9 }
 0x133   :  { %v12420_v48 = vld [vmem:[#allocation2 + $0x6e4] sm:$0xf]  ;;  %v8988_v26 = vld [vmem:[#allocation2 + $0x6f0] sm:$0xf0]  ;;  %6794 = vmatpush.bf16.msra.mxu1 %v8255_v61  ;;  %v8863_v50 = vor.u32 %v12388_v14, %v8860_v24 }
 0x134   :  { %6807 = vmatpush.bf16.msra.mxu2 %v8383_v60  ;;  %v12452_v39 = vld [vmem:[#allocation2 + $0x7e4] sm:$0xf]  ;;  %v9116_v40 = vld [vmem:[#allocation2 + $0x7f0] sm:$0xf0]  ;;  %v8991_v51 = vor.u32 %v12420_v48, %v8988_v26 }
 0x135   :  { %6820 = vmatpush.bf16.msra.mxu3 %v8511_v2  ;;  %v12352_v52 = vld [vmem:[#allocation2 + $0x4c4] sm:$0xf]  ;;  %v8716_v56 = vld [vmem:[#allocation2 + $0x4d0] sm:$0xf0]  ;;  %v9119_v57 = vor.u32 %v12452_v39, %v9116_v40 }
 0x136   :  { %v12384_v6 = vld [vmem:[#allocation2 + $0x5c4] sm:$0xf]  ;;  %6782 = vmatpush.bf16.msra.mxu0 %v8111_v15  ;;  %v8844_v58 = vld [vmem:[#allocation2 + $0x5d0] sm:$0xf0]  ;;  %v8719_v62 = vor.u32 %v12352_v52, %v8716_v56  ;;  %v6576_v52 = vpop.f32.mrf.mxu0 }
 0x137   :  { %v12416_v59 = vld [vmem:[#allocation2 + $0x6c4] sm:$0xf]  ;;  %v8972_v21 = vld [vmem:[#allocation2 + $0x6d0] sm:$0xf0]  ;;  %6795 = vmatpush.bf16.msra.mxu1 %v8239_v27  ;;  %v8847_v63 = vor.u32 %v12384_v6, %v8844_v58 }
 0x138   :  { %6808 = vmatpush.bf16.msra.mxu2 %v8367_v36  ;;  %v12448_v61 = vld [vmem:[#allocation2 + $0x7c4] sm:$0xf]  ;;  %v9100_v60 = vld [vmem:[#allocation2 + $0x7d0] sm:$0xf0]  ;;  %v8975_v0 = vor.u32 %v12416_v59, %v8972_v21  ;;  %v6589_v59 = vpop.f32.mrf.mxu1 }
 0x139   :  { %6821 = vmatpush.bf16.msra.mxu3 %v8495_v43  ;;  %v12348_v2 = vld [vmem:[#allocation2 + $0x4a4] sm:$0xf]  ;;  %v8700_v1 = vld [vmem:[#allocation2 + $0x4b0] sm:$0xf0]  ;;  %v9103_v4 = vor.u32 %v12448_v61, %v9100_v60  ;;  %6783 = vmatmul.bf16.vlgmr.msra.gmra.mxu0 %v13397_v19 }
 0x13a   :  { %6827 = vmatpush.bf16.msrb.mxu0 %v8735_v47  ;;  %v12380_v3 = vld [vmem:[#allocation2 + $0x5a4] sm:$0xf]  ;;  %v8828_v8 = vld [vmem:[#allocation2 + $0x5b0] sm:$0xf0]  ;;  %v8703_v48 = vor.u32 %v12348_v2, %v8700_v1  ;;  %6796 = vmatmul.bf16.vlgmr.msra.gmra.mxu1 %v13401_v22 }
 0x13b   :  { %6840 = vmatpush.bf16.msrb.mxu1 %v8863_v50  ;;  %v12412_v9 = vld [vmem:[#allocation2 + $0x6a4] sm:$0xf]  ;;  %v8956_v14 = vld [vmem:[#allocation2 + $0x6b0] sm:$0xf0]  ;;  %6809 = vmatmul.bf16.vlgmr.msra.gmra.mxu2 %v13395_v18  ;;  %v8831_v26 = vor.u32 %v12380_v3, %v8828_v8 }
 0x13c   :  { %6853 = vmatpush.bf16.msrb.mxu2 %v8991_v51  ;;  %v12444_v15 = vld [vmem:[#allocation2 + $0x7a4] sm:$0xf]  ;;  %v9084_v24 = vld [vmem:[#allocation2 + $0x7b0] sm:$0xf0]  ;;  %6822 = vmatmul.bf16.vlgmr.msra.gmra.mxu3 %v13399_v20  ;;  %v8959_v27 = vor.u32 %v12412_v9, %v8956_v14 }
 0x13d   :  { %6866 = vmatpush.bf16.msrb.mxu3 %v9119_v57  ;;  %v12344_v36 = vld [vmem:[#allocation2 + $0x484] sm:$0xf]  ;;  %v8684_v39 = vld [vmem:[#allocation2 + $0x490] sm:$0xf0]  ;;  %v9087_v43 = vor.u32 %v12444_v15, %v9084_v24  ;;  %v6577_v57 = vadd.f32 %v6576_v52, %v13542_v32 }
 0x13e   :  { %6828 = vmatpush.bf16.msrb.mxu0 %v8719_v62  ;;  %v12376_v40 = vld [vmem:[#allocation2 + $0x584] sm:$0xf]  ;;  %v8812_v47 = vld [vmem:[#allocation2 + $0x590] sm:$0xf0]  ;;  %v8687_v58 = vor.u32 %v12344_v36, %v8684_v39  ;;  %v6602_v36 = vpop.f32.mrf.mxu2 }
 0x13f   :  { %6841 = vmatpush.bf16.msrb.mxu1 %v8847_v63  ;;  %v12408_v50 = vld [vmem:[#allocation2 + $0x684] sm:$0xf]  ;;  %v8940_v51 = vld [vmem:[#allocation2 + $0x690] sm:$0xf0]  ;;  %v8815_v21 = vor.u32 %v12376_v40, %v8812_v47  ;;  %v6590_v2 = vadd.f32 %v6589_v59, %v6577_v57 }
 0x140   :  { %6854 = vmatpush.bf16.msrb.mxu2 %v8975_v0  ;;  %v12440_v56 = vld [vmem:[#allocation2 + $0x784] sm:$0xf]  ;;  %v9068_v6 = vld [vmem:[#allocation2 + $0x790] sm:$0xf0]  ;;  %v8943_v61 = vor.u32 %v12408_v50, %v8940_v51  ;;  %v6615_v50 = vpop.f32.mrf.mxu3  ;;  %v6591_v57 = vpop.f32.mrf.mxu1 }
 0x141   :  { %6867 = vmatpush.bf16.msrb.mxu3 %v9103_v4  ;;  %v12340_v60 = vld [vmem:[#allocation2 + $0x464] sm:$0xf]  ;;  %v8668_v62 = vld [vmem:[#allocation2 + $0x470] sm:$0xf0]  ;;  %v9071_v0 = vor.u32 %v12440_v56, %v9068_v6  ;;  %v6603_v47 = vadd.f32 %v6602_v36, %v6590_v2  ;;  %v6578_v56 = vpop.f32.mrf.mxu0 }
 0x142   :  { %6829 = vmatpush.bf16.msrb.mxu0 %v8703_v48  ;;  %v12372_v63 = vld [vmem:[#allocation2 + $0x564] sm:$0xf]  ;;  %v8796_v1 = vld [vmem:[#allocation2 + $0x570] sm:$0xf0]  ;;  %v8671_v14 = vor.u32 %v12340_v60, %v8668_v62 }
 0x143   :  { %6842 = vmatpush.bf16.msrb.mxu1 %v8831_v26  ;;  %v12404_v3 = vld [vmem:[#allocation2 + $0x664] sm:$0xf]  ;;  %v8924_v4 = vld [vmem:[#allocation2 + $0x670] sm:$0xf0]  ;;  %v8799_v32 = vor.u32 %v12372_v63, %v8796_v1 }
 0x144   :  { %6855 = vmatpush.bf16.msrb.mxu2 %v8959_v27  ;;  %v12436_v8 = vld [vmem:[#allocation2 + $0x764] sm:$0xf]  ;;  %v9052_v9 = vld [vmem:[#allocation2 + $0x770] sm:$0xf0]  ;;  %v8927_v15 = vor.u32 %v12404_v3, %v8924_v4 }
 0x145   :  { %6868 = vmatpush.bf16.msrb.mxu3 %v9087_v43  ;;  %v12336_v24 = vld [vmem:[#allocation2 + $0x444] sm:$0xf]  ;;  %v8652_v48 = vld [vmem:[#allocation2 + $0x450] sm:$0xf0]  ;;  %v9055_v27 = vor.u32 %v12436_v8, %v9052_v9 }
 0x146   :  { %6830 = vmatpush.bf16.msrb.mxu0 %v8687_v58  ;;  %v12368_v26 = vld [vmem:[#allocation2 + $0x544] sm:$0xf]  ;;  %v8780_v39 = vld [vmem:[#allocation2 + $0x550] sm:$0xf0]  ;;  %v8655_v6 = vor.u32 %v12336_v24, %v8652_v48  ;;  %v13549_v58 = vadd.f32 %v6615_v50, %v6603_v47 }
 0x147   :  { %6843 = vmatpush.bf16.msrb.mxu1 %v8815_v21  ;;  %v12400_v40 = vld [vmem:[#allocation2 + $0x644] sm:$0xf]  ;;  %v8908_v43 = vld [vmem:[#allocation2 + $0x650] sm:$0xf0]  ;;  %v8783_v59 = vor.u32 %v12368_v26, %v8780_v39 }
 0x148   :  { %6856 = vmatpush.bf16.msrb.mxu2 %v8943_v61  ;;  %v12432_v51 = vld [vmem:[#allocation2 + $0x744] sm:$0xf]  ;;  %v9036_v52 = vld [vmem:[#allocation2 + $0x750] sm:$0xf0]  ;;  %v8911_v21 = vor.u32 %v12400_v40, %v8908_v43  ;;  %v6604_v43 = vpop.f32.mrf.mxu2 }
 0x149   :  { %6869 = vmatpush.bf16.msrb.mxu3 %v9071_v0  ;;  %v12332_v61 = vld [vmem:[#allocation2 + $0x424] sm:$0xf]  ;;  %v8636_v60 = vld [vmem:[#allocation2 + $0x430] sm:$0xf0]  ;;  %v9039_v63 = vor.u32 %v12432_v51, %v9036_v52  ;;  %v6617_v52 = vpop.f32.mrf.mxu3 }
 0x14a   :  { %6831 = vmatpush.bf16.msrb.mxu0 %v8671_v14  ;;  %v12364_v62 = vld [vmem:[#allocation2 + $0x524] sm:$0xf]  ;;  %v8764_v0 = vld [vmem:[#allocation2 + $0x530] sm:$0xf0]  ;;  %v8639_v8 = vor.u32 %v12332_v61, %v8636_v60 }
 0x14b   :  { %6844 = vmatpush.bf16.msrb.mxu1 %v8799_v32  ;;  %v12396_v2 = vld [vmem:[#allocation2 + $0x624] sm:$0xf]  ;;  %v8892_v1 = vld [vmem:[#allocation2 + $0x630] sm:$0xf0]  ;;  %v8767_v32 = vor.u32 %v12364_v62, %v8764_v0 }
 0x14c   :  { %6857 = vmatpush.bf16.msrb.mxu2 %v8927_v15  ;;  %v12428_v3 = vld [vmem:[#allocation2 + $0x724] sm:$0xf]  ;;  %v9020_v4 = vld [vmem:[#allocation2 + $0x730] sm:$0xf0]  ;;  %v8895_v15 = vor.u32 %v12396_v2, %v8892_v1 }
 0x14d   :  { %6870 = vmatpush.bf16.msrb.mxu3 %v9055_v27  ;;  %v12328_v9 = vld [vmem:[#allocation2 + $0x404] sm:$0xf]  ;;  %v8620_v14 = vld [vmem:[#allocation2 + $0x410] sm:$0xf0]  ;;  %v9023_v36 = vor.u32 %v12428_v3, %v9020_v4 }
 0x14e   :  { %6832 = vmatpush.bf16.msrb.mxu0 %v8655_v6  ;;  %v12360_v24 = vld [vmem:[#allocation2 + $0x504] sm:$0xf]  ;;  %v8748_v48 = vld [vmem:[#allocation2 + $0x510] sm:$0xf0]  ;;  %v8623_v56 = vor.u32 %v12328_v9, %v8620_v14 }
 0x14f   :  { %6845 = vmatpush.bf16.msrb.mxu1 %v8783_v59  ;;  %v12392_v26 = vld [vmem:[#allocation2 + $0x604] sm:$0xf]  ;;  %v8876_v27 = vld [vmem:[#allocation2 + $0x610] sm:$0xf0] }
 0x150   :  { %6858 = vmatpush.bf16.msrb.mxu2 %v8911_v21  ;;  %v12424_v39 = vld [vmem:[#allocation2 + $0x704] sm:$0xf]  ;;  %v9004_v40 = vld [vmem:[#allocation2 + $0x710] sm:$0xf0]  ;;  %v8751_v21 = vor.u32 %v12360_v24, %v8748_v48  ;;  %v8879_v61 = vor.u32 %v12392_v26, %v8876_v27 }
 0x151   :  { %6871 = vmatpush.bf16.msrb.mxu3 %v9039_v63  ;;  %v12484_v47 = vld [vmem:[#allocation2 + $0x8e4] sm:$0xf]  ;;  %v9244_v50 = vld [vmem:[#allocation2 + $0x8f0] sm:$0xf0]  ;;  %v9007_v63 = vor.u32 %v12424_v39, %v9004_v40 }
 0x152   :  { %v12516_v51 = vld [vmem:[#allocation2 + $0x9e4] sm:$0xf]  ;;  %6833 = vmatpush.bf16.msrb.mxu0 %v8639_v8  ;;  %v9372_v6 = vld [vmem:[#allocation2 + $0x9f0] sm:$0xf0]  ;;  %v9247_v0 = vor.u32 %v12484_v47, %v9244_v50 }
 0x153   :  { %v12548_v57 = vld [vmem:[#allocation2 + $0xae4] sm:$0xf]  ;;  %v9500_v59 = vld [vmem:[#allocation2 + $0xaf0] sm:$0xf0]  ;;  %6846 = vmatpush.bf16.msrb.mxu1 %v8767_v32  ;;  %v9375_v2 = vor.u32 %v12516_v51, %v9372_v6 }
 0x154   :  { %6859 = vmatpush.bf16.msrb.mxu2 %v8895_v15  ;;  %v12580_v60 = vld [vmem:[#allocation2 + $0xbe4] sm:$0xf]  ;;  %v9628_v62 = vld [vmem:[#allocation2 + $0xbf0] sm:$0xf0]  ;;  %v9503_v1 = vor.u32 %v12548_v57, %v9500_v59 }
 0x155   :  { %6872 = vmatpush.bf16.msrb.mxu3 %v9023_v36  ;;  %v12480_v3 = vld [vmem:[#allocation2 + $0x8c4] sm:$0xf]  ;;  %v9228_v4 = vld [vmem:[#allocation2 + $0x8d0] sm:$0xf0]  ;;  %v9631_v8 = vor.u32 %v12580_v60, %v9628_v62 }
 0x156   :  { %v12512_v43 = vld [vmem:[#allocation2 + $0x9c4] sm:$0xf]  ;;  %6834 = vmatpush.bf16.msrb.mxu0 %v8623_v56  ;;  %v9356_v9 = vld [vmem:[#allocation2 + $0x9d0] sm:$0xf0]  ;;  %v9231_v24 = vor.u32 %v12480_v3, %v9228_v4  ;;  %v6628_v3 = vpop.f32.mrf.mxu0 }
 0x157   :  { %v12544_v14 = vld [vmem:[#allocation2 + $0xac4] sm:$0xf]  ;;  %v9484_v52 = vld [vmem:[#allocation2 + $0xad0] sm:$0xf0]  ;;  %6847 = vmatpush.bf16.msrb.mxu1 %v8751_v21  ;;  %v9359_v48 = vor.u32 %v12512_v43, %v9356_v9 }
 0x158   :  { %6860 = vmatpush.bf16.msrb.mxu2 %v8879_v61  ;;  %v12576_v32 = vld [vmem:[#allocation2 + $0xbc4] sm:$0xf]  ;;  %v9612_v15 = vld [vmem:[#allocation2 + $0xbd0] sm:$0xf0]  ;;  %v9487_v26 = vor.u32 %v12544_v14, %v9484_v52  ;;  %v6641_v14 = vpop.f32.mrf.mxu1 }
 0x159   :  { %6873 = vmatpush.bf16.msrb.mxu3 %v9007_v63  ;;  %v12476_v36 = vld [vmem:[#allocation2 + $0x8a4] sm:$0xf]  ;;  %v9212_v27 = vld [vmem:[#allocation2 + $0x8b0] sm:$0xf0]  ;;  %v9615_v40 = vor.u32 %v12576_v32, %v9612_v15  ;;  %6835 = vmatmul.bf16.vlgmr.msrb.gmra.mxu0 %v13415_v41 }
 0x15a   :  { %6879 = vmatpush.bf16.msra.mxu0 %v9247_v0  ;;  %v12508_v39 = vld [vmem:[#allocation2 + $0x9a4] sm:$0xf]  ;;  %v9340_v47 = vld [vmem:[#allocation2 + $0x9b0] sm:$0xf0]  ;;  %v9215_v57 = vor.u32 %v12476_v36, %v9212_v27  ;;  %6848 = vmatmul.bf16.vlgmr.msrb.gmra.mxu1 %v13419_v44 }
 0x15b   :  { %6892 = vmatpush.bf16.msra.mxu1 %v9375_v2  ;;  %6861 = vmatmul.bf16.vlgmr.msrb.gmra.mxu2 %v13413_v38  ;;  %v12540_v50 = vld [vmem:[#allocation2 + $0xaa4] sm:$0xf]  ;;  %v9468_v51 = vld [vmem:[#allocation2 + $0xab0] sm:$0xf0]  ;;  %v9343_v59 = vor.u32 %v12508_v39, %v9340_v47 }
 0x15c   :  { %6905 = vmatpush.bf16.msra.mxu2 %v9503_v1  ;;  %v12572_v56 = vld [vmem:[#allocation2 + $0xba4] sm:$0xf]  ;;  %v9596_v6 = vld [vmem:[#allocation2 + $0xbb0] sm:$0xf0]  ;;  %6874 = vmatmul.bf16.vlgmr.msrb.gmra.mxu3 %v13417_v42  ;;  %v9471_v21 = vor.u32 %v12540_v50, %v9468_v51 }
 0x15d   :  { %6918 = vmatpush.bf16.msra.mxu3 %v9631_v8  ;;  %v12472_v61 = vld [vmem:[#allocation2 + $0x884] sm:$0xf]  ;;  %v9196_v60 = vld [vmem:[#allocation2 + $0x890] sm:$0xf0]  ;;  %v9599_v63 = vor.u32 %v12572_v56, %v9596_v6  ;;  %v6629_v8 = vadd.f32 %v6628_v3, %v13549_v58 }
 0x15e   :  { %6880 = vmatpush.bf16.msra.mxu0 %v9231_v24  ;;  %v12504_v62 = vld [vmem:[#allocation2 + $0x984] sm:$0xf]  ;;  %v9324_v0 = vld [vmem:[#allocation2 + $0x990] sm:$0xf0]  ;;  %v9199_v9 = vor.u32 %v12472_v61, %v9196_v60  ;;  %v6654_v61 = vpop.f32.mrf.mxu2 }
 0x15f   :  { %6893 = vmatpush.bf16.msra.mxu1 %v9359_v48  ;;  %v12536_v2 = vld [vmem:[#allocation2 + $0xa84] sm:$0xf]  ;;  %v9452_v1 = vld [vmem:[#allocation2 + $0xa90] sm:$0xf0]  ;;  %v9327_v52 = vor.u32 %v12504_v62, %v9324_v0  ;;  %v6642_v36 = vadd.f32 %v6641_v14, %v6629_v8 }
 0x160   :  { %6906 = vmatpush.bf16.msra.mxu2 %v9487_v26  ;;  %v12568_v4 = vld [vmem:[#allocation2 + $0xb84] sm:$0xf]  ;;  %v9580_v43 = vld [vmem:[#allocation2 + $0xb90] sm:$0xf0]  ;;  %v9455_v32 = vor.u32 %v12536_v2, %v9452_v1  ;;  %v6667_v2 = vpop.f32.mrf.mxu3  ;;  %v6643_v8 = vpop.f32.mrf.mxu1 }
 0x161   :  { %6919 = vmatpush.bf16.msra.mxu3 %v9615_v40  ;;  %v12468_v15 = vld [vmem:[#allocation2 + $0x864] sm:$0xf]  ;;  %v9180_v24 = vld [vmem:[#allocation2 + $0x870] sm:$0xf0]  ;;  %v9583_v26 = vor.u32 %v12568_v4, %v9580_v43  ;;  %v6655_v0 = vadd.f32 %v6654_v61, %v6642_v36  ;;  %v6630_v4 = vpop.f32.mrf.mxu0 }
 0x162   :  { %6881 = vmatpush.bf16.msra.mxu0 %v9215_v57  ;;  %v12500_v48 = vld [vmem:[#allocation2 + $0x964] sm:$0xf]  ;;  %v9308_v27 = vld [vmem:[#allocation2 + $0x970] sm:$0xf0]  ;;  %v9183_v51 = vor.u32 %v12468_v15, %v9180_v24 }
 0x163   :  { %6894 = vmatpush.bf16.msra.mxu1 %v9343_v59  ;;  %v12532_v39 = vld [vmem:[#allocation2 + $0xa64] sm:$0xf]  ;;  %v9436_v40 = vld [vmem:[#allocation2 + $0xa70] sm:$0xf0]  ;;  %v9311_v58 = vor.u32 %v12500_v48, %v9308_v27 }
 0x164   :  { %6907 = vmatpush.bf16.msra.mxu2 %v9471_v21  ;;  %v12564_v47 = vld [vmem:[#allocation2 + $0xb64] sm:$0xf]  ;;  %v9564_v50 = vld [vmem:[#allocation2 + $0xb70] sm:$0xf0]  ;;  %v9439_v56 = vor.u32 %v12532_v39, %v9436_v40 }
 0x165   :  { %6920 = vmatpush.bf16.msra.mxu3 %v9599_v63  ;;  %v12464_v6 = vld [vmem:[#allocation2 + $0x844] sm:$0xf]  ;;  %v9164_v57 = vld [vmem:[#allocation2 + $0x850] sm:$0xf0]  ;;  %v9567_v21 = vor.u32 %v12564_v47, %v9564_v50 }
 0x166   :  { %6882 = vmatpush.bf16.msra.mxu0 %v9199_v9  ;;  %v12496_v59 = vld [vmem:[#allocation2 + $0x944] sm:$0xf]  ;;  %v9292_v60 = vld [vmem:[#allocation2 + $0x950] sm:$0xf0]  ;;  %v9167_v43 = vor.u32 %v12464_v6, %v9164_v57  ;;  %v13556_v9 = vadd.f32 %v6667_v2, %v6655_v0 }
 0x167   :  { %6895 = vmatpush.bf16.msra.mxu1 %v9327_v52  ;;  %v12528_v62 = vld [vmem:[#allocation2 + $0xa44] sm:$0xf]  ;;  %v9420_v63 = vld [vmem:[#allocation2 + $0xa50] sm:$0xf0]  ;;  %v9295_v14 = vor.u32 %v12496_v59, %v9292_v60 }
 0x168   :  { %6908 = vmatpush.bf16.msra.mxu2 %v9455_v32  ;;  %v12560_v1 = vld [vmem:[#allocation2 + $0xb44] sm:$0xf]  ;;  %v9548_v3 = vld [vmem:[#allocation2 + $0xb50] sm:$0xf0]  ;;  %v9423_v52 = vor.u32 %v12528_v62, %v9420_v63  ;;  %v6656_v63 = vpop.f32.mrf.mxu2 }
 0x169   :  { %6921 = vmatpush.bf16.msra.mxu3 %v9583_v26  ;;  %v12460_v32 = vld [vmem:[#allocation2 + $0x824] sm:$0xf]  ;;  %v9148_v15 = vld [vmem:[#allocation2 + $0x830] sm:$0xf0]  ;;  %v9551_v48 = vor.u32 %v12560_v1, %v9548_v3  ;;  %v6669_v3 = vpop.f32.mrf.mxu3 }
 0x16a   :  { %6883 = vmatpush.bf16.msra.mxu0 %v9183_v51  ;;  %v12492_v24 = vld [vmem:[#allocation2 + $0x924] sm:$0xf]  ;;  %v9276_v26 = vld [vmem:[#allocation2 + $0x930] sm:$0xf0]  ;;  %v9151_v47 = vor.u32 %v12460_v32, %v9148_v15 }
 0x16b   :  { %6896 = vmatpush.bf16.msra.mxu1 %v9311_v58  ;;  %v12524_v36 = vld [vmem:[#allocation2 + $0xa24] sm:$0xf]  ;;  %v9404_v27 = vld [vmem:[#allocation2 + $0xa30] sm:$0xf0]  ;;  %v9279_v58 = vor.u32 %v12492_v24, %v9276_v26 }
 0x16c   :  { %6909 = vmatpush.bf16.msra.mxu2 %v9439_v56  ;;  %v12556_v39 = vld [vmem:[#allocation2 + $0xb24] sm:$0xf]  ;;  %v9532_v40 = vld [vmem:[#allocation2 + $0xb30] sm:$0xf0]  ;;  %v9407_v56 = vor.u32 %v12524_v36, %v9404_v27 }
 0x16d   :  { %6922 = vmatpush.bf16.msra.mxu3 %v9567_v21  ;;  %v12456_v50 = vld [vmem:[#allocation2 + $0x804] sm:$0xf]  ;;  %v9132_v51 = vld [vmem:[#allocation2 + $0x810] sm:$0xf0]  ;;  %v9535_v61 = vor.u32 %v12556_v39, %v9532_v40 }
 0x16e   :  { %6884 = vmatpush.bf16.msra.mxu0 %v9167_v43  ;;  %v12488_v6 = vld [vmem:[#allocation2 + $0x904] sm:$0xf]  ;;  %v9260_v57 = vld [vmem:[#allocation2 + $0x910] sm:$0xf0]  ;;  %v9135_v4 = vor.u32 %v12456_v50, %v9132_v51 }
 0x16f   :  { %6897 = vmatpush.bf16.msra.mxu1 %v9295_v14  ;;  %v12520_v59 = vld [vmem:[#allocation2 + $0xa04] sm:$0xf]  ;;  %v9388_v21 = vld [vmem:[#allocation2 + $0xa10] sm:$0xf0] }
 0x170   :  { %6910 = vmatpush.bf16.msra.mxu2 %v9423_v52  ;;  %v12552_v60 = vld [vmem:[#allocation2 + $0xb04] sm:$0xf]  ;;  %v9516_v62 = vld [vmem:[#allocation2 + $0xb10] sm:$0xf0]  ;;  %v9263_v52 = vor.u32 %v12488_v6, %v9260_v57  ;;  %v9391_v32 = vor.u32 %v12520_v59, %v9388_v21 }
 0x171   :  { %6923 = vmatpush.bf16.msra.mxu3 %v9551_v48  ;;  %v12612_v0 = vld [vmem:[#allocation2 + $0xce4] sm:$0xf]  ;;  %v9756_v2 = vld [vmem:[#allocation2 + $0xcf0] sm:$0xf0]  ;;  %v9519_v48 = vor.u32 %v12552_v60, %v9516_v62 }
 0x172   :  { %v12644_v1 = vld [vmem:[#allocation2 + $0xde4] sm:$0xf]  ;;  %6885 = vmatpush.bf16.msra.mxu0 %v9151_v47  ;;  %v9884_v43 = vld [vmem:[#allocation2 + $0xdf0] sm:$0xf0]  ;;  %v9759_v26 = vor.u32 %v12612_v0, %v9756_v2 }
 0x173   :  { %v12676_v8 = vld [vmem:[#allocation2 + $0xee4] sm:$0xf]  ;;  %v10012_v14 = vld [vmem:[#allocation2 + $0xef0] sm:$0xf0]  ;;  %6898 = vmatpush.bf16.msra.mxu1 %v9279_v58  ;;  %v9887_v36 = vor.u32 %v12644_v1, %v9884_v43 }
 0x174   :  { %6911 = vmatpush.bf16.msra.mxu2 %v9407_v56  ;;  %v12708_v15 = vld [vmem:[#allocation2 + $0xfe4] sm:$0xf]  ;;  %v10140_v24 = vld [vmem:[#allocation2 + $0xff0] sm:$0xf0]  ;;  %v10015_v27 = vor.u32 %v12676_v8, %v10012_v14 }
 0x175   :  { %6924 = vmatpush.bf16.msra.mxu3 %v9535_v61  ;;  %v12608_v39 = vld [vmem:[#allocation2 + $0xcc4] sm:$0xf]  ;;  %v9740_v40 = vld [vmem:[#allocation2 + $0xcd0] sm:$0xf0]  ;;  %v10143_v47 = vor.u32 %v12708_v15, %v10140_v24 }
 0x176   :  { %v12640_v63 = vld [vmem:[#allocation2 + $0xdc4] sm:$0xf]  ;;  %6886 = vmatpush.bf16.msra.mxu0 %v9135_v4  ;;  %v9868_v50 = vld [vmem:[#allocation2 + $0xdd0] sm:$0xf0]  ;;  %v9743_v6 = vor.u32 %v12608_v39, %v9740_v40 }
 0x177   :  { %v12672_v51 = vld [vmem:[#allocation2 + $0xec4] sm:$0xf]  ;;  %v9996_v3 = vld [vmem:[#allocation2 + $0xed0] sm:$0xf0]  ;;  %6899 = vmatpush.bf16.msra.mxu1 %v9263_v52  ;;  %v9871_v57 = vor.u32 %v12640_v63, %v9868_v50 }
 0x178   :  { %6912 = vmatpush.bf16.msra.mxu2 %v9391_v32  ;;  %v12704_v58 = vld [vmem:[#allocation2 + $0xfc4] sm:$0xf]  ;;  %v10124_v56 = vld [vmem:[#allocation2 + $0xfd0] sm:$0xf0]  ;;  %v9999_v59 = vor.u32 %v12672_v51, %v9996_v3  ;;  %v6680_v39 = vpop.f32.mrf.mxu0 }
 0x179   :  { %6925 = vmatpush.bf16.msra.mxu3 %v9519_v48  ;;  %v12604_v61 = vld [vmem:[#allocation2 + $0xca4] sm:$0xf]  ;;  %v9724_v21 = vld [vmem:[#allocation2 + $0xcb0] sm:$0xf0]  ;;  %6887 = vmatmul.bf16.vlgmr.msra.gmra.mxu0 %v13431_v25  ;;  %v10127_v62 = vor.u32 %v12704_v58, %v10124_v56  ;;  %v6693_v51 = vpop.f32.mrf.mxu1 }
 0x17a   :  { %6931 = vmatpush.bf16.msrb.mxu0 %v9759_v26  ;;  %v12636_v60 = vld [vmem:[#allocation2 + $0xda4] sm:$0xf]  ;;  %v9852_v0 = vld [vmem:[#allocation2 + $0xdb0] sm:$0xf0]  ;;  %6900 = vmatmul.bf16.vlgmr.msra.gmra.mxu1 %v13435_v30  ;;  %v9727_v8 = vor.u32 %v12604_v61, %v9724_v21 }
 0x17b   :  { %6944 = vmatpush.bf16.msrb.mxu1 %v9887_v36  ;;  %v12668_v2 = vld [vmem:[#allocation2 + $0xea4] sm:$0xf]  ;;  %v9980_v1 = vld [vmem:[#allocation2 + $0xeb0] sm:$0xf0]  ;;  %6913 = vmatmul.bf16.vlgmr.msra.gmra.mxu2 %v13433_v29  ;;  %v9855_v14 = vor.u32 %v12636_v60, %v9852_v0 }
 0x17c   :  { %6957 = vmatpush.bf16.msrb.mxu2 %v10015_v27  ;;  %v12700_v4 = vld [vmem:[#allocation2 + $0xfa4] sm:$0xf]  ;;  %v10108_v43 = vld [vmem:[#allocation2 + $0xfb0] sm:$0xf0]  ;;  %6926 = vmatmul.bf16.vlgmr.msra.gmra.mxu3 %v13437_v33  ;;  %v9983_v52 = vor.u32 %v12668_v2, %v9980_v1 }
 0x17d   :  { %6970 = vmatpush.bf16.msrb.mxu3 %v10143_v47  ;;  %v12600_v32 = vld [vmem:[#allocation2 + $0xc84] sm:$0xf]  ;;  %v9708_v15 = vld [vmem:[#allocation2 + $0xc90] sm:$0xf0]  ;;  %v10111_v48 = vor.u32 %v12700_v4, %v10108_v43  ;;  %v6681_v47 = vadd.f32 %v6680_v39, %v13556_v9 }
 0x17e   :  { %6932 = vmatpush.bf16.msrb.mxu0 %v9743_v6  ;;  %v12632_v24 = vld [vmem:[#allocation2 + $0xd84] sm:$0xf]  ;;  %v9836_v26 = vld [vmem:[#allocation2 + $0xd90] sm:$0xf0]  ;;  %v9711_v50 = vor.u32 %v12600_v32, %v9708_v15  ;;  %v6706_v32 = vpop.f32.mrf.mxu2 }
 0x17f   :  { %6945 = vmatpush.bf16.msrb.mxu1 %v9871_v57  ;;  %v12664_v36 = vld [vmem:[#allocation2 + $0xe84] sm:$0xf]  ;;  %v9964_v27 = vld [vmem:[#allocation2 + $0xe90] sm:$0xf0]  ;;  %v9839_v3 = vor.u32 %v12632_v24, %v9836_v26  ;;  %v6694_v61 = vadd.f32 %v6693_v51, %v6681_v47 }
 0x180   :  { %6958 = vmatpush.bf16.msrb.mxu2 %v9999_v59  ;;  %v12696_v40 = vld [vmem:[#allocation2 + $0xf84] sm:$0xf]  ;;  %v10092_v63 = vld [vmem:[#allocation2 + $0xf90] sm:$0xf0]  ;;  %v9967_v58 = vor.u32 %v12664_v36, %v9964_v27 }
 0x181   :  { %6971 = vmatpush.bf16.msrb.mxu3 %v10127_v62  ;;  %v12596_v56 = vld [vmem:[#allocation2 + $0xc64] sm:$0xf]  ;;  %v9692_v6 = vld [vmem:[#allocation2 + $0xc70] sm:$0xf0]  ;;  %v10095_v59 = vor.u32 %v12696_v40, %v10092_v63  ;;  %v6707_v26 = vadd.f32 %v6706_v32, %v6694_v61  ;;  %v6719_v36 = vpop.f32.mrf.mxu3  ;;  %v6682_v40 = vpop.f32.mrf.mxu0 }
 0x182   :  { %6933 = vmatpush.bf16.msrb.mxu0 %v9727_v8  ;;  %v12628_v57 = vld [vmem:[#allocation2 + $0xd64] sm:$0xf]  ;;  %v9820_v21 = vld [vmem:[#allocation2 + $0xd70] sm:$0xf0]  ;;  %v9695_v1 = vor.u32 %v12596_v56, %v9692_v6  ;;  %v6695_v47 = vpop.f32.mrf.mxu1 }
 0x183   :  { %6946 = vmatpush.bf16.msrb.mxu1 %v9855_v14  ;;  %v12660_v60 = vld [vmem:[#allocation2 + $0xe64] sm:$0xf]  ;;  %v9948_v62 = vld [vmem:[#allocation2 + $0xe70] sm:$0xf0]  ;;  %v9823_v9 = vor.u32 %v12628_v57, %v9820_v21 }
 0x184   :  { %6959 = vmatpush.bf16.msrb.mxu2 %v9983_v52  ;;  %v12692_v0 = vld [vmem:[#allocation2 + $0xf64] sm:$0xf]  ;;  %v10076_v2 = vld [vmem:[#allocation2 + $0xf70] sm:$0xf0]  ;;  %v9951_v4 = vor.u32 %v12660_v60, %v9948_v62 }
 0x185   :  { %6972 = vmatpush.bf16.msrb.mxu3 %v10111_v48  ;;  %v12592_v43 = vld [vmem:[#allocation2 + $0xc44] sm:$0xf]  ;;  %v9676_v8 = vld [vmem:[#allocation2 + $0xc50] sm:$0xf0]  ;;  %v10079_v52 = vor.u32 %v12692_v0, %v10076_v2 }
 0x186   :  { %6934 = vmatpush.bf16.msrb.mxu0 %v9711_v50  ;;  %v12624_v14 = vld [vmem:[#allocation2 + $0xd44] sm:$0xf]  ;;  %v9804_v15 = vld [vmem:[#allocation2 + $0xd50] sm:$0xf0]  ;;  %v9679_v63 = vor.u32 %v12592_v43, %v9676_v8  ;;  %v13563_v50 = vadd.f32 %v6719_v36, %v6707_v26 }
 0x187   :  { %6947 = vmatpush.bf16.msrb.mxu1 %v9839_v3  ;;  %v12656_v24 = vld [vmem:[#allocation2 + $0xe44] sm:$0xf]  ;;  %v9932_v48 = vld [vmem:[#allocation2 + $0xe50] sm:$0xf0]  ;;  %v9807_v51 = vor.u32 %v12624_v14, %v9804_v15 }
 0x188   :  { %6960 = vmatpush.bf16.msrb.mxu2 %v9967_v58  ;;  %v12688_v27 = vld [vmem:[#allocation2 + $0xf44] sm:$0xf]  ;;  %v10060_v39 = vld [vmem:[#allocation2 + $0xf50] sm:$0xf0]  ;;  %v9935_v3 = vor.u32 %v12656_v24, %v9932_v48  ;;  %v6708_v48 = vpop.f32.mrf.mxu2 }
 0x189   :  { %6973 = vmatpush.bf16.msrb.mxu3 %v10095_v59  ;;  %v12588_v58 = vld [vmem:[#allocation2 + $0xc24] sm:$0xf]  ;;  %v9660_v56 = vld [vmem:[#allocation2 + $0xc30] sm:$0xf0]  ;;  %v10063_v57 = vor.u32 %v12688_v27, %v10060_v39  ;;  %v6721_v39 = vpop.f32.mrf.mxu3 }
 0x18a   :  { %6935 = vmatpush.bf16.msrb.mxu0 %v9695_v1  ;;  %v12620_v6 = vld [vmem:[#allocation2 + $0xd24] sm:$0xf]  ;;  %v9788_v59 = vld [vmem:[#allocation2 + $0xd30] sm:$0xf0]  ;;  %v9663_v0 = vor.u32 %v12588_v58, %v9660_v56 }
 0x18b   :  { %6948 = vmatpush.bf16.msrb.mxu1 %v9823_v9  ;;  %v12652_v61 = vld [vmem:[#allocation2 + $0xe24] sm:$0xf]  ;;  %v9916_v21 = vld [vmem:[#allocation2 + $0xe30] sm:$0xf0]  ;;  %v9791_v9 = vor.u32 %v12620_v6, %v9788_v59 }
 0x18c   :  { %6961 = vmatpush.bf16.msrb.mxu2 %v9951_v4  ;;  %v12684_v60 = vld [vmem:[#allocation2 + $0xf24] sm:$0xf]  ;;  %v10044_v62 = vld [vmem:[#allocation2 + $0xf30] sm:$0xf0]  ;;  %v9919_v4 = vor.u32 %v12652_v61, %v9916_v21 }
 0x18d   :  { %6974 = vmatpush.bf16.msrb.mxu3 %v10079_v52  ;;  %v12584_v2 = vld [vmem:[#allocation2 + $0xc04] sm:$0xf]  ;;  %v9644_v1 = vld [vmem:[#allocation2 + $0xc10] sm:$0xf0]  ;;  %v10047_v32 = vor.u32 %v12684_v60, %v10044_v62 }
 0x18e   :  { %6936 = vmatpush.bf16.msrb.mxu0 %v9679_v63  ;;  %v12616_v43 = vld [vmem:[#allocation2 + $0xd04] sm:$0xf]  ;;  %v9772_v8 = vld [vmem:[#allocation2 + $0xd10] sm:$0xf0]  ;;  %v9647_v40 = vor.u32 %v12584_v2, %v9644_v1 }
 0x18f   :  { %6949 = vmatpush.bf16.msrb.mxu1 %v9807_v51  ;;  %v12648_v14 = vld [vmem:[#allocation2 + $0xe04] sm:$0xf]  ;;  %v9900_v52 = vld [vmem:[#allocation2 + $0xe10] sm:$0xf0] }
 0x190   :  { %6962 = vmatpush.bf16.msrb.mxu2 %v9935_v3  ;;  %v12680_v15 = vld [vmem:[#allocation2 + $0xf04] sm:$0xf]  ;;  %v10028_v24 = vld [vmem:[#allocation2 + $0xf10] sm:$0xf0]  ;;  %v9775_v3 = vor.u32 %v12616_v43, %v9772_v8  ;;  %v9903_v58 = vor.u32 %v12648_v14, %v9900_v52 }
 0x191   :  { %6975 = vmatpush.bf16.msrb.mxu3 %v10063_v57  ;;  %v12740_v26 = vld [vmem:[#allocation2 + $0x10e4] sm:$0xf]  ;;  %v10268_v36 = vld [vmem:[#allocation2 + $0x10f0] sm:$0xf0]  ;;  %v10031_v57 = vor.u32 %v12680_v15, %v10028_v24 }
 0x192   :  { %v12772_v27 = vld [vmem:[#allocation2 + $0x11e4] sm:$0xf]  ;;  %6937 = vmatpush.bf16.msrb.mxu0 %v9663_v0  ;;  %v10396_v63 = vld [vmem:[#allocation2 + $0x11f0] sm:$0xf0]  ;;  %v10271_v59 = vor.u32 %v12740_v26, %v10268_v36 }
 0x193   :  { %v12804_v47 = vld [vmem:[#allocation2 + $0x12e4] sm:$0xf]  ;;  %v10524_v51 = vld [vmem:[#allocation2 + $0x12f0] sm:$0xf0]  ;;  %6950 = vmatpush.bf16.msrb.mxu1 %v9791_v9  ;;  %v10399_v61 = vor.u32 %v12772_v27, %v10396_v63 }
 0x194   :  { %6963 = vmatpush.bf16.msrb.mxu2 %v9919_v4  ;;  %v12836_v56 = vld [vmem:[#allocation2 + $0x13e4] sm:$0xf]  ;;  %v10652_v6 = vld [vmem:[#allocation2 + $0x13f0] sm:$0xf0]  ;;  %v10527_v21 = vor.u32 %v12804_v47, %v10524_v51 }
 0x195   :  { %6976 = vmatpush.bf16.msrb.mxu3 %v10047_v32  ;;  %v12736_v60 = vld [vmem:[#allocation2 + $0x10c4] sm:$0xf]  ;;  %v10252_v62 = vld [vmem:[#allocation2 + $0x10d0] sm:$0xf0]  ;;  %v10655_v0 = vor.u32 %v12836_v56, %v10652_v6 }
 0x196   :  { %v12768_v48 = vld [vmem:[#allocation2 + $0x11c4] sm:$0xf]  ;;  %6938 = vmatpush.bf16.msrb.mxu0 %v9647_v40  ;;  %v10380_v2 = vld [vmem:[#allocation2 + $0x11d0] sm:$0xf0]  ;;  %v10255_v43 = vor.u32 %v12736_v60, %v10252_v62  ;;  %v6732_v60 = vpop.f32.mrf.mxu0 }
 0x197   :  { %v12800_v1 = vld [vmem:[#allocation2 + $0x12c4] sm:$0xf]  ;;  %v10508_v39 = vld [vmem:[#allocation2 + $0x12d0] sm:$0xf0]  ;;  %6951 = vmatpush.bf16.msrb.mxu1 %v9775_v3  ;;  %v10383_v8 = vor.u32 %v12768_v48, %v10380_v2 }
 0x198   :  { %6964 = vmatpush.bf16.msrb.mxu2 %v9903_v58  ;;  %v12832_v9 = vld [vmem:[#allocation2 + $0x13c4] sm:$0xf]  ;;  %v10636_v4 = vld [vmem:[#allocation2 + $0x13d0] sm:$0xf0]  ;;  %v10511_v14 = vor.u32 %v12800_v1, %v10508_v39  ;;  %v6745_v1 = vpop.f32.mrf.mxu1 }
 0x199   :  { %6977 = vmatpush.bf16.msrb.mxu3 %v10031_v57  ;;  %v12732_v32 = vld [vmem:[#allocation2 + $0x10a4] sm:$0xf]  ;;  %v10236_v52 = vld [vmem:[#allocation2 + $0x10b0] sm:$0xf0]  ;;  %6939 = vmatmul.bf16.vlgmr.msrb.gmra.mxu0 %v13449_v23  ;;  %v10639_v24 = vor.u32 %v12832_v9, %v10636_v4 }
 0x19a   :  { %6983 = vmatpush.bf16.msra.mxu0 %v10271_v59  ;;  %v12764_v15 = vld [vmem:[#allocation2 + $0x11a4] sm:$0xf]  ;;  %v10364_v26 = vld [vmem:[#allocation2 + $0x11b0] sm:$0xf0]  ;;  %6952 = vmatmul.bf16.vlgmr.msrb.gmra.mxu1 %v13453_v31  ;;  %v10239_v47 = vor.u32 %v12732_v32, %v10236_v52 }
 0x19b   :  { %6996 = vmatpush.bf16.msra.mxu1 %v10399_v61  ;;  %v12796_v36 = vld [vmem:[#allocation2 + $0x12a4] sm:$0xf]  ;;  %v10492_v27 = vld [vmem:[#allocation2 + $0x12b0] sm:$0xf0]  ;;  %6965 = vmatmul.bf16.vlgmr.msrb.gmra.mxu2 %v13451_v28  ;;  %v10367_v51 = vor.u32 %v12764_v15, %v10364_v26 }
 0x19c   :  { %7009 = vmatpush.bf16.msra.mxu2 %v10527_v21  ;;  %v12828_v40 = vld [vmem:[#allocation2 + $0x13a4] sm:$0xf]  ;;  %v10620_v63 = vld [vmem:[#allocation2 + $0x13b0] sm:$0xf0]  ;;  %6978 = vmatmul.bf16.vlgmr.msrb.gmra.mxu3 %v13455_v35  ;;  %v10495_v3 = vor.u32 %v12796_v36, %v10492_v27 }
 0x19d   :  { %7022 = vmatpush.bf16.msra.mxu3 %v10655_v0  ;;  %v12728_v58 = vld [vmem:[#allocation2 + $0x1084] sm:$0xf]  ;;  %v10220_v56 = vld [vmem:[#allocation2 + $0x1090] sm:$0xf0]  ;;  %v10623_v57 = vor.u32 %v12828_v40, %v10620_v63  ;;  %v6733_v0 = vadd.f32 %v6732_v60, %v13563_v50 }
 0x19e   :  { %6984 = vmatpush.bf16.msra.mxu0 %v10255_v43  ;;  %v12760_v6 = vld [vmem:[#allocation2 + $0x1184] sm:$0xf]  ;;  %v10348_v59 = vld [vmem:[#allocation2 + $0x1190] sm:$0xf0]  ;;  %v10223_v2 = vor.u32 %v12728_v58, %v10220_v56  ;;  %v6758_v58 = vpop.f32.mrf.mxu2 }
 0x19f   :  { %6997 = vmatpush.bf16.msra.mxu1 %v10383_v8  ;;  %v12792_v61 = vld [vmem:[#allocation2 + $0x1284] sm:$0xf]  ;;  %v10476_v21 = vld [vmem:[#allocation2 + $0x1290] sm:$0xf0]  ;;  %v10351_v39 = vor.u32 %v12760_v6, %v10348_v59  ;;  %v6746_v32 = vadd.f32 %v6745_v1, %v6733_v0 }
 0x1a0   :  { %7010 = vmatpush.bf16.msra.mxu2 %v10511_v14  ;;  %v12824_v62 = vld [vmem:[#allocation2 + $0x1384] sm:$0xf]  ;;  %v10604_v48 = vld [vmem:[#allocation2 + $0x1390] sm:$0xf0]  ;;  %v10479_v9 = vor.u32 %v12792_v61, %v10476_v21  ;;  %v6771_v61 = vpop.f32.mrf.mxu3  ;;  %v6747_v0 = vpop.f32.mrf.mxu1 }
 0x1a1   :  { %7023 = vmatpush.bf16.msra.mxu3 %v10639_v24  ;;  %v12724_v4 = vld [vmem:[#allocation2 + $0x1064] sm:$0xf]  ;;  %v10204_v43 = vld [vmem:[#allocation2 + $0x1070] sm:$0xf0]  ;;  %v10607_v14 = vor.u32 %v12824_v62, %v10604_v48  ;;  %v6759_v59 = vadd.f32 %v6758_v58, %v6746_v32  ;;  %v6734_v62 = vpop.f32.mrf.mxu0 }
 0x1a2   :  { %6985 = vmatpush.bf16.msra.mxu0 %v10239_v47  ;;  %v12756_v8 = vld [vmem:[#allocation2 + $0x1164] sm:$0xf]  ;;  %v10332_v52 = vld [vmem:[#allocation2 + $0x1170] sm:$0xf0]  ;;  %v10207_v27 = vor.u32 %v12724_v4, %v10204_v43 }
 0x1a3   :  { %6998 = vmatpush.bf16.msra.mxu1 %v10367_v51  ;;  %v12788_v15 = vld [vmem:[#allocation2 + $0x1264] sm:$0xf]  ;;  %v10460_v24 = vld [vmem:[#allocation2 + $0x1270] sm:$0xf0]  ;;  %v10335_v50 = vor.u32 %v12756_v8, %v10332_v52 }
 0x1a4   :  { %7011 = vmatpush.bf16.msra.mxu2 %v10495_v3  ;;  %v12820_v26 = vld [vmem:[#allocation2 + $0x1364] sm:$0xf]  ;;  %v10588_v36 = vld [vmem:[#allocation2 + $0x1370] sm:$0xf0]  ;;  %v10463_v40 = vor.u32 %v12788_v15, %v10460_v24 }
 0x1a5   :  { %7024 = vmatpush.bf16.msra.mxu3 %v10623_v57  ;;  %v12720_v63 = vld [vmem:[#allocation2 + $0x1044] sm:$0xf]  ;;  %v10188_v47 = vld [vmem:[#allocation2 + $0x1050] sm:$0xf0]  ;;  %v10591_v3 = vor.u32 %v12820_v26, %v10588_v36 }
 0x1a6   :  { %6986 = vmatpush.bf16.msra.mxu0 %v10223_v2  ;;  %v12752_v51 = vld [vmem:[#allocation2 + $0x1144] sm:$0xf]  ;;  %v10316_v56 = vld [vmem:[#allocation2 + $0x1150] sm:$0xf0]  ;;  %v10191_v48 = vor.u32 %v12720_v63, %v10188_v47  ;;  %v13570_v2 = vadd.f32 %v6771_v61, %v6759_v59 }
 0x1a7   :  { %6999 = vmatpush.bf16.msra.mxu1 %v10351_v39  ;;  %v12784_v6 = vld [vmem:[#allocation2 + $0x1244] sm:$0xf]  ;;  %v10444_v57 = vld [vmem:[#allocation2 + $0x1250] sm:$0xf0]  ;;  %v10319_v1 = vor.u32 %v12752_v51, %v10316_v56 }
 0x1a8   :  { %7012 = vmatpush.bf16.msra.mxu2 %v10479_v9  ;;  %v12816_v21 = vld [vmem:[#allocation2 + $0x1344] sm:$0xf]  ;;  %v10572_v60 = vld [vmem:[#allocation2 + $0x1350] sm:$0xf0]  ;;  %13730 = vst [vmem:[#allocation12_spill] sm:$0xff] %v13570_v2  ;;  %v10447_v39 = vor.u32 %v12784_v6, %v10444_v57  ;;  %v6760_v57 = vpop.f32.mrf.mxu2 }
 0x1a9   :  { %7025 = vmatpush.bf16.msra.mxu3 %v10607_v14  ;;  %v12716_v9 = vld [vmem:[#allocation2 + $0x1024] sm:$0xf]  ;;  %v10172_v4 = vld [vmem:[#allocation2 + $0x1030] sm:$0xf0]  ;;  %v10575_v8 = vor.u32 %v12816_v21, %v10572_v60  ;;  %v6773_v60 = vpop.f32.mrf.mxu3 }
 0x1aa   :  { %6987 = vmatpush.bf16.msra.mxu0 %v10207_v27  ;;  %v12748_v43 = vld [vmem:[#allocation2 + $0x1124] sm:$0xf]  ;;  %v10300_v14 = vld [vmem:[#allocation2 + $0x1130] sm:$0xf0]  ;;  %v10175_v26 = vor.u32 %v12716_v9, %v10172_v4 }
 0x1ab   :  { %7000 = vmatpush.bf16.msra.mxu1 %v10335_v50  ;;  %v12780_v32 = vld [vmem:[#allocation2 + $0x1224] sm:$0xf]  ;;  %v10428_v52 = vld [vmem:[#allocation2 + $0x1230] sm:$0xf0]  ;;  %v10303_v50 = vor.u32 %v12748_v43, %v10300_v14 }
 0x1ac   :  { %7013 = vmatpush.bf16.msra.mxu2 %v10463_v40  ;;  %v12812_v15 = vld [vmem:[#allocation2 + $0x1324] sm:$0xf]  ;;  %v10556_v24 = vld [vmem:[#allocation2 + $0x1330] sm:$0xf0]  ;;  %v10431_v40 = vor.u32 %v12780_v32, %v10428_v52 }
 0x1ad   :  { %7026 = vmatpush.bf16.msra.mxu3 %v10591_v3  ;;  %v12712_v36 = vld [vmem:[#allocation2 + $0x1004] sm:$0xf]  ;;  %v10156_v27 = vld [vmem:[#allocation2 + $0x1010] sm:$0xf0]  ;;  %v10559_v58 = vor.u32 %v12812_v15, %v10556_v24 }
 0x1ae   :  { %6988 = vmatpush.bf16.msra.mxu0 %v10191_v48  ;;  %v12744_v63 = vld [vmem:[#allocation2 + $0x1104] sm:$0xf]  ;;  %v10284_v47 = vld [vmem:[#allocation2 + $0x1110] sm:$0xf0]  ;;  %v10159_v62 = vor.u32 %v12712_v36, %v10156_v27 }
 0x1af   :  { %7001 = vmatpush.bf16.msra.mxu1 %v10319_v1  ;;  %v12776_v51 = vld [vmem:[#allocation2 + $0x1204] sm:$0xf]  ;;  %v10412_v3 = vld [vmem:[#allocation2 + $0x1210] sm:$0xf0] }
 0x1b0   :  { %7014 = vmatpush.bf16.msra.mxu2 %v10447_v39  ;;  %v12808_v56 = vld [vmem:[#allocation2 + $0x1304] sm:$0xf]  ;;  %v10540_v6 = vld [vmem:[#allocation2 + $0x1310] sm:$0xf0]  ;;  %v10287_v39 = vor.u32 %v12744_v63, %v10284_v47  ;;  %v10415_v9 = vor.u32 %v12776_v51, %v10412_v3 }
 0x1b1   :  { %7027 = vmatpush.bf16.msra.mxu3 %v10575_v8  ;;  %v12868_v59 = vld [vmem:[#allocation2 + $0x14e4] sm:$0xf]  ;;  %v10780_v61 = vld [vmem:[#allocation2 + $0x14f0] sm:$0xf0]  ;;  %v10543_v8 = vor.u32 %v12808_v56, %v10540_v6 }
 0x1b2   :  { %v12900_v21 = vld [vmem:[#allocation2 + $0x15e4] sm:$0xf]  ;;  %6989 = vmatpush.bf16.msra.mxu0 %v10175_v26  ;;  %v10908_v48 = vld [vmem:[#allocation2 + $0x15f0] sm:$0xf0]  ;;  %v10783_v14 = vor.u32 %v12868_v59, %v10780_v61 }
 0x1b3   :  { %v12932_v0 = vld [vmem:[#allocation2 + $0x16e4] sm:$0xf]  ;;  %v11036_v1 = vld [vmem:[#allocation2 + $0x16f0] sm:$0xf0]  ;;  %7002 = vmatpush.bf16.msra.mxu1 %v10303_v50  ;;  %v10911_v32 = vor.u32 %v12900_v21, %v10908_v48 }
 0x1b4   :  { %7015 = vmatpush.bf16.msra.mxu2 %v10431_v40  ;;  %v12964_v4 = vld [vmem:[#allocation2 + $0x17e4] sm:$0xf]  ;;  %v11164_v43 = vld [vmem:[#allocation2 + $0x17f0] sm:$0xf0]  ;;  %v11039_v52 = vor.u32 %v12932_v0, %v11036_v1 }
 0x1b5   :  { %7028 = vmatpush.bf16.msra.mxu3 %v10559_v58  ;;  %v12864_v15 = vld [vmem:[#allocation2 + $0x14c4] sm:$0xf]  ;;  %v10764_v24 = vld [vmem:[#allocation2 + $0x14d0] sm:$0xf0]  ;;  %v11167_v26 = vor.u32 %v12964_v4, %v11164_v43 }
 0x1b6   :  { %v12896_v57 = vld [vmem:[#allocation2 + $0x15c4] sm:$0xf]  ;;  %6990 = vmatpush.bf16.msra.mxu0 %v10159_v62  ;;  %v10892_v36 = vld [vmem:[#allocation2 + $0x15d0] sm:$0xf0]  ;;  %v10767_v63 = vor.u32 %v12864_v15, %v10764_v24 }
 0x1b7   :  { %v12928_v27 = vld [vmem:[#allocation2 + $0x16c4] sm:$0xf]  ;;  %v11020_v60 = vld [vmem:[#allocation2 + $0x16d0] sm:$0xf0]  ;;  %7003 = vmatpush.bf16.msra.mxu1 %v10287_v39  ;;  %v10895_v47 = vor.u32 %v12896_v57, %v10892_v36 }
 0x1b8   :  { %7016 = vmatpush.bf16.msra.mxu2 %v10415_v9  ;;  %v12960_v50 = vld [vmem:[#allocation2 + $0x17c4] sm:$0xf]  ;;  %v11148_v40 = vld [vmem:[#allocation2 + $0x17d0] sm:$0xf0]  ;;  %v11023_v51 = vor.u32 %v12928_v27, %v11020_v60  ;;  %v6784_v27 = vpop.f32.mrf.mxu0 }
 0x1b9   :  { %7029 = vmatpush.bf16.msra.mxu3 %v10543_v8  ;;  %v12860_v58 = vld [vmem:[#allocation2 + $0x14a4] sm:$0xf]  ;;  %v10748_v3 = vld [vmem:[#allocation2 + $0x14b0] sm:$0xf0]  ;;  %6991 = vmatmul.bf16.vlgmr.msra.gmra.mxu0 %v13467_v37  ;;  %v11151_v6 = vor.u32 %v12960_v50, %v11148_v40  ;;  %v13235_v8 = vld [vmem:[#allocation4] sm:$0xf] }
 0x1ba   :  { %7035 = vmatpush.bf16.msrb.mxu0 %v10783_v14  ;;  %v12892_v56 = vld [vmem:[#allocation2 + $0x15a4] sm:$0xf]  ;;  %v10876_v59 = vld [vmem:[#allocation2 + $0x15b0] sm:$0xf0]  ;;  %7004 = vmatmul.bf16.vlgmr.msra.gmra.mxu1 %v13471_v46  ;;  %v10751_v0 = vor.u32 %v12860_v58, %v10748_v3  ;;  %v1120_v14 = vperm.slane %v13235_v8, 1  ;;  %v6797_v58 = vpop.f32.mrf.mxu1 }
 0x1bb   :  { %7048 = vmatpush.bf16.msrb.mxu1 %v10911_v32  ;;  %v12924_v61 = vld [vmem:[#allocation2 + $0x16a4] sm:$0xf]  ;;  %v11004_v21 = vld [vmem:[#allocation2 + $0x16b0] sm:$0xf0]  ;;  %7017 = vmatmul.bf16.vlgmr.msra.gmra.mxu2 %v13469_v45  ;;  %v10879_v39 = vor.u32 %v12892_v56, %v10876_v59 }
 0x1bc   :  { %7061 = vmatpush.bf16.msrb.mxu2 %v11039_v52  ;;  %v12956_v62 = vld [vmem:[#allocation2 + $0x17a4] sm:$0xf]  ;;  %v11132_v48 = vld [vmem:[#allocation2 + $0x17b0] sm:$0xf0]  ;;  %7030 = vmatmul.bf16.vlgmr.msra.gmra.mxu3 %v13473_v49  ;;  %v11007_v9 = vor.u32 %v12924_v61, %v11004_v21 }
 0x1bd   :  { %7074 = vmatpush.bf16.msrb.mxu3 %v11167_v26  ;;  %v12856_v1 = vld [vmem:[#allocation2 + $0x1484] sm:$0xf]  ;;  %v10732_v4 = vld [vmem:[#allocation2 + $0x1490] sm:$0xf0]  ;;  %v11135_v32 = vor.u32 %v12956_v62, %v11132_v48 }
 0x1be   :  { %7036 = vmatpush.bf16.msrb.mxu0 %v10767_v63  ;;  %v12888_v43 = vld [vmem:[#allocation2 + $0x1584] sm:$0xf]  ;;  %v10860_v52 = vld [vmem:[#allocation2 + $0x1590] sm:$0xf0]  ;;  %v10735_v36 = vor.u32 %v12856_v1, %v10732_v4 }
 0x1bf   :  { %7049 = vmatpush.bf16.msrb.mxu1 %v10895_v47  ;;  %v12920_v15 = vld [vmem:[#allocation2 + $0x1684] sm:$0xf]  ;;  %v10988_v24 = vld [vmem:[#allocation2 + $0x1690] sm:$0xf0]  ;;  %v10863_v60 = vor.u32 %v12888_v43, %v10860_v52  ;;  %v6810_v43 = vpop.f32.mrf.mxu2 }
 0x1c0   :  { %7062 = vmatpush.bf16.msrb.mxu2 %v11023_v51  ;;  %v12952_v57 = vld [vmem:[#allocation2 + $0x1784] sm:$0xf]  ;;  %v11116_v26 = vld [vmem:[#allocation2 + $0x1790] sm:$0xf0]  ;;  %v10991_v50 = vor.u32 %v12920_v15, %v10988_v24  ;;  %v6785_v51 = vadd.f32 %v6784_v27, %v1120_v14  ;;  %v6823_v24 = vpop.f32.mrf.mxu3 }
 0x1c1   :  { %7075 = vmatpush.bf16.msrb.mxu3 %v11151_v6  ;;  %v12852_v40 = vld [vmem:[#allocation2 + $0x1464] sm:$0xf]  ;;  %v10716_v63 = vld [vmem:[#allocation2 + $0x1470] sm:$0xf0]  ;;  %v11119_v3 = vor.u32 %v12952_v57, %v11116_v26 }
 0x1c2   :  { %7037 = vmatpush.bf16.msrb.mxu0 %v10751_v0  ;;  %v12884_v47 = vld [vmem:[#allocation2 + $0x1564] sm:$0xf]  ;;  %v10844_v56 = vld [vmem:[#allocation2 + $0x1570] sm:$0xf0]  ;;  %v6798_v62 = vadd.f32 %v6797_v58, %v6785_v51  ;;  %v10719_v48 = vor.u32 %v12852_v40, %v10716_v63  ;;  %v6799_v58 = vpop.f32.mrf.mxu1 }
 0x1c3   :  { %7050 = vmatpush.bf16.msrb.mxu1 %v10879_v39  ;;  %v12916_v6 = vld [vmem:[#allocation2 + $0x1664] sm:$0xf]  ;;  %v10972_v59 = vld [vmem:[#allocation2 + $0x1670] sm:$0xf0]  ;;  %v10847_v0 = vor.u32 %v12884_v47, %v10844_v56 }
 0x1c4   :  { %7063 = vmatpush.bf16.msrb.mxu2 %v11007_v9  ;;  %v12948_v61 = vld [vmem:[#allocation2 + $0x1764] sm:$0xf]  ;;  %v11100_v21 = vld [vmem:[#allocation2 + $0x1770] sm:$0xf0]  ;;  %v10975_v1 = vor.u32 %v12916_v6, %v10972_v59  ;;  %v6811_v15 = vadd.f32 %v6810_v43, %v6798_v62 }
 0x1c5   :  { %7076 = vmatpush.bf16.msrb.mxu3 %v11135_v32  ;;  %v12848_v39 = vld [vmem:[#allocation2 + $0x1444] sm:$0xf]  ;;  %v10700_v9 = vld [vmem:[#allocation2 + $0x1450] sm:$0xf0]  ;;  %v11103_v8 = vor.u32 %v12948_v61, %v11100_v21 }
 0x1c6   :  { %7038 = vmatpush.bf16.msrb.mxu0 %v10735_v36  ;;  %v12880_v4 = vld [vmem:[#allocation2 + $0x1544] sm:$0xf]  ;;  %v10828_v14 = vld [vmem:[#allocation2 + $0x1550] sm:$0xf0]  ;;  %v10703_v36 = vor.u32 %v12848_v39, %v10700_v9  ;;  %v13576_v27 = vadd.f32 %v6823_v24, %v6811_v15 }
 0x1c7   :  { %7051 = vmatpush.bf16.msrb.mxu1 %v10863_v60  ;;  %v12912_v32 = vld [vmem:[#allocation2 + $0x1644] sm:$0xf]  ;;  %v10956_v52 = vld [vmem:[#allocation2 + $0x1650] sm:$0xf0]  ;;  %v6786_v60 = vpop.f32.mrf.mxu0 }
 0x1c8   :  { %7064 = vmatpush.bf16.msrb.mxu2 %v10991_v50  ;;  %v12944_v57 = vld [vmem:[#allocation2 + $0x1744] sm:$0xf]  ;;  %v11084_v26 = vld [vmem:[#allocation2 + $0x1750] sm:$0xf0]  ;;  %v10831_v50 = vor.u32 %v12880_v4, %v10828_v14  ;;  %v10959_v40 = vor.u32 %v12912_v32, %v10956_v52  ;;  %v6812_v14 = vpop.f32.mrf.mxu2  ;;  %v6825_v24 = vpop.f32.mrf.mxu3 }
 0x1c9   :  { %7077 = vmatpush.bf16.msrb.mxu3 %v11119_v3  ;;  %v12844_v63 = vld [vmem:[#allocation2 + $0x1424] sm:$0xf]  ;;  %v10684_v47 = vld [vmem:[#allocation2 + $0x1430] sm:$0xf0]  ;;  %v11087_v3 = vor.u32 %v12944_v57, %v11084_v26 }
 0x1ca   :  { %7039 = vmatpush.bf16.msrb.mxu0 %v10719_v48  ;;  %v12876_v51 = vld [vmem:[#allocation2 + $0x1524] sm:$0xf]  ;;  %v10812_v56 = vld [vmem:[#allocation2 + $0x1530] sm:$0xf0]  ;;  %v10687_v62 = vor.u32 %v12844_v63, %v10684_v47 }
 0x1cb   :  { %7052 = vmatpush.bf16.msrb.mxu1 %v10847_v0  ;;  %v12908_v6 = vld [vmem:[#allocation2 + $0x1624] sm:$0xf]  ;;  %v10940_v59 = vld [vmem:[#allocation2 + $0x1630] sm:$0xf0]  ;;  %v10815_v0 = vor.u32 %v12876_v51, %v10812_v56 }
 0x1cc   :  { %7065 = vmatpush.bf16.msrb.mxu2 %v10975_v1  ;;  %v12940_v61 = vld [vmem:[#allocation2 + $0x1724] sm:$0xf]  ;;  %v11068_v21 = vld [vmem:[#allocation2 + $0x1730] sm:$0xf0]  ;;  %v10943_v1 = vor.u32 %v12908_v6, %v10940_v59 }
 0x1cd   :  { %7078 = vmatpush.bf16.msrb.mxu3 %v11103_v8  ;;  %v12840_v48 = vld [vmem:[#allocation2 + $0x1404] sm:$0xf]  ;;  %v10668_v39 = vld [vmem:[#allocation2 + $0x1410] sm:$0xf0]  ;;  %v11071_v8 = vor.u32 %v12940_v61, %v11068_v21 }
 0x1ce   :  { %7040 = vmatpush.bf16.msrb.mxu0 %v10703_v36  ;;  %v12872_v9 = vld [vmem:[#allocation2 + $0x1504] sm:$0xf]  ;;  %v10796_v4 = vld [vmem:[#allocation2 + $0x1510] sm:$0xf0]  ;;  %v10671_v60 = vor.u32 %v12840_v48, %v10668_v39 }
 0x1cf   :  { %7053 = vmatpush.bf16.msrb.mxu1 %v10831_v50  ;;  %v12904_v43 = vld [vmem:[#allocation2 + $0x1604] sm:$0xf]  ;;  %v10924_v32 = vld [vmem:[#allocation2 + $0x1610] sm:$0xf0]  ;;  %v10799_v47 = vor.u32 %v12872_v9, %v10796_v4 }
 0x1d0   :  { %7066 = vmatpush.bf16.msrb.mxu2 %v10959_v40  ;;  %v12936_v52 = vld [vmem:[#allocation2 + $0x1704] sm:$0xf]  ;;  %v11052_v15 = vld [vmem:[#allocation2 + $0x1710] sm:$0xf0]  ;;  %v10927_v51 = vor.u32 %v12904_v43, %v10924_v32 }
 0x1d1   :  { %7079 = vmatpush.bf16.msrb.mxu3 %v11087_v3  ;;  %v12996_v57 = vld [vmem:[#allocation2 + $0x18e4] sm:$0xf]  ;;  %v11292_v26 = vld [vmem:[#allocation2 + $0x18f0] sm:$0xf0]  ;;  %v11055_v3 = vor.u32 %v12936_v52, %v11052_v15 }
 0x1d2   :  { %v13028_v36 = vld [vmem:[#allocation2 + $0x19e4] sm:$0xf]  ;;  %7041 = vmatpush.bf16.msrb.mxu0 %v10687_v62  ;;  %v11420_v63 = vld [vmem:[#allocation2 + $0x19f0] sm:$0xf0]  ;;  %v11295_v6 = vor.u32 %v12996_v57, %v11292_v26 }
 0x1d3   :  { %v13060_v50 = vld [vmem:[#allocation2 + $0x1ae4] sm:$0xf]  ;;  %v11548_v40 = vld [vmem:[#allocation2 + $0x1af0] sm:$0xf0]  ;;  %7054 = vmatpush.bf16.msrb.mxu1 %v10815_v0  ;;  %v11423_v59 = vor.u32 %v13028_v36, %v11420_v63 }
 0x1d4   :  { %7067 = vmatpush.bf16.msrb.mxu2 %v10943_v1  ;;  %v13092_v58 = vld [vmem:[#allocation2 + $0x1be4] sm:$0xf]  ;;  %v11676_v56 = vld [vmem:[#allocation2 + $0x1bf0] sm:$0xf0]  ;;  %v11551_v61 = vor.u32 %v13060_v50, %v11548_v40 }
 0x1d5   :  { %7080 = vmatpush.bf16.msrb.mxu3 %v11071_v8  ;;  %v12992_v21 = vld [vmem:[#allocation2 + $0x18c4] sm:$0xf]  ;;  %v11276_v14 = vld [vmem:[#allocation2 + $0x18d0] sm:$0xf0]  ;;  %v11679_v62 = vor.u32 %v13092_v58, %v11676_v56 }
 0x1d6   :  { %v13024_v24 = vld [vmem:[#allocation2 + $0x19c4] sm:$0xf]  ;;  %7042 = vmatpush.bf16.msrb.mxu0 %v10671_v60  ;;  %v11404_v48 = vld [vmem:[#allocation2 + $0x19d0] sm:$0xf0]  ;;  %v11279_v9 = vor.u32 %v12992_v21, %v11276_v14 }
 0x1d7   :  { %v13056_v39 = vld [vmem:[#allocation2 + $0x1ac4] sm:$0xf]  ;;  %v11532_v2 = vld [vmem:[#allocation2 + $0x1ad0] sm:$0xf0]  ;;  %7055 = vmatpush.bf16.msrb.mxu1 %v10799_v47  ;;  %v11407_v4 = vor.u32 %v13024_v24, %v11404_v48  ;;  %v6836_v24 = vpop.f32.mrf.mxu0 }
 0x1d8   :  { %7068 = vmatpush.bf16.msrb.mxu2 %v10927_v51  ;;  %v13088_v0 = vld [vmem:[#allocation2 + $0x1bc4] sm:$0xf]  ;;  %v11660_v1 = vld [vmem:[#allocation2 + $0x1bd0] sm:$0xf0]  ;;  %v11535_v43 = vor.u32 %v13056_v39, %v11532_v2 }
 0x1d9   :  { %7081 = vmatpush.bf16.msrb.mxu3 %v11055_v3  ;;  %v12988_v8 = vld [vmem:[#allocation2 + $0x18a4] sm:$0xf]  ;;  %v11260_v32 = vld [vmem:[#allocation2 + $0x18b0] sm:$0xf0]  ;;  %7043 = vmatmul.bf16.vlgmr.msrb.gmra.mxu0 %v13487_v7  ;;  %v11663_v15 = vor.u32 %v13088_v0, %v11660_v1 }
 0x1da   :  { %7087 = vmatpush.bf16.msra.mxu0 %v11295_v6  ;;  %v13020_v52 = vld [vmem:[#allocation2 + $0x19a4] sm:$0xf]  ;;  %v11388_v57 = vld [vmem:[#allocation2 + $0x19b0] sm:$0xf0]  ;;  %7056 = vmatmul.bf16.vlgmr.msrb.gmra.mxu1 %v13491_v12  ;;  %v11263_v2 = vor.u32 %v12988_v8, %v11260_v32 }
 0x1db   :  { %7100 = vmatpush.bf16.msra.mxu1 %v11423_v59  ;;  %v13052_v26 = vld [vmem:[#allocation2 + $0x1aa4] sm:$0xf]  ;;  %v11516_v36 = vld [vmem:[#allocation2 + $0x1ab0] sm:$0xf0]  ;;  %7069 = vmatmul.bf16.vlgmr.msrb.gmra.mxu2 %v13489_v11  ;;  %v11391_v50 = vor.u32 %v13020_v52, %v11388_v57 }
 0x1dc   :  { %7113 = vmatpush.bf16.msra.mxu2 %v11551_v61  ;;  %v13084_v60 = vld [vmem:[#allocation2 + $0x1ba4] sm:$0xf]  ;;  %v11644_v63 = vld [vmem:[#allocation2 + $0x1bb0] sm:$0xf0]  ;;  %7082 = vmatmul.bf16.vlgmr.msrb.gmra.mxu3 %v13493_v16  ;;  %v11519_v40 = vor.u32 %v13052_v26, %v11516_v36 }
 0x1dd   :  { %7126 = vmatpush.bf16.msra.mxu3 %v11679_v62  ;;  %v12984_v47 = vld [vmem:[#allocation2 + $0x1884] sm:$0xf]  ;;  %v11244_v51 = vld [vmem:[#allocation2 + $0x1890] sm:$0xf0]  ;;  %v11647_v56 = vor.u32 %v13084_v60, %v11644_v63 }
 0x1de   :  { %7088 = vmatpush.bf16.msra.mxu0 %v11279_v9  ;;  %v13016_v58 = vld [vmem:[#allocation2 + $0x1984] sm:$0xf]  ;;  %v11372_v3 = vld [vmem:[#allocation2 + $0x1990] sm:$0xf0]  ;;  %v11247_v14 = vor.u32 %v12984_v47, %v11244_v51  ;;  %v6837_v9 = vadd.f32 %v6836_v24, %v13576_v27  ;;  %v6862_v47 = vpop.f32.mrf.mxu2 }
 0x1df   :  { %7101 = vmatpush.bf16.msra.mxu1 %v11407_v4  ;;  %v13048_v6 = vld [vmem:[#allocation2 + $0x1a84] sm:$0xf]  ;;  %v11500_v59 = vld [vmem:[#allocation2 + $0x1a90] sm:$0xf0]  ;;  %v11375_v62 = vor.u32 %v13016_v58, %v11372_v3  ;;  %v6849_v4 = vpop.f32.mrf.mxu1  ;;  %v6838_v24 = vpop.f32.mrf.mxu0 }
 0x1e0   :  { %7114 = vmatpush.bf16.msra.mxu2 %v11535_v43  ;;  %v13080_v61 = vld [vmem:[#allocation2 + $0x1b84] sm:$0xf]  ;;  %v11628_v21 = vld [vmem:[#allocation2 + $0x1b90] sm:$0xf0]  ;;  %v11503_v48 = vor.u32 %v13048_v6, %v11500_v59  ;;  %v6850_v26 = vadd.f32 %v6849_v4, %v6837_v9  ;;  %v6875_v6 = vpop.f32.mrf.mxu3 }
 0x1e1   :  { %7127 = vmatpush.bf16.msra.mxu3 %v11663_v15  ;;  %v12980_v39 = vld [vmem:[#allocation2 + $0x1864] sm:$0xf]  ;;  %v11228_v0 = vld [vmem:[#allocation2 + $0x1870] sm:$0xf0]  ;;  %v11631_v43 = vor.u32 %v13080_v61, %v11628_v21 }
 0x1e2   :  { %7089 = vmatpush.bf16.msra.mxu0 %v11263_v2  ;;  %v13012_v1 = vld [vmem:[#allocation2 + $0x1964] sm:$0xf]  ;;  %v11356_v8 = vld [vmem:[#allocation2 + $0x1970] sm:$0xf0]  ;;  %v11231_v36 = vor.u32 %v12980_v39, %v11228_v0  ;;  %v6863_v3 = vadd.f32 %v6862_v47, %v6850_v26 }
 0x1e3   :  { %7102 = vmatpush.bf16.msra.mxu1 %v11391_v50  ;;  %v13044_v32 = vld [vmem:[#allocation2 + $0x1a64] sm:$0xf]  ;;  %v11484_v52 = vld [vmem:[#allocation2 + $0x1a70] sm:$0xf0]  ;;  %v11359_v60 = vor.u32 %v13012_v1, %v11356_v8 }
 0x1e4   :  { %7115 = vmatpush.bf16.msra.mxu2 %v11519_v40  ;;  %v13076_v15 = vld [vmem:[#allocation2 + $0x1b64] sm:$0xf]  ;;  %v11612_v57 = vld [vmem:[#allocation2 + $0x1b70] sm:$0xf0]  ;;  %v11487_v63 = vor.u32 %v13044_v32, %v11484_v52 }
 0x1e5   :  { %7128 = vmatpush.bf16.msra.mxu3 %v11647_v56  ;;  %v12976_v2 = vld [vmem:[#allocation2 + $0x1844] sm:$0xf]  ;;  %v11212_v50 = vld [vmem:[#allocation2 + $0x1850] sm:$0xf0]  ;;  %v11615_v27 = vor.u32 %v13076_v15, %v11612_v57 }
 0x1e6   :  { %7090 = vmatpush.bf16.msra.mxu0 %v11247_v14  ;;  %v13008_v40 = vld [vmem:[#allocation2 + $0x1944] sm:$0xf]  ;;  %v11340_v51 = vld [vmem:[#allocation2 + $0x1950] sm:$0xf0]  ;;  %v11215_v21 = vor.u32 %v12976_v2, %v11212_v50  ;;  %v13583_v14 = vadd.f32 %v6875_v6, %v6863_v3  ;;  %v6864_v47 = vpop.f32.mrf.mxu2 }
 0x1e7   :  { %7103 = vmatpush.bf16.msra.mxu1 %v11375_v62  ;;  %v13040_v58 = vld [vmem:[#allocation2 + $0x1a44] sm:$0xf]  ;;  %v11468_v56 = vld [vmem:[#allocation2 + $0x1a50] sm:$0xf0]  ;;  %v11343_v62 = vor.u32 %v13008_v40, %v11340_v51  ;;  %v6851_v9 = vpop.f32.mrf.mxu1 }
 0x1e8   :  { %7116 = vmatpush.bf16.msra.mxu2 %v11503_v48  ;;  %v13072_v59 = vld [vmem:[#allocation2 + $0x1b44] sm:$0xf]  ;;  %v11596_v61 = vld [vmem:[#allocation2 + $0x1b50] sm:$0xf0]  ;;  %v11471_v48 = vor.u32 %v13040_v58, %v11468_v56  ;;  %v6877_v3 = vpop.f32.mrf.mxu3 }
 0x1e9   :  { %7129 = vmatpush.bf16.msra.mxu3 %v11631_v43  ;;  %v12972_v39 = vld [vmem:[#allocation2 + $0x1824] sm:$0xf]  ;;  %v11196_v0 = vld [vmem:[#allocation2 + $0x1830] sm:$0xf0]  ;;  %v11599_v4 = vor.u32 %v13072_v59, %v11596_v61 }
 0x1ea   :  { %7091 = vmatpush.bf16.msra.mxu0 %v11231_v36  ;;  %v13004_v1 = vld [vmem:[#allocation2 + $0x1924] sm:$0xf]  ;;  %v11324_v43 = vld [vmem:[#allocation2 + $0x1930] sm:$0xf0]  ;;  %v11199_v57 = vor.u32 %v12972_v39, %v11196_v0 }
 0x1eb   :  { %7104 = vmatpush.bf16.msra.mxu1 %v11359_v60  ;;  %v13036_v8 = vld [vmem:[#allocation2 + $0x1a24] sm:$0xf]  ;;  %v11452_v32 = vld [vmem:[#allocation2 + $0x1a30] sm:$0xf0]  ;;  %v11327_v60 = vor.u32 %v13004_v1, %v11324_v43 }
 0x1ec   :  { %7117 = vmatpush.bf16.msra.mxu2 %v11487_v63  ;;  %v13068_v52 = vld [vmem:[#allocation2 + $0x1b24] sm:$0xf]  ;;  %v11580_v15 = vld [vmem:[#allocation2 + $0x1b30] sm:$0xf0]  ;;  %v11455_v63 = vor.u32 %v13036_v8, %v11452_v32 }
 0x1ed   :  { %7130 = vmatpush.bf16.msra.mxu3 %v11615_v27  ;;  %v12968_v26 = vld [vmem:[#allocation2 + $0x1804] sm:$0xf]  ;;  %v11180_v36 = vld [vmem:[#allocation2 + $0x1810] sm:$0xf0]  ;;  %v11583_v27 = vor.u32 %v13068_v52, %v11580_v15 }
 0x1ee   :  { %7092 = vmatpush.bf16.msra.mxu0 %v11215_v21  ;;  %v13000_v2 = vld [vmem:[#allocation2 + $0x1904] sm:$0xf]  ;;  %v11308_v50 = vld [vmem:[#allocation2 + $0x1910] sm:$0xf0]  ;;  %v11183_v21 = vor.u32 %v12968_v26, %v11180_v36 }
 0x1ef   :  { %7105 = vmatpush.bf16.msra.mxu1 %v11343_v62  ;;  %v13032_v40 = vld [vmem:[#allocation2 + $0x1a04] sm:$0xf]  ;;  %v11436_v51 = vld [vmem:[#allocation2 + $0x1a10] sm:$0xf0]  ;;  %v11311_v39 = vor.u32 %v13000_v2, %v11308_v50 }
 0x1f0   :  { %7118 = vmatpush.bf16.msra.mxu2 %v11471_v48  ;;  %v13064_v58 = vld [vmem:[#allocation2 + $0x1b04] sm:$0xf]  ;;  %v11564_v56 = vld [vmem:[#allocation2 + $0x1b10] sm:$0xf0]  ;;  %v11439_v0 = vor.u32 %v13032_v40, %v11436_v51 }
 0x1f1   :  { %7131 = vmatpush.bf16.msra.mxu3 %v11599_v4  ;;  %v13124_v6 = vld [vmem:[#allocation2 + $0x1ce4] sm:$0xf]  ;;  %v11804_v59 = vld [vmem:[#allocation2 + $0x1cf0] sm:$0xf0]  ;;  %v11567_v4 = vor.u32 %v13064_v58, %v11564_v56 }
 0x1f2   :  { %v13156_v61 = vld [vmem:[#allocation2 + $0x1de4] sm:$0xf]  ;;  %7093 = vmatpush.bf16.msra.mxu0 %v11199_v57  ;;  %v11932_v24 = vld [vmem:[#allocation2 + $0x1df0] sm:$0xf0]  ;;  %v11807_v43 = vor.u32 %v13124_v6, %v11804_v59 }
 0x1f3   :  { %v13188_v62 = vld [vmem:[#allocation2 + $0x1ee4] sm:$0xf]  ;;  %v12060_v48 = vld [vmem:[#allocation2 + $0x1ef0] sm:$0xf0]  ;;  %7106 = vmatpush.bf16.msra.mxu1 %v11327_v60  ;;  %v11935_v8 = vor.u32 %v13156_v61, %v11932_v24 }
 0x1f4   :  { %7119 = vmatpush.bf16.msra.mxu2 %v11455_v63  ;;  %v13220_v1 = vld [vmem:[#allocation2 + $0x1fe4] sm:$0xf]  ;;  %v12188_v9 = vld [vmem:[#allocation2 + $0x1ff0] sm:$0xf0]  ;;  %v12063_v32 = vor.u32 %v13188_v62, %v12060_v48 }
 0x1f5   :  { %7132 = vmatpush.bf16.msra.mxu3 %v11583_v27  ;;  %v13120_v52 = vld [vmem:[#allocation2 + $0x1cc4] sm:$0xf]  ;;  %v11788_v15 = vld [vmem:[#allocation2 + $0x1cd0] sm:$0xf0]  ;;  %v12191_v57 = vor.u32 %v13220_v1, %v12188_v9 }
 0x1f6   :  { %v13152_v47 = vld [vmem:[#allocation2 + $0x1dc4] sm:$0xf]  ;;  %7094 = vmatpush.bf16.msra.mxu0 %v11183_v21  ;;  %v11916_v26 = vld [vmem:[#allocation2 + $0x1dd0] sm:$0xf0]  ;;  %v11791_v2 = vor.u32 %v13120_v52, %v11788_v15  ;;  %v6888_v52 = vpop.f32.mrf.mxu0 }
 0x1f7   :  { %v13184_v36 = vld [vmem:[#allocation2 + $0x1ec4] sm:$0xf]  ;;  %v12044_v3 = vld [vmem:[#allocation2 + $0x1ed0] sm:$0xf0]  ;;  %7107 = vmatpush.bf16.msra.mxu1 %v11311_v39  ;;  %v11919_v50 = vor.u32 %v13152_v47, %v11916_v26 }
 0x1f8   :  { %7120 = vmatpush.bf16.msra.mxu2 %v11439_v0  ;;  %v13216_v60 = vld [vmem:[#allocation2 + $0x1fc4] sm:$0xf]  ;;  %v12172_v63 = vld [vmem:[#allocation2 + $0x1fd0] sm:$0xf0]  ;;  %v12047_v40 = vor.u32 %v13184_v36, %v12044_v3  ;;  %v6901_v36 = vpop.f32.mrf.mxu1 }
 0x1f9   :  { %7133 = vmatpush.bf16.msra.mxu3 %v11567_v4  ;;  %v13116_v27 = vld [vmem:[#allocation2 + $0x1ca4] sm:$0xf]  ;;  %v11772_v51 = vld [vmem:[#allocation2 + $0x1cb0] sm:$0xf0]  ;;  %7095 = vmatmul.bf16.vlgmr.msra.gmra.mxu0 %v13508_v5  ;;  %v12175_v56 = vor.u32 %v13216_v60, %v12172_v63 }
 0x1fa   :  { %7139 = vmatpush.bf16.msrb.mxu0 %v11807_v43  ;;  %v13148_v58 = vld [vmem:[#allocation2 + $0x1da4] sm:$0xf]  ;;  %v11900_v6 = vld [vmem:[#allocation2 + $0x1db0] sm:$0xf0]  ;;  %7108 = vmatmul.bf16.vlgmr.msra.gmra.mxu1 %v13512_v13  ;;  %v11775_v62 = vor.u32 %v13116_v27, %v11772_v51 }
 0x1fb   :  { %7152 = vmatpush.bf16.msrb.mxu1 %v11935_v8  ;;  %v13180_v59 = vld [vmem:[#allocation2 + $0x1ea4] sm:$0xf]  ;;  %v12028_v61 = vld [vmem:[#allocation2 + $0x1eb0] sm:$0xf0]  ;;  %7121 = vmatmul.bf16.vlgmr.msra.gmra.mxu2 %v13510_v10  ;;  %v11903_v48 = vor.u32 %v13148_v58, %v11900_v6 }
 0x1fc   :  { %7165 = vmatpush.bf16.msrb.mxu2 %v12063_v32  ;;  %v13212_v21 = vld [vmem:[#allocation2 + $0x1fa4] sm:$0xf]  ;;  %v12156_v24 = vld [vmem:[#allocation2 + $0x1fb0] sm:$0xf0]  ;;  %7134 = vmatmul.bf16.vlgmr.msra.gmra.mxu3 %v13514_v17  ;;  %v12031_v39 = vor.u32 %v13180_v59, %v12028_v61 }
 0x1fd   :  { %7178 = vmatpush.bf16.msrb.mxu3 %v12191_v57  ;;  %v13112_v0 = vld [vmem:[#allocation2 + $0x1c84] sm:$0xf]  ;;  %v11756_v1 = vld [vmem:[#allocation2 + $0x1c90] sm:$0xf0]  ;;  %v12159_v4 = vor.u32 %v13212_v21, %v12156_v24  ;;  %v6889_v57 = vadd.f32 %v6888_v52, %v13583_v14 }
 0x1fe   :  { %7140 = vmatpush.bf16.msrb.mxu0 %v11791_v2  ;;  %v13144_v9 = vld [vmem:[#allocation2 + $0x1d84] sm:$0xf]  ;;  %v11884_v43 = vld [vmem:[#allocation2 + $0x1d90] sm:$0xf0]  ;;  %v11759_v26 = vor.u32 %v13112_v0, %v11756_v1  ;;  %v6914_v0 = vpop.f32.mrf.mxu2 }
 0x1ff   :  { %7153 = vmatpush.bf16.msrb.mxu1 %v11919_v50  ;;  %v13176_v8 = vld [vmem:[#allocation2 + $0x1e84] sm:$0xf]  ;;  %v12012_v32 = vld [vmem:[#allocation2 + $0x1e90] sm:$0xf0]  ;;  %v11887_v3 = vor.u32 %v13144_v9, %v11884_v43  ;;  %v6902_v27 = vadd.f32 %v6901_v36, %v6889_v57 }
 0x200   :  { %7166 = vmatpush.bf16.msrb.mxu2 %v12047_v40  ;;  %v13208_v15 = vld [vmem:[#allocation2 + $0x1f84] sm:$0xf]  ;;  %v12140_v47 = vld [vmem:[#allocation2 + $0x1f90] sm:$0xf0]  ;;  %v12015_v60 = vor.u32 %v13176_v8, %v12012_v32  ;;  %v6927_v8 = vpop.f32.mrf.mxu3  ;;  %v6903_v57 = vpop.f32.mrf.mxu1 }
 0x201   :  { %7179 = vmatpush.bf16.msrb.mxu3 %v12175_v56  ;;  %v13108_v63 = vld [vmem:[#allocation2 + $0x1c64] sm:$0xf]  ;;  %v11740_v2 = vld [vmem:[#allocation2 + $0x1c70] sm:$0xf0]  ;;  %v12143_v40 = vor.u32 %v13208_v15, %v12140_v47  ;;  %v6915_v43 = vadd.f32 %v6914_v0, %v6902_v27  ;;  %v6890_v15 = vpop.f32.mrf.mxu0  ;;  %v8482_v57 = vld [vmem:[#allocation2 + $0x2e8] sm:$0xf] }
 0x202   :  { %7141 = vmatpush.bf16.msrb.mxu0 %v11775_v62  ;;  %v13140_v50 = vld [vmem:[#allocation2 + $0x1d64] sm:$0xf]  ;;  %v11868_v51 = vld [vmem:[#allocation2 + $0x1d70] sm:$0xf0]  ;;  %v11743_v61 = vor.u32 %v13108_v63, %v11740_v2 }
 0x203   :  { %7154 = vmatpush.bf16.msrb.mxu1 %v11903_v48  ;;  %v13172_v58 = vld [vmem:[#allocation2 + $0x1e64] sm:$0xf]  ;;  %v11996_v56 = vld [vmem:[#allocation2 + $0x1e70] sm:$0xf0]  ;;  %v11871_v14 = vor.u32 %v13140_v50, %v11868_v51 }
 0x204   :  { %7167 = vmatpush.bf16.msrb.mxu2 %v12031_v39  ;;  %v13204_v6 = vld [vmem:[#allocation2 + $0x1f64] sm:$0xf]  ;;  %v12124_v59 = vld [vmem:[#allocation2 + $0x1f70] sm:$0xf0]  ;;  %v11999_v21 = vor.u32 %v13172_v58, %v11996_v56 }
 0x205   :  { %7180 = vmatpush.bf16.msrb.mxu3 %v12159_v4  ;;  %v13104_v24 = vld [vmem:[#allocation2 + $0x1c44] sm:$0xf]  ;;  %v11724_v62 = vld [vmem:[#allocation2 + $0x1c50] sm:$0xf0]  ;;  %v12127_v39 = vor.u32 %v13204_v6, %v12124_v59 }
 0x206   :  { %7142 = vmatpush.bf16.msrb.mxu0 %v11759_v26  ;;  %v13136_v48 = vld [vmem:[#allocation2 + $0x1d44] sm:$0xf]  ;;  %v11852_v1 = vld [vmem:[#allocation2 + $0x1d50] sm:$0xf0]  ;;  %v11727_v47 = vor.u32 %v13104_v24, %v11724_v62  ;;  %v13590_v26 = vadd.f32 %v6927_v8, %v6915_v43  ;;  %v8226_v43 = vld [vmem:[#allocation2 + $0xe8] sm:$0xf] }
 0x207   :  { %7155 = vmatpush.bf16.msrb.mxu1 %v11887_v3  ;;  %v13168_v9 = vld [vmem:[#allocation2 + $0x1e44] sm:$0xf]  ;;  %v11980_v4 = vld [vmem:[#allocation2 + $0x1e50] sm:$0xf0]  ;;  %v11855_v36 = vor.u32 %v13136_v48, %v11852_v1  ;;  %v12231_v8 = vld [vmem:[#allocation2 + $0xf4] sm:$0xf0] }
 0x208   :  { %7168 = vmatpush.bf16.msrb.mxu2 %v12015_v60  ;;  %v13200_v32 = vld [vmem:[#allocation2 + $0x1f44] sm:$0xf]  ;;  %v12108_v52 = vld [vmem:[#allocation2 + $0x1f50] sm:$0xf0]  ;;  %v11983_v3 = vor.u32 %v13168_v9, %v11980_v4  ;;  %v6916_v4 = vpop.f32.mrf.mxu2 }
 0x209   :  { %7181 = vmatpush.bf16.msrb.mxu3 %v12143_v40  ;;  %v13100_v60 = vld [vmem:[#allocation2 + $0x1c24] sm:$0xf]  ;;  %v11708_v63 = vld [vmem:[#allocation2 + $0x1c30] sm:$0xf0]  ;;  %v12111_v50 = vor.u32 %v13200_v32, %v12108_v52  ;;  %v8354_v32 = vld [vmem:[#allocation2 + $0x1e8] sm:$0xf]  ;;  %v6929_v52 = vpop.f32.mrf.mxu3 }
 0x20a   :  { %7143 = vmatpush.bf16.msrb.mxu0 %v11743_v61  ;;  %v13132_v2 = vld [vmem:[#allocation2 + $0x1d24] sm:$0xf]  ;;  %v11836_v40 = vld [vmem:[#allocation2 + $0x1d30] sm:$0xf0]  ;;  %v11711_v6 = vor.u32 %v13100_v60, %v11708_v63  ;;  %v8610_v63 = vld [vmem:[#allocation2 + $0x3e8] sm:$0xf] }
 0x20b   :  { %7156 = vmatpush.bf16.msrb.mxu1 %v11871_v14  ;;  %v13164_v27 = vld [vmem:[#allocation2 + $0x1e24] sm:$0xf]  ;;  %v11964_v51 = vld [vmem:[#allocation2 + $0x1e30] sm:$0xf0]  ;;  %v11839_v14 = vor.u32 %v13132_v2, %v11836_v40  ;;  %v12327_v2 = vld [vmem:[#allocation2 + $0x3f4] sm:$0xf0]  ;;  %v8227_v40 = vor.u32 %v12231_v8, %v8226_v43 }
 0x20c   :  { %7169 = vmatpush.bf16.msrb.mxu2 %v11999_v21  ;;  %v13196_v58 = vld [vmem:[#allocation2 + $0x1f24] sm:$0xf]  ;;  %v12092_v56 = vld [vmem:[#allocation2 + $0x1f30] sm:$0xf0]  ;;  %v11967_v21 = vor.u32 %v13164_v27, %v11964_v51  ;;  %v8338_v4 = vld [vmem:[#allocation2 + $0x1c8] sm:$0xf] }
 0x20d   :  { %7182 = vmatpush.bf16.msrb.mxu3 %v12127_v39  ;;  %v13096_v59 = vld [vmem:[#allocation2 + $0x1c04] sm:$0xf]  ;;  %v11692_v61 = vld [vmem:[#allocation2 + $0x1c10] sm:$0xf0]  ;;  %v12095_v0 = vor.u32 %v13196_v58, %v12092_v56  ;;  %v8210_v58 = vld [vmem:[#allocation2 + $0xc8] sm:$0xf] }
 0x20e   :  { %7144 = vmatpush.bf16.msrb.mxu0 %v11727_v47  ;;  %v13128_v24 = vld [vmem:[#allocation2 + $0x1d04] sm:$0xf]  ;;  %v11820_v62 = vld [vmem:[#allocation2 + $0x1d10] sm:$0xf0]  ;;  %v11695_v15 = vor.u32 %v13096_v59, %v11692_v61  ;;  %v12263_v47 = vld [vmem:[#allocation2 + $0x1f4] sm:$0xf0] }
 0x20f   :  { %7157 = vmatpush.bf16.msrb.mxu1 %v11855_v36  ;;  %v13160_v48 = vld [vmem:[#allocation2 + $0x1e04] sm:$0xf]  ;;  %v11948_v39 = vld [vmem:[#allocation2 + $0x1e10] sm:$0xf0]  ;;  %v12295_v36 = vld [vmem:[#allocation2 + $0x2f4] sm:$0xf0]  ;;  %v8355_v27 = vor.u32 %v12263_v47, %v8354_v32 }
 0x210   :  { %7170 = vmatpush.bf16.msrb.mxu2 %v11983_v3  ;;  %v13192_v1 = vld [vmem:[#allocation2 + $0x1f04] sm:$0xf]  ;;  %v12076_v9 = vld [vmem:[#allocation2 + $0x1f10] sm:$0xf0]  ;;  %v11823_v3 = vor.u32 %v13128_v24, %v11820_v62  ;;  %v11951_v60 = vor.u32 %v13160_v48, %v11948_v39  ;;  %v8483_v51 = vor.u32 %v12295_v36, %v8482_v57  ;;  %v12227_v56 = vld [vmem:[#allocation2 + $0xd4] sm:$0xf0] }
 0x211   :  { %7183 = vmatpush.bf16.msrb.mxu3 %v12111_v50  ;;  %v12079_v50 = vor.u32 %v13192_v1, %v12076_v9  ;;  %v12259_v59 = vld [vmem:[#allocation2 + $0x1d4] sm:$0xf0]  ;;  %v8466_v61 = vld [vmem:[#allocation2 + $0x2c8] sm:$0xf]  ;;  %v8211_v24 = vor.u32 %v12227_v56, %v8210_v58 }
 0x212   :  { %7145 = vmatpush.bf16.msrb.mxu0 %v11711_v6  ;;  %v8611_v6 = vor.u32 %v12327_v2, %v8610_v63  ;;  %v12291_v52 = vld [vmem:[#allocation2 + $0x2d4] sm:$0xf0]  ;;  %v8339_v62 = vor.u32 %v12259_v59, %v8338_v4  ;;  %v8322_v1 = vld [vmem:[#allocation2 + $0x1a8] sm:$0xf] }
 0x213   :  { %7158 = vmatpush.bf16.msrb.mxu1 %v11839_v14  ;;  %v8594_v14 = vld [vmem:[#allocation2 + $0x3c8] sm:$0xf]  ;;  %v8467_v48 = vor.u32 %v12291_v52, %v8466_v61  ;;  %v12223_v39 = vld [vmem:[#allocation2 + $0xb4] sm:$0xf0] }
 0x214   :  { %7171 = vmatpush.bf16.msrb.mxu2 %v11967_v21  ;;  %v12323_v21 = vld [vmem:[#allocation2 + $0x3d4] sm:$0xf0]  ;;  %v8450_v8 = vld [vmem:[#allocation2 + $0x2a8] sm:$0xf] }
 0x215   :  { %7184 = vmatpush.bf16.msrb.mxu3 %v12095_v0  ;;  %v8194_v0 = vld [vmem:[#allocation2 + $0xa8] sm:$0xf]  ;;  %v8595_v9 = vor.u32 %v12323_v21, %v8594_v14  ;;  %v12255_v43 = vld [vmem:[#allocation2 + $0x1b4] sm:$0xf0] }
 0x216   :  { %7146 = vmatpush.bf16.msrb.mxu0 %v11695_v15  ;;  %v12287_v32 = vld [vmem:[#allocation2 + $0x2b4] sm:$0xf0]  ;;  %v8578_v15 = vld [vmem:[#allocation2 + $0x3a8] sm:$0xf]  ;;  %v8195_v57 = vor.u32 %v12223_v39, %v8194_v0  ;;  %v8323_v36 = vor.u32 %v12255_v43, %v8322_v1  ;;  %v6940_v58 = vpop.f32.mrf.mxu0 }
 0x217   :  { %7159 = vmatpush.bf16.msrb.mxu1 %v11823_v3  ;;  %v12319_v47 = vld [vmem:[#allocation2 + $0x3b4] sm:$0xf0]  ;;  %v8451_v3 = vor.u32 %v12287_v32, %v8450_v8  ;;  %v8306_v2 = vld [vmem:[#allocation2 + $0x188] sm:$0xf]  ;;  %v6953_v61 = vpop.f32.mrf.mxu1 }
 0x218   :  { %7172 = vmatpush.bf16.msrb.mxu2 %v11951_v60  ;;  %v8178_v60 = vld [vmem:[#allocation2 + $0x88] sm:$0xf]  ;;  %v12219_v63 = vld [vmem:[#allocation2 + $0x94] sm:$0xf0] }
 0x219   :  { %7185 = vmatpush.bf16.msrb.mxu3 %v12079_v50  ;;  %7147 = vmatmul.bf16.vlgmr.msrb.gmra.mxu0 %v13529_v54  ;;  %v8579_v50 = vor.u32 %v12319_v47, %v8578_v15  ;;  %v8562_v56 = vld [vmem:[#allocation2 + $0x388] sm:$0xf]  ;;  %v12315_v4 = vld [vmem:[#allocation2 + $0x394] sm:$0xf0]  ;;  %v8179_v59 = vor.u32 %v12219_v63, %v8178_v60 }
 0x21a   :  { %7191 = vmatpush.bf16.msra.mxu0 %v8227_v40  ;;  %7160 = vmatmul.bf16.vlgmr.msrb.gmra.mxu1 %v13533_v55  ;;  %v12251_v40 = vld [vmem:[#allocation2 + $0x194] sm:$0xf0]  ;;  %v8162_v21 = vld [vmem:[#allocation2 + $0x68] sm:$0xf] }
 0x21b   :  { %7204 = vmatpush.bf16.msra.mxu1 %v8355_v27  ;;  %7173 = vmatmul.bf16.vlgmr.msrb.gmra.mxu2 %v13531_v34  ;;  %v8434_v27 = vld [vmem:[#allocation2 + $0x288] sm:$0xf]  ;;  %v8307_v52 = vor.u32 %v12251_v40, %v8306_v2  ;;  %v12247_v39 = vld [vmem:[#allocation2 + $0x174] sm:$0xf0] }
 0x21c   :  { %7217 = vmatpush.bf16.msra.mxu2 %v8483_v51  ;;  %7186 = vmatmul.bf16.vlgmr.msrb.gmra.mxu3 %v13535_v53  ;;  %v12283_v51 = vld [vmem:[#allocation2 + $0x294] sm:$0xf0]  ;;  %v8418_v1 = vld [vmem:[#allocation2 + $0x268] sm:$0xf] }
 0x21d   :  { %7230 = vmatpush.bf16.msra.mxu3 %v8611_v6  ;;  %v6941_v6 = vadd.f32 %v6940_v58, %v13590_v26  ;;  %v8435_v14 = vor.u32 %v12283_v51, %v8434_v27  ;;  %v8546_v43 = vld [vmem:[#allocation2 + $0x368] sm:$0xf]  ;;  %v12311_v8 = vld [vmem:[#allocation2 + $0x374] sm:$0xf0] }
 0x21e   :  { %7192 = vmatpush.bf16.msra.mxu0 %v8211_v24  ;;  %v12215_v24 = vld [vmem:[#allocation2 + $0x74] sm:$0xf0]  ;;  %v8146_v47 = vld [vmem:[#allocation2 + $0x48] sm:$0xf]  ;;  %v6966_v60 = vpop.f32.mrf.mxu2 }
 0x21f   :  { %7205 = vmatpush.bf16.msra.mxu1 %v8339_v62  ;;  %v8290_v62 = vld [vmem:[#allocation2 + $0x168] sm:$0xf]  ;;  %v6954_v0 = vadd.f32 %v6953_v61, %v6941_v6  ;;  %v8163_v32 = vor.u32 %v12215_v24, %v8162_v21  ;;  %v12243_v63 = vld [vmem:[#allocation2 + $0x154] sm:$0xf0]  ;;  %v6979_v27 = vpop.f32.mrf.mxu3  ;;  %v6955_v6 = vpop.f32.mrf.mxu1 }
 0x220   :  { %7218 = vmatpush.bf16.msra.mxu2 %v8467_v48  ;;  %v8563_v48 = vor.u32 %v12315_v4, %v8562_v56  ;;  %v8291_v26 = vor.u32 %v12247_v39, %v8290_v62  ;;  %v8402_v2 = vld [vmem:[#allocation2 + $0x248] sm:$0xf]  ;;  %v12307_v58 = vld [vmem:[#allocation2 + $0x354] sm:$0xf0]  ;;  %v6942_v56 = vpop.f32.mrf.mxu0 }
 0x221   :  { %7231 = vmatpush.bf16.msra.mxu3 %v8595_v9  ;;  %v12279_v9 = vld [vmem:[#allocation2 + $0x274] sm:$0xf0]  ;;  %v6967_v40 = vadd.f32 %v6966_v60, %v6954_v0  ;;  %v8530_v51 = vld [vmem:[#allocation2 + $0x348] sm:$0xf] }
 0x222   :  { %7193 = vmatpush.bf16.msra.mxu0 %v8195_v57  ;;  %v8419_v15 = vor.u32 %v12279_v9, %v8418_v1  ;;  %v12211_v57 = vld [vmem:[#allocation2 + $0x54] sm:$0xf0]  ;;  %v8258_v24 = vld [vmem:[#allocation2 + $0x128] sm:$0xf]  ;;  %v8531_v62 = vor.u32 %v12307_v58, %v8530_v51 }
 0x223   :  { %7206 = vmatpush.bf16.msra.mxu1 %v8323_v36  ;;  %v8274_v36 = vld [vmem:[#allocation2 + $0x148] sm:$0xf]  ;;  %v8147_v4 = vor.u32 %v12211_v57, %v8146_v47  ;;  %v12207_v21 = vld [vmem:[#allocation2 + $0x34] sm:$0xf0] }
 0x224   :  { %7219 = vmatpush.bf16.msra.mxu2 %v8451_v3  ;;  %v8547_v3 = vor.u32 %v12311_v8, %v8546_v43  ;;  %v8275_v61 = vor.u32 %v12243_v63, %v8274_v36  ;;  %v8386_v0 = vld [vmem:[#allocation2 + $0x228] sm:$0xf]  ;;  %v12271_v39 = vld [vmem:[#allocation2 + $0x234] sm:$0xf0] }
 0x225   :  { %7232 = vmatpush.bf16.msra.mxu3 %v8579_v50  ;;  %v12275_v50 = vld [vmem:[#allocation2 + $0x254] sm:$0xf0]  ;;  %v8514_v1 = vld [vmem:[#allocation2 + $0x328] sm:$0xf] }
 0x226   :  { %7194 = vmatpush.bf16.msra.mxu0 %v8179_v59  ;;  %v13597_v59 = vadd.f32 %v6979_v27, %v6967_v40  ;;  %v12303_v9 = vld [vmem:[#allocation2 + $0x334] sm:$0xf0]  ;;  %v8114_v8 = vld [vmem:[#allocation2 + $0x8] sm:$0xf] }
 0x227   :  { %7207 = vmatpush.bf16.msra.mxu1 %v8307_v52  ;;  %v8403_v52 = vor.u32 %v12275_v50, %v8402_v2  ;;  %v8242_v47 = vld [vmem:[#allocation2 + $0x108] sm:$0xf]  ;;  %v12235_v57 = vld [vmem:[#allocation2 + $0x114] sm:$0xf0]  ;;  %v8515_v60 = vor.u32 %v12303_v9, %v8514_v1  ;;  %v6968_v50 = vpop.f32.mrf.mxu2  ;;  %v6981_v58 = vpop.f32.mrf.mxu3 }
 0x228   :  { %7220 = vmatpush.bf16.msra.mxu2 %v8435_v14  ;;  %v8130_v14 = vld [vmem:[#allocation2 + $0x28] sm:$0xf]  ;;  %v12299_v2 = vld [vmem:[#allocation2 + $0x314] sm:$0xf0] }
 0x229   :  { %7233 = vmatpush.bf16.msra.mxu3 %v8563_v48  ;;  %v12239_v48 = vld [vmem:[#allocation2 + $0x134] sm:$0xf0]  ;;  %v8131_v43 = vor.u32 %v12207_v21, %v8130_v14  ;;  %v8370_v36 = vld [vmem:[#allocation2 + $0x208] sm:$0xf] }
 0x22a   :  { %7195 = vmatpush.bf16.msra.mxu0 %v8163_v32  ;;  %v12203_v32 = vld [vmem:[#allocation2 + $0x14] sm:$0xf0]  ;;  %v8498_v63 = vld [vmem:[#allocation2 + $0x308] sm:$0xf] }
 0x22b   :  { %7208 = vmatpush.bf16.msra.mxu1 %v8291_v26  ;;  %v8259_v26 = vor.u32 %v12239_v48, %v8258_v24  ;;  %v8738_v40 = vld [vmem:[#allocation2 + $0x4e8] sm:$0xf]  ;;  %v12359_v27 = vld [vmem:[#allocation2 + $0x4f4] sm:$0xf0]  ;;  %v8115_v56 = vor.u32 %v12203_v32, %v8114_v8 }
 0x22c   :  { %7221 = vmatpush.bf16.msra.mxu2 %v8419_v15  ;;  %v8387_v15 = vor.u32 %v12271_v39, %v8386_v0  ;;  %v8866_v51 = vld [vmem:[#allocation2 + $0x5e8] sm:$0xf]  ;;  %v12455_v24 = vld [vmem:[#allocation2 + $0x7f4] sm:$0xf0]  ;;  %v8739_v48 = vor.u32 %v12359_v27, %v8738_v40 }
 0x22d   :  { %7234 = vmatpush.bf16.msra.mxu3 %v8547_v3  ;;  %v12267_v3 = vld [vmem:[#allocation2 + $0x214] sm:$0xf0]  ;;  %v8994_v6 = vld [vmem:[#allocation2 + $0x6e8] sm:$0xf] }
 0x22e   :  { %7196 = vmatpush.bf16.msra.mxu0 %v8147_v4  ;;  %v12391_v4 = vld [vmem:[#allocation2 + $0x5f4] sm:$0xf0]  ;;  %v8371_v14 = vor.u32 %v12267_v3, %v8370_v36  ;;  %v9122_v21 = vld [vmem:[#allocation2 + $0x7e8] sm:$0xf] }
 0x22f   :  { %7209 = vmatpush.bf16.msra.mxu1 %v8275_v61  ;;  %v12423_v61 = vld [vmem:[#allocation2 + $0x6f4] sm:$0xf0]  ;;  %v8867_v0 = vor.u32 %v12391_v4, %v8866_v51  ;;  %v8722_v1 = vld [vmem:[#allocation2 + $0x4c8] sm:$0xf] }
 0x230   :  { %7222 = vmatpush.bf16.msra.mxu2 %v8403_v52  ;;  %v8243_v52 = vor.u32 %v12235_v57, %v8242_v47  ;;  %v8995_v39 = vor.u32 %v12423_v61, %v8994_v6  ;;  %v12355_v9 = vld [vmem:[#allocation2 + $0x4d4] sm:$0xf0]  ;;  %v8850_v50 = vld [vmem:[#allocation2 + $0x5c8] sm:$0xf] }
 0x231   :  { %7235 = vmatpush.bf16.msra.mxu3 %v8531_v62  ;;  %v8499_v62 = vor.u32 %v12299_v2, %v8498_v63  ;;  %v12387_v8 = vld [vmem:[#allocation2 + $0x5d4] sm:$0xf0]  ;;  %v8978_v32 = vld [vmem:[#allocation2 + $0x6c8] sm:$0xf]  ;;  %v8723_v47 = vor.u32 %v12355_v9, %v8722_v1 }
 0x232   :  { %7197 = vmatpush.bf16.msra.mxu0 %v8131_v43  ;;  %v9123_v43 = vor.u32 %v12455_v24, %v9122_v21  ;;  %v12419_v58 = vld [vmem:[#allocation2 + $0x6d4] sm:$0xf0]  ;;  %v8851_v57 = vor.u32 %v12387_v8, %v8850_v50  ;;  %v8834_v63 = vld [vmem:[#allocation2 + $0x5a8] sm:$0xf] }
 0x233   :  { %7210 = vmatpush.bf16.msra.mxu1 %v8259_v26  ;;  %v9106_v26 = vld [vmem:[#allocation2 + $0x7c8] sm:$0xf]  ;;  %v8979_v36 = vor.u32 %v12419_v58, %v8978_v32  ;;  %v12351_v3 = vld [vmem:[#allocation2 + $0x4b4] sm:$0xf0] }
 0x234   :  { %7223 = vmatpush.bf16.msra.mxu2 %v8387_v15  ;;  %v12451_v15 = vld [vmem:[#allocation2 + $0x7d4] sm:$0xf0]  ;;  %v8962_v27 = vld [vmem:[#allocation2 + $0x6a8] sm:$0xf] }
 0x235   :  { %7236 = vmatpush.bf16.msra.mxu3 %v8515_v60  ;;  %v8706_v60 = vld [vmem:[#allocation2 + $0x4a8] sm:$0xf]  ;;  %v9107_v2 = vor.u32 %v12451_v15, %v9106_v26  ;;  %v12383_v40 = vld [vmem:[#allocation2 + $0x5b4] sm:$0xf0] }
 0x236   :  { %7198 = vmatpush.bf16.msra.mxu0 %v8115_v56  ;;  %v12415_v51 = vld [vmem:[#allocation2 + $0x6b4] sm:$0xf0]  ;;  %v9090_v56 = vld [vmem:[#allocation2 + $0x7a8] sm:$0xf]  ;;  %v8707_v6 = vor.u32 %v12351_v3, %v8706_v60  ;;  %v8835_v61 = vor.u32 %v12383_v40, %v8834_v63  ;;  %v6992_v1 = vpop.f32.mrf.mxu0 }
 0x237   :  { %7211 = vmatpush.bf16.msra.mxu1 %v8243_v52  ;;  %v12447_v4 = vld [vmem:[#allocation2 + $0x7b4] sm:$0xf0]  ;;  %v8963_v52 = vor.u32 %v12415_v51, %v8962_v27  ;;  %v8818_v24 = vld [vmem:[#allocation2 + $0x588] sm:$0xf]  ;;  %v7005_v32 = vpop.f32.mrf.mxu1 }
 0x238   :  { %7224 = vmatpush.bf16.msra.mxu2 %v8371_v14  ;;  %v8690_v14 = vld [vmem:[#allocation2 + $0x488] sm:$0xf]  ;;  %v12347_v21 = vld [vmem:[#allocation2 + $0x494] sm:$0xf0] }
 0x239   :  { %7237 = vmatpush.bf16.msra.mxu3 %v8499_v62  ;;  %7199 = vmatmul.bf16.vlgmr.msra.gmra.mxu0 %v13397_v19  ;;  %v9091_v62 = vor.u32 %v12447_v4, %v9090_v56  ;;  %v9074_v9 = vld [vmem:[#allocation2 + $0x788] sm:$0xf]  ;;  %v12443_v50 = vld [vmem:[#allocation2 + $0x794] sm:$0xf0]  ;;  %v8691_v8 = vor.u32 %v12347_v21, %v8690_v14 }
 0x23a   :  { %7243 = vmatpush.bf16.msrb.mxu0 %v8739_v48  ;;  %7212 = vmatmul.bf16.vlgmr.msra.gmra.mxu1 %v13401_v22  ;;  %v12379_v48 = vld [vmem:[#allocation2 + $0x594] sm:$0xf0]  ;;  %v8674_v15 = vld [vmem:[#allocation2 + $0x468] sm:$0xf] }
 0x23b   :  { %7256 = vmatpush.bf16.msrb.mxu1 %v8867_v0  ;;  %7225 = vmatmul.bf16.vlgmr.msra.gmra.mxu2 %v13395_v18  ;;  %v8946_v0 = vld [vmem:[#allocation2 + $0x688] sm:$0xf]  ;;  %v8819_v58 = vor.u32 %v12379_v48, %v8818_v24  ;;  %v12375_v3 = vld [vmem:[#allocation2 + $0x574] sm:$0xf0] }
 0x23c   :  { %7269 = vmatpush.bf16.msrb.mxu2 %v8995_v39  ;;  %7238 = vmatmul.bf16.vlgmr.msra.gmra.mxu3 %v13399_v20  ;;  %v12411_v39 = vld [vmem:[#allocation2 + $0x694] sm:$0xf0]  ;;  %v8930_v63 = vld [vmem:[#allocation2 + $0x668] sm:$0xf] }
 0x23d   :  { %7282 = vmatpush.bf16.msrb.mxu3 %v9123_v43  ;;  %v6993_v43 = vadd.f32 %v6992_v1, %v13597_v59  ;;  %v8947_v26 = vor.u32 %v12411_v39, %v8946_v0  ;;  %v9058_v40 = vld [vmem:[#allocation2 + $0x768] sm:$0xf]  ;;  %v12439_v27 = vld [vmem:[#allocation2 + $0x774] sm:$0xf0] }
 0x23e   :  { %7244 = vmatpush.bf16.msrb.mxu0 %v8723_v47  ;;  %v12343_v47 = vld [vmem:[#allocation2 + $0x474] sm:$0xf0]  ;;  %v8658_v4 = vld [vmem:[#allocation2 + $0x448] sm:$0xf]  ;;  %v7018_v14 = vpop.f32.mrf.mxu2 }
 0x23f   :  { %7257 = vmatpush.bf16.msrb.mxu1 %v8851_v57  ;;  %v8802_v57 = vld [vmem:[#allocation2 + $0x568] sm:$0xf]  ;;  %v7006_v60 = vadd.f32 %v7005_v32, %v6993_v43  ;;  %v8675_v51 = vor.u32 %v12343_v47, %v8674_v15  ;;  %v12371_v21 = vld [vmem:[#allocation2 + $0x554] sm:$0xf0]  ;;  %v7031_v0 = vpop.f32.mrf.mxu3  ;;  %v7007_v43 = vpop.f32.mrf.mxu1 }
 0x240   :  { %7270 = vmatpush.bf16.msrb.mxu2 %v8979_v36  ;;  %v9075_v36 = vor.u32 %v12443_v50, %v9074_v9  ;;  %v8803_v59 = vor.u32 %v12375_v3, %v8802_v57  ;;  %v8914_v24 = vld [vmem:[#allocation2 + $0x648] sm:$0xf]  ;;  %v12435_v1 = vld [vmem:[#allocation2 + $0x754] sm:$0xf0]  ;;  %v6994_v9 = vpop.f32.mrf.mxu0 }
 0x241   :  { %7283 = vmatpush.bf16.msrb.mxu3 %v9107_v2  ;;  %v12407_v2 = vld [vmem:[#allocation2 + $0x674] sm:$0xf0]  ;;  %v7019_v48 = vadd.f32 %v7018_v14, %v7006_v60  ;;  %v9042_v39 = vld [vmem:[#allocation2 + $0x748] sm:$0xf] }
 0x242   :  { %7245 = vmatpush.bf16.msrb.mxu0 %v8707_v6  ;;  %v8931_v56 = vor.u32 %v12407_v2, %v8930_v63  ;;  %v12339_v6 = vld [vmem:[#allocation2 + $0x454] sm:$0xf0]  ;;  %v8770_v47 = vld [vmem:[#allocation2 + $0x528] sm:$0xf]  ;;  %v9043_v57 = vor.u32 %v12435_v1, %v9042_v39 }
 0x243   :  { %7258 = vmatpush.bf16.msrb.mxu1 %v8835_v61  ;;  %v8786_v61 = vld [vmem:[#allocation2 + $0x548] sm:$0xf]  ;;  %v8659_v50 = vor.u32 %v12339_v6, %v8658_v4  ;;  %v12335_v15 = vld [vmem:[#allocation2 + $0x434] sm:$0xf0] }
 0x244   :  { %7271 = vmatpush.bf16.msrb.mxu2 %v8963_v52  ;;  %v9059_v52 = vor.u32 %v12439_v27, %v9058_v40  ;;  %v8787_v32 = vor.u32 %v12371_v21, %v8786_v61  ;;  %v8898_v60 = vld [vmem:[#allocation2 + $0x628] sm:$0xf]  ;;  %v12399_v3 = vld [vmem:[#allocation2 + $0x634] sm:$0xf0] }
 0x245   :  { %7284 = vmatpush.bf16.msrb.mxu3 %v9091_v62  ;;  %v12403_v62 = vld [vmem:[#allocation2 + $0x654] sm:$0xf0]  ;;  %v9026_v63 = vld [vmem:[#allocation2 + $0x728] sm:$0xf] }
 0x246   :  { %7246 = vmatpush.bf16.msrb.mxu0 %v8691_v8  ;;  %v13604_v8 = vadd.f32 %v7031_v0, %v7019_v48  ;;  %v12431_v2 = vld [vmem:[#allocation2 + $0x734] sm:$0xf0]  ;;  %v8626_v27 = vld [vmem:[#allocation2 + $0x408] sm:$0xf] }
 0x247   :  { %7259 = vmatpush.bf16.msrb.mxu1 %v8819_v58  ;;  %v8915_v58 = vor.u32 %v12403_v62, %v8914_v24  ;;  %v8754_v4 = vld [vmem:[#allocation2 + $0x508] sm:$0xf]  ;;  %v12363_v6 = vld [vmem:[#allocation2 + $0x514] sm:$0xf0]  ;;  %v9027_v14 = vor.u32 %v12431_v2, %v9026_v63  ;;  %v7020_v62 = vpop.f32.mrf.mxu2  ;;  %v7033_v1 = vpop.f32.mrf.mxu3 }
 0x248   :  { %7272 = vmatpush.bf16.msrb.mxu2 %v8947_v26  ;;  %v8642_v26 = vld [vmem:[#allocation2 + $0x428] sm:$0xf]  ;;  %v12427_v24 = vld [vmem:[#allocation2 + $0x714] sm:$0xf0] }
 0x249   :  { %7285 = vmatpush.bf16.msrb.mxu3 %v9075_v36  ;;  %v12367_v36 = vld [vmem:[#allocation2 + $0x534] sm:$0xf0]  ;;  %v8643_v40 = vor.u32 %v12335_v15, %v8642_v26  ;;  %v8882_v61 = vld [vmem:[#allocation2 + $0x608] sm:$0xf] }
 0x24a   :  { %7247 = vmatpush.bf16.msrb.mxu0 %v8675_v51  ;;  %v12331_v51 = vld [vmem:[#allocation2 + $0x414] sm:$0xf0]  ;;  %v9010_v21 = vld [vmem:[#allocation2 + $0x708] sm:$0xf] }
 0x24b   :  { %7260 = vmatpush.bf16.msrb.mxu1 %v8803_v59  ;;  %v8771_v59 = vor.u32 %v12367_v36, %v8770_v47  ;;  %v9250_v48 = vld [vmem:[#allocation2 + $0x8e8] sm:$0xf]  ;;  %v12487_v0 = vld [vmem:[#allocation2 + $0x8f4] sm:$0xf0]  ;;  %v8627_v9 = vor.u32 %v12331_v51, %v8626_v27 }
 0x24c   :  { %7273 = vmatpush.bf16.msrb.mxu2 %v8931_v56  ;;  %v8899_v56 = vor.u32 %v12399_v3, %v8898_v60  ;;  %v9378_v39 = vld [vmem:[#allocation2 + $0x9e8] sm:$0xf]  ;;  %v12583_v47 = vld [vmem:[#allocation2 + $0xbf4] sm:$0xf0]  ;;  %v9251_v36 = vor.u32 %v12487_v0, %v9250_v48 }
 0x24d   :  { %7286 = vmatpush.bf16.msrb.mxu3 %v9059_v52  ;;  %v12395_v52 = vld [vmem:[#allocation2 + $0x614] sm:$0xf0]  ;;  %v9506_v43 = vld [vmem:[#allocation2 + $0xae8] sm:$0xf] }
 0x24e   :  { %7248 = vmatpush.bf16.msrb.mxu0 %v8659_v50  ;;  %v12519_v50 = vld [vmem:[#allocation2 + $0x9f4] sm:$0xf0]  ;;  %v8883_v26 = vor.u32 %v12395_v52, %v8882_v61  ;;  %v9634_v15 = vld [vmem:[#allocation2 + $0xbe8] sm:$0xf] }
 0x24f   :  { %7261 = vmatpush.bf16.msrb.mxu1 %v8787_v32  ;;  %v12551_v32 = vld [vmem:[#allocation2 + $0xaf4] sm:$0xf0]  ;;  %v9379_v60 = vor.u32 %v12519_v50, %v9378_v39  ;;  %v9234_v63 = vld [vmem:[#allocation2 + $0x8c8] sm:$0xf] }
 0x250   :  { %7274 = vmatpush.bf16.msrb.mxu2 %v8915_v58  ;;  %v8755_v58 = vor.u32 %v12363_v6, %v8754_v4  ;;  %v9507_v3 = vor.u32 %v12551_v32, %v9506_v43  ;;  %v12483_v2 = vld [vmem:[#allocation2 + $0x8d4] sm:$0xf0]  ;;  %v9362_v62 = vld [vmem:[#allocation2 + $0x9c8] sm:$0xf] }
 0x251   :  { %7287 = vmatpush.bf16.msrb.mxu3 %v9043_v57  ;;  %v9011_v57 = vor.u32 %v12427_v24, %v9010_v21  ;;  %v12515_v27 = vld [vmem:[#allocation2 + $0x9d4] sm:$0xf0]  ;;  %v9490_v51 = vld [vmem:[#allocation2 + $0xac8] sm:$0xf]  ;;  %v9235_v4 = vor.u32 %v12483_v2, %v9234_v63 }
 0x252   :  { %7249 = vmatpush.bf16.msrb.mxu0 %v8643_v40  ;;  %v9635_v40 = vor.u32 %v12583_v47, %v9634_v15  ;;  %v12547_v1 = vld [vmem:[#allocation2 + $0xad4] sm:$0xf0]  ;;  %v9363_v6 = vor.u32 %v12515_v27, %v9362_v62  ;;  %v9346_v21 = vld [vmem:[#allocation2 + $0x9a8] sm:$0xf] }
 0x253   :  { %7262 = vmatpush.bf16.msrb.mxu1 %v8771_v59  ;;  %v9618_v59 = vld [vmem:[#allocation2 + $0xbc8] sm:$0xf]  ;;  %v9491_v61 = vor.u32 %v12547_v1, %v9490_v51  ;;  %v12479_v52 = vld [vmem:[#allocation2 + $0x8b4] sm:$0xf0] }
 0x254   :  { %7275 = vmatpush.bf16.msrb.mxu2 %v8899_v56  ;;  %v12579_v56 = vld [vmem:[#allocation2 + $0xbd4] sm:$0xf0]  ;;  %v9474_v0 = vld [vmem:[#allocation2 + $0xaa8] sm:$0xf] }
 0x255   :  { %7288 = vmatpush.bf16.msrb.mxu3 %v9027_v14  ;;  %v9218_v14 = vld [vmem:[#allocation2 + $0x8a8] sm:$0xf]  ;;  %v9619_v24 = vor.u32 %v12579_v56, %v9618_v59  ;;  %v12511_v48 = vld [vmem:[#allocation2 + $0x9b4] sm:$0xf0] }
 0x256   :  { %7250 = vmatpush.bf16.msrb.mxu0 %v8627_v9  ;;  %v12543_v39 = vld [vmem:[#allocation2 + $0xab4] sm:$0xf0]  ;;  %v9602_v9 = vld [vmem:[#allocation2 + $0xba8] sm:$0xf]  ;;  %v9219_v43 = vor.u32 %v12479_v52, %v9218_v14  ;;  %v9347_v32 = vor.u32 %v12511_v48, %v9346_v21  ;;  %v7044_v63 = vpop.f32.mrf.mxu0 }
 0x257   :  { %7263 = vmatpush.bf16.msrb.mxu1 %v8755_v58  ;;  %v12575_v50 = vld [vmem:[#allocation2 + $0xbb4] sm:$0xf0]  ;;  %v9475_v58 = vor.u32 %v12543_v39, %v9474_v0  ;;  %v9330_v47 = vld [vmem:[#allocation2 + $0x988] sm:$0xf]  ;;  %v7057_v51 = vpop.f32.mrf.mxu1 }
 0x258   :  { %7276 = vmatpush.bf16.msrb.mxu2 %v8883_v26  ;;  %v9202_v26 = vld [vmem:[#allocation2 + $0x888] sm:$0xf]  ;;  %v12475_v15 = vld [vmem:[#allocation2 + $0x894] sm:$0xf0] }
 0x259   :  { %7289 = vmatpush.bf16.msrb.mxu3 %v9011_v57  ;;  %7251 = vmatmul.bf16.vlgmr.msrb.gmra.mxu0 %v13415_v41  ;;  %v9603_v57 = vor.u32 %v12575_v50, %v9602_v9  ;;  %v9586_v2 = vld [vmem:[#allocation2 + $0xb88] sm:$0xf]  ;;  %v12571_v62 = vld [vmem:[#allocation2 + $0xb94] sm:$0xf0]  ;;  %v9203_v27 = vor.u32 %v12475_v15, %v9202_v26 }
 0x25a   :  { %7295 = vmatpush.bf16.msra.mxu0 %v9251_v36  ;;  %7264 = vmatmul.bf16.vlgmr.msrb.gmra.mxu1 %v13419_v44  ;;  %v12507_v36 = vld [vmem:[#allocation2 + $0x994] sm:$0xf0]  ;;  %v9186_v56 = vld [vmem:[#allocation2 + $0x868] sm:$0xf] }
 0x25b   :  { %7308 = vmatpush.bf16.msra.mxu1 %v9379_v60  ;;  %7277 = vmatmul.bf16.vlgmr.msrb.gmra.mxu2 %v13413_v38  ;;  %v9458_v60 = vld [vmem:[#allocation2 + $0xa88] sm:$0xf]  ;;  %v9331_v1 = vor.u32 %v12507_v36, %v9330_v47  ;;  %v12503_v52 = vld [vmem:[#allocation2 + $0x974] sm:$0xf0] }
 0x25c   :  { %7321 = vmatpush.bf16.msra.mxu2 %v9507_v3  ;;  %7290 = vmatmul.bf16.vlgmr.msrb.gmra.mxu3 %v13417_v42  ;;  %v12539_v3 = vld [vmem:[#allocation2 + $0xa94] sm:$0xf0]  ;;  %v9442_v21 = vld [vmem:[#allocation2 + $0xa68] sm:$0xf] }
 0x25d   :  { %7334 = vmatpush.bf16.msra.mxu3 %v9635_v40  ;;  %v7045_v40 = vadd.f32 %v7044_v63, %v13604_v8  ;;  %v9459_v59 = vor.u32 %v12539_v3, %v9458_v60  ;;  %v9570_v48 = vld [vmem:[#allocation2 + $0xb68] sm:$0xf]  ;;  %v12567_v0 = vld [vmem:[#allocation2 + $0xb74] sm:$0xf0] }
 0x25e   :  { %7296 = vmatpush.bf16.msra.mxu0 %v9235_v4  ;;  %v12471_v4 = vld [vmem:[#allocation2 + $0x874] sm:$0xf0]  ;;  %v9170_v50 = vld [vmem:[#allocation2 + $0x848] sm:$0xf]  ;;  %v7070_v26 = vpop.f32.mrf.mxu2 }
 0x25f   :  { %7309 = vmatpush.bf16.msra.mxu1 %v9363_v6  ;;  %v9314_v6 = vld [vmem:[#allocation2 + $0x968] sm:$0xf]  ;;  %v7058_v14 = vadd.f32 %v7057_v51, %v7045_v40  ;;  %v9187_v39 = vor.u32 %v12471_v4, %v9186_v56  ;;  %v12499_v15 = vld [vmem:[#allocation2 + $0x954] sm:$0xf0]  ;;  %v7083_v60 = vpop.f32.mrf.mxu3  ;;  %v7059_v40 = vpop.f32.mrf.mxu1 }
 0x260   :  { %7322 = vmatpush.bf16.msra.mxu2 %v9491_v61  ;;  %v9587_v61 = vor.u32 %v12571_v62, %v9586_v2  ;;  %v9315_v8 = vor.u32 %v12503_v52, %v9314_v6  ;;  %v9426_v47 = vld [vmem:[#allocation2 + $0xa48] sm:$0xf]  ;;  %v12563_v63 = vld [vmem:[#allocation2 + $0xb54] sm:$0xf0]  ;;  %v7046_v2 = vpop.f32.mrf.mxu0 }
 0x261   :  { %7335 = vmatpush.bf16.msra.mxu3 %v9619_v24  ;;  %v12535_v24 = vld [vmem:[#allocation2 + $0xa74] sm:$0xf0]  ;;  %v7071_v36 = vadd.f32 %v7070_v26, %v7058_v14  ;;  %v9554_v3 = vld [vmem:[#allocation2 + $0xb48] sm:$0xf] }
 0x262   :  { %7297 = vmatpush.bf16.msra.mxu0 %v9219_v43  ;;  %v9443_v9 = vor.u32 %v12535_v24, %v9442_v21  ;;  %v12467_v43 = vld [vmem:[#allocation2 + $0x854] sm:$0xf0]  ;;  %v9282_v4 = vld [vmem:[#allocation2 + $0x928] sm:$0xf]  ;;  %v9555_v6 = vor.u32 %v12563_v63, %v9554_v3 }
 0x263   :  { %7310 = vmatpush.bf16.msra.mxu1 %v9347_v32  ;;  %v9298_v32 = vld [vmem:[#allocation2 + $0x948] sm:$0xf]  ;;  %v9171_v62 = vor.u32 %v12467_v43, %v9170_v50  ;;  %v12463_v56 = vld [vmem:[#allocation2 + $0x834] sm:$0xf0] }
 0x264   :  { %7323 = vmatpush.bf16.msra.mxu2 %v9475_v58  ;;  %v9571_v58 = vor.u32 %v12567_v0, %v9570_v48  ;;  %v9299_v51 = vor.u32 %v12499_v15, %v9298_v32  ;;  %v9410_v14 = vld [vmem:[#allocation2 + $0xa28] sm:$0xf]  ;;  %v12527_v52 = vld [vmem:[#allocation2 + $0xa34] sm:$0xf0] }
 0x265   :  { %7336 = vmatpush.bf16.msra.mxu3 %v9603_v57  ;;  %v12531_v57 = vld [vmem:[#allocation2 + $0xa54] sm:$0xf0]  ;;  %v9538_v21 = vld [vmem:[#allocation2 + $0xb28] sm:$0xf] }
 0x266   :  { %7298 = vmatpush.bf16.msra.mxu0 %v9203_v27  ;;  %v13611_v27 = vadd.f32 %v7083_v60, %v7071_v36  ;;  %v12559_v24 = vld [vmem:[#allocation2 + $0xb34] sm:$0xf0]  ;;  %v9138_v0 = vld [vmem:[#allocation2 + $0x808] sm:$0xf] }
 0x267   :  { %7311 = vmatpush.bf16.msra.mxu1 %v9331_v1  ;;  %v9427_v1 = vor.u32 %v12531_v57, %v9426_v47  ;;  %v9266_v50 = vld [vmem:[#allocation2 + $0x908] sm:$0xf]  ;;  %v12491_v43 = vld [vmem:[#allocation2 + $0x914] sm:$0xf0]  ;;  %v9539_v26 = vor.u32 %v12559_v24, %v9538_v21  ;;  %v7072_v57 = vpop.f32.mrf.mxu2  ;;  %v7085_v63 = vpop.f32.mrf.mxu3 }
 0x268   :  { %7324 = vmatpush.bf16.msra.mxu2 %v9459_v59  ;;  %v9154_v59 = vld [vmem:[#allocation2 + $0x828] sm:$0xf]  ;;  %v12555_v47 = vld [vmem:[#allocation2 + $0xb14] sm:$0xf0] }
 0x269   :  { %7337 = vmatpush.bf16.msra.mxu3 %v9587_v61  ;;  %v12495_v61 = vld [vmem:[#allocation2 + $0x934] sm:$0xf0]  ;;  %v9155_v48 = vor.u32 %v12463_v56, %v9154_v59  ;;  %v9394_v32 = vld [vmem:[#allocation2 + $0xa08] sm:$0xf] }
 0x26a   :  { %7299 = vmatpush.bf16.msra.mxu0 %v9187_v39  ;;  %v12459_v39 = vld [vmem:[#allocation2 + $0x814] sm:$0xf0]  ;;  %v9522_v15 = vld [vmem:[#allocation2 + $0xb08] sm:$0xf] }
 0x26b   :  { %7312 = vmatpush.bf16.msra.mxu1 %v9315_v8  ;;  %v9283_v8 = vor.u32 %v12495_v61, %v9282_v4  ;;  %v9762_v36 = vld [vmem:[#allocation2 + $0xce8] sm:$0xf]  ;;  %v12615_v60 = vld [vmem:[#allocation2 + $0xcf4] sm:$0xf0]  ;;  %v9139_v2 = vor.u32 %v12459_v39, %v9138_v0 }
 0x26c   :  { %7325 = vmatpush.bf16.msra.mxu2 %v9443_v9  ;;  %v9411_v9 = vor.u32 %v12527_v52, %v9410_v14  ;;  %v9890_v3 = vld [vmem:[#allocation2 + $0xde8] sm:$0xf]  ;;  %v12711_v4 = vld [vmem:[#allocation2 + $0xff4] sm:$0xf0]  ;;  %v9763_v61 = vor.u32 %v12615_v60, %v9762_v36 }
 0x26d   :  { %7338 = vmatpush.bf16.msra.mxu3 %v9571_v58  ;;  %v12523_v58 = vld [vmem:[#allocation2 + $0xa14] sm:$0xf0]  ;;  %v10018_v40 = vld [vmem:[#allocation2 + $0xee8] sm:$0xf] }
 0x26e   :  { %7300 = vmatpush.bf16.msra.mxu0 %v9171_v62  ;;  %v12647_v62 = vld [vmem:[#allocation2 + $0xdf4] sm:$0xf0]  ;;  %v9395_v59 = vor.u32 %v12523_v58, %v9394_v32  ;;  %v10146_v56 = vld [vmem:[#allocation2 + $0xfe8] sm:$0xf] }
 0x26f   :  { %7313 = vmatpush.bf16.msra.mxu1 %v9299_v51  ;;  %v12679_v51 = vld [vmem:[#allocation2 + $0xef4] sm:$0xf0]  ;;  %v9891_v14 = vor.u32 %v12647_v62, %v9890_v3  ;;  %v9746_v21 = vld [vmem:[#allocation2 + $0xcc8] sm:$0xf] }
 0x270   :  { %7326 = vmatpush.bf16.msra.mxu2 %v9427_v1  ;;  %v9267_v1 = vor.u32 %v12491_v43, %v9266_v50  ;;  %v10019_v52 = vor.u32 %v12679_v51, %v10018_v40  ;;  %v12611_v24 = vld [vmem:[#allocation2 + $0xcd4] sm:$0xf0]  ;;  %v9874_v57 = vld [vmem:[#allocation2 + $0xdc8] sm:$0xf] }
 0x271   :  { %7339 = vmatpush.bf16.msra.mxu3 %v9555_v6  ;;  %v9523_v6 = vor.u32 %v12555_v47, %v9522_v15  ;;  %v12643_v0 = vld [vmem:[#allocation2 + $0xdd4] sm:$0xf0]  ;;  %v10002_v39 = vld [vmem:[#allocation2 + $0xec8] sm:$0xf]  ;;  %v9747_v50 = vor.u32 %v12611_v24, %v9746_v21 }
 0x272   :  { %7301 = vmatpush.bf16.msra.mxu0 %v9155_v48  ;;  %v10147_v48 = vor.u32 %v12711_v4, %v10146_v56  ;;  %v12675_v63 = vld [vmem:[#allocation2 + $0xed4] sm:$0xf0]  ;;  %v9875_v43 = vor.u32 %v12643_v0, %v9874_v57  ;;  %v9858_v15 = vld [vmem:[#allocation2 + $0xda8] sm:$0xf] }
 0x273   :  { %7314 = vmatpush.bf16.msra.mxu1 %v9283_v8  ;;  %v10130_v8 = vld [vmem:[#allocation2 + $0xfc8] sm:$0xf]  ;;  %v10003_v32 = vor.u32 %v12675_v63, %v10002_v39  ;;  %v12607_v58 = vld [vmem:[#allocation2 + $0xcb4] sm:$0xf0] }
 0x274   :  { %7327 = vmatpush.bf16.msra.mxu2 %v9411_v9  ;;  %v12707_v9 = vld [vmem:[#allocation2 + $0xfd4] sm:$0xf0]  ;;  %v9986_v60 = vld [vmem:[#allocation2 + $0xea8] sm:$0xf] }
 0x275   :  { %7340 = vmatpush.bf16.msra.mxu3 %v9539_v26  ;;  %v9730_v26 = vld [vmem:[#allocation2 + $0xca8] sm:$0xf]  ;;  %v10131_v47 = vor.u32 %v12707_v9, %v10130_v8  ;;  %v12639_v36 = vld [vmem:[#allocation2 + $0xdb4] sm:$0xf0] }
 0x276   :  { %7302 = vmatpush.bf16.msra.mxu0 %v9139_v2  ;;  %v12671_v3 = vld [vmem:[#allocation2 + $0xeb4] sm:$0xf0]  ;;  %v10114_v2 = vld [vmem:[#allocation2 + $0xfa8] sm:$0xf]  ;;  %v9731_v40 = vor.u32 %v12607_v58, %v9730_v26  ;;  %v9859_v51 = vor.u32 %v12639_v36, %v9858_v15  ;;  %v7096_v21 = vpop.f32.mrf.mxu0 }
 0x277   :  { %7315 = vmatpush.bf16.msra.mxu1 %v9267_v1  ;;  %v12703_v62 = vld [vmem:[#allocation2 + $0xfb4] sm:$0xf0]  ;;  %v9987_v1 = vor.u32 %v12671_v3, %v9986_v60  ;;  %v9842_v4 = vld [vmem:[#allocation2 + $0xd88] sm:$0xf]  ;;  %v7109_v39 = vpop.f32.mrf.mxu1 }
 0x278   :  { %7328 = vmatpush.bf16.msra.mxu2 %v9395_v59  ;;  %v9714_v59 = vld [vmem:[#allocation2 + $0xc88] sm:$0xf]  ;;  %v12603_v56 = vld [vmem:[#allocation2 + $0xc94] sm:$0xf0] }
 0x279   :  { %7341 = vmatpush.bf16.msra.mxu3 %v9523_v6  ;;  %7303 = vmatmul.bf16.vlgmr.msra.gmra.mxu0 %v13431_v25  ;;  %v10115_v6 = vor.u32 %v12703_v62, %v10114_v2  ;;  %v10098_v24 = vld [vmem:[#allocation2 + $0xf88] sm:$0xf]  ;;  %v12699_v57 = vld [vmem:[#allocation2 + $0xf94] sm:$0xf0]  ;;  %v9715_v0 = vor.u32 %v12603_v56, %v9714_v59 }
 0x27a   :  { %7347 = vmatpush.bf16.msrb.mxu0 %v9763_v61  ;;  %7316 = vmatmul.bf16.vlgmr.msra.gmra.mxu1 %v13435_v30  ;;  %v12635_v61 = vld [vmem:[#allocation2 + $0xd94] sm:$0xf0]  ;;  %v9698_v9 = vld [vmem:[#allocation2 + $0xc68] sm:$0xf] }
 0x27b   :  { %7360 = vmatpush.bf16.msrb.mxu1 %v9891_v14  ;;  %7329 = vmatmul.bf16.vlgmr.msra.gmra.mxu2 %v13433_v29  ;;  %v9970_v14 = vld [vmem:[#allocation2 + $0xe88] sm:$0xf]  ;;  %v9843_v63 = vor.u32 %v12635_v61, %v9842_v4  ;;  %v12631_v58 = vld [vmem:[#allocation2 + $0xd74] sm:$0xf0] }
 0x27c   :  { %7373 = vmatpush.bf16.msrb.mxu2 %v10019_v52  ;;  %7342 = vmatmul.bf16.vlgmr.msra.gmra.mxu3 %v13437_v33  ;;  %v12667_v52 = vld [vmem:[#allocation2 + $0xe94] sm:$0xf0]  ;;  %v9954_v15 = vld [vmem:[#allocation2 + $0xe68] sm:$0xf] }
 0x27d   :  { %7386 = vmatpush.bf16.msrb.mxu3 %v10147_v48  ;;  %v7097_v48 = vadd.f32 %v7096_v21, %v13611_v27  ;;  %v9971_v8 = vor.u32 %v12667_v52, %v9970_v14  ;;  %v10082_v36 = vld [vmem:[#allocation2 + $0xf68] sm:$0xf]  ;;  %v12695_v60 = vld [vmem:[#allocation2 + $0xf74] sm:$0xf0] }
 0x27e   :  { %7348 = vmatpush.bf16.msrb.mxu0 %v9747_v50  ;;  %v12599_v50 = vld [vmem:[#allocation2 + $0xc74] sm:$0xf0]  ;;  %v9682_v62 = vld [vmem:[#allocation2 + $0xc48] sm:$0xf]  ;;  %v7122_v59 = vpop.f32.mrf.mxu2 }
 0x27f   :  { %7361 = vmatpush.bf16.msrb.mxu1 %v9875_v43  ;;  %v9826_v43 = vld [vmem:[#allocation2 + $0xd68] sm:$0xf]  ;;  %v7110_v26 = vadd.f32 %v7109_v39, %v7097_v48  ;;  %v9699_v3 = vor.u32 %v12599_v50, %v9698_v9  ;;  %v12627_v56 = vld [vmem:[#allocation2 + $0xd54] sm:$0xf0]  ;;  %v7135_v14 = vpop.f32.mrf.mxu3  ;;  %v7111_v48 = vpop.f32.mrf.mxu1 }
 0x280   :  { %7374 = vmatpush.bf16.msrb.mxu2 %v10003_v32  ;;  %v10099_v32 = vor.u32 %v12699_v57, %v10098_v24  ;;  %v9827_v27 = vor.u32 %v12631_v58, %v9826_v43  ;;  %v9938_v4 = vld [vmem:[#allocation2 + $0xe48] sm:$0xf]  ;;  %v12691_v21 = vld [vmem:[#allocation2 + $0xf54] sm:$0xf0]  ;;  %v7098_v24 = vpop.f32.mrf.mxu0 }
 0x281   :  { %7387 = vmatpush.bf16.msrb.mxu3 %v10131_v47  ;;  %v12663_v47 = vld [vmem:[#allocation2 + $0xe74] sm:$0xf0]  ;;  %v7123_v61 = vadd.f32 %v7122_v59, %v7110_v26  ;;  %v10066_v52 = vld [vmem:[#allocation2 + $0xf48] sm:$0xf] }
 0x282   :  { %7349 = vmatpush.bf16.msrb.mxu0 %v9731_v40  ;;  %v9955_v2 = vor.u32 %v12663_v47, %v9954_v15  ;;  %v12595_v40 = vld [vmem:[#allocation2 + $0xc54] sm:$0xf0]  ;;  %v9794_v50 = vld [vmem:[#allocation2 + $0xd28] sm:$0xf]  ;;  %v10067_v43 = vor.u32 %v12691_v21, %v10066_v52 }
 0x283   :  { %7362 = vmatpush.bf16.msrb.mxu1 %v9859_v51  ;;  %v9810_v51 = vld [vmem:[#allocation2 + $0xd48] sm:$0xf]  ;;  %v9683_v57 = vor.u32 %v12595_v40, %v9682_v62  ;;  %v12591_v9 = vld [vmem:[#allocation2 + $0xc34] sm:$0xf0] }
 0x284   :  { %7375 = vmatpush.bf16.msrb.mxu2 %v9987_v1  ;;  %v10083_v1 = vor.u32 %v12695_v60, %v10082_v36  ;;  %v9811_v39 = vor.u32 %v12627_v56, %v9810_v51  ;;  %v9922_v26 = vld [vmem:[#allocation2 + $0xe28] sm:$0xf]  ;;  %v12655_v58 = vld [vmem:[#allocation2 + $0xe34] sm:$0xf0] }
 0x285   :  { %7388 = vmatpush.bf16.msrb.mxu3 %v10115_v6  ;;  %v12659_v6 = vld [vmem:[#allocation2 + $0xe54] sm:$0xf0]  ;;  %v10050_v15 = vld [vmem:[#allocation2 + $0xf28] sm:$0xf] }
 0x286   :  { %7350 = vmatpush.bf16.msrb.mxu0 %v9715_v0  ;;  %v13618_v0 = vadd.f32 %v7135_v14, %v7123_v61  ;;  %v12687_v47 = vld [vmem:[#allocation2 + $0xf34] sm:$0xf0]  ;;  %v9650_v60 = vld [vmem:[#allocation2 + $0xc08] sm:$0xf] }
 0x287   :  { %7363 = vmatpush.bf16.msrb.mxu1 %v9843_v63  ;;  %v9939_v63 = vor.u32 %v12659_v6, %v9938_v4  ;;  %v9778_v62 = vld [vmem:[#allocation2 + $0xd08] sm:$0xf]  ;;  %v12619_v40 = vld [vmem:[#allocation2 + $0xd14] sm:$0xf0]  ;;  %v10051_v59 = vor.u32 %v12687_v47, %v10050_v15  ;;  %v7124_v6 = vpop.f32.mrf.mxu2  ;;  %v7137_v21 = vpop.f32.mrf.mxu3 }
 0x288   :  { %7376 = vmatpush.bf16.msrb.mxu2 %v9971_v8  ;;  %v9666_v8 = vld [vmem:[#allocation2 + $0xc28] sm:$0xf]  ;;  %v12683_v4 = vld [vmem:[#allocation2 + $0xf14] sm:$0xf0] }
 0x289   :  { %7389 = vmatpush.bf16.msrb.mxu3 %v10099_v32  ;;  %v12623_v32 = vld [vmem:[#allocation2 + $0xd34] sm:$0xf0]  ;;  %v9667_v36 = vor.u32 %v12591_v9, %v9666_v8  ;;  %v9906_v51 = vld [vmem:[#allocation2 + $0xe08] sm:$0xf] }
 0x28a   :  { %7351 = vmatpush.bf16.msrb.mxu0 %v9699_v3  ;;  %v12587_v3 = vld [vmem:[#allocation2 + $0xc14] sm:$0xf0]  ;;  %v10034_v56 = vld [vmem:[#allocation2 + $0xf08] sm:$0xf] }
 0x28b   :  { %7364 = vmatpush.bf16.msrb.mxu1 %v9827_v27  ;;  %v9795_v27 = vor.u32 %v12623_v32, %v9794_v50  ;;  %v10274_v61 = vld [vmem:[#allocation2 + $0x10e8] sm:$0xf]  ;;  %v12743_v14 = vld [vmem:[#allocation2 + $0x10f4] sm:$0xf0]  ;;  %v9651_v24 = vor.u32 %v12587_v3, %v9650_v60 }
 0x28c   :  { %7377 = vmatpush.bf16.msrb.mxu2 %v9955_v2  ;;  %v9923_v2 = vor.u32 %v12655_v58, %v9922_v26  ;;  %v10402_v52 = vld [vmem:[#allocation2 + $0x11e8] sm:$0xf]  ;;  %v12839_v50 = vld [vmem:[#allocation2 + $0x13f4] sm:$0xf0]  ;;  %v10275_v32 = vor.u32 %v12743_v14, %v10274_v61 }
 0x28d   :  { %7390 = vmatpush.bf16.msrb.mxu3 %v10083_v1  ;;  %v12651_v1 = vld [vmem:[#allocation2 + $0xe14] sm:$0xf0]  ;;  %v10530_v48 = vld [vmem:[#allocation2 + $0x12e8] sm:$0xf] }
 0x28e   :  { %7352 = vmatpush.bf16.msrb.mxu0 %v9683_v57  ;;  %v12775_v57 = vld [vmem:[#allocation2 + $0x11f4] sm:$0xf0]  ;;  %v9907_v8 = vor.u32 %v12651_v1, %v9906_v51  ;;  %v10658_v9 = vld [vmem:[#allocation2 + $0x13e8] sm:$0xf] }
 0x28f   :  { %7365 = vmatpush.bf16.msrb.mxu1 %v9811_v39  ;;  %v12807_v39 = vld [vmem:[#allocation2 + $0x12f4] sm:$0xf0]  ;;  %v10403_v26 = vor.u32 %v12775_v57, %v10402_v52  ;;  %v10258_v15 = vld [vmem:[#allocation2 + $0x10c8] sm:$0xf] }
 0x290   :  { %7378 = vmatpush.bf16.msrb.mxu2 %v9939_v63  ;;  %v9779_v63 = vor.u32 %v12619_v40, %v9778_v62  ;;  %v10531_v58 = vor.u32 %v12807_v39, %v10530_v48  ;;  %v12739_v47 = vld [vmem:[#allocation2 + $0x10d4] sm:$0xf0]  ;;  %v10386_v6 = vld [vmem:[#allocation2 + $0x11c8] sm:$0xf] }
 0x291   :  { %7391 = vmatpush.bf16.msrb.mxu3 %v10067_v43  ;;  %v10035_v43 = vor.u32 %v12683_v4, %v10034_v56  ;;  %v12771_v60 = vld [vmem:[#allocation2 + $0x11d4] sm:$0xf0]  ;;  %v10514_v3 = vld [vmem:[#allocation2 + $0x12c8] sm:$0xf]  ;;  %v10259_v62 = vor.u32 %v12739_v47, %v10258_v15 }
 0x292   :  { %7353 = vmatpush.bf16.msrb.mxu0 %v9667_v36  ;;  %v10659_v36 = vor.u32 %v12839_v50, %v10658_v9  ;;  %v12803_v21 = vld [vmem:[#allocation2 + $0x12d4] sm:$0xf0]  ;;  %v10387_v40 = vor.u32 %v12771_v60, %v10386_v6  ;;  %v10370_v56 = vld [vmem:[#allocation2 + $0x11a8] sm:$0xf] }
 0x293   :  { %7366 = vmatpush.bf16.msrb.mxu1 %v9795_v27  ;;  %v10642_v27 = vld [vmem:[#allocation2 + $0x13c8] sm:$0xf]  ;;  %v10515_v51 = vor.u32 %v12803_v21, %v10514_v3  ;;  %v12735_v1 = vld [vmem:[#allocation2 + $0x10b4] sm:$0xf0] }
 0x294   :  { %7379 = vmatpush.bf16.msrb.mxu2 %v9923_v2  ;;  %v12835_v2 = vld [vmem:[#allocation2 + $0x13d4] sm:$0xf0]  ;;  %v10498_v14 = vld [vmem:[#allocation2 + $0x12a8] sm:$0xf] }
 0x295   :  { %7392 = vmatpush.bf16.msrb.mxu3 %v10051_v59  ;;  %v10242_v59 = vld [vmem:[#allocation2 + $0x10a8] sm:$0xf]  ;;  %v10643_v4 = vor.u32 %v12835_v2, %v10642_v27  ;;  %v12767_v61 = vld [vmem:[#allocation2 + $0x11b4] sm:$0xf0] }
 0x296   :  { %7354 = vmatpush.bf16.msrb.mxu0 %v9651_v24  ;;  %v12799_v52 = vld [vmem:[#allocation2 + $0x12b4] sm:$0xf0]  ;;  %v10626_v24 = vld [vmem:[#allocation2 + $0x13a8] sm:$0xf]  ;;  %v10243_v48 = vor.u32 %v12735_v1, %v10242_v59  ;;  %v10371_v39 = vor.u32 %v12767_v61, %v10370_v56  ;;  %v7148_v15 = vpop.f32.mrf.mxu0 }
 0x297   :  { %7367 = vmatpush.bf16.msrb.mxu1 %v9779_v63  ;;  %v12831_v57 = vld [vmem:[#allocation2 + $0x13b4] sm:$0xf0]  ;;  %v10499_v63 = vor.u32 %v12799_v52, %v10498_v14  ;;  %v10354_v50 = vld [vmem:[#allocation2 + $0x1188] sm:$0xf]  ;;  %v7161_v3 = vpop.f32.mrf.mxu1 }
 0x298   :  { %7380 = vmatpush.bf16.msrb.mxu2 %v9907_v8  ;;  %v10226_v8 = vld [vmem:[#allocation2 + $0x1088] sm:$0xf]  ;;  %v12731_v9 = vld [vmem:[#allocation2 + $0x1094] sm:$0xf0] }
 0x299   :  { %7393 = vmatpush.bf16.msrb.mxu3 %v10035_v43  ;;  %7355 = vmatmul.bf16.vlgmr.msrb.gmra.mxu0 %v13449_v23  ;;  %v10627_v43 = vor.u32 %v12831_v57, %v10626_v24  ;;  %v10610_v47 = vld [vmem:[#allocation2 + $0x1388] sm:$0xf]  ;;  %v12827_v6 = vld [vmem:[#allocation2 + $0x1394] sm:$0xf0]  ;;  %v10227_v60 = vor.u32 %v12731_v9, %v10226_v8 }
 0x29a   :  { %7399 = vmatpush.bf16.msra.mxu0 %v10275_v32  ;;  %7368 = vmatmul.bf16.vlgmr.msrb.gmra.mxu1 %v13453_v31  ;;  %v12763_v32 = vld [vmem:[#allocation2 + $0x1194] sm:$0xf0]  ;;  %v10210_v2 = vld [vmem:[#allocation2 + $0x1068] sm:$0xf] }
 0x29b   :  { %7412 = vmatpush.bf16.msra.mxu1 %v10403_v26  ;;  %7381 = vmatmul.bf16.vlgmr.msrb.gmra.mxu2 %v13451_v28  ;;  %v10482_v26 = vld [vmem:[#allocation2 + $0x1288] sm:$0xf]  ;;  %v10355_v21 = vor.u32 %v12763_v32, %v10354_v50  ;;  %v12759_v1 = vld [vmem:[#allocation2 + $0x1174] sm:$0xf0] }
 0x29c   :  { %7425 = vmatpush.bf16.msra.mxu2 %v10531_v58  ;;  %7394 = vmatmul.bf16.vlgmr.msrb.gmra.mxu3 %v13455_v35  ;;  %v12795_v58 = vld [vmem:[#allocation2 + $0x1294] sm:$0xf0]  ;;  %v10466_v56 = vld [vmem:[#allocation2 + $0x1268] sm:$0xf] }
 0x29d   :  { %7438 = vmatpush.bf16.msra.mxu3 %v10659_v36  ;;  %v7149_v36 = vadd.f32 %v7148_v15, %v13618_v0  ;;  %v10483_v27 = vor.u32 %v12795_v58, %v10482_v26  ;;  %v10594_v61 = vld [vmem:[#allocation2 + $0x1368] sm:$0xf]  ;;  %v12823_v14 = vld [vmem:[#allocation2 + $0x1374] sm:$0xf0] }
 0x29e   :  { %7400 = vmatpush.bf16.msra.mxu0 %v10259_v62  ;;  %v12727_v62 = vld [vmem:[#allocation2 + $0x1074] sm:$0xf0]  ;;  %v10194_v57 = vld [vmem:[#allocation2 + $0x1048] sm:$0xf]  ;;  %v7174_v8 = vpop.f32.mrf.mxu2 }
 0x29f   :  { %7413 = vmatpush.bf16.msra.mxu1 %v10387_v40  ;;  %v10338_v40 = vld [vmem:[#allocation2 + $0x1168] sm:$0xf]  ;;  %v7162_v59 = vadd.f32 %v7161_v3, %v7149_v36  ;;  %v10211_v52 = vor.u32 %v12727_v62, %v10210_v2  ;;  %v12755_v9 = vld [vmem:[#allocation2 + $0x1154] sm:$0xf0]  ;;  %v7187_v26 = vpop.f32.mrf.mxu3  ;;  %v7163_v36 = vpop.f32.mrf.mxu1 }
 0x2a0   :  { %7426 = vmatpush.bf16.msra.mxu2 %v10515_v51  ;;  %v10611_v51 = vor.u32 %v12827_v6, %v10610_v47  ;;  %v10339_v0 = vor.u32 %v12759_v1, %v10338_v40  ;;  %v10450_v50 = vld [vmem:[#allocation2 + $0x1248] sm:$0xf]  ;;  %v12819_v15 = vld [vmem:[#allocation2 + $0x1354] sm:$0xf0]  ;;  %v7150_v47 = vpop.f32.mrf.mxu0 }
 0x2a1   :  { %7439 = vmatpush.bf16.msra.mxu3 %v10643_v4  ;;  %v12791_v4 = vld [vmem:[#allocation2 + $0x1274] sm:$0xf0]  ;;  %v7175_v32 = vadd.f32 %v7174_v8, %v7162_v59  ;;  %v10578_v58 = vld [vmem:[#allocation2 + $0x1348] sm:$0xf] }
 0x2a2   :  { %7401 = vmatpush.bf16.msra.mxu0 %v10243_v48  ;;  %v10467_v24 = vor.u32 %v12791_v4, %v10466_v56  ;;  %v12723_v48 = vld [vmem:[#allocation2 + $0x1054] sm:$0xf0]  ;;  %v10306_v62 = vld [vmem:[#allocation2 + $0x1128] sm:$0xf]  ;;  %v10579_v40 = vor.u32 %v12819_v15, %v10578_v58 }
 0x2a3   :  { %7414 = vmatpush.bf16.msra.mxu1 %v10371_v39  ;;  %v10322_v39 = vld [vmem:[#allocation2 + $0x1148] sm:$0xf]  ;;  %v10195_v6 = vor.u32 %v12723_v48, %v10194_v57  ;;  %v12719_v2 = vld [vmem:[#allocation2 + $0x1034] sm:$0xf0] }
 0x2a4   :  { %7427 = vmatpush.bf16.msra.mxu2 %v10499_v63  ;;  %v10595_v63 = vor.u32 %v12823_v14, %v10594_v61  ;;  %v10323_v3 = vor.u32 %v12755_v9, %v10322_v39  ;;  %v10434_v59 = vld [vmem:[#allocation2 + $0x1228] sm:$0xf]  ;;  %v12783_v1 = vld [vmem:[#allocation2 + $0x1234] sm:$0xf0] }
 0x2a5   :  { %7440 = vmatpush.bf16.msra.mxu3 %v10627_v43  ;;  %v12787_v43 = vld [vmem:[#allocation2 + $0x1254] sm:$0xf0]  ;;  %v10562_v56 = vld [vmem:[#allocation2 + $0x1328] sm:$0xf] }
 0x2a6   :  { %7402 = vmatpush.bf16.msra.mxu0 %v10227_v60  ;;  %v13625_v60 = vadd.f32 %v7187_v26, %v7175_v32  ;;  %v12815_v4 = vld [vmem:[#allocation2 + $0x1334] sm:$0xf0]  ;;  %v10162_v14 = vld [vmem:[#allocation2 + $0x1008] sm:$0xf] }
 0x2a7   :  { %7415 = vmatpush.bf16.msra.mxu1 %v10355_v21  ;;  %v10451_v21 = vor.u32 %v12787_v43, %v10450_v50  ;;  %v10290_v57 = vld [vmem:[#allocation2 + $0x1108] sm:$0xf]  ;;  %v12747_v48 = vld [vmem:[#allocation2 + $0x1114] sm:$0xf0]  ;;  %v10563_v8 = vor.u32 %v12815_v4, %v10562_v56  ;;  %v7176_v43 = vpop.f32.mrf.mxu2  ;;  %v7189_v15 = vpop.f32.mrf.mxu3 }
 0x2a8   :  { %7428 = vmatpush.bf16.msra.mxu2 %v10483_v27  ;;  %13731 = vst [vmem:[#allocation13_spill] sm:$0xff] %v13625_v60  ;;  %v10178_v27 = vld [vmem:[#allocation2 + $0x1028] sm:$0xf]  ;;  %v12811_v50 = vld [vmem:[#allocation2 + $0x1314] sm:$0xf0] }
 0x2a9   :  { %7441 = vmatpush.bf16.msra.mxu3 %v10611_v51  ;;  %v12751_v51 = vld [vmem:[#allocation2 + $0x1134] sm:$0xf0]  ;;  %v10179_v61 = vor.u32 %v12719_v2, %v10178_v27  ;;  %v10418_v39 = vld [vmem:[#allocation2 + $0x1208] sm:$0xf] }
 0x2aa   :  { %7403 = vmatpush.bf16.msra.mxu0 %v10211_v52  ;;  %v12715_v52 = vld [vmem:[#allocation2 + $0x1014] sm:$0xf0]  ;;  %v10546_v9 = vld [vmem:[#allocation2 + $0x1308] sm:$0xf] }
 0x2ab   :  { %7416 = vmatpush.bf16.msra.mxu1 %v10339_v0  ;;  %v10307_v0 = vor.u32 %v12751_v51, %v10306_v62  ;;  %v10786_v32 = vld [vmem:[#allocation2 + $0x14e8] sm:$0xf]  ;;  %v12871_v26 = vld [vmem:[#allocation2 + $0x14f4] sm:$0xf0]  ;;  %v10163_v47 = vor.u32 %v12715_v52, %v10162_v14 }
 0x2ac   :  { %7429 = vmatpush.bf16.msra.mxu2 %v10467_v24  ;;  %v10435_v24 = vor.u32 %v12783_v1, %v10434_v59  ;;  %v10914_v58 = vld [vmem:[#allocation2 + $0x15e8] sm:$0xf]  ;;  %v12967_v62 = vld [vmem:[#allocation2 + $0x17f4] sm:$0xf0]  ;;  %v10787_v51 = vor.u32 %v12871_v26, %v10786_v32 }
 0x2ad   :  { %7442 = vmatpush.bf16.msra.mxu3 %v10595_v63  ;;  %v12779_v63 = vld [vmem:[#allocation2 + $0x1214] sm:$0xf0]  ;;  %v11042_v36 = vld [vmem:[#allocation2 + $0x16e8] sm:$0xf] }
 0x2ae   :  { %7404 = vmatpush.bf16.msra.mxu0 %v10195_v6  ;;  %v12903_v6 = vld [vmem:[#allocation2 + $0x15f4] sm:$0xf0]  ;;  %v10419_v27 = vor.u32 %v12779_v63, %v10418_v39  ;;  %v11170_v2 = vld [vmem:[#allocation2 + $0x17e8] sm:$0xf] }
 0x2af   :  { %7417 = vmatpush.bf16.msra.mxu1 %v10323_v3  ;;  %v12935_v3 = vld [vmem:[#allocation2 + $0x16f4] sm:$0xf0]  ;;  %v10915_v59 = vor.u32 %v12903_v6, %v10914_v58  ;;  %v10770_v56 = vld [vmem:[#allocation2 + $0x14c8] sm:$0xf] }
 0x2b0   :  { %7430 = vmatpush.bf16.msra.mxu2 %v10451_v21  ;;  %v10291_v21 = vor.u32 %v12747_v48, %v10290_v57  ;;  %v11043_v1 = vor.u32 %v12935_v3, %v11042_v36  ;;  %v12867_v4 = vld [vmem:[#allocation2 + $0x14d4] sm:$0xf0]  ;;  %v10898_v43 = vld [vmem:[#allocation2 + $0x15c8] sm:$0xf] }
 0x2b1   :  { %7443 = vmatpush.bf16.msra.mxu3 %v10579_v40  ;;  %v10547_v40 = vor.u32 %v12811_v50, %v10546_v9  ;;  %v12899_v14 = vld [vmem:[#allocation2 + $0x15d4] sm:$0xf0]  ;;  %v11026_v52 = vld [vmem:[#allocation2 + $0x16c8] sm:$0xf]  ;;  %v10771_v57 = vor.u32 %v12867_v4, %v10770_v56 }
 0x2b2   :  { %7405 = vmatpush.bf16.msra.mxu0 %v10179_v61  ;;  %v11171_v61 = vor.u32 %v12967_v62, %v11170_v2  ;;  %v12931_v15 = vld [vmem:[#allocation2 + $0x16d4] sm:$0xf0]  ;;  %v10899_v48 = vor.u32 %v12899_v14, %v10898_v43  ;;  %v10882_v9 = vld [vmem:[#allocation2 + $0x15a8] sm:$0xf] }
 0x2b3   :  { %7418 = vmatpush.bf16.msra.mxu1 %v10307_v0  ;;  %v11154_v0 = vld [vmem:[#allocation2 + $0x17c8] sm:$0xf]  ;;  %v11027_v39 = vor.u32 %v12931_v15, %v11026_v52  ;;  %v12863_v63 = vld [vmem:[#allocation2 + $0x14b4] sm:$0xf0] }
 0x2b4   :  { %7431 = vmatpush.bf16.msra.mxu2 %v10435_v24  ;;  %v12963_v24 = vld [vmem:[#allocation2 + $0x17d4] sm:$0xf0]  ;;  %v11010_v26 = vld [vmem:[#allocation2 + $0x16a8] sm:$0xf] }
 0x2b5   :  { %7444 = vmatpush.bf16.msra.mxu3 %v10563_v8  ;;  %v10754_v8 = vld [vmem:[#allocation2 + $0x14a8] sm:$0xf]  ;;  %v11155_v50 = vor.u32 %v12963_v24, %v11154_v0  ;;  %v12895_v32 = vld [vmem:[#allocation2 + $0x15b4] sm:$0xf0] }
 0x2b6   :  { %7406 = vmatpush.bf16.msra.mxu0 %v10163_v47  ;;  %v12927_v58 = vld [vmem:[#allocation2 + $0x16b4] sm:$0xf0]  ;;  %v11138_v47 = vld [vmem:[#allocation2 + $0x17a8] sm:$0xf]  ;;  %v10755_v36 = vor.u32 %v12863_v63, %v10754_v8  ;;  %v7200_v52 = vpop.f32.mrf.mxu0 }
 0x2b7   :  { %7419 = vmatpush.bf16.msra.mxu1 %v10291_v21  ;;  %v12959_v6 = vld [vmem:[#allocation2 + $0x17b4] sm:$0xf0]  ;;  %v10738_v3 = vld [vmem:[#allocation2 + $0x1488] sm:$0xf]  ;;  %v10883_v21 = vor.u32 %v12895_v32, %v10882_v9  ;;  %v7213_v8 = vpop.f32.mrf.mxu1 }
 0x2b8   :  { %7432 = vmatpush.bf16.msra.mxu2 %v10419_v27  ;;  %v11011_v27 = vor.u32 %v12927_v58, %v11010_v26  ;;  %v12859_v2 = vld [vmem:[#allocation2 + $0x1494] sm:$0xf0]  ;;  %v10866_v62 = vld [vmem:[#allocation2 + $0x1588] sm:$0xf] }
 0x2b9   :  { %7445 = vmatpush.bf16.msra.mxu3 %v10547_v40  ;;  %7407 = vmatmul.bf16.vlgmr.msra.gmra.mxu0 %v13467_v37  ;;  %v13236_v40 = vld [vmem:[#allocation4] sm:$0xf]  ;;  %v10994_v56 = vld [vmem:[#allocation2 + $0x1688] sm:$0xf]  ;;  %v12923_v4 = vld [vmem:[#allocation2 + $0x1694] sm:$0xf0]  ;;  %v10739_v14 = vor.u32 %v12859_v2, %v10738_v3 }
 0x2ba   :  { %7451 = vmatpush.bf16.msrb.mxu0 %v10787_v51  ;;  %7420 = vmatmul.bf16.vlgmr.msra.gmra.mxu1 %v13471_v46  ;;  %v1121_v51 = vperm.slane %v13236_v40, 2  ;;  %v11122_v43 = vld [vmem:[#allocation2 + $0x1788] sm:$0xf]  ;;  %v10995_v0 = vor.u32 %v12923_v4, %v10994_v56  ;;  %v12887_v9 = vld [vmem:[#allocation2 + $0x1574] sm:$0xf0] }
 0x2bb   :  { %7464 = vmatpush.bf16.msrb.mxu1 %v10915_v59  ;;  %7433 = vmatmul.bf16.vlgmr.msra.gmra.mxu2 %v13469_v45  ;;  %v11139_v59 = vor.u32 %v12959_v6, %v11138_v47  ;;  %v10722_v24 = vld [vmem:[#allocation2 + $0x1468] sm:$0xf]  ;;  %v12919_v32 = vld [vmem:[#allocation2 + $0x1674] sm:$0xf0] }
 0x2bc   :  { %7477 = vmatpush.bf16.msrb.mxu2 %v11043_v1  ;;  %7446 = vmatmul.bf16.vlgmr.msra.gmra.mxu3 %v13473_v49  ;;  %v12891_v1 = vld [vmem:[#allocation2 + $0x1594] sm:$0xf0]  ;;  %v11106_v26 = vld [vmem:[#allocation2 + $0x1768] sm:$0xf] }
 0x2bd   :  { %7490 = vmatpush.bf16.msrb.mxu3 %v11171_v61  ;;  %v12955_v61 = vld [vmem:[#allocation2 + $0x1794] sm:$0xf0]  ;;  %v10867_v15 = vor.u32 %v12891_v1, %v10866_v62  ;;  %v10834_v2 = vld [vmem:[#allocation2 + $0x1548] sm:$0xf] }
 0x2be   :  { %7452 = vmatpush.bf16.msrb.mxu0 %v10771_v57  ;;  %v12855_v57 = vld [vmem:[#allocation2 + $0x1474] sm:$0xf0]  ;;  %v11123_v63 = vor.u32 %v12955_v61, %v11122_v43  ;;  %v7226_v62 = vpop.f32.mrf.mxu2  ;;  %v11090_v43 = vld [vmem:[#allocation2 + $0x1748] sm:$0xf] }
 0x2bf   :  { %7465 = vmatpush.bf16.msrb.mxu1 %v10899_v48  ;;  %v10850_v48 = vld [vmem:[#allocation2 + $0x1568] sm:$0xf]  ;;  %v12951_v58 = vld [vmem:[#allocation2 + $0x1774] sm:$0xf0]  ;;  %v10723_v6 = vor.u32 %v12855_v57, %v10722_v24  ;;  %v7239_v4 = vpop.f32.mrf.mxu3 }
 0x2c0   :  { %7478 = vmatpush.bf16.msrb.mxu2 %v11027_v39  ;;  %v7201_v39 = vadd.f32 %v7200_v52, %v1121_v51  ;;  %v11107_v40 = vor.u32 %v12951_v58, %v11106_v26  ;;  %v12883_v51 = vld [vmem:[#allocation2 + $0x1554] sm:$0xf0]  ;;  %v10690_v57 = vld [vmem:[#allocation2 + $0x1428] sm:$0xf] }
 0x2c1   :  { %7491 = vmatpush.bf16.msrb.mxu3 %v11155_v50  ;;  %v10978_v50 = vld [vmem:[#allocation2 + $0x1668] sm:$0xf]  ;;  %v12915_v1 = vld [vmem:[#allocation2 + $0x1654] sm:$0xf0] }
 0x2c2   :  { %7453 = vmatpush.bf16.msrb.mxu0 %v10755_v36  ;;  %v7214_v47 = vadd.f32 %v7213_v8, %v7201_v39  ;;  %v10851_v36 = vor.u32 %v12887_v9, %v10850_v48  ;;  %v10979_v3 = vor.u32 %v12919_v32, %v10978_v50  ;;  %v12947_v61 = vld [vmem:[#allocation2 + $0x1754] sm:$0xf0]  ;;  %v10818_v39 = vld [vmem:[#allocation2 + $0x1528] sm:$0xf]  ;;  %v7215_v8 = vpop.f32.mrf.mxu1 }
 0x2c3   :  { %7466 = vmatpush.bf16.msrb.mxu1 %v10883_v21  ;;  %v10706_v21 = vld [vmem:[#allocation2 + $0x1448] sm:$0xf]  ;;  %v12847_v48 = vld [vmem:[#allocation2 + $0x1434] sm:$0xf0] }
 0x2c4   :  { %7479 = vmatpush.bf16.msrb.mxu2 %v11011_v27  ;;  %v12851_v27 = vld [vmem:[#allocation2 + $0x1454] sm:$0xf0]  ;;  %v7227_v56 = vadd.f32 %v7226_v62, %v7214_v47  ;;  %v10946_v50 = vld [vmem:[#allocation2 + $0x1628] sm:$0xf]  ;;  %v10691_v47 = vor.u32 %v12847_v48, %v10690_v57 }
 0x2c5   :  { %7492 = vmatpush.bf16.msrb.mxu3 %v11139_v59  ;;  %v10962_v59 = vld [vmem:[#allocation2 + $0x1648] sm:$0xf]  ;;  %v12879_v9 = vld [vmem:[#allocation2 + $0x1534] sm:$0xf0] }
 0x2c6   :  { %7454 = vmatpush.bf16.msrb.mxu0 %v10739_v14  ;;  %v10707_v14 = vor.u32 %v12851_v27, %v10706_v21  ;;  %v13631_v52 = vadd.f32 %v7239_v4, %v7227_v56  ;;  %v10963_v24 = vor.u32 %v12915_v1, %v10962_v59  ;;  %v12911_v32 = vld [vmem:[#allocation2 + $0x1634] sm:$0xf0]  ;;  %v11074_v26 = vld [vmem:[#allocation2 + $0x1728] sm:$0xf] }
 0x2c7   :  { %7467 = vmatpush.bf16.msrb.mxu1 %v10867_v15  ;;  %v7202_v15 = vpop.f32.mrf.mxu0  ;;  %v12943_v58 = vld [vmem:[#allocation2 + $0x1734] sm:$0xf0]  ;;  %v10802_v27 = vld [vmem:[#allocation2 + $0x1508] sm:$0xf]  ;;  %v7241_v4 = vpop.f32.mrf.mxu3 }
 0x2c8   :  { %7480 = vmatpush.bf16.msrb.mxu2 %v10995_v0  ;;  %v10835_v0 = vor.u32 %v12883_v51, %v10834_v2  ;;  %v12843_v21 = vld [vmem:[#allocation2 + $0x1414] sm:$0xf0]  ;;  %v10930_v62 = vld [vmem:[#allocation2 + $0x1608] sm:$0xf]  ;;  %v7228_v51 = vpop.f32.mrf.mxu2 }
 0x2c9   :  { %7493 = vmatpush.bf16.msrb.mxu3 %v11123_v63  ;;  %v11091_v63 = vor.u32 %v12947_v61, %v11090_v43  ;;  %v12875_v2 = vld [vmem:[#allocation2 + $0x1514] sm:$0xf0]  ;;  %v11058_v1 = vld [vmem:[#allocation2 + $0x1708] sm:$0xf] }
 0x2ca   :  { %7455 = vmatpush.bf16.msrb.mxu0 %v10723_v6  ;;  %v10674_v6 = vld [vmem:[#allocation2 + $0x1408] sm:$0xf]  ;;  %v12907_v59 = vld [vmem:[#allocation2 + $0x1614] sm:$0xf0]  ;;  %v10803_v48 = vor.u32 %v12875_v2, %v10802_v27 }
 0x2cb   :  { %7468 = vmatpush.bf16.msrb.mxu1 %v10851_v36  ;;  %v10819_v36 = vor.u32 %v12879_v9, %v10818_v39  ;;  %v12939_v56 = vld [vmem:[#allocation2 + $0x1714] sm:$0xf0]  ;;  %v11298_v43 = vld [vmem:[#allocation2 + $0x18e8] sm:$0xf]  ;;  %v10675_v15 = vor.u32 %v12843_v21, %v10674_v6  ;;  %v10931_v39 = vor.u32 %v12907_v59, %v10930_v62 }
 0x2cc   :  { %7481 = vmatpush.bf16.msrb.mxu2 %v10979_v3  ;;  %v10947_v3 = vor.u32 %v12911_v32, %v10946_v50  ;;  %v12999_v61 = vld [vmem:[#allocation2 + $0x18f4] sm:$0xf0]  ;;  %v11682_v8 = vld [vmem:[#allocation2 + $0x1be8] sm:$0xf] }
 0x2cd   :  { %7494 = vmatpush.bf16.msrb.mxu3 %v11107_v40  ;;  %v11075_v40 = vor.u32 %v12943_v58, %v11074_v26  ;;  %v13031_v57 = vld [vmem:[#allocation2 + $0x19f4] sm:$0xf0]  ;;  %v11299_v50 = vor.u32 %v12999_v61, %v11298_v43  ;;  %v11282_v58 = vld [vmem:[#allocation2 + $0x18c8] sm:$0xf] }
 0x2ce   :  { %7456 = vmatpush.bf16.msrb.mxu0 %v10707_v14  ;;  %v11426_v14 = vld [vmem:[#allocation2 + $0x19e8] sm:$0xf]  ;;  %v13095_v9 = vld [vmem:[#allocation2 + $0x1bf4] sm:$0xf0] }
 0x2cf   :  { %7469 = vmatpush.bf16.msrb.mxu1 %v10835_v0  ;;  %v11554_v0 = vld [vmem:[#allocation2 + $0x1ae8] sm:$0xf]  ;;  %v11427_v32 = vor.u32 %v13031_v57, %v11426_v14  ;;  %v12995_v51 = vld [vmem:[#allocation2 + $0x18d4] sm:$0xf0] }
 0x2d0   :  { %7482 = vmatpush.bf16.msrb.mxu2 %v10963_v24  ;;  %v13063_v24 = vld [vmem:[#allocation2 + $0x1af4] sm:$0xf0]  ;;  %v11410_v4 = vld [vmem:[#allocation2 + $0x19c8] sm:$0xf]  ;;  %v11283_v27 = vor.u32 %v12995_v51, %v11282_v58 }
 0x2d1   :  { %7495 = vmatpush.bf16.msrb.mxu3 %v11091_v63  ;;  %v11059_v63 = vor.u32 %v12939_v56, %v11058_v1  ;;  %v11555_v26 = vor.u32 %v13063_v24, %v11554_v0  ;;  %v13027_v6 = vld [vmem:[#allocation2 + $0x19d4] sm:$0xf0]  ;;  %v11538_v21 = vld [vmem:[#allocation2 + $0x1ac8] sm:$0xf] }
 0x2d2   :  { %7457 = vmatpush.bf16.msrb.mxu0 %v10691_v47  ;;  %v11683_v47 = vor.u32 %v13095_v9, %v11682_v8  ;;  %v13059_v60 = vld [vmem:[#allocation2 + $0x1ad4] sm:$0xf0]  ;;  %v11411_v2 = vor.u32 %v13027_v6, %v11410_v4  ;;  %v11394_v1 = vld [vmem:[#allocation2 + $0x19a8] sm:$0xf] }
 0x2d3   :  { %7470 = vmatpush.bf16.msrb.mxu1 %v10819_v36  ;;  %v11666_v36 = vld [vmem:[#allocation2 + $0x1bc8] sm:$0xf]  ;;  %v11539_v62 = vor.u32 %v13059_v60, %v11538_v21  ;;  %v12991_v59 = vld [vmem:[#allocation2 + $0x18b4] sm:$0xf0] }
 0x2d4   :  { %7483 = vmatpush.bf16.msrb.mxu2 %v10947_v3  ;;  %v13091_v3 = vld [vmem:[#allocation2 + $0x1bd4] sm:$0xf0]  ;;  %v11522_v61 = vld [vmem:[#allocation2 + $0x1aa8] sm:$0xf] }
 0x2d5   :  { %7496 = vmatpush.bf16.msrb.mxu3 %v11075_v40  ;;  %v11266_v40 = vld [vmem:[#allocation2 + $0x18a8] sm:$0xf]  ;;  %v11667_v56 = vor.u32 %v13091_v3, %v11666_v36  ;;  %v13023_v43 = vld [vmem:[#allocation2 + $0x19b4] sm:$0xf0] }
 0x2d6   :  { %7458 = vmatpush.bf16.msrb.mxu0 %v10675_v15  ;;  %v13055_v14 = vld [vmem:[#allocation2 + $0x1ab4] sm:$0xf0]  ;;  %v11650_v15 = vld [vmem:[#allocation2 + $0x1ba8] sm:$0xf]  ;;  %v11267_v60 = vor.u32 %v12991_v59, %v11266_v40  ;;  %v11395_v0 = vor.u32 %v13023_v43, %v11394_v1  ;;  %v7252_v4 = vpop.f32.mrf.mxu0 }
 0x2d7   :  { %7471 = vmatpush.bf16.msrb.mxu1 %v10803_v48  ;;  %v13087_v57 = vld [vmem:[#allocation2 + $0x1bb4] sm:$0xf0]  ;;  %v11523_v24 = vor.u32 %v13055_v14, %v11522_v61  ;;  %v11250_v48 = vld [vmem:[#allocation2 + $0x1888] sm:$0xf] }
 0x2d8   :  { %7484 = vmatpush.bf16.msrb.mxu2 %v10931_v39  ;;  %v12987_v39 = vld [vmem:[#allocation2 + $0x1894] sm:$0xf0]  ;;  %v11378_v8 = vld [vmem:[#allocation2 + $0x1988] sm:$0xf]  ;;  %v11651_v9 = vor.u32 %v13087_v57, %v11650_v15 }
 0x2d9   :  { %7497 = vmatpush.bf16.msrb.mxu3 %v11059_v63  ;;  %7459 = vmatmul.bf16.vlgmr.msrb.gmra.mxu0 %v13487_v7  ;;  %v13019_v63 = vld [vmem:[#allocation2 + $0x1994] sm:$0xf0]  ;;  %v11251_v51 = vor.u32 %v12987_v39, %v11250_v48  ;;  %v11234_v21 = vld [vmem:[#allocation2 + $0x1868] sm:$0xf] }
 0x2da   :  { %7503 = vmatpush.bf16.msra.mxu0 %v11299_v50  ;;  %7472 = vmatmul.bf16.vlgmr.msrb.gmra.mxu1 %v13491_v12  ;;  %v11506_v50 = vld [vmem:[#allocation2 + $0x1a88] sm:$0xf]  ;;  %v13083_v58 = vld [vmem:[#allocation2 + $0x1b94] sm:$0xf0] }
 0x2db   :  { %7516 = vmatpush.bf16.msra.mxu1 %v11427_v32  ;;  %7485 = vmatmul.bf16.vlgmr.msrb.gmra.mxu2 %v13489_v11  ;;  %v13051_v32 = vld [vmem:[#allocation2 + $0x1a94] sm:$0xf0]  ;;  %v11362_v3 = vld [vmem:[#allocation2 + $0x1968] sm:$0xf] }
 0x2dc   :  { %7529 = vmatpush.bf16.msra.mxu2 %v11555_v26  ;;  %7498 = vmatmul.bf16.vlgmr.msrb.gmra.mxu3 %v13493_v16  ;;  %v11634_v26 = vld [vmem:[#allocation2 + $0x1b88] sm:$0xf]  ;;  %v11507_v6 = vor.u32 %v13051_v32, %v11506_v50  ;;  %v12983_v36 = vld [vmem:[#allocation2 + $0x1874] sm:$0xf0] }
 0x2dd   :  { %7542 = vmatpush.bf16.msra.mxu3 %v11683_v47  ;;  %v11379_v47 = vor.u32 %v13019_v63, %v11378_v8  ;;  %v13015_v40 = vld [vmem:[#allocation2 + $0x1974] sm:$0xf0]  ;;  %v11490_v59 = vld [vmem:[#allocation2 + $0x1a68] sm:$0xf]  ;;  %v11235_v14 = vor.u32 %v12983_v36, %v11234_v21 }
 0x2de   :  { %7504 = vmatpush.bf16.msra.mxu0 %v11283_v27  ;;  %v7253_v27 = vadd.f32 %v7252_v4, %v13631_v52  ;;  %v13047_v1 = vld [vmem:[#allocation2 + $0x1a74] sm:$0xf0]  ;;  %v11363_v15 = vor.u32 %v13015_v40, %v11362_v3  ;;  %v7278_v48 = vpop.f32.mrf.mxu2  ;;  %v11474_v8 = vld [vmem:[#allocation2 + $0x1a48] sm:$0xf]  ;;  %v7254_v4 = vpop.f32.mrf.mxu0 }
 0x2df   :  { %7517 = vmatpush.bf16.msra.mxu1 %v11411_v2  ;;  %v7265_v2 = vpop.f32.mrf.mxu1  ;;  %v13079_v43 = vld [vmem:[#allocation2 + $0x1b74] sm:$0xf0]  ;;  %v11491_v57 = vor.u32 %v13047_v1, %v11490_v59  ;;  %v7291_v50 = vpop.f32.mrf.mxu3  ;;  %v11602_v32 = vld [vmem:[#allocation2 + $0x1b48] sm:$0xf] }
 0x2e0   :  { %7530 = vmatpush.bf16.msra.mxu2 %v11539_v62  ;;  %v11635_v62 = vor.u32 %v13083_v58, %v11634_v26  ;;  %v7266_v61 = vadd.f32 %v7265_v2, %v7253_v27  ;;  %v13011_v39 = vld [vmem:[#allocation2 + $0x1954] sm:$0xf0]  ;;  %v11202_v21 = vld [vmem:[#allocation2 + $0x1828] sm:$0xf] }
 0x2e1   :  { %7543 = vmatpush.bf16.msra.mxu3 %v11667_v56  ;;  %v11618_v56 = vld [vmem:[#allocation2 + $0x1b68] sm:$0xf]  ;;  %v13075_v26 = vld [vmem:[#allocation2 + $0x1b54] sm:$0xf0] }
 0x2e2   :  { %7505 = vmatpush.bf16.msra.mxu0 %v11267_v60  ;;  %v11218_v60 = vld [vmem:[#allocation2 + $0x1848] sm:$0xf]  ;;  %v11619_v52 = vor.u32 %v13079_v43, %v11618_v56  ;;  %v7279_v63 = vadd.f32 %v7278_v48, %v7266_v61  ;;  %v12975_v36 = vld [vmem:[#allocation2 + $0x1834] sm:$0xf0]  ;;  %v11603_v2 = vor.u32 %v13075_v26, %v11602_v32 }
 0x2e3   :  { %7518 = vmatpush.bf16.msra.mxu1 %v11395_v0  ;;  %v12979_v0 = vld [vmem:[#allocation2 + $0x1854] sm:$0xf0]  ;;  %v11330_v3 = vld [vmem:[#allocation2 + $0x1928] sm:$0xf]  ;;  %v11203_v43 = vor.u32 %v12975_v36, %v11202_v21 }
 0x2e4   :  { %7531 = vmatpush.bf16.msra.mxu2 %v11523_v24  ;;  %v11346_v24 = vld [vmem:[#allocation2 + $0x1948] sm:$0xf]  ;;  %v11219_v58 = vor.u32 %v12979_v0, %v11218_v60  ;;  %v13039_v59 = vld [vmem:[#allocation2 + $0x1a34] sm:$0xf0] }
 0x2e5   :  { %7544 = vmatpush.bf16.msra.mxu3 %v11651_v9  ;;  %v13043_v9 = vld [vmem:[#allocation2 + $0x1a54] sm:$0xf0]  ;;  %v11458_v40 = vld [vmem:[#allocation2 + $0x1a28] sm:$0xf] }
 0x2e6   :  { %7506 = vmatpush.bf16.msra.mxu0 %v11251_v51  ;;  %v13638_v51 = vadd.f32 %v7291_v50, %v7279_v63  ;;  %v11586_v1 = vld [vmem:[#allocation2 + $0x1b28] sm:$0xf]  ;;  %v13071_v56 = vld [vmem:[#allocation2 + $0x1b34] sm:$0xf0]  ;;  %v7280_v48 = vpop.f32.mrf.mxu2 }
 0x2e7   :  { %7519 = vmatpush.bf16.msra.mxu1 %v11379_v47  ;;  %v11347_v47 = vor.u32 %v13011_v39, %v11346_v24  ;;  %v7267_v27 = vpop.f32.mrf.mxu1  ;;  %v11186_v61 = vld [vmem:[#allocation2 + $0x1808] sm:$0xf]  ;;  %v13003_v0 = vld [vmem:[#allocation2 + $0x1914] sm:$0xf0]  ;;  %v7293_v63 = vpop.f32.mrf.mxu3 }
 0x2e8   :  { %7532 = vmatpush.bf16.msra.mxu2 %v11507_v6  ;;  %v11475_v6 = vor.u32 %v13043_v9, %v11474_v8  ;;  %v11314_v60 = vld [vmem:[#allocation2 + $0x1908] sm:$0xf]  ;;  %v13035_v39 = vld [vmem:[#allocation2 + $0x1a14] sm:$0xf0] }
 0x2e9   :  { %7545 = vmatpush.bf16.msra.mxu3 %v11635_v62  ;;  %v13007_v62 = vld [vmem:[#allocation2 + $0x1934] sm:$0xf0]  ;;  %v11442_v24 = vld [vmem:[#allocation2 + $0x1a08] sm:$0xf]  ;;  %v11315_v21 = vor.u32 %v13003_v0, %v11314_v60 }
 0x2ea   :  { %7507 = vmatpush.bf16.msra.mxu0 %v11235_v14  ;;  %v12971_v14 = vld [vmem:[#allocation2 + $0x1814] sm:$0xf0]  ;;  %v11570_v8 = vld [vmem:[#allocation2 + $0x1b08] sm:$0xf]  ;;  %v11443_v36 = vor.u32 %v13035_v39, %v11442_v24 }
 0x2eb   :  { %7520 = vmatpush.bf16.msra.mxu1 %v11363_v15  ;;  %v11331_v15 = vor.u32 %v13007_v62, %v11330_v3  ;;  %v13067_v9 = vld [vmem:[#allocation2 + $0x1b14] sm:$0xf0]  ;;  %v11810_v50 = vld [vmem:[#allocation2 + $0x1ce8] sm:$0xf] }
 0x2ec   :  { %7533 = vmatpush.bf16.msra.mxu2 %v11491_v57  ;;  %v11459_v57 = vor.u32 %v13039_v59, %v11458_v40  ;;  %v13127_v32 = vld [vmem:[#allocation2 + $0x1cf4] sm:$0xf0]  ;;  %v11938_v26 = vld [vmem:[#allocation2 + $0x1de8] sm:$0xf] }
 0x2ed   :  { %7546 = vmatpush.bf16.msra.mxu3 %v11619_v52  ;;  %v11587_v52 = vor.u32 %v13071_v56, %v11586_v1  ;;  %v13159_v4 = vld [vmem:[#allocation2 + $0x1df4] sm:$0xf0]  ;;  %v12194_v3 = vld [vmem:[#allocation2 + $0x1fe8] sm:$0xf]  ;;  %v11811_v62 = vor.u32 %v13127_v32, %v11810_v50 }
 0x2ee   :  { %7508 = vmatpush.bf16.msra.mxu0 %v11219_v58  ;;  %v11187_v58 = vor.u32 %v12971_v14, %v11186_v61  ;;  %v13223_v27 = vld [vmem:[#allocation2 + $0x1ff4] sm:$0xf0]  ;;  %v11939_v40 = vor.u32 %v13159_v4, %v11938_v26  ;;  %v11794_v1 = vld [vmem:[#allocation2 + $0x1cc8] sm:$0xf] }
 0x2ef   :  { %7521 = vmatpush.bf16.msra.mxu1 %v11347_v47  ;;  %v12066_v47 = vld [vmem:[#allocation2 + $0x1ee8] sm:$0xf]  ;;  %v13123_v56 = vld [vmem:[#allocation2 + $0x1cd4] sm:$0xf0] }
 0x2f0   :  { %7534 = vmatpush.bf16.msra.mxu2 %v11475_v6  ;;  %v13191_v6 = vld [vmem:[#allocation2 + $0x1ef4] sm:$0xf0]  ;;  %v11922_v48 = vld [vmem:[#allocation2 + $0x1dc8] sm:$0xf]  ;;  %v11795_v60 = vor.u32 %v13123_v56, %v11794_v1 }
 0x2f1   :  { %7547 = vmatpush.bf16.msra.mxu3 %v11603_v2  ;;  %v11571_v2 = vor.u32 %v13067_v9, %v11570_v8  ;;  %v12067_v59 = vor.u32 %v13191_v6, %v12066_v47  ;;  %v13155_v61 = vld [vmem:[#allocation2 + $0x1dd4] sm:$0xf0]  ;;  %v12050_v14 = vld [vmem:[#allocation2 + $0x1ec8] sm:$0xf] }
 0x2f2   :  { %7509 = vmatpush.bf16.msra.mxu0 %v11203_v43  ;;  %v12195_v43 = vor.u32 %v13223_v27, %v12194_v3  ;;  %v13187_v63 = vld [vmem:[#allocation2 + $0x1ed4] sm:$0xf0]  ;;  %v11923_v0 = vor.u32 %v13155_v61, %v11922_v48  ;;  %v11906_v8 = vld [vmem:[#allocation2 + $0x1da8] sm:$0xf] }
 0x2f3   :  { %7522 = vmatpush.bf16.msra.mxu1 %v11331_v15  ;;  %v12178_v15 = vld [vmem:[#allocation2 + $0x1fc8] sm:$0xf]  ;;  %v12051_v24 = vor.u32 %v13187_v63, %v12050_v14  ;;  %v13119_v39 = vld [vmem:[#allocation2 + $0x1cb4] sm:$0xf0] }
 0x2f4   :  { %7535 = vmatpush.bf16.msra.mxu2 %v11459_v57  ;;  %v13219_v57 = vld [vmem:[#allocation2 + $0x1fd4] sm:$0xf0]  ;;  %v12034_v32 = vld [vmem:[#allocation2 + $0x1ea8] sm:$0xf] }
 0x2f5   :  { %7548 = vmatpush.bf16.msra.mxu3 %v11587_v52  ;;  %v11778_v52 = vld [vmem:[#allocation2 + $0x1ca8] sm:$0xf]  ;;  %v12179_v9 = vor.u32 %v13219_v57, %v12178_v15  ;;  %v13151_v50 = vld [vmem:[#allocation2 + $0x1db4] sm:$0xf0] }
 0x2f6   :  { %7510 = vmatpush.bf16.msra.mxu0 %v11187_v58  ;;  %v13183_v26 = vld [vmem:[#allocation2 + $0x1eb4] sm:$0xf0]  ;;  %v12162_v58 = vld [vmem:[#allocation2 + $0x1fa8] sm:$0xf]  ;;  %v11779_v47 = vor.u32 %v13119_v39, %v11778_v52  ;;  %v11907_v6 = vor.u32 %v13151_v50, %v11906_v8  ;;  %v7304_v1 = vpop.f32.mrf.mxu0 }
 0x2f7   :  { %7523 = vmatpush.bf16.msra.mxu1 %v11315_v21  ;;  %v13215_v4 = vld [vmem:[#allocation2 + $0x1fb4] sm:$0xf0]  ;;  %v12035_v21 = vor.u32 %v13183_v26, %v12034_v32  ;;  %v11890_v27 = vld [vmem:[#allocation2 + $0x1d88] sm:$0xf]  ;;  %v7317_v14 = vpop.f32.mrf.mxu1 }
 0x2f8   :  { %7536 = vmatpush.bf16.msra.mxu2 %v11443_v36  ;;  %v11762_v36 = vld [vmem:[#allocation2 + $0x1c88] sm:$0xf]  ;;  %v13115_v3 = vld [vmem:[#allocation2 + $0x1c94] sm:$0xf0] }
 0x2f9   :  { %7549 = vmatpush.bf16.msra.mxu3 %v11571_v2  ;;  %7511 = vmatmul.bf16.vlgmr.msra.gmra.mxu0 %v13508_v5  ;;  %v12163_v2 = vor.u32 %v13215_v4, %v12162_v58  ;;  %v12146_v56 = vld [vmem:[#allocation2 + $0x1f88] sm:$0xf]  ;;  %v13211_v48 = vld [vmem:[#allocation2 + $0x1f94] sm:$0xf0]  ;;  %v11763_v61 = vor.u32 %v13115_v3, %v11762_v36 }
 0x2fa   :  { %7555 = vmatpush.bf16.msrb.mxu0 %v11811_v62  ;;  %7524 = vmatmul.bf16.vlgmr.msra.gmra.mxu1 %v13512_v13  ;;  %v13147_v62 = vld [vmem:[#allocation2 + $0x1d94] sm:$0xf0]  ;;  %v11746_v57 = vld [vmem:[#allocation2 + $0x1c68] sm:$0xf] }
 0x2fb   :  { %7568 = vmatpush.bf16.msrb.mxu1 %v11939_v40  ;;  %7537 = vmatmul.bf16.vlgmr.msra.gmra.mxu2 %v13510_v10  ;;  %v12018_v40 = vld [vmem:[#allocation2 + $0x1e88] sm:$0xf]  ;;  %v11891_v63 = vor.u32 %v13147_v62, %v11890_v27  ;;  %v13143_v39 = vld [vmem:[#allocation2 + $0x1d74] sm:$0xf0] }
 0x2fc   :  { %7581 = vmatpush.bf16.msrb.mxu2 %v12067_v59  ;;  %7550 = vmatmul.bf16.vlgmr.msra.gmra.mxu3 %v13514_v17  ;;  %v13179_v59 = vld [vmem:[#allocation2 + $0x1e94] sm:$0xf0]  ;;  %v12002_v8 = vld [vmem:[#allocation2 + $0x1e68] sm:$0xf] }
 0x2fd   :  { %7594 = vmatpush.bf16.msrb.mxu3 %v12195_v43  ;;  %v7305_v43 = vadd.f32 %v7304_v1, %v13638_v51  ;;  %v12019_v15 = vor.u32 %v13179_v59, %v12018_v40  ;;  %v12130_v50 = vld [vmem:[#allocation2 + $0x1f68] sm:$0xf]  ;;  %v13207_v32 = vld [vmem:[#allocation2 + $0x1f74] sm:$0xf0] }
 0x2fe   :  { %7556 = vmatpush.bf16.msrb.mxu0 %v11795_v60  ;;  %v13111_v60 = vld [vmem:[#allocation2 + $0x1c74] sm:$0xf0]  ;;  %v11730_v4 = vld [vmem:[#allocation2 + $0x1c48] sm:$0xf]  ;;  %v7330_v36 = vpop.f32.mrf.mxu2 }
 0x2ff   :  { %7569 = vmatpush.bf16.msrb.mxu1 %v11923_v0  ;;  %v11874_v0 = vld [vmem:[#allocation2 + $0x1d68] sm:$0xf]  ;;  %v7318_v52 = vadd.f32 %v7317_v14, %v7305_v43  ;;  %v11747_v26 = vor.u32 %v13111_v60, %v11746_v57  ;;  %v13139_v3 = vld [vmem:[#allocation2 + $0x1d54] sm:$0xf0]  ;;  %v7343_v40 = vpop.f32.mrf.mxu3  ;;  %v7319_v43 = vpop.f32.mrf.mxu1 }
 0x300   :  { %7582 = vmatpush.bf16.msrb.mxu2 %v12051_v24  ;;  %v12147_v24 = vor.u32 %v13211_v48, %v12146_v56  ;;  %v11875_v51 = vor.u32 %v13143_v39, %v11874_v0  ;;  %v11986_v27 = vld [vmem:[#allocation2 + $0x1e48] sm:$0xf]  ;;  %v13203_v1 = vld [vmem:[#allocation2 + $0x1f54] sm:$0xf0]  ;;  %v7306_v56 = vpop.f32.mrf.mxu0  ;;  %v12293_v43 = vld [vmem:[#allocation2 + $0x2ec] sm:$0xf] }
 0x301   :  { %7595 = vmatpush.bf16.msrb.mxu3 %v12179_v9  ;;  %v13175_v9 = vld [vmem:[#allocation2 + $0x1e74] sm:$0xf0]  ;;  %v7331_v62 = vadd.f32 %v7330_v36, %v7318_v52  ;;  %v12114_v59 = vld [vmem:[#allocation2 + $0x1f48] sm:$0xf] }
 0x302   :  { %7557 = vmatpush.bf16.msrb.mxu0 %v11779_v47  ;;  %v12003_v58 = vor.u32 %v13175_v9, %v12002_v8  ;;  %v13107_v47 = vld [vmem:[#allocation2 + $0x1c54] sm:$0xf0]  ;;  %v11842_v60 = vld [vmem:[#allocation2 + $0x1d28] sm:$0xf]  ;;  %v12115_v0 = vor.u32 %v13203_v1, %v12114_v59  ;;  %v12261_v59 = vld [vmem:[#allocation2 + $0x1ec] sm:$0xf] }
 0x303   :  { %7570 = vmatpush.bf16.msrb.mxu1 %v11907_v6  ;;  %v11858_v6 = vld [vmem:[#allocation2 + $0x1d48] sm:$0xf]  ;;  %v11731_v48 = vor.u32 %v13107_v47, %v11730_v4  ;;  %v13103_v57 = vld [vmem:[#allocation2 + $0x1c34] sm:$0xf0] }
 0x304   :  { %7583 = vmatpush.bf16.msrb.mxu2 %v12035_v21  ;;  %v12131_v21 = vor.u32 %v13207_v32, %v12130_v50  ;;  %v11859_v14 = vor.u32 %v13139_v3, %v11858_v6  ;;  %v11970_v52 = vld [vmem:[#allocation2 + $0x1e28] sm:$0xf]  ;;  %v13167_v39 = vld [vmem:[#allocation2 + $0x1e34] sm:$0xf0] }
 0x305   :  { %7596 = vmatpush.bf16.msrb.mxu3 %v12163_v2  ;;  %v13171_v2 = vld [vmem:[#allocation2 + $0x1e54] sm:$0xf0]  ;;  %v12098_v8 = vld [vmem:[#allocation2 + $0x1f28] sm:$0xf] }
 0x306   :  { %7558 = vmatpush.bf16.msrb.mxu0 %v11763_v61  ;;  %v13645_v61 = vadd.f32 %v7343_v40, %v7331_v62  ;;  %v13199_v9 = vld [vmem:[#allocation2 + $0x1f34] sm:$0xf0]  ;;  %v11698_v32 = vld [vmem:[#allocation2 + $0x1c08] sm:$0xf]  ;;  %v12229_v62 = vld [vmem:[#allocation2 + $0xec] sm:$0xf] }
 0x307   :  { %7571 = vmatpush.bf16.msrb.mxu1 %v11891_v63  ;;  %v11987_v63 = vor.u32 %v13171_v2, %v11986_v27  ;;  %v11826_v4 = vld [vmem:[#allocation2 + $0x1d08] sm:$0xf]  ;;  %v13131_v47 = vld [vmem:[#allocation2 + $0x1d14] sm:$0xf0]  ;;  %v12099_v36 = vor.u32 %v13199_v9, %v12098_v8  ;;  %v7332_v2 = vpop.f32.mrf.mxu2  ;;  %v8228_v40 = vld [vmem:[#allocation2 + $0xf8] sm:$0xf0]  ;;  %v7345_v1 = vpop.f32.mrf.mxu3 }
 0x308   :  { %7584 = vmatpush.bf16.msrb.mxu2 %v12019_v15  ;;  %v11714_v15 = vld [vmem:[#allocation2 + $0x1c28] sm:$0xf]  ;;  %v13195_v27 = vld [vmem:[#allocation2 + $0x1f14] sm:$0xf0]  ;;  %v12225_v8 = vld [vmem:[#allocation2 + $0xcc] sm:$0xf] }
 0x309   :  { %7597 = vmatpush.bf16.msrb.mxu3 %v12147_v24  ;;  %v13135_v24 = vld [vmem:[#allocation2 + $0x1d34] sm:$0xf0]  ;;  %v11715_v50 = vor.u32 %v13103_v57, %v11714_v15  ;;  %v11954_v6 = vld [vmem:[#allocation2 + $0x1e08] sm:$0xf]  ;;  %v12325_v57 = vld [vmem:[#allocation2 + $0x3ec] sm:$0xf] }
 0x30a   :  { %7559 = vmatpush.bf16.msrb.mxu0 %v11747_v26  ;;  %v13099_v26 = vld [vmem:[#allocation2 + $0x1c14] sm:$0xf0]  ;;  %v12082_v3 = vld [vmem:[#allocation2 + $0x1f08] sm:$0xf]  ;;  %v8212_v9 = vld [vmem:[#allocation2 + $0xd8] sm:$0xf0] }
 0x30b   :  { %7572 = vmatpush.bf16.msrb.mxu1 %v11875_v51  ;;  %v11843_v51 = vor.u32 %v13135_v24, %v11842_v60  ;;  %v11699_v56 = vor.u32 %v13099_v26, %v11698_v32  ;;  %v8612_v60 = vld [vmem:[#allocation2 + $0x3f8] sm:$0xf0]  ;;  %v8231_v24 = vor.u32 %v12229_v62, %v8228_v40  ;;  %v12257_v2 = vld [vmem:[#allocation2 + $0x1cc] sm:$0xf] }
 0x30c   :  { %7585 = vmatpush.bf16.msrb.mxu2 %v12003_v58  ;;  %v11971_v58 = vor.u32 %v13167_v39, %v11970_v52  ;;  %v8340_v32 = vld [vmem:[#allocation2 + $0x1d8] sm:$0xf0]  ;;  %v12289_v26 = vld [vmem:[#allocation2 + $0x2cc] sm:$0xf] }
 0x30d   :  { %7598 = vmatpush.bf16.msrb.mxu3 %v12131_v21  ;;  %v13163_v21 = vld [vmem:[#allocation2 + $0x1e14] sm:$0xf0]  ;;  %v8468_v1 = vld [vmem:[#allocation2 + $0x2d8] sm:$0xf0]  ;;  %v12285_v40 = vld [vmem:[#allocation2 + $0x2ac] sm:$0xf] }
 0x30e   :  { %7560 = vmatpush.bf16.msrb.mxu0 %v11731_v48  ;;  %v8356_v48 = vld [vmem:[#allocation2 + $0x1f8] sm:$0xf0]  ;;  %v11955_v15 = vor.u32 %v13163_v21, %v11954_v6  ;;  %v8471_v6 = vor.u32 %v12289_v26, %v8468_v1 }
 0x30f   :  { %7573 = vmatpush.bf16.msrb.mxu1 %v11859_v14  ;;  %v8484_v14 = vld [vmem:[#allocation2 + $0x2f8] sm:$0xf0]  ;;  %v8359_v52 = vor.u32 %v12261_v59, %v8356_v48 }
 0x310   :  { %7586 = vmatpush.bf16.msrb.mxu2 %v11987_v63  ;;  %v11827_v63 = vor.u32 %v13131_v47, %v11826_v4  ;;  %v8487_v39 = vor.u32 %v12293_v43, %v8484_v14  ;;  %v8215_v4 = vor.u32 %v12225_v8, %v8212_v9  ;;  %v8343_v47 = vor.u32 %v12257_v2, %v8340_v32  ;;  %v8196_v21 = vld [vmem:[#allocation2 + $0xb8] sm:$0xf0]  ;;  %v12313_v9 = vld [vmem:[#allocation2 + $0x38c] sm:$0xf] }
 0x311   :  { %7599 = vmatpush.bf16.msrb.mxu3 %v12115_v0  ;;  %v12083_v0 = vor.u32 %v13195_v27, %v12082_v3  ;;  %v12253_v3 = vld [vmem:[#allocation2 + $0x1ac] sm:$0xf]  ;;  %v8324_v62 = vld [vmem:[#allocation2 + $0x1b8] sm:$0xf0] }
 0x312   :  { %7561 = vmatpush.bf16.msrb.mxu0 %v11715_v50  ;;  %v8615_v50 = vor.u32 %v12325_v57, %v8612_v60  ;;  %v8452_v59 = vld [vmem:[#allocation2 + $0x2b8] sm:$0xf0]  ;;  %v8327_v14 = vor.u32 %v12253_v3, %v8324_v62  ;;  %v12249_v60 = vld [vmem:[#allocation2 + $0x18c] sm:$0xf] }
 0x313   :  { %7574 = vmatpush.bf16.msrb.mxu1 %v11843_v51  ;;  %v12321_v51 = vld [vmem:[#allocation2 + $0x3cc] sm:$0xf]  ;;  %v8580_v48 = vld [vmem:[#allocation2 + $0x3b8] sm:$0xf0] }
 0x314   :  { %7587 = vmatpush.bf16.msrb.mxu2 %v11971_v58  ;;  %v8596_v58 = vld [vmem:[#allocation2 + $0x3d8] sm:$0xf0]  ;;  %v12277_v3 = vld [vmem:[#allocation2 + $0x26c] sm:$0xf] }
 0x315   :  { %7600 = vmatpush.bf16.msrb.mxu3 %v12099_v36  ;;  %v12221_v36 = vld [vmem:[#allocation2 + $0xac] sm:$0xf]  ;;  %v8599_v27 = vor.u32 %v12321_v51, %v8596_v58  ;;  %v8180_v57 = vld [vmem:[#allocation2 + $0x98] sm:$0xf0] }
 0x316   :  { %7562 = vmatpush.bf16.msrb.mxu0 %v11699_v56  ;;  %v12317_v56 = vld [vmem:[#allocation2 + $0x3ac] sm:$0xf]  ;;  %v8199_v43 = vor.u32 %v12221_v36, %v8196_v21  ;;  %v7356_v8 = vpop.f32.mrf.mxu0  ;;  %v8564_v2 = vld [vmem:[#allocation2 + $0x398] sm:$0xf0] }
 0x317   :  { %7575 = vmatpush.bf16.msrb.mxu1 %v11827_v63  ;;  %v8455_v63 = vor.u32 %v12285_v40, %v8452_v59  ;;  %v7369_v26 = vpop.f32.mrf.mxu1  ;;  %v12213_v58 = vld [vmem:[#allocation2 + $0x6c] sm:$0xf]  ;;  %v8292_v21 = vld [vmem:[#allocation2 + $0x178] sm:$0xf0] }
 0x318   :  { %7588 = vmatpush.bf16.msrb.mxu2 %v11955_v15  ;;  %v12217_v15 = vld [vmem:[#allocation2 + $0x8c] sm:$0xf]  ;;  %v8548_v40 = vld [vmem:[#allocation2 + $0x378] sm:$0xf0] }
 0x319   :  { %7601 = vmatpush.bf16.msrb.mxu3 %v12083_v0  ;;  %7563 = vmatmul.bf16.vlgmr.msrb.gmra.mxu0 %v13529_v54  ;;  %v8583_v0 = vor.u32 %v12317_v56, %v8580_v48  ;;  %v8183_v32 = vor.u32 %v12217_v15, %v8180_v57  ;;  %v12309_v62 = vld [vmem:[#allocation2 + $0x36c] sm:$0xf]  ;;  %v8276_v57 = vld [vmem:[#allocation2 + $0x158] sm:$0xf0] }
 0x31a   :  { %7607 = vmatpush.bf16.msra.mxu0 %v8231_v24  ;;  %7576 = vmatmul.bf16.vlgmr.msrb.gmra.mxu1 %v13533_v55  ;;  %v8308_v24 = vld [vmem:[#allocation2 + $0x198] sm:$0xf0]  ;;  %v12209_v48 = vld [vmem:[#allocation2 + $0x4c] sm:$0xf] }
 0x31b   :  { %7620 = vmatpush.bf16.msra.mxu1 %v8359_v52  ;;  %7589 = vmatmul.bf16.vlgmr.msrb.gmra.mxu2 %v13531_v34  ;;  %v12281_v52 = vld [vmem:[#allocation2 + $0x28c] sm:$0xf]  ;;  %v8311_v1 = vor.u32 %v12249_v60, %v8308_v24 }
 0x31c   :  { %7633 = vmatpush.bf16.msra.mxu2 %v8487_v39  ;;  %7602 = vmatmul.bf16.vlgmr.msrb.gmra.mxu3 %v13535_v53  ;;  %v8436_v39 = vld [vmem:[#allocation2 + $0x298] sm:$0xf0]  ;;  %v12273_v60 = vld [vmem:[#allocation2 + $0x24c] sm:$0xf] }
 0x31d   :  { %7646 = vmatpush.bf16.msra.mxu3 %v8615_v50  ;;  %v7357_v50 = vadd.f32 %v7356_v8, %v13645_v61  ;;  %v8439_v51 = vor.u32 %v12281_v52, %v8436_v39  ;;  %v12305_v39 = vld [vmem:[#allocation2 + $0x34c] sm:$0xf]  ;;  %v8532_v8 = vld [vmem:[#allocation2 + $0x358] sm:$0xf0] }
 0x31e   :  { %7608 = vmatpush.bf16.msra.mxu0 %v8215_v4  ;;  %v8164_v4 = vld [vmem:[#allocation2 + $0x78] sm:$0xf0]  ;;  %v7382_v15 = vpop.f32.mrf.mxu2 }
 0x31f   :  { %7621 = vmatpush.bf16.msra.mxu1 %v8343_v47  ;;  %v12245_v47 = vld [vmem:[#allocation2 + $0x16c] sm:$0xf]  ;;  %v7370_v36 = vadd.f32 %v7369_v26, %v7357_v50  ;;  %v8167_v59 = vor.u32 %v12213_v58, %v8164_v4  ;;  %v7395_v52 = vpop.f32.mrf.mxu3  ;;  %v7371_v50 = vpop.f32.mrf.mxu1  ;;  %v8132_v58 = vld [vmem:[#allocation2 + $0x38] sm:$0xf0] }
 0x320   :  { %7634 = vmatpush.bf16.msra.mxu2 %v8471_v6  ;;  %v8567_v6 = vor.u32 %v12313_v9, %v8564_v2  ;;  %v8295_v61 = vor.u32 %v12245_v47, %v8292_v21  ;;  %v7358_v9 = vpop.f32.mrf.mxu0  ;;  %v12237_v4 = vld [vmem:[#allocation2 + $0x12c] sm:$0xf]  ;;  %v8535_v47 = vor.u32 %v12305_v39, %v8532_v8  ;;  %v8388_v21 = vld [vmem:[#allocation2 + $0x238] sm:$0xf0] }
 0x321   :  { %7647 = vmatpush.bf16.msra.mxu3 %v8599_v27  ;;  %v8420_v27 = vld [vmem:[#allocation2 + $0x278] sm:$0xf0]  ;;  %v7383_v24 = vadd.f32 %v7382_v15, %v7370_v36  ;;  %v12269_v36 = vld [vmem:[#allocation2 + $0x22c] sm:$0xf] }
 0x322   :  { %7609 = vmatpush.bf16.msra.mxu0 %v8199_v43  ;;  %v8423_v56 = vor.u32 %v12277_v3, %v8420_v27  ;;  %v8148_v43 = vld [vmem:[#allocation2 + $0x58] sm:$0xf0]  ;;  %v12301_v3 = vld [vmem:[#allocation2 + $0x32c] sm:$0xf] }
 0x323   :  { %7622 = vmatpush.bf16.msra.mxu1 %v8327_v14  ;;  %v12241_v14 = vld [vmem:[#allocation2 + $0x14c] sm:$0xf]  ;;  %v8151_v2 = vor.u32 %v12209_v48, %v8148_v43  ;;  %v8516_v27 = vld [vmem:[#allocation2 + $0x338] sm:$0xf0] }
 0x324   :  { %7635 = vmatpush.bf16.msra.mxu2 %v8455_v63  ;;  %v8551_v63 = vor.u32 %v12309_v62, %v8548_v40  ;;  %v8279_v26 = vor.u32 %v12241_v14, %v8276_v57  ;;  %v12201_v40 = vld [vmem:[#allocation2 + $0xc] sm:$0xf]  ;;  %v8244_v43 = vld [vmem:[#allocation2 + $0x118] sm:$0xf0]  ;;  %v8519_v15 = vor.u32 %v12301_v3, %v8516_v27 }
 0x325   :  { %7648 = vmatpush.bf16.msra.mxu3 %v8583_v0  ;;  %v8404_v0 = vld [vmem:[#allocation2 + $0x258] sm:$0xf0]  ;;  %v12233_v48 = vld [vmem:[#allocation2 + $0x10c] sm:$0xf] }
 0x326   :  { %7610 = vmatpush.bf16.msra.mxu0 %v8183_v32  ;;  %v13652_v32 = vadd.f32 %v7395_v52, %v7383_v24  ;;  %v12265_v14 = vld [vmem:[#allocation2 + $0x20c] sm:$0xf]  ;;  %v8740_v52 = vld [vmem:[#allocation2 + $0x4f8] sm:$0xf0] }
 0x327   :  { %7623 = vmatpush.bf16.msra.mxu1 %v8311_v1  ;;  %v8407_v1 = vor.u32 %v12273_v60, %v8404_v0  ;;  %v12297_v57 = vld [vmem:[#allocation2 + $0x30c] sm:$0xf]  ;;  %v8500_v60 = vld [vmem:[#allocation2 + $0x318] sm:$0xf0]  ;;  %v7384_v0 = vpop.f32.mrf.mxu2  ;;  %v7397_v8 = vpop.f32.mrf.mxu3 }
 0x328   :  { %7636 = vmatpush.bf16.msra.mxu2 %v8439_v51  ;;  %v12205_v51 = vld [vmem:[#allocation2 + $0x2c] sm:$0xf]  ;;  %v8724_v27 = vld [vmem:[#allocation2 + $0x4d8] sm:$0xf0] }
 0x329   :  { %7649 = vmatpush.bf16.msra.mxu3 %v8567_v6  ;;  %v8260_v6 = vld [vmem:[#allocation2 + $0x138] sm:$0xf0]  ;;  %v8135_v62 = vor.u32 %v12205_v51, %v8132_v58  ;;  %v12357_v24 = vld [vmem:[#allocation2 + $0x4ec] sm:$0xf] }
 0x32a   :  { %7611 = vmatpush.bf16.msra.mxu0 %v8167_v59  ;;  %v8116_v59 = vld [vmem:[#allocation2 + $0x18] sm:$0xf0]  ;;  %v12389_v39 = vld [vmem:[#allocation2 + $0x5ec] sm:$0xf] }
 0x32b   :  { %7624 = vmatpush.bf16.msra.mxu1 %v8295_v61  ;;  %v8263_v61 = vor.u32 %v12237_v4, %v8260_v6  ;;  %v8119_v9 = vor.u32 %v12201_v40, %v8116_v59  ;;  %v12421_v50 = vld [vmem:[#allocation2 + $0x6ec] sm:$0xf]  ;;  %v9124_v4 = vld [vmem:[#allocation2 + $0x7f8] sm:$0xf0]  ;;  %v8743_v6 = vor.u32 %v12357_v24, %v8740_v52 }
 0x32c   :  { %7637 = vmatpush.bf16.msra.mxu2 %v8423_v56  ;;  %v8391_v56 = vor.u32 %v12269_v36, %v8388_v21  ;;  %v12453_v58 = vld [vmem:[#allocation2 + $0x7ec] sm:$0xf]  ;;  %v8852_v40 = vld [vmem:[#allocation2 + $0x5d8] sm:$0xf0] }
 0x32d   :  { %7650 = vmatpush.bf16.msra.mxu3 %v8551_v63  ;;  %v8372_v63 = vld [vmem:[#allocation2 + $0x218] sm:$0xf0]  ;;  %v12353_v3 = vld [vmem:[#allocation2 + $0x4cc] sm:$0xf] }
 0x32e   :  { %7612 = vmatpush.bf16.msra.mxu0 %v8151_v2  ;;  %v8868_v2 = vld [vmem:[#allocation2 + $0x5f8] sm:$0xf0]  ;;  %v8375_v51 = vor.u32 %v12265_v14, %v8372_v63  ;;  %v12385_v0 = vld [vmem:[#allocation2 + $0x5cc] sm:$0xf] }
 0x32f   :  { %7625 = vmatpush.bf16.msra.mxu1 %v8279_v26  ;;  %v8996_v26 = vld [vmem:[#allocation2 + $0x6f8] sm:$0xf0]  ;;  %v8871_v36 = vor.u32 %v12389_v39, %v8868_v2  ;;  %v12417_v59 = vld [vmem:[#allocation2 + $0x6cc] sm:$0xf] }
 0x330   :  { %7638 = vmatpush.bf16.msra.mxu2 %v8407_v1  ;;  %v8247_v1 = vor.u32 %v12233_v48, %v8244_v43  ;;  %v8999_v21 = vor.u32 %v12421_v50, %v8996_v26  ;;  %v8980_v8 = vld [vmem:[#allocation2 + $0x6d8] sm:$0xf0]  ;;  %v8727_v48 = vor.u32 %v12353_v3, %v8724_v27  ;;  %v8855_v43 = vor.u32 %v12385_v0, %v8852_v40  ;;  %v12413_v52 = vld [vmem:[#allocation2 + $0x6ac] sm:$0xf] }
 0x331   :  { %7651 = vmatpush.bf16.msra.mxu3 %v8535_v47  ;;  %v8503_v47 = vor.u32 %v12297_v57, %v8500_v60  ;;  %v8983_v14 = vor.u32 %v12417_v59, %v8980_v8  ;;  %v8708_v63 = vld [vmem:[#allocation2 + $0x4b8] sm:$0xf0]  ;;  %v12381_v57 = vld [vmem:[#allocation2 + $0x5ac] sm:$0xf] }
 0x332   :  { %7613 = vmatpush.bf16.msra.mxu0 %v8135_v62  ;;  %v9127_v62 = vor.u32 %v12453_v58, %v9124_v4  ;;  %v8836_v24 = vld [vmem:[#allocation2 + $0x5b8] sm:$0xf0]  ;;  %v12377_v4 = vld [vmem:[#allocation2 + $0x58c] sm:$0xf] }
 0x333   :  { %7626 = vmatpush.bf16.msra.mxu1 %v8263_v61  ;;  %v12449_v61 = vld [vmem:[#allocation2 + $0x7cc] sm:$0xf]  ;;  %v8964_v39 = vld [vmem:[#allocation2 + $0x6b8] sm:$0xf0]  ;;  %v8839_v26 = vor.u32 %v12381_v57, %v8836_v24 }
 0x334   :  { %7639 = vmatpush.bf16.msra.mxu2 %v8391_v56  ;;  %v9108_v56 = vld [vmem:[#allocation2 + $0x7d8] sm:$0xf0]  ;;  %v12341_v40 = vld [vmem:[#allocation2 + $0x46c] sm:$0xf] }
 0x335   :  { %7652 = vmatpush.bf16.msra.mxu3 %v8519_v15  ;;  %v12349_v15 = vld [vmem:[#allocation2 + $0x4ac] sm:$0xf]  ;;  %v9111_v60 = vor.u32 %v12449_v61, %v9108_v56  ;;  %v9092_v2 = vld [vmem:[#allocation2 + $0x7b8] sm:$0xf0] }
 0x336   :  { %7614 = vmatpush.bf16.msra.mxu0 %v8119_v9  ;;  %v12445_v9 = vld [vmem:[#allocation2 + $0x7ac] sm:$0xf]  ;;  %v8711_v50 = vor.u32 %v12349_v15, %v8708_v63  ;;  %v8692_v58 = vld [vmem:[#allocation2 + $0x498] sm:$0xf0] }
 0x337   :  { %7627 = vmatpush.bf16.msra.mxu1 %v8247_v1  ;;  %v8967_v1 = vor.u32 %v12413_v52, %v8964_v39  ;;  %v9076_v3 = vld [vmem:[#allocation2 + $0x798] sm:$0xf0]  ;;  %v12373_v8 = vld [vmem:[#allocation2 + $0x56c] sm:$0xf] }
 0x338   :  { %7640 = vmatpush.bf16.msra.mxu2 %v8375_v51  ;;  %v12345_v51 = vld [vmem:[#allocation2 + $0x48c] sm:$0xf]  ;;  %v8676_v59 = vld [vmem:[#allocation2 + $0x478] sm:$0xf0] }
 0x339   :  { %7653 = vmatpush.bf16.msra.mxu3 %v8503_v47  ;;  %7615 = vmatmul.bf16.vlgmr.msra.gmra.mxu0 %v13397_v19  ;;  %v9095_v47 = vor.u32 %v12445_v9, %v9092_v2  ;;  %v12441_v19 = vld [vmem:[#allocation2 + $0x78c] sm:$0xf]  ;;  %v8695_v27 = vor.u32 %v12345_v51, %v8692_v58  ;;  %v9060_v63 = vld [vmem:[#allocation2 + $0x778] sm:$0xf0]  ;;  %v8679_v57 = vor.u32 %v12341_v40, %v8676_v59 }
 0x33a   :  { %7659 = vmatpush.bf16.msrb.mxu0 %v8743_v6  ;;  %7628 = vmatmul.bf16.vlgmr.msra.gmra.mxu1 %v13401_v22  ;;  %v12409_v6 = vld [vmem:[#allocation2 + $0x68c] sm:$0xf]  ;;  %v7421_v22 = vpop.f32.mrf.mxu1  ;;  %v9079_v61 = vor.u32 %v12441_v19, %v9076_v3  ;;  %v8660_v52 = vld [vmem:[#allocation2 + $0x458] sm:$0xf0] }
 0x33b   :  { %7672 = vmatpush.bf16.msrb.mxu1 %v8871_v36  ;;  %7641 = vmatmul.bf16.vlgmr.msra.gmra.mxu2 %v13395_v18  ;;  %v8820_v18 = vld [vmem:[#allocation2 + $0x598] sm:$0xf0]  ;;  %v12437_v15 = vld [vmem:[#allocation2 + $0x76c] sm:$0xf] }
 0x33c   :  { %7685 = vmatpush.bf16.msrb.mxu2 %v8999_v21  ;;  %7654 = vmatmul.bf16.vlgmr.msra.gmra.mxu3 %v13399_v20  ;;  %v8948_v36 = vld [vmem:[#allocation2 + $0x698] sm:$0xf0]  ;;  %v7408_v21 = vpop.f32.mrf.mxu0  ;;  %v8823_v0 = vor.u32 %v12377_v4, %v8820_v18  ;;  %v12337_v24 = vld [vmem:[#allocation2 + $0x44c] sm:$0xf]  ;;  %v9063_v9 = vor.u32 %v12437_v15, %v9060_v63 }
 0x33d   :  { %7698 = vmatpush.bf16.msrb.mxu3 %v9127_v62  ;;  %v7409_v20 = vadd.f32 %v7408_v21, %v13652_v32  ;;  %v8951_v62 = vor.u32 %v12409_v6, %v8948_v36  ;;  %v12369_v39 = vld [vmem:[#allocation2 + $0x54c] sm:$0xf]  ;;  %v8663_v6 = vor.u32 %v12337_v24, %v8660_v52  ;;  %v8900_v59 = vld [vmem:[#allocation2 + $0x638] sm:$0xf0] }
 0x33e   :  { %7660 = vmatpush.bf16.msrb.mxu0 %v8727_v48  ;;  %v8804_v48 = vld [vmem:[#allocation2 + $0x578] sm:$0xf0]  ;;  %v7434_v2 = vpop.f32.mrf.mxu2  ;;  %v12433_v4 = vld [vmem:[#allocation2 + $0x74c] sm:$0xf] }
 0x33f   :  { %7673 = vmatpush.bf16.msrb.mxu1 %v8855_v43  ;;  %v7422_v56 = vadd.f32 %v7421_v22, %v7409_v20  ;;  %v12405_v43 = vld [vmem:[#allocation2 + $0x66c] sm:$0xf]  ;;  %v8807_v32 = vor.u32 %v12373_v8, %v8804_v48  ;;  %v7447_v58 = vpop.f32.mrf.mxu3  ;;  %v8884_v24 = vld [vmem:[#allocation2 + $0x618] sm:$0xf0] }
 0x340   :  { %7686 = vmatpush.bf16.msrb.mxu2 %v8983_v14  ;;  %v8932_v14 = vld [vmem:[#allocation2 + $0x678] sm:$0xf0]  ;;  %v12333_v20 = vld [vmem:[#allocation2 + $0x42c] sm:$0xf] }
 0x341   :  { %7699 = vmatpush.bf16.msrb.mxu3 %v9111_v60  ;;  %v8935_v60 = vor.u32 %v12405_v43, %v8932_v14  ;;  %v7435_v51 = vadd.f32 %v7434_v2, %v7422_v56  ;;  %v12365_v22 = vld [vmem:[#allocation2 + $0x52c] sm:$0xf]  ;;  %v8628_v43 = vld [vmem:[#allocation2 + $0x418] sm:$0xf0] }
 0x342   :  { %7661 = vmatpush.bf16.msrb.mxu0 %v8711_v50  ;;  %v8788_v50 = vld [vmem:[#allocation2 + $0x558] sm:$0xf0]  ;;  %v7423_v36 = vpop.f32.mrf.mxu1  ;;  %v12397_v40 = vld [vmem:[#allocation2 + $0x62c] sm:$0xf] }
 0x343   :  { %7674 = vmatpush.bf16.msrb.mxu1 %v8839_v26  ;;  %v12401_v26 = vld [vmem:[#allocation2 + $0x64c] sm:$0xf]  ;;  %v13659_v21 = vadd.f32 %v7447_v58, %v7435_v51  ;;  %v8791_v19 = vor.u32 %v12369_v39, %v8788_v50  ;;  %v8903_v15 = vor.u32 %v12397_v40, %v8900_v59  ;;  %v9012_v39 = vld [vmem:[#allocation2 + $0x718] sm:$0xf0] }
 0x344   :  { %7687 = vmatpush.bf16.msrb.mxu2 %v8967_v1  ;;  %v8916_v1 = vld [vmem:[#allocation2 + $0x658] sm:$0xf0]  ;;  %v7410_v18 = vpop.f32.mrf.mxu0  ;;  %v12429_v8 = vld [vmem:[#allocation2 + $0x72c] sm:$0xf] }
 0x345   :  { %7700 = vmatpush.bf16.msrb.mxu3 %v9095_v47  ;;  %v9044_v47 = vld [vmem:[#allocation2 + $0x758] sm:$0xf0]  ;;  %v8919_v3 = vor.u32 %v12401_v26, %v8916_v1  ;;  %v12329_v48 = vld [vmem:[#allocation2 + $0x40c] sm:$0xf] }
 0x346   :  { %7662 = vmatpush.bf16.msrb.mxu0 %v8695_v27  ;;  %v8644_v27 = vld [vmem:[#allocation2 + $0x438] sm:$0xf0]  ;;  %v12361_v63 = vld [vmem:[#allocation2 + $0x50c] sm:$0xf]  ;;  %v8631_v51 = vor.u32 %v12329_v48, %v8628_v43 }
 0x347   :  { %7675 = vmatpush.bf16.msrb.mxu1 %v8823_v0  ;;  %v9047_v0 = vor.u32 %v12433_v4, %v9044_v47  ;;  %v8647_v56 = vor.u32 %v12333_v20, %v8644_v27  ;;  %v12425_v52 = vld [vmem:[#allocation2 + $0x70c] sm:$0xf]  ;;  %v9252_v50 = vld [vmem:[#allocation2 + $0x8f8] sm:$0xf0]  ;;  %v7449_v1 = vpop.f32.mrf.mxu3 }
 0x348   :  { %7688 = vmatpush.bf16.msrb.mxu2 %v8951_v62  ;;  %v8772_v62 = vld [vmem:[#allocation2 + $0x538] sm:$0xf0]  ;;  %v12485_v2 = vld [vmem:[#allocation2 + $0x8ec] sm:$0xf] }
 0x349   :  { %7701 = vmatpush.bf16.msrb.mxu3 %v9079_v61  ;;  %v9028_v61 = vld [vmem:[#allocation2 + $0x738] sm:$0xf0]  ;;  %v8775_v14 = vor.u32 %v12365_v22, %v8772_v62  ;;  %v12517_v26 = vld [vmem:[#allocation2 + $0x9ec] sm:$0xf]  ;;  %v9255_v20 = vor.u32 %v12485_v2, %v9252_v50 }
 0x34a   :  { %7663 = vmatpush.bf16.msrb.mxu0 %v8679_v57  ;;  %v8756_v57 = vld [vmem:[#allocation2 + $0x518] sm:$0xf0]  ;;  %v12549_v4 = vld [vmem:[#allocation2 + $0xaec] sm:$0xf] }
 0x34b   :  { %7676 = vmatpush.bf16.msrb.mxu1 %v8807_v32  ;;  %v12393_v32 = vld [vmem:[#allocation2 + $0x60c] sm:$0xf]  ;;  %v9380_v58 = vld [vmem:[#allocation2 + $0x9f8] sm:$0xf0]  ;;  %v8759_v18 = vor.u32 %v12361_v63, %v8756_v57 }
 0x34c   :  { %7689 = vmatpush.bf16.msrb.mxu2 %v8935_v60  ;;  %v9031_v60 = vor.u32 %v12429_v8, %v9028_v61  ;;  %v9508_v47 = vld [vmem:[#allocation2 + $0xaf8] sm:$0xf0]  ;;  %v12581_v36 = vld [vmem:[#allocation2 + $0xbec] sm:$0xf]  ;;  %v9383_v27 = vor.u32 %v12517_v26, %v9380_v58 }
 0x34d   :  { %7702 = vmatpush.bf16.msrb.mxu3 %v9063_v9  ;;  %v7436_v9 = vpop.f32.mrf.mxu2  ;;  %v9511_v22 = vor.u32 %v12549_v4, %v9508_v47  ;;  %v9236_v62 = vld [vmem:[#allocation2 + $0x8d8] sm:$0xf0]  ;;  %v12513_v40 = vld [vmem:[#allocation2 + $0x9cc] sm:$0xf] }
 0x34e   :  { %7664 = vmatpush.bf16.msrb.mxu0 %v8663_v6  ;;  %v8887_v6 = vor.u32 %v12393_v32, %v8884_v24  ;;  %v9364_v8 = vld [vmem:[#allocation2 + $0x9d8] sm:$0xf0]  ;;  %v12545_v61 = vld [vmem:[#allocation2 + $0xacc] sm:$0xf] }
 0x34f   :  { %7677 = vmatpush.bf16.msrb.mxu1 %v8791_v19  ;;  %v9636_v19 = vld [vmem:[#allocation2 + $0xbf8] sm:$0xf0]  ;;  %v12577_v48 = vld [vmem:[#allocation2 + $0xbcc] sm:$0xf] }
 0x350   :  { %7690 = vmatpush.bf16.msrb.mxu2 %v8919_v3  ;;  %v9015_v3 = vor.u32 %v12425_v52, %v9012_v39  ;;  %v9639_v59 = vor.u32 %v12581_v36, %v9636_v19  ;;  %v9620_v43 = vld [vmem:[#allocation2 + $0xbd8] sm:$0xf0]  ;;  %v12477_v57 = vld [vmem:[#allocation2 + $0x8ac] sm:$0xf] }
 0x351   :  { %7703 = vmatpush.bf16.msrb.mxu3 %v9047_v0  ;;  %v12481_v0 = vld [vmem:[#allocation2 + $0x8cc] sm:$0xf]  ;;  %v9220_v32 = vld [vmem:[#allocation2 + $0x8b8] sm:$0xf0]  ;;  %v9623_v24 = vor.u32 %v12577_v48, %v9620_v43 }
 0x352   :  { %7665 = vmatpush.bf16.msrb.mxu0 %v8647_v56  ;;  %v9492_v56 = vld [vmem:[#allocation2 + $0xad8] sm:$0xf0]  ;;  %v12541_v39 = vld [vmem:[#allocation2 + $0xaac] sm:$0xf]  ;;  %v9223_v26 = vor.u32 %v12477_v57, %v9220_v32 }
 0x353   :  { %7678 = vmatpush.bf16.msrb.mxu1 %v8775_v14  ;;  %v9239_v14 = vor.u32 %v12481_v0, %v9236_v62  ;;  %v9495_v63 = vor.u32 %v12545_v61, %v9492_v56  ;;  %v9348_v52 = vld [vmem:[#allocation2 + $0x9b8] sm:$0xf0]  ;;  %v12573_v2 = vld [vmem:[#allocation2 + $0xbac] sm:$0xf] }
 0x354   :  { %7691 = vmatpush.bf16.msrb.mxu2 %v8903_v15  ;;  %v9367_v15 = vor.u32 %v12513_v40, %v9364_v8  ;;  %v9476_v9 = vld [vmem:[#allocation2 + $0xab8] sm:$0xf0]  ;;  %v12473_v58 = vld [vmem:[#allocation2 + $0x88c] sm:$0xf] }
 0x355   :  { %7704 = vmatpush.bf16.msrb.mxu3 %v9031_v60  ;;  %v12509_v60 = vld [vmem:[#allocation2 + $0x9ac] sm:$0xf]  ;;  %v9604_v50 = vld [vmem:[#allocation2 + $0xbb8] sm:$0xf0] }
 0x356   :  { %7666 = vmatpush.bf16.msrb.mxu0 %v8631_v51  ;;  %v9351_v1 = vor.u32 %v12509_v60, %v9348_v52  ;;  %v9479_v51 = vor.u32 %v12541_v39, %v9476_v9  ;;  %v9204_v4 = vld [vmem:[#allocation2 + $0x898] sm:$0xf0]  ;;  %v9607_v47 = vor.u32 %v12573_v2, %v9604_v50  ;;  %v7460_v19 = vpop.f32.mrf.mxu0  ;;  %v12469_v0 = vld [vmem:[#allocation2 + $0x86c] sm:$0xf] }
 0x357   :  { %7679 = vmatpush.bf16.msrb.mxu1 %v8759_v18  ;;  %v9332_v18 = vld [vmem:[#allocation2 + $0x998] sm:$0xf0]  ;;  %v12501_v40 = vld [vmem:[#allocation2 + $0x96c] sm:$0xf] }
 0x358   :  { %7692 = vmatpush.bf16.msrb.mxu2 %v8887_v6  ;;  %v12537_v6 = vld [vmem:[#allocation2 + $0xa8c] sm:$0xf]  ;;  %v9460_v36 = vld [vmem:[#allocation2 + $0xa98] sm:$0xf0] }
 0x359   :  { %7705 = vmatpush.bf16.msrb.mxu3 %v9015_v3  ;;  %7667 = vmatmul.bf16.vlgmr.msrb.gmra.mxu0 %v13415_v41  ;;  %v12569_v41 = vld [vmem:[#allocation2 + $0xb8c] sm:$0xf]  ;;  %v9588_v3 = vld [vmem:[#allocation2 + $0xb98] sm:$0xf0] }
 0x35a   :  { %7711 = vmatpush.bf16.msra.mxu0 %v9255_v20  ;;  %7680 = vmatmul.bf16.vlgmr.msrb.gmra.mxu1 %v13419_v44  ;;  %v9207_v20 = vor.u32 %v12473_v58, %v9204_v4  ;;  %v7473_v44 = vpop.f32.mrf.mxu1  ;;  %v9188_v62 = vld [vmem:[#allocation2 + $0x878] sm:$0xf0]  ;;  %v12533_v56 = vld [vmem:[#allocation2 + $0xa6c] sm:$0xf] }
 0x35b   :  { %7724 = vmatpush.bf16.msra.mxu1 %v9383_v27  ;;  %7693 = vmatmul.bf16.vlgmr.msrb.gmra.mxu2 %v13413_v38  ;;  %v12505_v38 = vld [vmem:[#allocation2 + $0x98c] sm:$0xf]  ;;  %v9316_v61 = vld [vmem:[#allocation2 + $0x978] sm:$0xf0] }
 0x35c   :  { %7737 = vmatpush.bf16.msra.mxu2 %v9511_v22  ;;  %7706 = vmatmul.bf16.vlgmr.msrb.gmra.mxu3 %v13417_v42  ;;  %v7461_v42 = vadd.f32 %v7460_v19, %v13659_v21  ;;  %v9335_v27 = vor.u32 %v12505_v38, %v9332_v18  ;;  %v9463_v22 = vor.u32 %v12537_v6, %v9460_v36  ;;  %v9444_v48 = vld [vmem:[#allocation2 + $0xa78] sm:$0xf0]  ;;  %v12565_v43 = vld [vmem:[#allocation2 + $0xb6c] sm:$0xf] }
 0x35d   :  { %7750 = vmatpush.bf16.msra.mxu3 %v9639_v59  ;;  %v9591_v59 = vor.u32 %v12569_v41, %v9588_v3  ;;  %v9319_v21 = vor.u32 %v12501_v40, %v9316_v61  ;;  %v12465_v57 = vld [vmem:[#allocation2 + $0x84c] sm:$0xf]  ;;  %v9172_v32 = vld [vmem:[#allocation2 + $0x858] sm:$0xf0] }
 0x35e   :  { %7712 = vmatpush.bf16.msra.mxu0 %v9239_v14  ;;  %v7474_v8 = vadd.f32 %v7473_v44, %v7461_v42  ;;  %v9572_v14 = vld [vmem:[#allocation2 + $0xb78] sm:$0xf0]  ;;  %v12497_v60 = vld [vmem:[#allocation2 + $0x94c] sm:$0xf]  ;;  %v7486_v52 = vpop.f32.mrf.mxu2  ;;  %v7462_v58 = vpop.f32.mrf.mxu0  ;;  %v9175_v4 = vor.u32 %v12465_v57, %v9172_v32 }
 0x35f   :  { %7725 = vmatpush.bf16.msra.mxu1 %v9367_v15  ;;  %v9191_v15 = vor.u32 %v12469_v0, %v9188_v62  ;;  %v9300_v39 = vld [vmem:[#allocation2 + $0x958] sm:$0xf0]  ;;  %v12529_v9 = vld [vmem:[#allocation2 + $0xa4c] sm:$0xf] }
 0x360   :  { %7738 = vmatpush.bf16.msra.mxu2 %v9495_v63  ;;  %v9447_v63 = vor.u32 %v12533_v56, %v9444_v48  ;;  %v9428_v2 = vld [vmem:[#allocation2 + $0xa58] sm:$0xf0]  ;;  %v7487_v50 = vadd.f32 %v7486_v52, %v7474_v8  ;;  %v9303_v18 = vor.u32 %v12497_v60, %v9300_v39  ;;  %v12461_v36 = vld [vmem:[#allocation2 + $0x82c] sm:$0xf] }
 0x361   :  { %7751 = vmatpush.bf16.msra.mxu3 %v9623_v24  ;;  %v9575_v24 = vor.u32 %v12565_v43, %v9572_v14  ;;  %v9431_v6 = vor.u32 %v12529_v9, %v9428_v2  ;;  %v9156_v19 = vld [vmem:[#allocation2 + $0x838] sm:$0xf0]  ;;  %v12493_v41 = vld [vmem:[#allocation2 + $0x92c] sm:$0xf] }
 0x362   :  { %7713 = vmatpush.bf16.msra.mxu0 %v9223_v26  ;;  %v7499_v26 = vpop.f32.mrf.mxu3  ;;  %v7475_v38 = vpop.f32.mrf.mxu1  ;;  %v9284_v42 = vld [vmem:[#allocation2 + $0x938] sm:$0xf0]  ;;  %v9159_v0 = vor.u32 %v12461_v36, %v9156_v19  ;;  %v12457_v62 = vld [vmem:[#allocation2 + $0x80c] sm:$0xf] }
 0x363   :  { %7726 = vmatpush.bf16.msra.mxu1 %v9351_v1  ;;  %v12561_v1 = vld [vmem:[#allocation2 + $0xb4c] sm:$0xf]  ;;  %v9412_v44 = vld [vmem:[#allocation2 + $0xa38] sm:$0xf0] }
 0x364   :  { %7739 = vmatpush.bf16.msra.mxu2 %v9479_v51  ;;  %v9556_v51 = vld [vmem:[#allocation2 + $0xb58] sm:$0xf0]  ;;  %v12489_v61 = vld [vmem:[#allocation2 + $0x90c] sm:$0xf] }
 0x365   :  { %7752 = vmatpush.bf16.msra.mxu3 %v9607_v47  ;;  %v13666_v47 = vadd.f32 %v7499_v26, %v7487_v50  ;;  %v9559_v3 = vor.u32 %v12561_v1, %v9556_v51  ;;  %v9140_v40 = vld [vmem:[#allocation2 + $0x818] sm:$0xf0]  ;;  %v12521_v48 = vld [vmem:[#allocation2 + $0xa0c] sm:$0xf] }
 0x366   :  { %7714 = vmatpush.bf16.msra.mxu0 %v9207_v20  ;;  %v12525_v20 = vld [vmem:[#allocation2 + $0xa2c] sm:$0xf]  ;;  %v9268_v56 = vld [vmem:[#allocation2 + $0x918] sm:$0xf0]  ;;  %v9143_v52 = vor.u32 %v12457_v62, %v9140_v40 }
 0x367   :  { %7727 = vmatpush.bf16.msra.mxu1 %v9335_v27  ;;  %v12557_v27 = vld [vmem:[#allocation2 + $0xb2c] sm:$0xf]  ;;  %v9415_v8 = vor.u32 %v12525_v20, %v9412_v44  ;;  %v9396_v14 = vld [vmem:[#allocation2 + $0xa18] sm:$0xf0]  ;;  %v9271_v50 = vor.u32 %v12489_v61, %v9268_v56 }
 0x368   :  { %7740 = vmatpush.bf16.msra.mxu2 %v9463_v22  ;;  %v9540_v22 = vld [vmem:[#allocation2 + $0xb38] sm:$0xf0]  ;;  %v12613_v57 = vld [vmem:[#allocation2 + $0xcec] sm:$0xf]  ;;  %v9399_v26 = vor.u32 %v12521_v48, %v9396_v14 }
 0x369   :  { %7753 = vmatpush.bf16.msra.mxu3 %v9591_v59  ;;  %v9287_v59 = vor.u32 %v12493_v41, %v9284_v42  ;;  %v9543_v43 = vor.u32 %v12557_v27, %v9540_v22  ;;  %v9764_v32 = vld [vmem:[#allocation2 + $0xcf8] sm:$0xf0]  ;;  %v12645_v60 = vld [vmem:[#allocation2 + $0xdec] sm:$0xf] }
 0x36a   :  { %7715 = vmatpush.bf16.msra.mxu0 %v9191_v15  ;;  %v12553_v15 = vld [vmem:[#allocation2 + $0xb0c] sm:$0xf]  ;;  %v9892_v39 = vld [vmem:[#allocation2 + $0xdf8] sm:$0xf0] }
 0x36b   :  { %7728 = vmatpush.bf16.msra.mxu1 %v9319_v21  ;;  %v9524_v21 = vld [vmem:[#allocation2 + $0xb18] sm:$0xf0]  ;;  %v12677_v9 = vld [vmem:[#allocation2 + $0xeec] sm:$0xf]  ;;  %v9895_v38 = vor.u32 %v12645_v60, %v9892_v39 }
 0x36c   :  { %7741 = vmatpush.bf16.msra.mxu2 %v9447_v63  ;;  %v7488_v63 = vpop.f32.mrf.mxu2  ;;  %v10020_v2 = vld [vmem:[#allocation2 + $0xef8] sm:$0xf0]  ;;  %v12709_v1 = vld [vmem:[#allocation2 + $0xfec] sm:$0xf]  ;;  %v9527_v58 = vor.u32 %v12553_v15, %v9524_v21 }
 0x36d   :  { %7754 = vmatpush.bf16.msra.mxu3 %v9575_v24  ;;  %v7501_v24 = vpop.f32.mrf.mxu3  ;;  %v10148_v51 = vld [vmem:[#allocation2 + $0xff8] sm:$0xf0]  ;;  %v12641_v19 = vld [vmem:[#allocation2 + $0xdcc] sm:$0xf] }
 0x36e   :  { %7716 = vmatpush.bf16.msra.mxu0 %v9175_v4  ;;  %v9767_v4 = vor.u32 %v12613_v57, %v9764_v32  ;;  %v9748_v36 = vld [vmem:[#allocation2 + $0xcd8] sm:$0xf0]  ;;  %v10151_v41 = vor.u32 %v12709_v1, %v10148_v51  ;;  %v12673_v42 = vld [vmem:[#allocation2 + $0xecc] sm:$0xf] }
 0x36f   :  { %7729 = vmatpush.bf16.msra.mxu1 %v9303_v18  ;;  %v10023_v18 = vor.u32 %v12677_v9, %v10020_v2  ;;  %v10004_v20 = vld [vmem:[#allocation2 + $0xed8] sm:$0xf0]  ;;  %v12705_v44 = vld [vmem:[#allocation2 + $0xfcc] sm:$0xf] }
 0x370   :  { %7742 = vmatpush.bf16.msra.mxu2 %v9431_v6  ;;  %v12609_v6 = vld [vmem:[#allocation2 + $0xccc] sm:$0xf]  ;;  %v10132_v27 = vld [vmem:[#allocation2 + $0xfd8] sm:$0xf0]  ;;  %v10007_v62 = vor.u32 %v12673_v42, %v10004_v20 }
 0x371   :  { %7755 = vmatpush.bf16.msra.mxu3 %v9559_v3  ;;  %v9876_v3 = vld [vmem:[#allocation2 + $0xdd8] sm:$0xf0]  ;;  %v9751_v22 = vor.u32 %v12609_v6, %v9748_v36  ;;  %v12605_v40 = vld [vmem:[#allocation2 + $0xcac] sm:$0xf]  ;;  %v10135_v61 = vor.u32 %v12705_v44, %v10132_v27 }
 0x372   :  { %7717 = vmatpush.bf16.msra.mxu0 %v9159_v0  ;;  %v9879_v0 = vor.u32 %v12641_v19, %v9876_v3  ;;  %v9860_v56 = vld [vmem:[#allocation2 + $0xdb8] sm:$0xf0]  ;;  %v12669_v48 = vld [vmem:[#allocation2 + $0xeac] sm:$0xf] }
 0x373   :  { %7730 = vmatpush.bf16.msra.mxu1 %v9287_v59  ;;  %v9732_v59 = vld [vmem:[#allocation2 + $0xcb8] sm:$0xf0]  ;;  %v12701_v14 = vld [vmem:[#allocation2 + $0xfac] sm:$0xf] }
 0x374   :  { %7743 = vmatpush.bf16.msra.mxu2 %v9415_v8  ;;  %v12637_v8 = vld [vmem:[#allocation2 + $0xdac] sm:$0xf]  ;;  %v10116_v15 = vld [vmem:[#allocation2 + $0xfb8] sm:$0xf0]  ;;  %v9735_v21 = vor.u32 %v12605_v40, %v9732_v59 }
 0x375   :  { %7756 = vmatpush.bf16.msra.mxu3 %v9543_v43  ;;  %v9988_v43 = vld [vmem:[#allocation2 + $0xeb8] sm:$0xf0]  ;;  %v9863_v63 = vor.u32 %v12637_v8, %v9860_v56  ;;  %v12601_v32 = vld [vmem:[#allocation2 + $0xc8c] sm:$0xf]  ;;  %v10119_v24 = vor.u32 %v12701_v14, %v10116_v15 }
 0x376   :  { %7718 = vmatpush.bf16.msra.mxu0 %v9143_v52  ;;  %v9991_v57 = vor.u32 %v12669_v48, %v9988_v43  ;;  %v12633_v60 = vld [vmem:[#allocation2 + $0xd8c] sm:$0xf]  ;;  %v9844_v52 = vld [vmem:[#allocation2 + $0xd98] sm:$0xf0]  ;;  %v7512_v9 = vpop.f32.mrf.mxu0 }
 0x377   :  { %7731 = vmatpush.bf16.msra.mxu1 %v9271_v50  ;;  %v12665_v39 = vld [vmem:[#allocation2 + $0xe8c] sm:$0xf]  ;;  %v10100_v2 = vld [vmem:[#allocation2 + $0xf98] sm:$0xf0]  ;;  %v9847_v1 = vor.u32 %v12633_v60, %v9844_v52 }
 0x378   :  { %7744 = vmatpush.bf16.msra.mxu2 %v9399_v26  ;;  %v7525_v26 = vpop.f32.mrf.mxu1  ;;  %v9828_v36 = vld [vmem:[#allocation2 + $0xd78] sm:$0xf0]  ;;  %v12661_v19 = vld [vmem:[#allocation2 + $0xe6c] sm:$0xf] }
 0x379   :  { %7757 = vmatpush.bf16.msra.mxu3 %v9527_v58  ;;  %7719 = vmatmul.bf16.vlgmr.msra.gmra.mxu0 %v13431_v25  ;;  %v9716_v25 = vld [vmem:[#allocation2 + $0xc98] sm:$0xf0]  ;;  %v12597_v58 = vld [vmem:[#allocation2 + $0xc6c] sm:$0xf] }
 0x37a   :  { %7763 = vmatpush.bf16.msrb.mxu0 %v9767_v4  ;;  %7732 = vmatmul.bf16.vlgmr.msra.gmra.mxu1 %v13435_v30  ;;  %v12697_v30 = vld [vmem:[#allocation2 + $0xf8c] sm:$0xf]  ;;  %v9719_v50 = vor.u32 %v12601_v32, %v9716_v25  ;;  %v9700_v4 = vld [vmem:[#allocation2 + $0xc78] sm:$0xf0] }
 0x37b   :  { %7776 = vmatpush.bf16.msrb.mxu1 %v9895_v38  ;;  %7745 = vmatmul.bf16.vlgmr.msra.gmra.mxu2 %v13433_v29  ;;  %v9972_v29 = vld [vmem:[#allocation2 + $0xe98] sm:$0xf0]  ;;  %v12629_v38 = vld [vmem:[#allocation2 + $0xd6c] sm:$0xf]  ;;  %v9703_v20 = vor.u32 %v12597_v58, %v9700_v4 }
 0x37c   :  { %7789 = vmatpush.bf16.msrb.mxu2 %v10023_v18  ;;  %7758 = vmatmul.bf16.vlgmr.msra.gmra.mxu3 %v13437_v33  ;;  %v7513_v33 = vadd.f32 %v7512_v9, %v13666_v47  ;;  %v9975_v51 = vor.u32 %v12665_v39, %v9972_v29  ;;  %v10103_v18 = vor.u32 %v12697_v30, %v10100_v2  ;;  %v12693_v3 = vld [vmem:[#allocation2 + $0xf6c] sm:$0xf]  ;;  %v10084_v42 = vld [vmem:[#allocation2 + $0xf78] sm:$0xf0] }
 0x37d   :  { %7802 = vmatpush.bf16.msrb.mxu3 %v10151_v41  ;;  %v9956_v41 = vld [vmem:[#allocation2 + $0xe78] sm:$0xf0]  ;;  %v9831_v47 = vor.u32 %v12629_v38, %v9828_v36  ;;  %v12593_v27 = vld [vmem:[#allocation2 + $0xc4c] sm:$0xf] }
 0x37e   :  { %7764 = vmatpush.bf16.msrb.mxu0 %v9751_v22  ;;  %v7526_v6 = vadd.f32 %v7525_v26, %v7513_v33  ;;  %v9959_v44 = vor.u32 %v12661_v19, %v9956_v41  ;;  %v9684_v22 = vld [vmem:[#allocation2 + $0xc58] sm:$0xf0]  ;;  %v7538_v40 = vpop.f32.mrf.mxu2  ;;  %v12657_v8 = vld [vmem:[#allocation2 + $0xe4c] sm:$0xf]  ;;  %v7514_v15 = vpop.f32.mrf.mxu0 }
 0x37f   :  { %7777 = vmatpush.bf16.msrb.mxu1 %v9879_v0  ;;  %v12625_v0 = vld [vmem:[#allocation2 + $0xd4c] sm:$0xf]  ;;  %v9812_v59 = vld [vmem:[#allocation2 + $0xd58] sm:$0xf0]  ;;  %v7551_v48 = vpop.f32.mrf.mxu3 }
 0x380   :  { %7790 = vmatpush.bf16.msrb.mxu2 %v10007_v62  ;;  %v10087_v62 = vor.u32 %v12693_v3, %v10084_v42  ;;  %v7539_v56 = vadd.f32 %v7538_v40, %v7526_v6  ;;  %v12689_v43 = vld [vmem:[#allocation2 + $0xf4c] sm:$0xf]  ;;  %v10068_v14 = vld [vmem:[#allocation2 + $0xf58] sm:$0xf0]  ;;  %v9815_v32 = vor.u32 %v12625_v0, %v9812_v59 }
 0x381   :  { %7803 = vmatpush.bf16.msrb.mxu3 %v10135_v61  ;;  %v9940_v61 = vld [vmem:[#allocation2 + $0xe58] sm:$0xf0]  ;;  %v12589_v60 = vld [vmem:[#allocation2 + $0xc2c] sm:$0xf]  ;;  %v10071_v39 = vor.u32 %v12689_v43, %v10068_v14 }
 0x382   :  { %7765 = vmatpush.bf16.msrb.mxu0 %v9735_v21  ;;  %v9687_v21 = vor.u32 %v12593_v27, %v9684_v22  ;;  %v9943_v25 = vor.u32 %v12657_v8, %v9940_v61  ;;  %v12621_v52 = vld [vmem:[#allocation2 + $0xd2c] sm:$0xf]  ;;  %v9796_v29 = vld [vmem:[#allocation2 + $0xd38] sm:$0xf0] }
 0x383   :  { %7778 = vmatpush.bf16.msrb.mxu1 %v9863_v63  ;;  %v7527_v63 = vpop.f32.mrf.mxu1  ;;  %v12653_v9 = vld [vmem:[#allocation2 + $0xe2c] sm:$0xf]  ;;  %v9924_v30 = vld [vmem:[#allocation2 + $0xe38] sm:$0xf0] }
 0x384   :  { %7791 = vmatpush.bf16.msrb.mxu2 %v9991_v57  ;;  %v13673_v57 = vadd.f32 %v7551_v48, %v7539_v56  ;;  %v12685_v2 = vld [vmem:[#allocation2 + $0xf2c] sm:$0xf]  ;;  %v10052_v33 = vld [vmem:[#allocation2 + $0xf38] sm:$0xf0]  ;;  %v9927_v58 = vor.u32 %v12653_v9, %v9924_v30 }
 0x385   :  { %7804 = vmatpush.bf16.msrb.mxu3 %v10119_v24  ;;  %v9668_v24 = vld [vmem:[#allocation2 + $0xc38] sm:$0xf0]  ;;  %v12585_v26 = vld [vmem:[#allocation2 + $0xc0c] sm:$0xf]  ;;  %v10055_v6 = vor.u32 %v12685_v2, %v10052_v33 }
 0x386   :  { %7766 = vmatpush.bf16.msrb.mxu0 %v9719_v50  ;;  %v9671_v50 = vor.u32 %v12589_v60, %v9668_v24  ;;  %v12617_v4 = vld [vmem:[#allocation2 + $0xd0c] sm:$0xf]  ;;  %v9780_v38 = vld [vmem:[#allocation2 + $0xd18] sm:$0xf0]  ;;  %v7540_v3 = vpop.f32.mrf.mxu2 }
 0x387   :  { %7779 = vmatpush.bf16.msrb.mxu1 %v9847_v1  ;;  %v9652_v1 = vld [vmem:[#allocation2 + $0xc18] sm:$0xf0]  ;;  %v12681_v19 = vld [vmem:[#allocation2 + $0xf0c] sm:$0xf]  ;;  %v9783_v40 = vor.u32 %v12617_v4, %v9780_v38 }
 0x388   :  { %7792 = vmatpush.bf16.msrb.mxu2 %v9975_v51  ;;  %v9799_v51 = vor.u32 %v12621_v52, %v9796_v29  ;;  %v9908_v36 = vld [vmem:[#allocation2 + $0xe18] sm:$0xf0]  ;;  %v12741_v42 = vld [vmem:[#allocation2 + $0x10ec] sm:$0xf]  ;;  %v9655_v27 = vor.u32 %v12585_v26, %v9652_v1 }
 0x389   :  { %7805 = vmatpush.bf16.msrb.mxu3 %v10103_v18  ;;  %v12649_v18 = vld [vmem:[#allocation2 + $0xe0c] sm:$0xf]  ;;  %v10036_v41 = vld [vmem:[#allocation2 + $0xf18] sm:$0xf0] }
 0x38a   :  { %7767 = vmatpush.bf16.msrb.mxu0 %v9703_v20  ;;  %v10276_v20 = vld [vmem:[#allocation2 + $0x10f8] sm:$0xf0]  ;;  %v12805_v0 = vld [vmem:[#allocation2 + $0x12ec] sm:$0xf]  ;;  %v9911_v59 = vor.u32 %v12649_v18, %v9908_v36  ;;  %v10039_v56 = vor.u32 %v12681_v19, %v10036_v41 }
 0x38b   :  { %7780 = vmatpush.bf16.msrb.mxu1 %v9831_v47  ;;  %v12773_v47 = vld [vmem:[#allocation2 + $0x11ec] sm:$0xf]  ;;  %v10404_v22 = vld [vmem:[#allocation2 + $0x11f8] sm:$0xf0]  ;;  %v10279_v48 = vor.u32 %v12741_v42, %v10276_v20 }
 0x38c   :  { %7793 = vmatpush.bf16.msrb.mxu2 %v9959_v44  ;;  %v7553_v44 = vpop.f32.mrf.mxu3  ;;  %v12837_v8 = vld [vmem:[#allocation2 + $0x13ec] sm:$0xf]  ;;  %v10660_v61 = vld [vmem:[#allocation2 + $0x13f8] sm:$0xf0]  ;;  %v10407_v43 = vor.u32 %v12773_v47, %v10404_v22 }
 0x38d   :  { %7806 = vmatpush.bf16.msrb.mxu3 %v10087_v62  ;;  %v10532_v62 = vld [vmem:[#allocation2 + $0x12f8] sm:$0xf0]  ;;  %v12737_v15 = vld [vmem:[#allocation2 + $0x10cc] sm:$0xf] }
 0x38e   :  { %7768 = vmatpush.bf16.msrb.mxu0 %v9687_v21  ;;  %v10535_v14 = vor.u32 %v12805_v0, %v10532_v62  ;;  %v10260_v21 = vld [vmem:[#allocation2 + $0x10d8] sm:$0xf0]  ;;  %v12769_v63 = vld [vmem:[#allocation2 + $0x11cc] sm:$0xf] }
 0x38f   :  { %7781 = vmatpush.bf16.msrb.mxu1 %v9815_v32  ;;  %v10663_v32 = vor.u32 %v12837_v8, %v10660_v61  ;;  %v12801_v60 = vld [vmem:[#allocation2 + $0x12cc] sm:$0xf]  ;;  %v10516_v24 = vld [vmem:[#allocation2 + $0x12d8] sm:$0xf0]  ;;  %v10263_v29 = vor.u32 %v12737_v15, %v10260_v21 }
 0x390   :  { %7794 = vmatpush.bf16.msrb.mxu2 %v9943_v25  ;;  %v10388_v25 = vld [vmem:[#allocation2 + $0x11d8] sm:$0xf0]  ;;  %v12833_v52 = vld [vmem:[#allocation2 + $0x13cc] sm:$0xf]  ;;  %v10519_v30 = vor.u32 %v12801_v60, %v10516_v24 }
 0x391   :  { %7807 = vmatpush.bf16.msrb.mxu3 %v10071_v39  ;;  %v10644_v39 = vld [vmem:[#allocation2 + $0x13d8] sm:$0xf0]  ;;  %v10391_v9 = vor.u32 %v12769_v63, %v10388_v25  ;;  %v12733_v2 = vld [vmem:[#allocation2 + $0x10ac] sm:$0xf] }
 0x392   :  { %7769 = vmatpush.bf16.msrb.mxu0 %v9671_v50  ;;  %v10244_v33 = vld [vmem:[#allocation2 + $0x10b8] sm:$0xf0]  ;;  %v12765_v50 = vld [vmem:[#allocation2 + $0x11ac] sm:$0xf]  ;;  %v10647_v26 = vor.u32 %v12833_v52, %v10644_v39 }
 0x393   :  { %7782 = vmatpush.bf16.msrb.mxu1 %v9799_v51  ;;  %v10372_v1 = vld [vmem:[#allocation2 + $0x11b8] sm:$0xf0]  ;;  %v12797_v51 = vld [vmem:[#allocation2 + $0x12ac] sm:$0xf]  ;;  %v10247_v18 = vor.u32 %v12733_v2, %v10244_v33 }
 0x394   :  { %7795 = vmatpush.bf16.msrb.mxu2 %v9927_v58  ;;  %v10500_v58 = vld [vmem:[#allocation2 + $0x12b8] sm:$0xf0]  ;;  %v12829_v4 = vld [vmem:[#allocation2 + $0x13ac] sm:$0xf] }
 0x395   :  { %7808 = vmatpush.bf16.msrb.mxu3 %v10055_v6  ;;  %v10628_v38 = vld [vmem:[#allocation2 + $0x13b8] sm:$0xf0]  ;;  %v10375_v6 = vor.u32 %v12765_v50, %v10372_v1  ;;  %v10503_v36 = vor.u32 %v12797_v51, %v10500_v58  ;;  %v12729_v19 = vld [vmem:[#allocation2 + $0x108c] sm:$0xf] }
 0x396   :  { %7770 = vmatpush.bf16.msrb.mxu0 %v9655_v27  ;;  %v12761_v41 = vld [vmem:[#allocation2 + $0x118c] sm:$0xf]  ;;  %v10631_v3 = vor.u32 %v12829_v4, %v10628_v38  ;;  %v10356_v42 = vld [vmem:[#allocation2 + $0x1198] sm:$0xf0]  ;;  %v7564_v47 = vpop.f32.mrf.mxu0 }
 0x397   :  { %7783 = vmatpush.bf16.msrb.mxu1 %v9783_v40  ;;  %v12793_v20 = vld [vmem:[#allocation2 + $0x128c] sm:$0xf]  ;;  %v10612_v44 = vld [vmem:[#allocation2 + $0x1398] sm:$0xf0]  ;;  %v7577_v22 = vpop.f32.mrf.mxu1  ;;  %v10359_v0 = vor.u32 %v12761_v41, %v10356_v42 }
 0x398   :  { %7796 = vmatpush.bf16.msrb.mxu2 %v9911_v59  ;;  %v12725_v40 = vld [vmem:[#allocation2 + $0x106c] sm:$0xf]  ;;  %v10212_v59 = vld [vmem:[#allocation2 + $0x1078] sm:$0xf0] }
 0x399   :  { %7809 = vmatpush.bf16.msrb.mxu3 %v10039_v56  ;;  %7771 = vmatmul.bf16.vlgmr.msrb.gmra.mxu0 %v13449_v23  ;;  %v10228_v23 = vld [vmem:[#allocation2 + $0x1098] sm:$0xf0]  ;;  %v12757_v8 = vld [vmem:[#allocation2 + $0x116c] sm:$0xf]  ;;  %v10215_v63 = vor.u32 %v12725_v40, %v10212_v59 }
 0x39a   :  { %7815 = vmatpush.bf16.msra.mxu0 %v10279_v48  ;;  %7784 = vmatmul.bf16.vlgmr.msrb.gmra.mxu1 %v13453_v31  ;;  %v12825_v31 = vld [vmem:[#allocation2 + $0x138c] sm:$0xf]  ;;  %v10231_v27 = vor.u32 %v12729_v19, %v10228_v23  ;;  %v10340_v48 = vld [vmem:[#allocation2 + $0x1178] sm:$0xf0] }
 0x39b   :  { %7828 = vmatpush.bf16.msra.mxu1 %v10407_v43  ;;  %7797 = vmatmul.bf16.vlgmr.msrb.gmra.mxu2 %v13451_v28  ;;  %v10484_v28 = vld [vmem:[#allocation2 + $0x1298] sm:$0xf0]  ;;  %v10615_v61 = vor.u32 %v12825_v31, %v10612_v44  ;;  %v12789_v43 = vld [vmem:[#allocation2 + $0x126c] sm:$0xf] }
 0x39c   :  { %7841 = vmatpush.bf16.msra.mxu2 %v10535_v14  ;;  %7810 = vmatmul.bf16.vlgmr.msrb.gmra.mxu3 %v13455_v35  ;;  %v7565_v35 = vadd.f32 %v7564_v47, %v13673_v57  ;;  %v10487_v62 = vor.u32 %v12793_v20, %v10484_v28  ;;  %v10468_v14 = vld [vmem:[#allocation2 + $0x1278] sm:$0xf0]  ;;  %v12821_v15 = vld [vmem:[#allocation2 + $0x136c] sm:$0xf]  ;;  %v10343_v57 = vor.u32 %v12757_v8, %v10340_v48 }
 0x39d   :  { %7854 = vmatpush.bf16.msra.mxu3 %v10663_v32  ;;  %v10596_v21 = vld [vmem:[#allocation2 + $0x1378] sm:$0xf0]  ;;  %v10471_v32 = vor.u32 %v12789_v43, %v10468_v14  ;;  %v12721_v25 = vld [vmem:[#allocation2 + $0x104c] sm:$0xf] }
 0x39e   :  { %7816 = vmatpush.bf16.msra.mxu0 %v10263_v29  ;;  %v7578_v56 = vadd.f32 %v7577_v22, %v7565_v35  ;;  %v10196_v60 = vld [vmem:[#allocation2 + $0x1058] sm:$0xf0]  ;;  %v12753_v24 = vld [vmem:[#allocation2 + $0x114c] sm:$0xf]  ;;  %v10599_v52 = vor.u32 %v12821_v15, %v10596_v21  ;;  %v7590_v39 = vpop.f32.mrf.mxu2  ;;  %v7566_v1 = vpop.f32.mrf.mxu0 }
 0x39f   :  { %7829 = vmatpush.bf16.msra.mxu1 %v10391_v9  ;;  %v10324_v29 = vld [vmem:[#allocation2 + $0x1158] sm:$0xf0]  ;;  %v12785_v9 = vld [vmem:[#allocation2 + $0x124c] sm:$0xf]  ;;  %v7603_v33 = vpop.f32.mrf.mxu3  ;;  %v10199_v51 = vor.u32 %v12721_v25, %v10196_v60  ;;  %v7579_v58 = vpop.f32.mrf.mxu1 }
 0x3a0   :  { %7842 = vmatpush.bf16.msra.mxu2 %v10519_v30  ;;  %v10452_v30 = vld [vmem:[#allocation2 + $0x1258] sm:$0xf0]  ;;  %v7591_v2 = vadd.f32 %v7590_v39, %v7578_v56  ;;  %v12817_v50 = vld [vmem:[#allocation2 + $0x134c] sm:$0xf]  ;;  %v10327_v38 = vor.u32 %v12753_v24, %v10324_v29 }
 0x3a1   :  { %7855 = vmatpush.bf16.msra.mxu3 %v10647_v26  ;;  %v10580_v26 = vld [vmem:[#allocation2 + $0x1358] sm:$0xf0]  ;;  %v12749_v19 = vld [vmem:[#allocation2 + $0x112c] sm:$0xf] }
 0x3a2   :  { %7817 = vmatpush.bf16.msra.mxu0 %v10247_v18  ;;  %v13680_v4 = vadd.f32 %v7603_v33, %v7591_v2  ;;  %v10455_v18 = vor.u32 %v12785_v9, %v10452_v30  ;;  %v10583_v23 = vor.u32 %v12817_v50, %v10580_v26  ;;  %v10308_v41 = vld [vmem:[#allocation2 + $0x1138] sm:$0xf0]  ;;  %v12813_v20 = vld [vmem:[#allocation2 + $0x132c] sm:$0xf] }
 0x3a3   :  { %7830 = vmatpush.bf16.msra.mxu1 %v10375_v6  ;;  %v12717_v6 = vld [vmem:[#allocation2 + $0x102c] sm:$0xf]  ;;  %v10436_v42 = vld [vmem:[#allocation2 + $0x1238] sm:$0xf0]  ;;  %v10311_v35 = vor.u32 %v12749_v19, %v10308_v41 }
 0x3a4   :  { %7843 = vmatpush.bf16.msra.mxu2 %v10503_v36  ;;  %v10180_v36 = vld [vmem:[#allocation2 + $0x1038] sm:$0xf0]  ;;  %v12713_v31 = vld [vmem:[#allocation2 + $0x100c] sm:$0xf] }
 0x3a5   :  { %7856 = vmatpush.bf16.msra.mxu3 %v10631_v3  ;;  %v12781_v3 = vld [vmem:[#allocation2 + $0x122c] sm:$0xf]  ;;  %v10564_v28 = vld [vmem:[#allocation2 + $0x1338] sm:$0xf0]  ;;  %v10183_v47 = vor.u32 %v12717_v6, %v10180_v36 }
 0x3a6   :  { %7818 = vmatpush.bf16.msra.mxu0 %v10231_v27  ;;  %v10164_v44 = vld [vmem:[#allocation2 + $0x1018] sm:$0xf0]  ;;  %v10439_v27 = vor.u32 %v12781_v3, %v10436_v42  ;;  %v12745_v22 = vld [vmem:[#allocation2 + $0x110c] sm:$0xf]  ;;  %v10567_v40 = vor.u32 %v12813_v20, %v10564_v28  ;;  %v7592_v56 = vpop.f32.mrf.mxu2 }
 0x3a7   :  { %7831 = vmatpush.bf16.msra.mxu1 %v10359_v0  ;;  %v10292_v0 = vld [vmem:[#allocation2 + $0x1118] sm:$0xf0]  ;;  %v12809_v8 = vld [vmem:[#allocation2 + $0x130c] sm:$0xf]  ;;  %v7605_v15 = vpop.f32.mrf.mxu3  ;;  %v10167_v21 = vor.u32 %v12713_v31, %v10164_v44 }
 0x3a8   :  { %7844 = vmatpush.bf16.msra.mxu2 %v10487_v62  ;;  %v12777_v62 = vld [vmem:[#allocation2 + $0x120c] sm:$0xf]  ;;  %v10420_v59 = vld [vmem:[#allocation2 + $0x1218] sm:$0xf0]  ;;  %v10295_v25 = vor.u32 %v12745_v22, %v10292_v0 }
 0x3a9   :  { %7857 = vmatpush.bf16.msra.mxu3 %v10615_v61  ;;  %v10548_v61 = vld [vmem:[#allocation2 + $0x1318] sm:$0xf0]  ;;  %v12869_v48 = vld [vmem:[#allocation2 + $0x14ec] sm:$0xf]  ;;  %v10423_v60 = vor.u32 %v12777_v62, %v10420_v59 }
 0x3aa   :  { %7819 = vmatpush.bf16.msra.mxu0 %v10215_v63  ;;  %v10788_v43 = vld [vmem:[#allocation2 + $0x14f8] sm:$0xf0]  ;;  %v12901_v14 = vld [vmem:[#allocation2 + $0x15ec] sm:$0xf]  ;;  %v10551_v39 = vor.u32 %v12809_v8, %v10548_v61 }
 0x3ab   :  { %7832 = vmatpush.bf16.msra.mxu1 %v10343_v57  ;;  %v10916_v63 = vld [vmem:[#allocation2 + $0x15f8] sm:$0xf0]  ;;  %v12933_v57 = vld [vmem:[#allocation2 + $0x16ec] sm:$0xf]  ;;  %v10791_v29 = vor.u32 %v12869_v48, %v10788_v43 }
 0x3ac   :  { %7845 = vmatpush.bf16.msra.mxu2 %v10471_v32  ;;  %v11044_v32 = vld [vmem:[#allocation2 + $0x16f8] sm:$0xf0]  ;;  %v12965_v24 = vld [vmem:[#allocation2 + $0x17ec] sm:$0xf]  ;;  %v10919_v9 = vor.u32 %v12901_v14, %v10916_v63 }
 0x3ad   :  { %7858 = vmatpush.bf16.msra.mxu3 %v10599_v52  ;;  %v11172_v52 = vld [vmem:[#allocation2 + $0x17f8] sm:$0xf0]  ;;  %v11047_v30 = vor.u32 %v12933_v57, %v11044_v32  ;;  %v12865_v2 = vld [vmem:[#allocation2 + $0x14cc] sm:$0xf] }
 0x3ae   :  { %7820 = vmatpush.bf16.msra.mxu0 %v10199_v51  ;;  %v10772_v33 = vld [vmem:[#allocation2 + $0x14d8] sm:$0xf0]  ;;  %v12897_v50 = vld [vmem:[#allocation2 + $0x15cc] sm:$0xf]  ;;  %v11175_v26 = vor.u32 %v12965_v24, %v11172_v52 }
 0x3af   :  { %7833 = vmatpush.bf16.msra.mxu1 %v10327_v38  ;;  %v10900_v1 = vld [vmem:[#allocation2 + $0x15d8] sm:$0xf0]  ;;  %v12929_v51 = vld [vmem:[#allocation2 + $0x16cc] sm:$0xf]  ;;  %v10775_v6 = vor.u32 %v12865_v2, %v10772_v33 }
 0x3b0   :  { %7846 = vmatpush.bf16.msra.mxu2 %v10455_v18  ;;  %v11028_v58 = vld [vmem:[#allocation2 + $0x16d8] sm:$0xf0]  ;;  %v12961_v38 = vld [vmem:[#allocation2 + $0x17cc] sm:$0xf]  ;;  %v10903_v36 = vor.u32 %v12897_v50, %v10900_v1 }
 0x3b1   :  { %7859 = vmatpush.bf16.msra.mxu3 %v10583_v23  ;;  %v11156_v18 = vld [vmem:[#allocation2 + $0x17d8] sm:$0xf0]  ;;  %v11031_v19 = vor.u32 %v12929_v51, %v11028_v58  ;;  %v12861_v23 = vld [vmem:[#allocation2 + $0x14ac] sm:$0xf] }
 0x3b2   :  { %7821 = vmatpush.bf16.msra.mxu0 %v10183_v47  ;;  %v10756_v41 = vld [vmem:[#allocation2 + $0x14b8] sm:$0xf0]  ;;  %v12893_v3 = vld [vmem:[#allocation2 + $0x15ac] sm:$0xf]  ;;  %v11159_v42 = vor.u32 %v12961_v38, %v11156_v18 }
 0x3b3   :  { %7834 = vmatpush.bf16.msra.mxu1 %v10311_v35  ;;  %v10884_v20 = vld [vmem:[#allocation2 + $0x15b8] sm:$0xf0]  ;;  %v12925_v28 = vld [vmem:[#allocation2 + $0x16ac] sm:$0xf]  ;;  %v10759_v35 = vor.u32 %v12861_v23, %v10756_v41 }
 0x3b4   :  { %7847 = vmatpush.bf16.msra.mxu2 %v10439_v27  ;;  %v11012_v47 = vld [vmem:[#allocation2 + $0x16b8] sm:$0xf0]  ;;  %v12957_v31 = vld [vmem:[#allocation2 + $0x17ac] sm:$0xf]  ;;  %v10887_v22 = vor.u32 %v12893_v3, %v10884_v20 }
 0x3b5   :  { %7860 = vmatpush.bf16.msra.mxu3 %v10567_v40  ;;  %v11140_v44 = vld [vmem:[#allocation2 + $0x17b8] sm:$0xf0]  ;;  %v12857_v27 = vld [vmem:[#allocation2 + $0x148c] sm:$0xf]  ;;  %v11015_v0 = vor.u32 %v12925_v28, %v11012_v47  ;;  %v13237_v40 = vld [vmem:[#allocation4] sm:$0xf] }
 0x3b6   :  { %7822 = vmatpush.bf16.msra.mxu0 %v10167_v21  ;;  %v12889_v62 = vld [vmem:[#allocation2 + $0x158c] sm:$0xf]  ;;  %v1122_v59 = vperm.slane %v13237_v40, 3  ;;  %v11143_v8 = vor.u32 %v12957_v31, %v11140_v44  ;;  %v11124_v48 = vld [vmem:[#allocation2 + $0x1798] sm:$0xf0]  ;;  %v7616_v43 = vpop.f32.mrf.mxu0 }
 0x3b7   :  { %7835 = vmatpush.bf16.msra.mxu1 %v10295_v25  ;;  %v12921_v61 = vld [vmem:[#allocation2 + $0x168c] sm:$0xf]  ;;  %v10724_v63 = vld [vmem:[#allocation2 + $0x1478] sm:$0xf0]  ;;  %v7629_v25 = vpop.f32.mrf.mxu1 }
 0x3b8   :  { %7848 = vmatpush.bf16.msra.mxu2 %v10423_v60  ;;  %v12953_v56 = vld [vmem:[#allocation2 + $0x178c] sm:$0xf]  ;;  %v7617_v32 = vadd.f32 %v7616_v43, %v1122_v59  ;;  %v10852_v24 = vld [vmem:[#allocation2 + $0x1578] sm:$0xf0] }
 0x3b9   :  { %7861 = vmatpush.bf16.msra.mxu3 %v10551_v39  ;;  %7823 = vmatmul.bf16.vlgmr.msra.gmra.mxu0 %v13467_v37  ;;  %v10740_v37 = vld [vmem:[#allocation2 + $0x1498] sm:$0xf0]  ;;  %v12853_v21 = vld [vmem:[#allocation2 + $0x146c] sm:$0xf]  ;;  %v11127_v60 = vor.u32 %v12953_v56, %v11124_v48 }
 0x3ba   :  { %7867 = vmatpush.bf16.msrb.mxu0 %v10791_v29  ;;  %7836 = vmatmul.bf16.vlgmr.msra.gmra.mxu1 %v13471_v46  ;;  %v10996_v46 = vld [vmem:[#allocation2 + $0x1698] sm:$0xf0]  ;;  %v12885_v57 = vld [vmem:[#allocation2 + $0x156c] sm:$0xf]  ;;  %v10727_v2 = vor.u32 %v12853_v21, %v10724_v63 }
 0x3bb   :  { %7880 = vmatpush.bf16.msrb.mxu1 %v10919_v9  ;;  %7849 = vmatmul.bf16.vlgmr.msra.gmra.mxu2 %v13469_v45  ;;  %v10868_v45 = vld [vmem:[#allocation2 + $0x1598] sm:$0xf0]  ;;  %v10999_v15 = vor.u32 %v12921_v61, %v10996_v46  ;;  %v12917_v52 = vld [vmem:[#allocation2 + $0x166c] sm:$0xf]  ;;  %v10855_v33 = vor.u32 %v12885_v57, %v10852_v24 }
 0x3bc   :  { %7893 = vmatpush.bf16.msrb.mxu2 %v11047_v30  ;;  %7862 = vmatmul.bf16.vlgmr.msra.gmra.mxu3 %v13473_v49  ;;  %v10743_v49 = vor.u32 %v12857_v27, %v10740_v37  ;;  %v10871_v14 = vor.u32 %v12889_v62, %v10868_v45  ;;  %v10980_v39 = vld [vmem:[#allocation2 + $0x1678] sm:$0xf0]  ;;  %v12949_v29 = vld [vmem:[#allocation2 + $0x176c] sm:$0xf]  ;;  %v7630_v30 = vadd.f32 %v7629_v25, %v7617_v32 }
 0x3bd   :  { %7906 = vmatpush.bf16.msrb.mxu3 %v11175_v26  ;;  %v11108_v9 = vld [vmem:[#allocation2 + $0x1778] sm:$0xf0]  ;;  %v10983_v50 = vor.u32 %v12917_v52, %v10980_v39  ;;  %v12849_v26 = vld [vmem:[#allocation2 + $0x144c] sm:$0xf] }
 0x3be   :  { %7868 = vmatpush.bf16.msrb.mxu0 %v10775_v6  ;;  %v10708_v1 = vld [vmem:[#allocation2 + $0x1458] sm:$0xf0]  ;;  %v12881_v51 = vld [vmem:[#allocation2 + $0x154c] sm:$0xf]  ;;  %v7642_v58 = vpop.f32.mrf.mxu2  ;;  %v11111_v38 = vor.u32 %v12949_v29, %v11108_v9  ;;  %v7618_v28 = vpop.f32.mrf.mxu0 }
 0x3bf   :  { %7881 = vmatpush.bf16.msrb.mxu1 %v10903_v36  ;;  %v10836_v18 = vld [vmem:[#allocation2 + $0x1558] sm:$0xf0]  ;;  %v12913_v6 = vld [vmem:[#allocation2 + $0x164c] sm:$0xf]  ;;  %v7655_v23 = vpop.f32.mrf.mxu3 }
 0x3c0   :  { %7894 = vmatpush.bf16.msrb.mxu2 %v11031_v19  ;;  %v10964_v36 = vld [vmem:[#allocation2 + $0x1658] sm:$0xf0]  ;;  %v7643_v19 = vadd.f32 %v7642_v58, %v7630_v30  ;;  %v12945_v41 = vld [vmem:[#allocation2 + $0x174c] sm:$0xf]  ;;  %v10839_v47 = vor.u32 %v12881_v51, %v10836_v18 }
 0x3c1   :  { %7907 = vmatpush.bf16.msrb.mxu3 %v11159_v42  ;;  %v11092_v3 = vld [vmem:[#allocation2 + $0x1758] sm:$0xf0]  ;;  %v10711_v42 = vor.u32 %v12849_v26, %v10708_v1  ;;  %v10967_v31 = vor.u32 %v12913_v6, %v10964_v36  ;;  %v12845_v44 = vld [vmem:[#allocation2 + $0x142c] sm:$0xf] }
 0x3c2   :  { %7869 = vmatpush.bf16.msrb.mxu0 %v10759_v35  ;;  %v13686_v20 = vadd.f32 %v7655_v23, %v7643_v19  ;;  %v10692_v35 = vld [vmem:[#allocation2 + $0x1438] sm:$0xf0]  ;;  %v12877_v27 = vld [vmem:[#allocation2 + $0x152c] sm:$0xf] }
 0x3c3   :  { %7882 = vmatpush.bf16.msrb.mxu1 %v10887_v22  ;;  %v7631_v22 = vpop.f32.mrf.mxu1  ;;  %v10820_v37 = vld [vmem:[#allocation2 + $0x1538] sm:$0xf0]  ;;  %v12909_v62 = vld [vmem:[#allocation2 + $0x162c] sm:$0xf]  ;;  %v10695_v45 = vor.u32 %v12845_v44, %v10692_v35 }
 0x3c4   :  { %7895 = vmatpush.bf16.msrb.mxu2 %v11015_v0  ;;  %v11095_v0 = vor.u32 %v12945_v41, %v11092_v3  ;;  %v10948_v40 = vld [vmem:[#allocation2 + $0x1638] sm:$0xf0]  ;;  %v12941_v59 = vld [vmem:[#allocation2 + $0x172c] sm:$0xf]  ;;  %v10823_v56 = vor.u32 %v12877_v27, %v10820_v37 }
 0x3c5   :  { %7908 = vmatpush.bf16.msrb.mxu3 %v11143_v8  ;;  %v11076_v8 = vld [vmem:[#allocation2 + $0x1738] sm:$0xf0]  ;;  %v12841_v61 = vld [vmem:[#allocation2 + $0x140c] sm:$0xf]  ;;  %v10951_v48 = vor.u32 %v12909_v62, %v10948_v40 }
 0x3c6   :  { %7870 = vmatpush.bf16.msrb.mxu0 %v10743_v49  ;;  %v10676_v46 = vld [vmem:[#allocation2 + $0x1418] sm:$0xf0]  ;;  %v12873_v49 = vld [vmem:[#allocation2 + $0x150c] sm:$0xf]  ;;  %v11079_v21 = vor.u32 %v12941_v59, %v11076_v8 }
 0x3c7   :  { %7883 = vmatpush.bf16.msrb.mxu1 %v10871_v14  ;;  %v10804_v43 = vld [vmem:[#allocation2 + $0x1518] sm:$0xf0]  ;;  %v12905_v14 = vld [vmem:[#allocation2 + $0x160c] sm:$0xf]  ;;  %v7657_v25 = vpop.f32.mrf.mxu3  ;;  %v10679_v39 = vor.u32 %v12841_v61, %v10676_v46 }
 0x3c8   :  { %7896 = vmatpush.bf16.msrb.mxu2 %v10999_v15  ;;  %v7644_v15 = vpop.f32.mrf.mxu2  ;;  %v10932_v63 = vld [vmem:[#allocation2 + $0x1618] sm:$0xf0]  ;;  %v12937_v57 = vld [vmem:[#allocation2 + $0x170c] sm:$0xf] }
 0x3c9   :  { %7909 = vmatpush.bf16.msrb.mxu3 %v11127_v60  ;;  %v11060_v32 = vld [vmem:[#allocation2 + $0x1718] sm:$0xf0]  ;;  %v12997_v60 = vld [vmem:[#allocation2 + $0x18ec] sm:$0xf] }
 0x3ca   :  { %7871 = vmatpush.bf16.msrb.mxu0 %v10727_v2  ;;  %v11300_v24 = vld [vmem:[#allocation2 + $0x18f8] sm:$0xf0]  ;;  %v13029_v52 = vld [vmem:[#allocation2 + $0x19ec] sm:$0xf]  ;;  %v10807_v2 = vor.u32 %v12873_v49, %v10804_v43  ;;  %v11063_v1 = vor.u32 %v12937_v57, %v11060_v32 }
 0x3cb   :  { %7884 = vmatpush.bf16.msrb.mxu1 %v10855_v33  ;;  %v11428_v29 = vld [vmem:[#allocation2 + $0x19f8] sm:$0xf0]  ;;  %v13061_v9 = vld [vmem:[#allocation2 + $0x1aec] sm:$0xf]  ;;  %v10935_v33 = vor.u32 %v12905_v14, %v10932_v63  ;;  %v11303_v51 = vor.u32 %v12997_v60, %v11300_v24 }
 0x3cc   :  { %7897 = vmatpush.bf16.msrb.mxu2 %v10983_v50  ;;  %v11556_v30 = vld [vmem:[#allocation2 + $0x1af8] sm:$0xf0]  ;;  %v13093_v50 = vld [vmem:[#allocation2 + $0x1bec] sm:$0xf]  ;;  %v11431_v58 = vor.u32 %v13029_v52, %v11428_v29 }
 0x3cd   :  { %7910 = vmatpush.bf16.msrb.mxu3 %v11111_v38  ;;  %v11684_v26 = vld [vmem:[#allocation2 + $0x1bf8] sm:$0xf0]  ;;  %v11559_v38 = vor.u32 %v13061_v9, %v11556_v30  ;;  %v12993_v18 = vld [vmem:[#allocation2 + $0x18cc] sm:$0xf] }
 0x3ce   :  { %7872 = vmatpush.bf16.msrb.mxu0 %v10711_v42  ;;  %v11284_v6 = vld [vmem:[#allocation2 + $0x18d8] sm:$0xf0]  ;;  %v13025_v36 = vld [vmem:[#allocation2 + $0x19cc] sm:$0xf]  ;;  %v11687_v19 = vor.u32 %v13093_v50, %v11684_v26 }
 0x3cf   :  { %7885 = vmatpush.bf16.msrb.mxu1 %v10839_v47  ;;  %v11412_v23 = vld [vmem:[#allocation2 + $0x19d8] sm:$0xf0]  ;;  %v13057_v41 = vld [vmem:[#allocation2 + $0x1acc] sm:$0xf]  ;;  %v11287_v47 = vor.u32 %v12993_v18, %v11284_v6 }
 0x3d0   :  { %7898 = vmatpush.bf16.msrb.mxu2 %v10967_v31  ;;  %v11540_v3 = vld [vmem:[#allocation2 + $0x1ad8] sm:$0xf0]  ;;  %v13089_v42 = vld [vmem:[#allocation2 + $0x1bcc] sm:$0xf]  ;;  %v11415_v31 = vor.u32 %v13025_v36, %v11412_v23 }
 0x3d1   :  { %7911 = vmatpush.bf16.msrb.mxu3 %v11095_v0  ;;  %v11668_v28 = vld [vmem:[#allocation2 + $0x1bd8] sm:$0xf0]  ;;  %v11543_v44 = vor.u32 %v13057_v41, %v11540_v3  ;;  %v12989_v35 = vld [vmem:[#allocation2 + $0x18ac] sm:$0xf] }
 0x3d2   :  { %7873 = vmatpush.bf16.msrb.mxu0 %v10695_v45  ;;  %v11268_v27 = vld [vmem:[#allocation2 + $0x18b8] sm:$0xf0]  ;;  %v13021_v22 = vld [vmem:[#allocation2 + $0x19ac] sm:$0xf]  ;;  %v11671_v0 = vor.u32 %v13089_v42, %v11668_v28 }
 0x3d3   :  { %7886 = vmatpush.bf16.msrb.mxu1 %v10823_v56  ;;  %v11396_v37 = vld [vmem:[#allocation2 + $0x19b8] sm:$0xf0]  ;;  %v13053_v62 = vld [vmem:[#allocation2 + $0x1aac] sm:$0xf]  ;;  %v11271_v45 = vor.u32 %v12989_v35, %v11268_v27 }
 0x3d4   :  { %7899 = vmatpush.bf16.msrb.mxu2 %v10951_v48  ;;  %v11524_v40 = vld [vmem:[#allocation2 + $0x1ab8] sm:$0xf0]  ;;  %v13085_v59 = vld [vmem:[#allocation2 + $0x1bac] sm:$0xf]  ;;  %v11399_v61 = vor.u32 %v13021_v22, %v11396_v37 }
 0x3d5   :  { %7912 = vmatpush.bf16.msrb.mxu3 %v11079_v21  ;;  %v11652_v8 = vld [vmem:[#allocation2 + $0x1bb8] sm:$0xf0]  ;;  %v11527_v46 = vor.u32 %v13053_v62, %v11524_v40  ;;  %v12985_v56 = vld [vmem:[#allocation2 + $0x188c] sm:$0xf] }
 0x3d6   :  { %7874 = vmatpush.bf16.msrb.mxu0 %v10679_v39  ;;  %v13017_v48 = vld [vmem:[#allocation2 + $0x198c] sm:$0xf]  ;;  %v11655_v49 = vor.u32 %v13085_v59, %v11652_v8  ;;  %v11380_v43 = vld [vmem:[#allocation2 + $0x1998] sm:$0xf0]  ;;  %v7668_v63 = vpop.f32.mrf.mxu0 }
 0x3d7   :  { %7887 = vmatpush.bf16.msrb.mxu1 %v10807_v2  ;;  %v13049_v14 = vld [vmem:[#allocation2 + $0x1a8c] sm:$0xf]  ;;  %v11236_v25 = vld [vmem:[#allocation2 + $0x1878] sm:$0xf0]  ;;  %v7669_v24 = vadd.f32 %v7668_v63, %v13686_v20  ;;  %v7681_v52 = vpop.f32.mrf.mxu1 }
 0x3d8   :  { %7900 = vmatpush.bf16.msrb.mxu2 %v10935_v33  ;;  %v13081_v15 = vld [vmem:[#allocation2 + $0x1b8c] sm:$0xf]  ;;  %v11364_v29 = vld [vmem:[#allocation2 + $0x1978] sm:$0xf0] }
 0x3d9   :  { %7913 = vmatpush.bf16.msrb.mxu3 %v11063_v1  ;;  %7875 = vmatmul.bf16.vlgmr.msrb.gmra.mxu0 %v13487_v7  ;;  %v11252_v7 = vld [vmem:[#allocation2 + $0x1898] sm:$0xf0]  ;;  %v12981_v32 = vld [vmem:[#allocation2 + $0x186c] sm:$0xf]  ;;  %v7682_v50 = vadd.f32 %v7681_v52, %v7669_v24 }
 0x3da   :  { %7919 = vmatpush.bf16.msra.mxu0 %v11303_v51  ;;  %7888 = vmatmul.bf16.vlgmr.msrb.gmra.mxu1 %v13491_v12  ;;  %v11636_v12 = vld [vmem:[#allocation2 + $0x1b98] sm:$0xf0]  ;;  %v11255_v21 = vor.u32 %v12985_v56, %v11252_v7  ;;  %v13013_v60 = vld [vmem:[#allocation2 + $0x196c] sm:$0xf]  ;;  %v11239_v26 = vor.u32 %v12981_v32, %v11236_v25 }
 0x3db   :  { %7932 = vmatpush.bf16.msra.mxu1 %v11431_v58  ;;  %7901 = vmatmul.bf16.vlgmr.msrb.gmra.mxu2 %v13489_v11  ;;  %v11508_v11 = vld [vmem:[#allocation2 + $0x1a98] sm:$0xf0]  ;;  %v11639_v39 = vor.u32 %v13081_v15, %v11636_v12  ;;  %v13045_v9 = vld [vmem:[#allocation2 + $0x1a6c] sm:$0xf]  ;;  %v11367_v1 = vor.u32 %v13013_v60, %v11364_v29 }
 0x3dc   :  { %7945 = vmatpush.bf16.msra.mxu2 %v11559_v38  ;;  %7914 = vmatmul.bf16.vlgmr.msrb.gmra.mxu3 %v13493_v16  ;;  %v11383_v16 = vor.u32 %v13017_v48, %v11380_v43  ;;  %v11511_v57 = vor.u32 %v13049_v14, %v11508_v11  ;;  %v11492_v30 = vld [vmem:[#allocation2 + $0x1a78] sm:$0xf0]  ;;  %v13077_v2 = vld [vmem:[#allocation2 + $0x1b6c] sm:$0xf] }
 0x3dd   :  { %7958 = vmatpush.bf16.msra.mxu3 %v11687_v19  ;;  %v11620_v33 = vld [vmem:[#allocation2 + $0x1b78] sm:$0xf0]  ;;  %v11495_v51 = vor.u32 %v13045_v9, %v11492_v30  ;;  %v12977_v58 = vld [vmem:[#allocation2 + $0x184c] sm:$0xf] }
 0x3de   :  { %7920 = vmatpush.bf16.msra.mxu0 %v11287_v47  ;;  %v11220_v38 = vld [vmem:[#allocation2 + $0x1858] sm:$0xf0]  ;;  %v13009_v18 = vld [vmem:[#allocation2 + $0x194c] sm:$0xf]  ;;  %v7694_v6 = vpop.f32.mrf.mxu2  ;;  %v11623_v20 = vor.u32 %v13077_v2, %v11620_v33 }
 0x3df   :  { %7933 = vmatpush.bf16.msra.mxu1 %v11415_v31  ;;  %v11348_v36 = vld [vmem:[#allocation2 + $0x1958] sm:$0xf0]  ;;  %v13041_v19 = vld [vmem:[#allocation2 + $0x1a4c] sm:$0xf]  ;;  %v7695_v41 = vadd.f32 %v7694_v6, %v7682_v50  ;;  %v7707_v3 = vpop.f32.mrf.mxu3  ;;  %v11223_v47 = vor.u32 %v12977_v58, %v11220_v38  ;;  %v7683_v62 = vpop.f32.mrf.mxu1 }
 0x3e0   :  { %7946 = vmatpush.bf16.msra.mxu2 %v11543_v44  ;;  %v11476_v23 = vld [vmem:[#allocation2 + $0x1a58] sm:$0xf0]  ;;  %v13073_v42 = vld [vmem:[#allocation2 + $0x1b4c] sm:$0xf]  ;;  %v7670_v44 = vpop.f32.mrf.mxu0  ;;  %v11351_v35 = vor.u32 %v13009_v18, %v11348_v36 }
 0x3e1   :  { %7959 = vmatpush.bf16.msra.mxu3 %v11671_v0  ;;  %v11604_v28 = vld [vmem:[#allocation2 + $0x1b58] sm:$0xf0]  ;;  %v13693_v31 = vadd.f32 %v7707_v3, %v7695_v41  ;;  %v11479_v27 = vor.u32 %v13041_v19, %v11476_v23  ;;  %v12973_v22 = vld [vmem:[#allocation2 + $0x182c] sm:$0xf] }
 0x3e2   :  { %7921 = vmatpush.bf16.msra.mxu0 %v11271_v45  ;;  %v11204_v0 = vld [vmem:[#allocation2 + $0x1838] sm:$0xf0]  ;;  %v13005_v37 = vld [vmem:[#allocation2 + $0x192c] sm:$0xf]  ;;  %v11607_v40 = vor.u32 %v13073_v42, %v11604_v28 }
 0x3e3   :  { %7934 = vmatpush.bf16.msra.mxu1 %v11399_v61  ;;  %v11332_v59 = vld [vmem:[#allocation2 + $0x1938] sm:$0xf0]  ;;  %v13037_v8 = vld [vmem:[#allocation2 + $0x1a2c] sm:$0xf]  ;;  %v11207_v56 = vor.u32 %v12973_v22, %v11204_v0 }
 0x3e4   :  { %7947 = vmatpush.bf16.msra.mxu2 %v11527_v46  ;;  %v11460_v45 = vld [vmem:[#allocation2 + $0x1a38] sm:$0xf0]  ;;  %v13069_v61 = vld [vmem:[#allocation2 + $0x1b2c] sm:$0xf] }
 0x3e5   :  { %7960 = vmatpush.bf16.msra.mxu3 %v11655_v49  ;;  %v11588_v46 = vld [vmem:[#allocation2 + $0x1b38] sm:$0xf0]  ;;  %v12969_v7 = vld [vmem:[#allocation2 + $0x180c] sm:$0xf]  ;;  %v11335_v49 = vor.u32 %v13005_v37, %v11332_v59  ;;  %v11463_v43 = vor.u32 %v13037_v8, %v11460_v45 }
 0x3e6   :  { %7922 = vmatpush.bf16.msra.mxu0 %v11255_v21  ;;  %v11188_v48 = vld [vmem:[#allocation2 + $0x1818] sm:$0xf0]  ;;  %v13001_v14 = vld [vmem:[#allocation2 + $0x190c] sm:$0xf]  ;;  %v7696_v12 = vpop.f32.mrf.mxu2  ;;  %v11591_v21 = vor.u32 %v13069_v61, %v11588_v46 }
 0x3e7   :  { %7935 = vmatpush.bf16.msra.mxu1 %v11383_v16  ;;  %v11316_v11 = vld [vmem:[#allocation2 + $0x1918] sm:$0xf0]  ;;  %v13033_v15 = vld [vmem:[#allocation2 + $0x1a0c] sm:$0xf]  ;;  %v7709_v32 = vpop.f32.mrf.mxu3  ;;  %v11191_v52 = vor.u32 %v12969_v7, %v11188_v48 }
 0x3e8   :  { %7948 = vmatpush.bf16.msra.mxu2 %v11511_v57  ;;  %v11444_v63 = vld [vmem:[#allocation2 + $0x1a18] sm:$0xf0]  ;;  %v13065_v16 = vld [vmem:[#allocation2 + $0x1b0c] sm:$0xf]  ;;  %v11319_v30 = vor.u32 %v13001_v14, %v11316_v11 }
 0x3e9   :  { %7961 = vmatpush.bf16.msra.mxu3 %v11639_v39  ;;  %v11572_v57 = vld [vmem:[#allocation2 + $0x1b18] sm:$0xf0]  ;;  %v13125_v25 = vld [vmem:[#allocation2 + $0x1cec] sm:$0xf]  ;;  %v11447_v2 = vor.u32 %v13033_v15, %v11444_v63 }
 0x3ea   :  { %7923 = vmatpush.bf16.msra.mxu0 %v11239_v26  ;;  %v11812_v60 = vld [vmem:[#allocation2 + $0x1cf8] sm:$0xf0]  ;;  %v13157_v24 = vld [vmem:[#allocation2 + $0x1dec] sm:$0xf]  ;;  %v11575_v26 = vor.u32 %v13065_v16, %v11572_v57 }
 0x3eb   :  { %7936 = vmatpush.bf16.msra.mxu1 %v11367_v1  ;;  %v11940_v39 = vld [vmem:[#allocation2 + $0x1df8] sm:$0xf0]  ;;  %v13189_v29 = vld [vmem:[#allocation2 + $0x1eec] sm:$0xf]  ;;  %v11815_v1 = vor.u32 %v13125_v25, %v11812_v60 }
 0x3ec   :  { %7949 = vmatpush.bf16.msra.mxu2 %v11495_v51  ;;  %v12068_v9 = vld [vmem:[#allocation2 + $0x1ef8] sm:$0xf0]  ;;  %v13221_v33 = vld [vmem:[#allocation2 + $0x1fec] sm:$0xf]  ;;  %v11943_v51 = vor.u32 %v13157_v24, %v11940_v39 }
 0x3ed   :  { %7962 = vmatpush.bf16.msra.mxu3 %v11623_v20  ;;  %v12196_v50 = vld [vmem:[#allocation2 + $0x1ff8] sm:$0xf0]  ;;  %v12071_v58 = vor.u32 %v13189_v29, %v12068_v9  ;;  %v13121_v38 = vld [vmem:[#allocation2 + $0x1ccc] sm:$0xf] }
 0x3ee   :  { %7924 = vmatpush.bf16.msra.mxu0 %v11223_v47  ;;  %v11796_v18 = vld [vmem:[#allocation2 + $0x1cd8] sm:$0xf0]  ;;  %v13153_v6 = vld [vmem:[#allocation2 + $0x1dcc] sm:$0xf]  ;;  %v12199_v20 = vor.u32 %v13221_v33, %v12196_v50 }
 0x3ef   :  { %7937 = vmatpush.bf16.msra.mxu1 %v11351_v35  ;;  %v11924_v36 = vld [vmem:[#allocation2 + $0x1dd8] sm:$0xf0]  ;;  %v13185_v19 = vld [vmem:[#allocation2 + $0x1ecc] sm:$0xf]  ;;  %v11799_v42 = vor.u32 %v13121_v38, %v11796_v18 }
 0x3f0   :  { %7950 = vmatpush.bf16.msra.mxu2 %v11479_v27  ;;  %v12052_v23 = vld [vmem:[#allocation2 + $0x1ed8] sm:$0xf0]  ;;  %v13217_v41 = vld [vmem:[#allocation2 + $0x1fcc] sm:$0xf]  ;;  %v11927_v28 = vor.u32 %v13153_v6, %v11924_v36 }
 0x3f1   :  { %7963 = vmatpush.bf16.msra.mxu3 %v11607_v40  ;;  %v12180_v3 = vld [vmem:[#allocation2 + $0x1fd8] sm:$0xf0]  ;;  %v12055_v47 = vor.u32 %v13185_v19, %v12052_v23  ;;  %v13117_v44 = vld [vmem:[#allocation2 + $0x1cac] sm:$0xf] }
 0x3f2   :  { %7925 = vmatpush.bf16.msra.mxu0 %v11207_v56  ;;  %v11780_v35 = vld [vmem:[#allocation2 + $0x1cb8] sm:$0xf0]  ;;  %v13149_v27 = vld [vmem:[#allocation2 + $0x1dac] sm:$0xf]  ;;  %v12183_v22 = vor.u32 %v13217_v41, %v12180_v3 }
 0x3f3   :  { %7938 = vmatpush.bf16.msra.mxu1 %v11335_v49  ;;  %v11908_v0 = vld [vmem:[#allocation2 + $0x1db8] sm:$0xf0]  ;;  %v13181_v37 = vld [vmem:[#allocation2 + $0x1eac] sm:$0xf]  ;;  %v11783_v8 = vor.u32 %v13117_v44, %v11780_v35 }
 0x3f4   :  { %7951 = vmatpush.bf16.msra.mxu2 %v11463_v43  ;;  %v12036_v62 = vld [vmem:[#allocation2 + $0x1eb8] sm:$0xf0]  ;;  %v13213_v40 = vld [vmem:[#allocation2 + $0x1fac] sm:$0xf]  ;;  %v11911_v45 = vor.u32 %v13149_v27, %v11908_v0 }
 0x3f5   :  { %7964 = vmatpush.bf16.msra.mxu3 %v11591_v21  ;;  %v12164_v59 = vld [vmem:[#allocation2 + $0x1fb8] sm:$0xf0]  ;;  %v12039_v61 = vor.u32 %v13181_v37, %v12036_v62  ;;  %v13113_v46 = vld [vmem:[#allocation2 + $0x1c8c] sm:$0xf] }
 0x3f6   :  { %7926 = vmatpush.bf16.msra.mxu0 %v11191_v52  ;;  %v13145_v56 = vld [vmem:[#allocation2 + $0x1d8c] sm:$0xf]  ;;  %v12167_v7 = vor.u32 %v13213_v40, %v12164_v59  ;;  %v11892_v48 = vld [vmem:[#allocation2 + $0x1d98] sm:$0xf0]  ;;  %v7720_v43 = vpop.f32.mrf.mxu0 }
 0x3f7   :  { %7939 = vmatpush.bf16.msra.mxu1 %v11319_v30  ;;  %v13177_v49 = vld [vmem:[#allocation2 + $0x1e8c] sm:$0xf]  ;;  %v12148_v14 = vld [vmem:[#allocation2 + $0x1f98] sm:$0xf0]  ;;  %v7733_v15 = vpop.f32.mrf.mxu1  ;;  %v11895_v12 = vor.u32 %v13145_v56, %v11892_v48 }
 0x3f8   :  { %7952 = vmatpush.bf16.msra.mxu2 %v11447_v2  ;;  %v13109_v63 = vld [vmem:[#allocation2 + $0x1c6c] sm:$0xf]  ;;  %v11748_v16 = vld [vmem:[#allocation2 + $0x1c78] sm:$0xf0] }
 0x3f9   :  { %7965 = vmatpush.bf16.msra.mxu3 %v11575_v26  ;;  %7927 = vmatmul.bf16.vlgmr.msra.gmra.mxu0 %v13508_v5  ;;  %v11764_v5 = vld [vmem:[#allocation2 + $0x1c98] sm:$0xf0]  ;;  %v13141_v57 = vld [vmem:[#allocation2 + $0x1d6c] sm:$0xf]  ;;  %v11751_v9 = vor.u32 %v13109_v63, %v11748_v16 }
 0x3fa   :  { %7971 = vmatpush.bf16.msrb.mxu0 %v11815_v1  ;;  %7940 = vmatmul.bf16.vlgmr.msra.gmra.mxu1 %v13512_v13  ;;  %v13209_v13 = vld [vmem:[#allocation2 + $0x1f8c] sm:$0xf]  ;;  %v11767_v11 = vor.u32 %v13113_v46, %v11764_v5  ;;  %v11876_v60 = vld [vmem:[#allocation2 + $0x1d78] sm:$0xf0] }
 0x3fb   :  { %7984 = vmatpush.bf16.msrb.mxu1 %v11943_v51  ;;  %7953 = vmatmul.bf16.vlgmr.msra.gmra.mxu2 %v13510_v10  ;;  %v12020_v10 = vld [vmem:[#allocation2 + $0x1e98] sm:$0xf0]  ;;  %v12151_v32 = vor.u32 %v13209_v13, %v12148_v14  ;;  %v13173_v24 = vld [vmem:[#allocation2 + $0x1e6c] sm:$0xf] }
 0x3fc   :  { %7997 = vmatpush.bf16.msrb.mxu2 %v12071_v58  ;;  %7966 = vmatmul.bf16.vlgmr.msra.gmra.mxu3 %v13514_v17  ;;  %v7721_v17 = vadd.f32 %v7720_v43, %v13693_v31  ;;  %v12023_v21 = vor.u32 %v13177_v49, %v12020_v10  ;;  %v12004_v52 = vld [vmem:[#allocation2 + $0x1e78] sm:$0xf0]  ;;  %v13205_v39 = vld [vmem:[#allocation2 + $0x1f6c] sm:$0xf]  ;;  %v11879_v31 = vor.u32 %v13141_v57, %v11876_v60 }
 0x3fd   :  { %8010 = vmatpush.bf16.msrb.mxu3 %v12199_v20  ;;  %v12132_v29 = vld [vmem:[#allocation2 + $0x1f78] sm:$0xf0]  ;;  %v12007_v30 = vor.u32 %v13173_v24, %v12004_v52  ;;  %v13105_v2 = vld [vmem:[#allocation2 + $0x1c4c] sm:$0xf] }
 0x3fe   :  { %7972 = vmatpush.bf16.msrb.mxu0 %v11799_v42  ;;  %v7734_v25 = vadd.f32 %v7733_v15, %v7721_v17  ;;  %v11732_v33 = vld [vmem:[#allocation2 + $0x1c58] sm:$0xf0]  ;;  %v13137_v50 = vld [vmem:[#allocation2 + $0x1d4c] sm:$0xf]  ;;  %v12135_v26 = vor.u32 %v13205_v39, %v12132_v29  ;;  %v7746_v1 = vpop.f32.mrf.mxu2  ;;  %v7722_v19 = vpop.f32.mrf.mxu0 }
 0x3ff   :  { %7985 = vmatpush.bf16.msrb.mxu1 %v11927_v28  ;;  %v11860_v51 = vld [vmem:[#allocation2 + $0x1d58] sm:$0xf0]  ;;  %v13169_v58 = vld [vmem:[#allocation2 + $0x1e4c] sm:$0xf]  ;;  %v7759_v6 = vpop.f32.mrf.mxu3  ;;  %v11735_v23 = vor.u32 %v13105_v2, %v11732_v33  ;;  %v7735_v41 = vpop.f32.mrf.mxu1 }
 0x400   :  { %7998 = vmatpush.bf16.msrb.mxu2 %v12055_v47  ;;  %v11988_v38 = vld [vmem:[#allocation2 + $0x1e58] sm:$0xf0]  ;;  %v7747_v18 = vadd.f32 %v7746_v1, %v7734_v25  ;;  %v13201_v20 = vld [vmem:[#allocation2 + $0x1f4c] sm:$0xf]  ;;  %v11863_v42 = vor.u32 %v13137_v50, %v11860_v51 }
 0x401   :  { %8011 = vmatpush.bf16.msrb.mxu3 %v12183_v22  ;;  %v12116_v36 = vld [vmem:[#allocation2 + $0x1f58] sm:$0xf0]  ;;  %v11991_v28 = vor.u32 %v13169_v58, %v11988_v38  ;;  %v13101_v47 = vld [vmem:[#allocation2 + $0x1c2c] sm:$0xf] }
 0x402   :  { %7973 = vmatpush.bf16.msrb.mxu0 %v11783_v8  ;;  %v7760_v3 = vadd.f32 %v7759_v6, %v7747_v18  ;;  %v11716_v44 = vld [vmem:[#allocation2 + $0x1c38] sm:$0xf0]  ;;  %v13133_v35 = vld [vmem:[#allocation2 + $0x1d2c] sm:$0xf]  ;;  %v12119_v27 = vor.u32 %v13201_v20, %v12116_v36 }
 0x403   :  { %7986 = vmatpush.bf16.msrb.mxu1 %v11911_v45  ;;  %v11844_v22 = vld [vmem:[#allocation2 + $0x1d38] sm:$0xf0]  ;;  %v13165_v0 = vld [vmem:[#allocation2 + $0x1e2c] sm:$0xf]  ;;  %v11719_v59 = vor.u32 %v13101_v47, %v11716_v44 }
 0x404   :  { %7999 = vmatpush.bf16.msrb.mxu2 %v12039_v61  ;;  %v11972_v37 = vld [vmem:[#allocation2 + $0x1e38] sm:$0xf0]  ;;  %v13197_v62 = vld [vmem:[#allocation2 + $0x1f2c] sm:$0xf]  ;;  %v11847_v8 = vor.u32 %v13133_v35, %v11844_v22 }
 0x405   :  { %8012 = vmatpush.bf16.msrb.mxu3 %v12167_v7  ;;  %v12100_v40 = vld [vmem:[#allocation2 + $0x1f38] sm:$0xf0]  ;;  %v11975_v45 = vor.u32 %v13165_v0, %v11972_v37  ;;  %v13097_v61 = vld [vmem:[#allocation2 + $0x1c0c] sm:$0xf] }
 0x406   :  { %7974 = vmatpush.bf16.msrb.mxu0 %v11767_v11  ;;  %v11700_v46 = vld [vmem:[#allocation2 + $0x1c18] sm:$0xf0]  ;;  %v13129_v5 = vld [vmem:[#allocation2 + $0x1d0c] sm:$0xf]  ;;  %v12103_v56 = vor.u32 %v13197_v62, %v12100_v40  ;;  %v7748_v10 = vpop.f32.mrf.mxu2 }
 0x407   :  { %7987 = vmatpush.bf16.msrb.mxu1 %v11895_v12  ;;  %v11828_v7 = vld [vmem:[#allocation2 + $0x1d18] sm:$0xf0]  ;;  %v13161_v48 = vld [vmem:[#allocation2 + $0x1e0c] sm:$0xf]  ;;  %v7761_v14 = vpop.f32.mrf.mxu3  ;;  %v11703_v17 = vor.u32 %v13097_v61, %v11700_v46 }
 0x408   :  { %8000 = vmatpush.bf16.msrb.mxu2 %v12023_v21  ;;  %v11956_v49 = vld [vmem:[#allocation2 + $0x1e18] sm:$0xf0]  ;;  %v13193_v43 = vld [vmem:[#allocation2 + $0x1f0c] sm:$0xf]  ;;  %v11831_v11 = vor.u32 %v13129_v5, %v11828_v7 }
 0x409   :  { %8013 = vmatpush.bf16.msrb.mxu3 %v12151_v32  ;;  %v12084_v13 = vld [vmem:[#allocation2 + $0x1f18] sm:$0xf0]  ;;  %v11959_v15 = vor.u32 %v13161_v48, %v11956_v49  ;;  %v13732_v48 = vld [vmem:[#allocation12_spill] sm:$0xff]  ;;  %v13733_v49 = vld [vmem:[#allocation13_spill] sm:$0xff] }
 0x40a   :  { %7975 = vmatpush.bf16.msrb.mxu0 %v11751_v9  ;;  %v12087_v12 = vor.u32 %v13193_v43, %v12084_v13  ;;  %v8023_v10 = vadd.f32 %v13733_v49, %v13732_v48 }
 0x40b   :  { %7988 = vmatpush.bf16.msrb.mxu1 %v11879_v31 }
 0x40c   :  { %8001 = vmatpush.bf16.msrb.mxu2 %v12007_v30 }
 0x40d   :  { %8014 = vmatpush.bf16.msrb.mxu3 %v12135_v26 }
 0x40e   :  { %7976 = vmatpush.bf16.msrb.mxu0 %v11735_v23 }
 0x40f   :  { %7989 = vmatpush.bf16.msrb.mxu1 %v11863_v42 }
 0x410   :  { %8002 = vmatpush.bf16.msrb.mxu2 %v11991_v28 }
 0x411   :  { %8015 = vmatpush.bf16.msrb.mxu3 %v12119_v27 }
 0x412   :  { %7977 = vmatpush.bf16.msrb.mxu0 %v11719_v59 }
 0x413   :  { %7990 = vmatpush.bf16.msrb.mxu1 %v11847_v8 }
 0x414   :  { %8003 = vmatpush.bf16.msrb.mxu2 %v11975_v45 }
 0x415   :  { %8016 = vmatpush.bf16.msrb.mxu3 %v12103_v56 }
 0x416   :  { %7978 = vmatpush.bf16.msrb.mxu0 %v11703_v17  ;;  %v7772_v21 = vpop.f32.mrf.mxu0 }
 0x417   :  { %7991 = vmatpush.bf16.msrb.mxu1 %v11831_v11  ;;  %v7773_v63 = vadd.f32 %v7772_v21, %v7760_v3  ;;  %v7785_v16 = vpop.f32.mrf.mxu1 }
 0x418   :  { %8004 = vmatpush.bf16.msrb.mxu2 %v11959_v15  ;;  %v8024_v15 = vadd.f32 %v8023_v10, %v13680_v4 }
 0x419   :  { %8017 = vmatpush.bf16.msrb.mxu3 %v12087_v12  ;;  %7979 = vmatmul.bf16.vlgmr.msrb.gmra.mxu0 %v13529_v54  ;;  %v7786_v57 = vadd.f32 %v7785_v16, %v7773_v63  ;;  %v13346_v16 = vmov 512.0  }
 0x41a   :  { %7992 = vmatmul.bf16.vlgmr.msrb.gmra.mxu1 %v13533_v55  ;;  %13231 = vrcp.f32 %v13346_v16 }
 0x41b   :  { %8005 = vmatmul.bf16.vlgmr.msrb.gmra.mxu2 %v13531_v34 }
 0x41c   :  { %8018 = vmatmul.bf16.vlgmr.msrb.gmra.mxu3 %v13535_v53 }
 0x41e   :  { %v7798_v32 = vpop.f32.mrf.mxu2  ;;  %v7774_v24 = vpop.f32.mrf.mxu0 }
 0x41f   :  { %v7799_v25 = vadd.f32 %v7798_v32, %v7786_v57  ;;  %v7811_v60 = vpop.f32.mrf.mxu3  ;;  %v7787_v52 = vpop.f32.mrf.mxu1 }
 0x420   :  { %v13232_v57 = vpop.eup %13231 }
 0x421   :  { %v7812_v39 = vadd.f32 %v7811_v60, %v7799_v25  ;;  %v8029_v32 = vmul.f32 512.0, %v13232_v57  ;;  %vm8033_vm0 = vweird.f32 %v13232_v57 }
 0x423   :  { %v8030_v25 = vsub.f32 1.0, %v8029_v32 }
 0x425   :  { %v8031_v60 = vmul.f32 %v13232_v57, %v8030_v25 }
 0x426   :  { %v7800_v29 = vpop.f32.mrf.mxu2 }
 0x427   :  { %v7813_v9 = vpop.f32.mrf.mxu3  ;;  %v8032_v24 = vadd.f32 %v13232_v57, %v8031_v60 }
 0x429   :  { %v8034_v52 = vsel %vm8033_vm0, %v13232_v57, %v8032_v24 }
 0x436   :  { %v7824_v31 = vpop.f32.mrf.mxu0 }
 0x437   :  { %v7825_v54 = vadd.f32 %v7824_v31, %v7812_v39  ;;  %v7837_v30 = vpop.f32.mrf.mxu1 }
 0x439   :  { %v7838_v55 = vadd.f32 %v7837_v30, %v7825_v54 }
 0x43e   :  { %v7850_v2 = vpop.f32.mrf.mxu2  ;;  %v7826_v53 = vpop.f32.mrf.mxu0 }
 0x43f   :  { %v7851_v34 = vadd.f32 %v7850_v2, %v7838_v55  ;;  %v7863_v33 = vpop.f32.mrf.mxu3  ;;  %v7839_v50 = vpop.f32.mrf.mxu1 }
 0x441   :  { %v7864_v26 = vadd.f32 %v7863_v33, %v7851_v34 }
 0x446   :  { %v7852_v1 = vpop.f32.mrf.mxu2 }
 0x447   :  { %v7865_v51 = vpop.f32.mrf.mxu3 }
 0x456   :  { %v7876_v58 = vpop.f32.mrf.mxu0 }
 0x457   :  { %v7889_v38 = vpop.f32.mrf.mxu1  ;;  %v7877_v42 = vadd.f32 %v7876_v58, %v7864_v26 }
 0x459   :  { %v7890_v27 = vadd.f32 %v7889_v38, %v7877_v42 }
 0x45e   :  { %v7902_v18 = vpop.f32.mrf.mxu2  ;;  %v7878_v20 = vpop.f32.mrf.mxu0 }
 0x45f   :  { %v7915_v6 = vpop.f32.mrf.mxu3  ;;  %v7891_v36 = vpop.f32.mrf.mxu1  ;;  %v7903_v22 = vadd.f32 %v7902_v18, %v7890_v27 }
 0x460   :  { %v8065_v36 = vld [vmem:[#allocation6] sm:$0xf] }
 0x461   :  { %v7916_v62 = vadd.f32 %v7915_v6, %v7903_v22  ;;  %v8069_v42 = vperm.slane %v8065_v36, 2 }
 0x466   :  { %v7904_v19 = vpop.f32.mrf.mxu2 }
 0x467   :  { %v7917_v23 = vpop.f32.mrf.mxu3 }
 0x476   :  { %v7928_v41 = vpop.f32.mrf.mxu0 }
 0x477   :  { %v7941_v3 = vpop.f32.mrf.mxu1  ;;  %v7929_v40 = vadd.f32 %v7928_v41, %v7916_v62  ;;  %v8067_v41 = vperm.slane %v8065_v36, 0 }
 0x479   :  { %v7942_v59 = vadd.f32 %v7941_v3, %v7929_v40  ;;  %v8068_v3 = vperm.slane %v8065_v36, 1 }
 0x47e   :  { %v7954_v28 = vpop.f32.mrf.mxu2  ;;  %v7930_v44 = vpop.f32.mrf.mxu0 }
 0x47f   :  { %v7967_v47 = vpop.f32.mrf.mxu3  ;;  %v7943_v35 = vpop.f32.mrf.mxu1  ;;  %v7955_v8 = vadd.f32 %v7954_v28, %v7942_v59  ;;  %v8070_v28 = vperm.slane %v8065_v36, 3 }
 0x481   :  { %v7968_v45 = vadd.f32 %v7967_v47, %v7955_v8 }
 0x486   :  { %v7956_v0 = vpop.f32.mrf.mxu2 }
 0x487   :  { %v7969_v37 = vpop.f32.mrf.mxu3 }
 0x496   :  { %v7980_v61 = vpop.f32.mrf.mxu0 }
 0x497   :  { %v7993_v46 = vpop.f32.mrf.mxu1  ;;  %v7981_v5 = vadd.f32 %v7980_v61, %v7968_v45 }
 0x499   :  { %v7994_v56 = vadd.f32 %v7993_v46, %v7981_v5 }
 0x49e   :  { %v8006_v7 = vpop.f32.mrf.mxu2  ;;  %v7982_v14 = vpop.f32.mrf.mxu0 }
 0x49f   :  { %v8007_v43 = vadd.f32 %v8006_v7, %v7994_v56  ;;  %v8019_v13 = vpop.f32.mrf.mxu3  ;;  %v7995_v17 = vpop.f32.mrf.mxu1 }
 0x4a1   :  { %v8020_v11 = vadd.f32 %v8019_v13, %v8007_v43 }
 0x4a3   :  { %v8025_v12 = vadd.f32 %v8024_v15, %v8020_v11 }
 0x4a5   :  { %8026 = vadd.xlane.f32.xlu0 %v8025_v12 }
 0x4a6   :  { %v8008_v21 = vpop.f32.mrf.mxu2 }
 0x4a7   :  { %v8021_v63 = vpop.f32.mrf.mxu3 }
 0x518   :  { %v8027_v39 = vpop.xlane.xlu0 %8026 }
 0x519   :  { %v8035_v29 = vmul.f32 %v8034_v52, %v8027_v39 }
 0x51b   :  { %v8036_v9 = vsub.f32 %v13732_v48, %v8035_v29  ;;  %v8037_v31 = vsub.f32 %v13733_v49, %v8035_v29  ;;  %v8038_v54 = vsub.f32 %v13680_v4, %v8035_v29  ;;  %v8039_v30 = vsub.f32 %v8020_v11, %v8035_v29  ;;  %v8079_v4 = vld [vmem:[#allocation7] sm:$0xf] }
 0x51c   :  { %v8081_v47 = vperm.slane %v8079_v4, 0  ;;  %v8082_v44 = vperm.slane %v8079_v4, 1  ;;  %v8083_v35 = vperm.slane %v8079_v4, 2  ;;  %v8084_v40 = vperm.slane %v8079_v4, 3 }
 0x51d   :  { %v8040_v55 = vmul.f32 %v8036_v9, %v8036_v9  ;;  %v8041_v2 = vmul.f32 %v8037_v31, %v8037_v31  ;;  %v8042_v34 = vmul.f32 %v8038_v54, %v8038_v54  ;;  %v8043_v53 = vmul.f32 %v8039_v30, %v8039_v30 }
 0x51f   :  { %v8044_v33 = vadd.f32 %v8041_v2, %v8040_v55 }
 0x521   :  { %v8045_v50 = vadd.f32 %v8044_v33, %v8042_v34 }
 0x523   :  { %v8046_v26 = vadd.f32 %v8045_v50, %v8043_v53 }
 0x525   :  { %8047 = vadd.xlane.f32.xlu0 %v8046_v26 }
 0x598   :  { %v8048_v1 = vpop.xlane.xlu0 %8047 }
 0x599   :  { %v8049_v51 = vmul.f32 %v8048_v1, %v8034_v52 }
 0x59b   :  { %v8050_v58 = vadd.f32 1e-05, %v8049_v51 }
 0x59d   :  { %13233 = vrsqrt.f32 %v8050_v58  ;;  %vm8057_vm2 = vweird.f32 %v8050_v58 }
 0x5a3   :  { %v13234_v38 = vpop.eup %13233 }
 0x5a4   :  { %v8052_v18 = vmul.f32 %v13234_v38, %v8050_v58  ;;  %vm8058_vm1 = vweird.f32 %v13234_v38 }
 0x5a5   :  { %vm8059_vm3 = vmor %vm8057_vm2, %vm8058_vm1 }
 0x5a6   :  { %v8053_v6 = vmul.f32 %v13234_v38, %v8052_v18 }
 0x5a8   :  { %v8054_v20 = vmul.f32 0.5, %v8053_v6 }
 0x5aa   :  { %v8055_v19 = vsub.f32 1.5, %v8054_v20 }
 0x5ac   :  { %v8056_v23 = vmul.f32 %v13234_v38, %v8055_v19 }
 0x5ae   :  { %v8060_v27 = vsel %vm8059_vm3, %v13234_v38, %v8056_v23 }
 0x5af   :  { %v8061_v22 = vmul.f32 %v8060_v27, %v8036_v9  ;;  %v8062_v0 = vmul.f32 %v8060_v27, %v8037_v31  ;;  %v8063_v37 = vmul.f32 %v8060_v27, %v8038_v54  ;;  %v8064_v62 = vmul.f32 %v8060_v27, %v8039_v30 }
 0x5b1   :  { %v8075_v59 = vmul.f32 %v8067_v41, %v8061_v22  ;;  %v8076_v8 = vmul.f32 %v8068_v3, %v8062_v0  ;;  %v8077_v45 = vmul.f32 %v8069_v42, %v8063_v37  ;;  %v8078_v61 = vmul.f32 %v8070_v28, %v8064_v62 }
 0x5b3   :  { %v8089_v46 = vadd.f32 %v8081_v47, %v8075_v59  ;;  %v8090_v5 = vadd.f32 %v8082_v44, %v8076_v8  ;;  %v8091_v56 = vadd.f32 %v8083_v35, %v8077_v45  ;;  %v8092_v7 = vadd.f32 %v8084_v40, %v8078_v61 }
 0x5b5   :  { %8093 = vst [vmem:[%s13727_s5] sm:$0xff] %v8089_v46 }
 0x5b6   :  { %8094 = vst [vmem:[%s13727_s5 + $0x8] sm:$0xff] %v8090_v5 }
 0x5b7   :  { %8095 = vst [vmem:[%s13727_s5 + $0x10] sm:$0xff] %v8091_v56 }
 0x5b8   :  { %8096 = vst [vmem:[%s13727_s5 + $0x18] sm:$0xff] %v8092_v7 }
 0x5b9   :  { %8101 = vsyncpa [#allocation3], 1 }
 0x5ba   :  { %8102 = vsyncpa [#allocation5], 1 }
 0x5bb   :  { %8103 = vsyncpa [#allocation8], 1 }

</bundles_post_ra>
